<compile_context>
chip_gen: v7x
topology: tpu7x:2x2x1
jax: 0.10.0
libtpu: 0.0.40
codegen_flags: <defaults>
</compile_context>

<pallas_src>
import functools
import math

import jax
import jax.numpy as jnp
import numpy as np
from jax.experimental import pallas as pl
from jax.experimental.pallas import tpu as pltpu

LN_EPS = 1e-5


# --------------------------------------------------------------------------
# trace-time helpers
# --------------------------------------------------------------------------
def _round_up(a, b):
    return -(-a // b) * b


def _vmem_budgets():
    """Generation-aware scoped-VMEM limit and per-grid-step block budget."""
    phys = 64 * 1024 * 1024                                   # conservative fallback (v7x)
    try:
        phys = int(pltpu.get_tpu_info().vmem_capacity_bytes)
    except Exception:
        pass
    limit = min(phys * 3 // 4, phys - 8 * 1024 * 1024)        # ~96MiB v5e/v6e, ~48MiB v7x
    return limit, max(2 * 1024 * 1024, limit // 4)


def _choose_gru_tile(bn_pad, t, d, budget):
    per_row = t * d * 60 + 64          # x(bf16,dbl) + 9x gi(f32) + 3x out(bf16,dbl) + h
    cap = max(8, (budget // per_row) // 8 * 8)
    cap = min(cap, bn_pad)
    if bn_pad >= 16:                   # prefer >=2 grid steps (v7x: 2 TensorCores)
        cap = min(cap, bn_pad // 2)
    tile = 8
    k = 8
    while k <= cap:
        if bn_pad % k == 0:
            tile = k
        k += 8
    return tile


def _choose_attn_rows(rows, n, d, h, budget):
    per_row = 4 * (8 * n * d + 2 * h * n * n) + 256
    cap = max(h, (budget // per_row) // h * h)
    if rows >= 2 * h:                  # prefer >=2 grid steps
        cap = min(cap, _round_up(-(-rows // 2), h))
    return min(cap, _round_up(rows, h))


def _choose_post_rows(rows, d, f, budget):
    per_row = 4 * (8 * d + 3 * f) + 64
    cap = max(8, min(4096, (budget // per_row) // 8 * 8))
    if rows >= 16:                     # prefer >=2 grid steps
        cap = min(cap, _round_up(-(-rows // 2), 8))
    return cap


def _layer_norm(h, g, b):
    mu = jnp.mean(h, axis=-1, keepdims=True)
    var = jnp.mean((h - mu) ** 2, axis=-1, keepdims=True)
    return (h - mu) * jax.lax.rsqrt(var + LN_EPS) * g + b


# --------------------------------------------------------------------------
# Kernel 1: fused Q/K/V GRU (input projections computed in-kernel, gate-major)
# --------------------------------------------------------------------------
def _gru_kernel(x_ref, wi_ref, bi_ref, wh_ref, bh_ref, out_ref, *scr):
    """x_ref  : (T, TILE_BN, D)    bf16  time-major input rows
       wi_ref : (3, 3, D, D)       bf16  input weights [gru, gate(r|z|n), in, out]
       bi_ref : (3, 3, 1, D)       f32   input biases
       wh_ref : (3, D, 3D)         bf16  recurrent weights, gate-blocked columns [r|z|n]
       bh_ref : (3, 1, 3D)         f32   recurrent biases
       out_ref: (T, 3, TILE_BN, D) bf16  hidden states per step / per GRU
       scr    : 9x (T, TILE_BN, D) f32 gate-major input gates [gru*3+gate]; 3x (TILE_BN, D) f32 h
    """
    T, TILE_BN, D = x_ref.shape
    gi_scr = scr[:9]
    h_scr = scr[9:]

    # Prologue: hoisted input projections, one small MXU GEMM per (gru, gate).
    x2 = x_ref[...].reshape(T * TILE_BN, D)
    for g in range(3):
        for c in range(3):
            gi = jnp.dot(x2, wi_ref[g, c],
                         preferred_element_type=jnp.float32) + bi_ref[g, c]
            gi_scr[g * 3 + c][...] = gi.reshape(T, TILE_BN, D)
        h_scr[g][...] = jnp.zeros_like(h_scr[g])

    wh = wh_ref[...]                                   # hoisted out of the time loop
    bh = bh_ref[...]

    def step(t, carry):
        hs = []
        for g in range(3):                             # 3 independent recurrences (ILP)
            h = h_scr[g][...]                          # carried state stays f32
            gh = jnp.dot(h.astype(jnp.bfloat16), wh[g],
                         preferred_element_type=jnp.float32) + bh[g]
            r = jax.nn.sigmoid(gi_scr[g * 3 + 0][t] + gh[:, :D])
            z = jax.nn.sigmoid(gi_scr[g * 3 + 1][t] + gh[:, D:2 * D])
            n = jnp.tanh(gi_scr[g * 3 + 2][t] + r * gh[:, 2 * D:])
            h_new = (1.0 - z) * n + z * h
            h_scr[g][...] = h_new
            hs.append(h_new)
        out_ref[t] = jnp.stack(hs, axis=0).astype(out_ref.dtype)
        return carry

    # Full unroll: gives the LLO scheduler cross-iteration visibility (T is small/static).
    jax.lax.fori_loop(0, T, step, 0, unroll=True)


def _gru_qkv_pallas(x, params, limit, budget):
    """x: (B, T, N, D) f32 -> (3, B*T, N, D) bf16 GRU hidden states for Q, K, V."""
    B, T, N, D = x.shape
    BN = B * N
    BN_pad = _round_up(BN, 8)

    # torch: query.reshape(B*N, T, D) is a raw row-major reshape (mixes T and N) -- faithful.
    xr = x.reshape(BN, T, D)
    if BN_pad != BN:
        xr = jnp.pad(xr, ((0, BN_pad - BN), (0, 0), (0, 0)))
    x_t = jnp.transpose(xr, (1, 0, 2)).astype(jnp.bfloat16)           # (T, BN_pad, D)

    gps = (params["gru_q"], params["gru_k"], params["gru_v"])
    wi = jnp.stack([p["w_ih"].reshape(3, D, D).transpose(0, 2, 1) for p in gps],
                   0).astype(jnp.bfloat16)                            # (3, 3, D, D)
    bi = jnp.stack([p["b_ih"].reshape(3, 1, D) for p in gps], 0)      # (3, 3, 1, D) f32
    wh = jnp.stack([jnp.transpose(p["w_hh"].reshape(3, D, D), (2, 0, 1)).reshape(D, 3 * D)
                    for p in gps], 0).astype(jnp.bfloat16)            # (3, D, 3D)
    bh = jnp.stack([p["b_hh"][None, :] for p in gps], 0)              # (3, 1, 3D) f32

    TILE_BN = _choose_gru_tile(BN_pad, T, D, budget)
    scratch = ([pltpu.VMEM((T, TILE_BN, D), jnp.float32) for _ in range(9)]
               + [pltpu.VMEM((TILE_BN, D), jnp.float32) for _ in range(3)])

    y = pl.pallas_call(
        _gru_kernel,
        out_shape=jax.ShapeDtypeStruct((T, 3, BN_pad, D), jnp.bfloat16),
        grid=(BN_pad // TILE_BN,),
        in_specs=[
            pl.BlockSpec((T, TILE_BN, D), lambda b: (0, b, 0)),
            pl.BlockSpec((3, 3, D, D), lambda b: (0, 0, 0, 0)),
            pl.BlockSpec((3, 3, 1, D), lambda b: (0, 0, 0, 0)),
            pl.BlockSpec((3, D, 3 * D), lambda b: (0, 0, 0)),
            pl.BlockSpec((3, 1, 3 * D), lambda b: (0, 0, 0)),
        ],
        out_specs=pl.BlockSpec((T, 3, TILE_BN, D), lambda b: (0, 0, b, 0)),
        scratch_shapes=scratch,
        compiler_params=pltpu.CompilerParams(
            dimension_semantics=("parallel",), vmem_limit_bytes=limit),
    )(x_t, wi, bi, wh, bh)

    # (T, 3, BN, D) -> (3, B*T, N, D): the only inter-kernel relayout left in the layer.
    y = y[:, :, :BN, :].reshape(T, 3, B, N, D)
    return jnp.transpose(y, (1, 2, 0, 3, 4)).reshape(3, B * T, N, D)


# --------------------------------------------------------------------------
# Kernel 2: attention core on (rows = B*T, N, D) tiles, heads fused in the lane dim
# --------------------------------------------------------------------------
def _attn_kernel(q_ref, k_ref, v_ref, b_ref, o_ref, *, scale, mask, H):
    """q/k/v/o blocks: (TR, N, D) bf16.  b_ref: (H, H, N, N) f32 bias table indexed
    [head, row % H] (faithful torch rel-pos expand/contiguous/view semantics)."""
    TR, N, D = q_ref.shape
    dh = D // H
    q = q_ref[...]
    k = k_ref[...]
    v = v_ref[...]
    outs = []
    for h in range(H):
        sl = slice(h * dh, (h + 1) * dh)
        s = jnp.einsum("rnd,rkd->rnk", q[:, :, sl], k[:, :, sl],
                       preferred_element_type=jnp.float32) * scale
        # Row blocks start at a multiple of TR and TR % H == 0, so global_row % H == local % H.
        s = (s.reshape(TR // H, H, N, N) + b_ref[h][None]).reshape(TR, N, N)
        if mask:  # static python bool (module default is False)
            rr = jax.lax.broadcasted_iota(jnp.int32, s.shape, 1)
            cc = jax.lax.broadcasted_iota(jnp.int32, s.shape, 2)
            s = jnp.where(cc <= rr, s, -jnp.inf)
        s = s - jnp.max(s, axis=-1, keepdims=True)
        e = jnp.exp(s)
        p = e * pl.reciprocal(jnp.sum(e, axis=-1, keepdims=True), approx=False)
        outs.append(jnp.einsum("rnk,rkd->rnd", p.astype(v.dtype), v[:, :, sl],
                               preferred_element_type=jnp.float32))
    # In-kernel head merge: a single lane-dense (TR, N, D) store instead of dh-wide stores.
    o_ref[...] = jnp.concatenate(outs, axis=-1).astype(o_ref.dtype)


def _attn_pallas(qkv, bias_hp, scale, mask, H, limit, budget):
    """qkv: (3, R, N, D) bf16 with R = B*T -> (R, N, D) bf16 attention output."""
    _, R, N, D = qkv.shape
    TR = _choose_attn_rows(R, N, D, H, budget)
    R_pad = _round_up(R, TR)
    if R_pad != R:
        qkv = jnp.pad(qkv, ((0, 0), (0, R_pad - R), (0, 0), (0, 0)))
    q, k, v = qkv[0], qkv[1], qkv[2]
    rows3 = lambda i: (i, 0, 0)
    out = pl.pallas_call(
        functools.partial(_attn_kernel, scale=scale, mask=mask, H=H),
        out_shape=jax.ShapeDtypeStruct((R_pad, N, D), jnp.bfloat16),
        grid=(R_pad // TR,),
        in_specs=[pl.BlockSpec((TR, N, D), rows3),
                  pl.BlockSpec((TR, N, D), rows3),
                  pl.BlockSpec((TR, N, D), rows3),
                  pl.BlockSpec((H, H, N, N), lambda i: (0, 0, 0, 0))],
        out_specs=pl.BlockSpec((TR, N, D), rows3),
        compiler_params=pltpu.CompilerParams(
            dimension_semantics=("parallel",), vmem_limit_bytes=limit),
    )(q, k, v, bias_hp)
    return out[:R]


# --------------------------------------------------------------------------
# Kernel 3: out_proj + residual + LN1 + FFN(ReLU) + residual + LN2, per row tile
# --------------------------------------------------------------------------
def _post_kernel(a_ref, x_ref, wo_ref, bo_ref, g1_ref, be1_ref,
                 w1_ref, b1_ref, w2_ref, b2_ref, g2_ref, be2_ref, out_ref):
    a = a_ref[...]                                   # (TILE, D) bf16
    x = x_ref[...]                                   # (TILE, D) f32 residual
    o = jnp.dot(a, wo_ref[...], preferred_element_type=jnp.float32) + bo_ref[...]
    h1 = _layer_norm(x + o, g1_ref[...], be1_ref[...])
    f = jnp.maximum(jnp.dot(h1.astype(jnp.bfloat16), w1_ref[...],
                            preferred_element_type=jnp.float32) + b1_ref[...], 0.0)
    f = jnp.dot(f.astype(jnp.bfloat16), w2_ref[...],
                preferred_element_type=jnp.float32) + b2_ref[...]
    out_ref[...] = _layer_norm(h1 + f, g2_ref[...], be2_ref[...])


def _post_pallas(attn_flat, x_flat, params, limit, budget):
    R, D = x_flat.shape
    F = params["w1"].shape[1]
    TILE = _choose_post_rows(R, D, F, budget)
    R_pad = _round_up(R, TILE)
    if R_pad != R:                                   # ragged R -> zero padding
        attn_flat = jnp.pad(attn_flat, ((0, R_pad - R), (0, 0)))
        x_flat = jnp.pad(x_flat, ((0, R_pad - R), (0, 0)))
    rows = lambda i: (i, 0)
    const = lambda i: (0, 0)
    out = pl.pallas_call(
        _post_kernel,
        out_shape=jax.ShapeDtypeStruct((R_pad, D), jnp.float32),
        grid=(R_pad // TILE,),
        in_specs=[pl.BlockSpec((TILE, D), rows),
                  pl.BlockSpec((TILE, D), rows),
                  pl.BlockSpec((D, D), const),
                  pl.BlockSpec((1, D), const),
                  pl.BlockSpec((1, D), const),
                  pl.BlockSpec((1, D), const),
                  pl.BlockSpec((D, F), const),
                  pl.BlockSpec((1, F), const),
                  pl.BlockSpec((F, D), const),
                  pl.BlockSpec((1, D), const),
                  pl.BlockSpec((1, D), const),
                  pl.BlockSpec((1, D), const)],
        out_specs=pl.BlockSpec((TILE, D), rows),
        compiler_params=pltpu.CompilerParams(
            dimension_semantics=("parallel",), vmem_limit_bytes=limit),
    )(attn_flat, x_flat,
      params["wo"].astype(jnp.bfloat16), params["bo"][None],
      params["ln1_g"][None], params["ln1_b"][None],
      params["w1"].astype(jnp.bfloat16), params["b1"][None],
      params["w2"].astype(jnp.bfloat16), params["b2"][None],
      params["ln2_g"][None], params["ln2_b"][None])
    return out[:R]


# --------------------------------------------------------------------------
# Full forward (faithful port of Tem_SelfAttentionLayer.forward, dim=-2, dropout=0)
# --------------------------------------------------------------------------
def tem_self_attention_forward(x, params, *, num_heads, mask=False, use_pallas=True):
    if not use_pallas:
        return _forward_reference(x, params, num_heads=num_heads, mask=mask)

    B, T, N, D = x.shape
    H = num_heads
    scale = 1.0 / math.sqrt(D // H)
    limit, budget = _vmem_budgets()

    # torch: x.transpose(-2, -2) is an identity -> no-op.
    qkv = _gru_qkv_pallas(x, params, limit, budget)                   # (3, B*T, N, D) bf16

    # Rel-pos bias table: torch's expand/contiguous/view applies rel[(head*B*T + row) % H]
    # to (row=b*T+t, head).  Ported faithfully (it keys off the time index, as in torch).
    rel = params["rel_pos"][:, :N, :N]                                # (H, N, N)
    idx = (np.arange(H)[:, None] * (B * T) + np.arange(H)[None, :]) % H
    bias_hp = rel[jnp.asarray(idx)]                                   # (H, H, N, N) f32

    attn = _attn_pallas(qkv, bias_hp, scale, mask, H, limit, budget)  # (B*T, N, D) bf16

    # nn.Dropout(p=0) is the identity (omitted).
    out = _post_pallas(attn.reshape(B * T * N, D), x.reshape(B * T * N, D),
                       params, limit, budget)
    return out.reshape(B, T, N, D)


# --------------------------------------------------------------------------
# Pure-JAX f32 reference (mirrors the torch module op-for-op) for the sanity check
# --------------------------------------------------------------------------
def _forward_reference(x, params, *, num_heads, mask):
    B, T, N, D = x.shape
    H = num_heads
    dh = D // H
    scale = 1.0 / math.sqrt(dh)

    xr = x.reshape(B * N, T, D)                       # raw row-major reshape, as torch
    xt = jnp.transpose(xr, (1, 0, 2))                 # (T, BN, D)
    outs = []
    for p in (params["gru_q"], params["gru_k"], params["gru_v"]):
        wi = p["w_ih"].reshape(3, D, D).transpose(0, 2, 1)
        wh = p["w_hh"].reshape(3, D, D).transpose(0, 2, 1)
        bi = p["b_ih"].reshape(3, 1, D)
        bh = p["b_hh"].reshape(3, 1, D)

        def cell(h, x_t, wi=wi, wh=wh, bi=bi, bh=bh):
            r = jax.nn.sigmoid(x_t @ wi[0] + bi[0] + h @ wh[0] + bh[0])
            z = jax.nn.sigmoid(x_t @ wi[1] + bi[1] + h @ wh[1] + bh[1])
            n = jnp.tanh(x_t @ wi[2] + bi[2] + r * (h @ wh[2] + bh[2]))
            h_new = (1.0 - z) * n + z * h
            return h_new, h_new

        _, ys = jax.lax.scan(cell, jnp.zeros((B * N, D), jnp.float32), xt)
        outs.append(jnp.transpose(ys, (1, 0, 2)))     # (BN, T, D)

    def to_heads(y):
        t = y.reshape(B, N, T, D).transpose(0, 2, 1, 3)              # (B, T, N, D)
        return jnp.concatenate(jnp.split(t, H, axis=-1), axis=0)     # (H*B, T, N, dh)

    qh, kh, vh = (to_heads(y) for y in outs)
    M = H * B * T
    rel = params["rel_pos"][:, :N, :N]
    bias = jnp.broadcast_to(rel[None], (M // H, H, N, N)).reshape(M, N, N)
    q2, k2, v2 = (a.reshape(M, N, dh) for a in (qh, kh, vh))
    s = jnp.einsum("mnd,mkd->mnk", q2, k2) * scale + bias
    if mask:
        tri = jnp.tril(jnp.ones((N, N), bool))
        s = jnp.where(tri[None], s, -jnp.inf)
    p_attn = jax.nn.softmax(s, axis=-1)
    o = jnp.einsum("mnk,mkd->mnd", p_attn, v2).reshape(H * B, T, N, dh)
    o = jnp.concatenate(jnp.split(o, H, axis=0), axis=-1)            # (B, T, N, D)

    attn_flat = o.reshape(B * T * N, D)
    x_flat = x.reshape(B * T * N, D)
    h1 = _layer_norm(x_flat + (attn_flat @ params["wo"] + params["bo"][None]),
                     params["ln1_g"][None], params["ln1_b"][None])
    f = jnp.maximum(h1 @ params["w1"] + params["b1"][None], 0.0) @ params["w2"] + params["b2"][None]
    out = _layer_norm(h1 + f, params["ln2_g"][None], params["ln2_b"][None])
    return out.reshape(B, T, N, D)


# --------------------------------------------------------------------------
# Deterministic parameter construction (shapes per module __init__; synthetic values)
# --------------------------------------------------------------------------
def init_params(key, D, F, H, max_len=12):
    ks = jax.random.split(key, 16)
    s = 0.2

    def gru_p(k):
        k1, k2, k3, k4 = jax.random.split(k, 4)
        return dict(
            w_ih=s * jax.random.normal(k1, (3 * D, D), jnp.float32),
            w_hh=s * jax.random.normal(k2, (3 * D, D), jnp.float32),
            b_ih=s * jax.random.normal(k3, (3 * D,), jnp.float32),
            b_hh=s * jax.random.normal(k4, (3 * D,), jnp.float32),
        )

    return dict(
        gru_q=gru_p(ks[0]), gru_k=gru_p(ks[1]), gru_v=gru_p(ks[2]),
        wo=s * jax.random.normal(ks[3], (D, D), jnp.float32),   # stored as (in, out)
        bo=s * jax.random.normal(ks[4], (D,), jnp.float32),
        rel_pos=jax.random.normal(ks[5], (H, max_len, max_len), jnp.float32),
        w1=s * jax.random.normal(ks[6], (D, F), jnp.float32),
        b1=s * jax.random.normal(ks[7], (F,), jnp.float32),
        w2=s * jax.random.normal(ks[8], (F, D), jnp.float32),
        b2=s * jax.random.normal(ks[9], (D,), jnp.float32),
        ln1_g=jnp.ones((D,), jnp.float32), ln1_b=jnp.zeros((D,), jnp.float32),
        ln2_g=jnp.ones((D,), jnp.float32), ln2_b=jnp.zeros((D,), jnp.float32),
    )


if __name__ == "__main__":
    # small shapes: batch=2, seq_len=8, num_nodes=6 (<= max_len 12), model_dim=16,
    # num_heads=4 (head_dim=4), feed_forward_dim=64
    B, T, N, D, H, F = 2, 8, 6, 16, 4, 64
    key = jax.random.PRNGKey(0)
    kx, kp = jax.random.split(key)
    x = jax.random.normal(kx, (B, T, N, D), jnp.float32)
    params = init_params(kp, D, F, H)

    fwd = jax.jit(functools.partial(tem_self_attention_forward,
                                    num_heads=H, mask=False, use_pallas=True))
    out = jax.block_until_ready(fwd(x, params))

    ref_fn = jax.jit(functools.partial(tem_self_attention_forward,
                                       num_heads=H, mask=False, use_pallas=False))
    ref = jax.block_until_ready(ref_fn(x, params))

    assert out.shape == (B, T, N, D)
    assert bool(jnp.all(jnp.isfinite(out)))
    # tolerance covers the bf16 MXU operands on the Pallas path (f32 accumulation,
    # f32 carried GRU state, f32 residual/LayerNorm math)
    np.testing.assert_allclose(np.asarray(out), np.asarray(ref), rtol=5e-2, atol=5e-2)
    print("KERNEL_OK")
</pallas_src>

<mosaic_0001>
module attributes {stable_mosaic.version = 11 : i64} {
  func.func @_attn_kernel(%arg0: i32, %arg1: memref<8x6x16xbf16, #tpu.memory_space<vmem>>, %arg2: memref<8x6x16xbf16, #tpu.memory_space<vmem>>, %arg3: memref<8x6x16xbf16, #tpu.memory_space<vmem>>, %arg4: memref<4x4x6x6xf32, #tpu.memory_space<vmem>>, %arg5: memref<8x6x16xbf16, #tpu.memory_space<vmem>>) attributes {dimension_semantics = [#tpu.dimension_semantics<parallel>], iteration_bounds = array<i64: 2>, scalar_prefetch = 0 : i64, scratch_operands = 0 : i64, tpu.core_type = #tpu.core_type<tc>, window_params = [{transform_indices = @transform_0, window_bounds = array<i64: 8, 6, 16>}, {transform_indices = @transform_1, window_bounds = array<i64: 8, 6, 16>}, {transform_indices = @transform_2, window_bounds = array<i64: 8, 6, 16>}, {pipeline_mode = #tpu.pipeline_mode<synchronous>, transform_indices = @transform_3, window_bounds = array<i64: 4, 4, 6, 6>}, {transform_indices = @transform_4, window_bounds = array<i64: 8, 6, 16>}]} {
    %c0 = arith.constant 0 : index
    %c0_0 = arith.constant 0 : index
    %c0_1 = arith.constant 0 : index
    %0 = vector.load %arg1[%c0, %c0_0, %c0_1] : memref<8x6x16xbf16, #tpu.memory_space<vmem>>, vector<8x6x16xbf16>
    %c0_2 = arith.constant 0 : index
    %c0_3 = arith.constant 0 : index
    %c0_4 = arith.constant 0 : index
    %1 = vector.load %arg2[%c0_2, %c0_3, %c0_4] : memref<8x6x16xbf16, #tpu.memory_space<vmem>>, vector<8x6x16xbf16>
    %c0_5 = arith.constant 0 : index
    %c0_6 = arith.constant 0 : index
    %c0_7 = arith.constant 0 : index
    %2 = vector.load %arg3[%c0_5, %c0_6, %c0_7] : memref<8x6x16xbf16, #tpu.memory_space<vmem>>, vector<8x6x16xbf16>
    %3 = vector.extract_strided_slice %0 {offsets = [0, 0, 0], sizes = [8, 6, 4], strides = [1, 1, 1]} : vector<8x6x16xbf16> to vector<8x6x4xbf16>
    %4 = vector.extract_strided_slice %1 {offsets = [0, 0, 0], sizes = [8, 6, 4], strides = [1, 1, 1]} : vector<8x6x16xbf16> to vector<8x6x4xbf16>
    "tpu.trace_start"() <{level = 10 : i32, message = "rnd,rkd->rnk"}> : () -> ()
    %cst = arith.constant dense<0.000000e+00> : vector<8x6x6xf32>
    %5 = tpu.matmul %3, %4, %cst {dimension_numbers = #tpu.dot_dimension_numbers<[2], [2], [1], [1], [0, 0, 0, 1, 1, 1], [0], [0]>} : vector<8x6x4xbf16>, vector<8x6x4xbf16>, vector<8x6x6xf32> -> vector<8x6x6xf32>
    "tpu.trace_stop"() : () -> ()
    %cst_8 = arith.constant 5.000000e-01 : f32
    %6 = vector.broadcast %cst_8 : f32 to vector<8x6x6xf32>
    %7 = arith.mulf %5, %6 : vector<8x6x6xf32>
    %8 = vector.shape_cast %7 : vector<8x6x6xf32> to vector<2x4x6x6xf32>
    %c0_9 = arith.constant 0 : index
    %c0_10 = arith.constant 0 : index
    %c0_11 = arith.constant 0 : index
    %c0_12 = arith.constant 0 : index
    %9 = vector.load %arg4[%c0_9, %c0_10, %c0_11, %c0_12] : memref<4x4x6x6xf32, #tpu.memory_space<vmem>>, vector<1x4x6x6xf32>
    %10 = vector.shape_cast %9 : vector<1x4x6x6xf32> to vector<4x6x6xf32>
    %11 = vector.shape_cast %10 : vector<4x6x6xf32> to vector<1x4x6x6xf32>
    %12 = vector.broadcast %11 : vector<1x4x6x6xf32> to vector<2x4x6x6xf32>
    %13 = arith.addf %8, %12 : vector<2x4x6x6xf32>
    %14 = vector.shape_cast %13 : vector<2x4x6x6xf32> to vector<8x6x6xf32>
    %cst_13 = arith.constant dense<0xFF800000> : vector<8x6xf32>
    %15 = vector.multi_reduction <maximumf>, %14, %cst_13 [2] : vector<8x6x6xf32> to vector<8x6xf32>
    %16 = vector.shape_cast %15 : vector<8x6xf32> to vector<8x6x1xf32>
    %17 = vector.broadcast %16 : vector<8x6x1xf32> to vector<8x6x6xf32>
    %18 = arith.subf %14, %17 : vector<8x6x6xf32>
    %19 = math.exp %18 : vector<8x6x6xf32>
    %cst_14 = arith.constant dense<0.000000e+00> : vector<8x6xf32>
    %20 = vector.multi_reduction <add>, %19, %cst_14 [2] : vector<8x6x6xf32> to vector<8x6xf32>
    %21 = vector.shape_cast %20 : vector<8x6xf32> to vector<8x6x1xf32>
    %22 = tpu.reciprocal %21 : vector<8x6x1xf32> -> vector<8x6x1xf32>
    %23 = vector.broadcast %22 : vector<8x6x1xf32> to vector<8x6x6xf32>
    %24 = arith.mulf %19, %23 : vector<8x6x6xf32>
    %25 = arith.truncf %24 : vector<8x6x6xf32> to vector<8x6x6xbf16>
    %26 = vector.extract_strided_slice %2 {offsets = [0, 0, 0], sizes = [8, 6, 4], strides = [1, 1, 1]} : vector<8x6x16xbf16> to vector<8x6x4xbf16>
    "tpu.trace_start"() <{level = 10 : i32, message = "rnk,rkd->rnd"}> : () -> ()
    %cst_15 = arith.constant dense<0.000000e+00> : vector<8x6x4xf32>
    %27 = tpu.matmul %25, %26, %cst_15 {dimension_numbers = #tpu.dot_dimension_numbers<[2], [1], [1], [2], [0, 0, 0, 1, 1, 2], [0], [0]>} : vector<8x6x6xbf16>, vector<8x6x4xbf16>, vector<8x6x4xf32> -> vector<8x6x4xf32>
    "tpu.trace_stop"() : () -> ()
    %28 = vector.extract_strided_slice %0 {offsets = [0, 0, 4], sizes = [8, 6, 4], strides = [1, 1, 1]} : vector<8x6x16xbf16> to vector<8x6x4xbf16>
    %29 = vector.extract_strided_slice %1 {offsets = [0, 0, 4], sizes = [8, 6, 4], strides = [1, 1, 1]} : vector<8x6x16xbf16> to vector<8x6x4xbf16>
    "tpu.trace_start"() <{level = 10 : i32, message = "rnd,rkd->rnk"}> : () -> ()
    %cst_16 = arith.constant dense<0.000000e+00> : vector<8x6x6xf32>
    %30 = tpu.matmul %28, %29, %cst_16 {dimension_numbers = #tpu.dot_dimension_numbers<[2], [2], [1], [1], [0, 0, 0, 1, 1, 1], [0], [0]>} : vector<8x6x4xbf16>, vector<8x6x4xbf16>, vector<8x6x6xf32> -> vector<8x6x6xf32>
    "tpu.trace_stop"() : () -> ()
    %cst_17 = arith.constant 5.000000e-01 : f32
    %31 = vector.broadcast %cst_17 : f32 to vector<8x6x6xf32>
    %32 = arith.mulf %30, %31 : vector<8x6x6xf32>
    %33 = vector.shape_cast %32 : vector<8x6x6xf32> to vector<2x4x6x6xf32>
    %c1 = arith.constant 1 : index
    %c0_18 = arith.constant 0 : index
    %c0_19 = arith.constant 0 : index
    %c0_20 = arith.constant 0 : index
    %34 = vector.load %arg4[%c1, %c0_18, %c0_19, %c0_20] : memref<4x4x6x6xf32, #tpu.memory_space<vmem>>, vector<1x4x6x6xf32>
    %35 = vector.shape_cast %34 : vector<1x4x6x6xf32> to vector<4x6x6xf32>
    %36 = vector.shape_cast %35 : vector<4x6x6xf32> to vector<1x4x6x6xf32>
    %37 = vector.broadcast %36 : vector<1x4x6x6xf32> to vector<2x4x6x6xf32>
    %38 = arith.addf %33, %37 : vector<2x4x6x6xf32>
    %39 = vector.shape_cast %38 : vector<2x4x6x6xf32> to vector<8x6x6xf32>
    %cst_21 = arith.constant dense<0xFF800000> : vector<8x6xf32>
    %40 = vector.multi_reduction <maximumf>, %39, %cst_21 [2] : vector<8x6x6xf32> to vector<8x6xf32>
    %41 = vector.shape_cast %40 : vector<8x6xf32> to vector<8x6x1xf32>
    %42 = vector.broadcast %41 : vector<8x6x1xf32> to vector<8x6x6xf32>
    %43 = arith.subf %39, %42 : vector<8x6x6xf32>
    %44 = math.exp %43 : vector<8x6x6xf32>
    %cst_22 = arith.constant dense<0.000000e+00> : vector<8x6xf32>
    %45 = vector.multi_reduction <add>, %44, %cst_22 [2] : vector<8x6x6xf32> to vector<8x6xf32>
    %46 = vector.shape_cast %45 : vector<8x6xf32> to vector<8x6x1xf32>
    %47 = tpu.reciprocal %46 : vector<8x6x1xf32> -> vector<8x6x1xf32>
    %48 = vector.broadcast %47 : vector<8x6x1xf32> to vector<8x6x6xf32>
    %49 = arith.mulf %44, %48 : vector<8x6x6xf32>
    %50 = arith.truncf %49 : vector<8x6x6xf32> to vector<8x6x6xbf16>
    %51 = vector.extract_strided_slice %2 {offsets = [0, 0, 4], sizes = [8, 6, 4], strides = [1, 1, 1]} : vector<8x6x16xbf16> to vector<8x6x4xbf16>
    "tpu.trace_start"() <{level = 10 : i32, message = "rnk,rkd->rnd"}> : () -> ()
    %cst_23 = arith.constant dense<0.000000e+00> : vector<8x6x4xf32>
    %52 = tpu.matmul %50, %51, %cst_23 {dimension_numbers = #tpu.dot_dimension_numbers<[2], [1], [1], [2], [0, 0, 0, 1, 1, 2], [0], [0]>} : vector<8x6x6xbf16>, vector<8x6x4xbf16>, vector<8x6x4xf32> -> vector<8x6x4xf32>
    "tpu.trace_stop"() : () -> ()
    %53 = vector.extract_strided_slice %0 {offsets = [0, 0, 8], sizes = [8, 6, 4], strides = [1, 1, 1]} : vector<8x6x16xbf16> to vector<8x6x4xbf16>
    %54 = vector.extract_strided_slice %1 {offsets = [0, 0, 8], sizes = [8, 6, 4], strides = [1, 1, 1]} : vector<8x6x16xbf16> to vector<8x6x4xbf16>
    "tpu.trace_start"() <{level = 10 : i32, message = "rnd,rkd->rnk"}> : () -> ()
    %cst_24 = arith.constant dense<0.000000e+00> : vector<8x6x6xf32>
    %55 = tpu.matmul %53, %54, %cst_24 {dimension_numbers = #tpu.dot_dimension_numbers<[2], [2], [1], [1], [0, 0, 0, 1, 1, 1], [0], [0]>} : vector<8x6x4xbf16>, vector<8x6x4xbf16>, vector<8x6x6xf32> -> vector<8x6x6xf32>
    "tpu.trace_stop"() : () -> ()
    %cst_25 = arith.constant 5.000000e-01 : f32
    %56 = vector.broadcast %cst_25 : f32 to vector<8x6x6xf32>
    %57 = arith.mulf %55, %56 : vector<8x6x6xf32>
    %58 = vector.shape_cast %57 : vector<8x6x6xf32> to vector<2x4x6x6xf32>
    %c2 = arith.constant 2 : index
    %c0_26 = arith.constant 0 : index
    %c0_27 = arith.constant 0 : index
    %c0_28 = arith.constant 0 : index
    %59 = vector.load %arg4[%c2, %c0_26, %c0_27, %c0_28] : memref<4x4x6x6xf32, #tpu.memory_space<vmem>>, vector<1x4x6x6xf32>
    %60 = vector.shape_cast %59 : vector<1x4x6x6xf32> to vector<4x6x6xf32>
    %61 = vector.shape_cast %60 : vector<4x6x6xf32> to vector<1x4x6x6xf32>
    %62 = vector.broadcast %61 : vector<1x4x6x6xf32> to vector<2x4x6x6xf32>
    %63 = arith.addf %58, %62 : vector<2x4x6x6xf32>
    %64 = vector.shape_cast %63 : vector<2x4x6x6xf32> to vector<8x6x6xf32>
    %cst_29 = arith.constant dense<0xFF800000> : vector<8x6xf32>
    %65 = vector.multi_reduction <maximumf>, %64, %cst_29 [2] : vector<8x6x6xf32> to vector<8x6xf32>
    %66 = vector.shape_cast %65 : vector<8x6xf32> to vector<8x6x1xf32>
    %67 = vector.broadcast %66 : vector<8x6x1xf32> to vector<8x6x6xf32>
    %68 = arith.subf %64, %67 : vector<8x6x6xf32>
    %69 = math.exp %68 : vector<8x6x6xf32>
    %cst_30 = arith.constant dense<0.000000e+00> : vector<8x6xf32>
    %70 = vector.multi_reduction <add>, %69, %cst_30 [2] : vector<8x6x6xf32> to vector<8x6xf32>
    %71 = vector.shape_cast %70 : vector<8x6xf32> to vector<8x6x1xf32>
    %72 = tpu.reciprocal %71 : vector<8x6x1xf32> -> vector<8x6x1xf32>
    %73 = vector.broadcast %72 : vector<8x6x1xf32> to vector<8x6x6xf32>
    %74 = arith.mulf %69, %73 : vector<8x6x6xf32>
    %75 = arith.truncf %74 : vector<8x6x6xf32> to vector<8x6x6xbf16>
    %76 = vector.extract_strided_slice %2 {offsets = [0, 0, 8], sizes = [8, 6, 4], strides = [1, 1, 1]} : vector<8x6x16xbf16> to vector<8x6x4xbf16>
    "tpu.trace_start"() <{level = 10 : i32, message = "rnk,rkd->rnd"}> : () -> ()
    %cst_31 = arith.constant dense<0.000000e+00> : vector<8x6x4xf32>
    %77 = tpu.matmul %75, %76, %cst_31 {dimension_numbers = #tpu.dot_dimension_numbers<[2], [1], [1], [2], [0, 0, 0, 1, 1, 2], [0], [0]>} : vector<8x6x6xbf16>, vector<8x6x4xbf16>, vector<8x6x4xf32> -> vector<8x6x4xf32>
    "tpu.trace_stop"() : () -> ()
    %78 = vector.extract_strided_slice %0 {offsets = [0, 0, 12], sizes = [8, 6, 4], strides = [1, 1, 1]} : vector<8x6x16xbf16> to vector<8x6x4xbf16>
    %79 = vector.extract_strided_slice %1 {offsets = [0, 0, 12], sizes = [8, 6, 4], strides = [1, 1, 1]} : vector<8x6x16xbf16> to vector<8x6x4xbf16>
    "tpu.trace_start"() <{level = 10 : i32, message = "rnd,rkd->rnk"}> : () -> ()
    %cst_32 = arith.constant dense<0.000000e+00> : vector<8x6x6xf32>
    %80 = tpu.matmul %78, %79, %cst_32 {dimension_numbers = #tpu.dot_dimension_numbers<[2], [2], [1], [1], [0, 0, 0, 1, 1, 1], [0], [0]>} : vector<8x6x4xbf16>, vector<8x6x4xbf16>, vector<8x6x6xf32> -> vector<8x6x6xf32>
    "tpu.trace_stop"() : () -> ()
    %cst_33 = arith.constant 5.000000e-01 : f32
    %81 = vector.broadcast %cst_33 : f32 to vector<8x6x6xf32>
    %82 = arith.mulf %80, %81 : vector<8x6x6xf32>
    %83 = vector.shape_cast %82 : vector<8x6x6xf32> to vector<2x4x6x6xf32>
    %c3 = arith.constant 3 : index
    %c0_34 = arith.constant 0 : index
    %c0_35 = arith.constant 0 : index
    %c0_36 = arith.constant 0 : index
    %84 = vector.load %arg4[%c3, %c0_34, %c0_35, %c0_36] : memref<4x4x6x6xf32, #tpu.memory_space<vmem>>, vector<1x4x6x6xf32>
    %85 = vector.shape_cast %84 : vector<1x4x6x6xf32> to vector<4x6x6xf32>
    %86 = vector.shape_cast %85 : vector<4x6x6xf32> to vector<1x4x6x6xf32>
    %87 = vector.broadcast %86 : vector<1x4x6x6xf32> to vector<2x4x6x6xf32>
    %88 = arith.addf %83, %87 : vector<2x4x6x6xf32>
    %89 = vector.shape_cast %88 : vector<2x4x6x6xf32> to vector<8x6x6xf32>
    %cst_37 = arith.constant dense<0xFF800000> : vector<8x6xf32>
    %90 = vector.multi_reduction <maximumf>, %89, %cst_37 [2] : vector<8x6x6xf32> to vector<8x6xf32>
    %91 = vector.shape_cast %90 : vector<8x6xf32> to vector<8x6x1xf32>
    %92 = vector.broadcast %91 : vector<8x6x1xf32> to vector<8x6x6xf32>
    %93 = arith.subf %89, %92 : vector<8x6x6xf32>
    %94 = math.exp %93 : vector<8x6x6xf32>
    %cst_38 = arith.constant dense<0.000000e+00> : vector<8x6xf32>
    %95 = vector.multi_reduction <add>, %94, %cst_38 [2] : vector<8x6x6xf32> to vector<8x6xf32>
    %96 = vector.shape_cast %95 : vector<8x6xf32> to vector<8x6x1xf32>
    %97 = tpu.reciprocal %96 : vector<8x6x1xf32> -> vector<8x6x1xf32>
    %98 = vector.broadcast %97 : vector<8x6x1xf32> to vector<8x6x6xf32>
    %99 = arith.mulf %94, %98 : vector<8x6x6xf32>
    %100 = arith.truncf %99 : vector<8x6x6xf32> to vector<8x6x6xbf16>
    %101 = vector.extract_strided_slice %2 {offsets = [0, 0, 12], sizes = [8, 6, 4], strides = [1, 1, 1]} : vector<8x6x16xbf16> to vector<8x6x4xbf16>
    "tpu.trace_start"() <{level = 10 : i32, message = "rnk,rkd->rnd"}> : () -> ()
    %cst_39 = arith.constant dense<0.000000e+00> : vector<8x6x4xf32>
    %102 = tpu.matmul %100, %101, %cst_39 {dimension_numbers = #tpu.dot_dimension_numbers<[2], [1], [1], [2], [0, 0, 0, 1, 1, 2], [0], [0]>} : vector<8x6x6xbf16>, vector<8x6x4xbf16>, vector<8x6x4xf32> -> vector<8x6x4xf32>
    "tpu.trace_stop"() : () -> ()
    %103 = tpu.concatenate %27, %52, %77, %102 in 2 : vector<8x6x4xf32>, vector<8x6x4xf32>, vector<8x6x4xf32>, vector<8x6x4xf32> -> vector<8x6x16xf32>
    %104 = arith.truncf %103 : vector<8x6x16xf32> to vector<8x6x16xbf16>
    %c0_40 = arith.constant 0 : index
    %c0_41 = arith.constant 0 : index
    %c0_42 = arith.constant 0 : index
    %105 = vector.load %arg5[%c0_40, %c0_41, %c0_42] : memref<8x6x16xbf16, #tpu.memory_space<vmem>>, vector<8x6x16xbf16>
    tpu.vector_store %arg5[%c0_40, %c0_41, %c0_42], %104 {strides = array<i32>} : memref<8x6x16xbf16, #tpu.memory_space<vmem>>, vector<8x6x16xbf16>,
    return
  }
  func.func @transform_0(%arg0: i32) -> (i32, i32, i32) {
    %c0_i32 = arith.constant 0 : i32
    %c0_i32_0 = arith.constant 0 : i32
    %c0_i32_1 = arith.constant 0 : i32
    return %arg0, %c0_i32, %c0_i32_0 : i32, i32, i32
  }
  func.func @transform_1(%arg0: i32) -> (i32, i32, i32) {
    %c0_i32 = arith.constant 0 : i32
    %c0_i32_0 = arith.constant 0 : i32
    %c0_i32_1 = arith.constant 0 : i32
    return %arg0, %c0_i32, %c0_i32_0 : i32, i32, i32
  }
  func.func @transform_2(%arg0: i32) -> (i32, i32, i32) {
    %c0_i32 = arith.constant 0 : i32
    %c0_i32_0 = arith.constant 0 : i32
    %c0_i32_1 = arith.constant 0 : i32
    return %arg0, %c0_i32, %c0_i32_0 : i32, i32, i32
  }
  func.func @transform_3(%arg0: i32) -> (i32, i32, i32, i32) {
    %c0_i32 = arith.constant 0 : i32
    %c0_i32_0 = arith.constant 0 : i32
    %c0_i32_1 = arith.constant 0 : i32
    %c0_i32_2 = arith.constant 0 : i32
    %c0_i32_3 = arith.constant 0 : i32
    return %c0_i32, %c0_i32_0, %c0_i32_1, %c0_i32_2 : i32, i32, i32, i32
  }
  func.func @transform_4(%arg0: i32) -> (i32, i32, i32) {
    %c0_i32 = arith.constant 0 : i32
    %c0_i32_0 = arith.constant 0 : i32
    %c0_i32_1 = arith.constant 0 : i32
    return %arg0, %c0_i32, %c0_i32_0 : i32, i32, i32
  }
}

module attributes {stable_mosaic.version = 11 : i64} {
  func.func @_gru_kernel(%arg0: i32, %arg1: memref<8x8x16xbf16, #tpu.memory_space<vmem>>, %arg2: memref<3x3x16x16xbf16, #tpu.memory_space<vmem>>, %arg3: memref<3x3x1x16xf32, #tpu.memory_space<vmem>>, %arg4: memref<3x16x48xbf16, #tpu.memory_space<vmem>>, %arg5: memref<3x1x48xf32, #tpu.memory_space<vmem>>, %arg6: memref<8x3x8x16xbf16, #tpu.memory_space<vmem>>, %arg7: memref<8x8x16xf32, #tpu.memory_space<vmem>>, %arg8: memref<8x8x16xf32, #tpu.memory_space<vmem>>, %arg9: memref<8x8x16xf32, #tpu.memory_space<vmem>>, %arg10: memref<8x8x16xf32, #tpu.memory_space<vmem>>, %arg11: memref<8x8x16xf32, #tpu.memory_space<vmem>>, %arg12: memref<8x8x16xf32, #tpu.memory_space<vmem>>, %arg13: memref<8x8x16xf32, #tpu.memory_space<vmem>>, %arg14: memref<8x8x16xf32, #tpu.memory_space<vmem>>, %arg15: memref<8x8x16xf32, #tpu.memory_space<vmem>>, %arg16: memref<8x16xf32, #tpu.memory_space<vmem>>, %arg17: memref<8x16xf32, #tpu.memory_space<vmem>>, %arg18: memref<8x16xf32, #tpu.memory_space<vmem>>) attributes {dimension_semantics = [#tpu.dimension_semantics<parallel>], iteration_bounds = array<i64: 2>, scalar_prefetch = 0 : i64, scratch_operands = 12 : i64, tpu.core_type = #tpu.core_type<tc>, window_params = [{transform_indices = @transform_0, window_bounds = array<i64: 8, 8, 16>}, {pipeline_mode = #tpu.pipeline_mode<synchronous>, transform_indices = @transform_1, window_bounds = array<i64: 3, 3, 16, 16>}, {pipeline_mode = #tpu.pipeline_mode<synchronous>, transform_indices = @transform_2, window_bounds = array<i64: 3, 3, 1, 16>}, {pipeline_mode = #tpu.pipeline_mode<synchronous>, transform_indices = @transform_3, window_bounds = array<i64: 3, 16, 48>}, {pipeline_mode = #tpu.pipeline_mode<synchronous>, transform_indices = @transform_4, window_bounds = array<i64: 3, 1, 48>}, {transform_indices = @transform_5, window_bounds = array<i64: 8, 3, 8, 16>}]} {
    %c0 = arith.constant 0 : index
    %c0_0 = arith.constant 0 : index
    %c0_1 = arith.constant 0 : index
    %0 = vector.load %arg1[%c0, %c0_0, %c0_1] : memref<8x8x16xbf16, #tpu.memory_space<vmem>>, vector<8x8x16xbf16>
    %1 = vector.shape_cast %0 : vector<8x8x16xbf16> to vector<64x16xbf16>
    %c0_2 = arith.constant 0 : index
    %c0_3 = arith.constant 0 : index
    %c0_4 = arith.constant 0 : index
    %c0_5 = arith.constant 0 : index
    %2 = vector.load %arg2[%c0_2, %c0_3, %c0_4, %c0_5] : memref<3x3x16x16xbf16, #tpu.memory_space<vmem>>, vector<1x1x16x16xbf16>
    %3 = vector.shape_cast %2 : vector<1x1x16x16xbf16> to vector<16x16xbf16>
    %cst = arith.constant dense<0.000000e+00> : vector<64x16xf32>
    %4 = tpu.matmul %1, %3, %cst {dimension_numbers = #tpu.dot_dimension_numbers<[1], [0], [0], [1], [0, 0, 1, 1], [], []>} : vector<64x16xbf16>, vector<16x16xbf16>, vector<64x16xf32> -> vector<64x16xf32>
    %c0_6 = arith.constant 0 : index
    %c0_7 = arith.constant 0 : index
    %c0_8 = arith.constant 0 : index
    %c0_9 = arith.constant 0 : index
    %5 = vector.load %arg3[%c0_6, %c0_7, %c0_8, %c0_9] : memref<3x3x1x16xf32, #tpu.memory_space<vmem>>, vector<1x1x1x16xf32>
    %6 = vector.shape_cast %5 : vector<1x1x1x16xf32> to vector<1x16xf32>
    %7 = vector.broadcast %6 : vector<1x16xf32> to vector<64x16xf32>
    %8 = arith.addf %4, %7 : vector<64x16xf32>
    %9 = vector.shape_cast %8 : vector<64x16xf32> to vector<8x8x16xf32>
    %c0_10 = arith.constant 0 : index
    %c0_11 = arith.constant 0 : index
    %c0_12 = arith.constant 0 : index
    %10 = vector.load %arg7[%c0_10, %c0_11, %c0_12] : memref<8x8x16xf32, #tpu.memory_space<vmem>>, vector<8x8x16xf32>
    tpu.vector_store %arg7[%c0_10, %c0_11, %c0_12], %9 {strides = array<i32>} : memref<8x8x16xf32, #tpu.memory_space<vmem>>, vector<8x8x16xf32>,
    %c0_13 = arith.constant 0 : index
    %c1 = arith.constant 1 : index
    %c0_14 = arith.constant 0 : index
    %c0_15 = arith.constant 0 : index
    %11 = vector.load %arg2[%c0_13, %c1, %c0_14, %c0_15] : memref<3x3x16x16xbf16, #tpu.memory_space<vmem>>, vector<1x1x16x16xbf16>
    %12 = vector.shape_cast %11 : vector<1x1x16x16xbf16> to vector<16x16xbf16>
    %cst_16 = arith.constant dense<0.000000e+00> : vector<64x16xf32>
    %13 = tpu.matmul %1, %12, %cst_16 {dimension_numbers = #tpu.dot_dimension_numbers<[1], [0], [0], [1], [0, 0, 1, 1], [], []>} : vector<64x16xbf16>, vector<16x16xbf16>, vector<64x16xf32> -> vector<64x16xf32>
    %c0_17 = arith.constant 0 : index
    %c1_18 = arith.constant 1 : index
    %c0_19 = arith.constant 0 : index
    %c0_20 = arith.constant 0 : index
    %14 = vector.load %arg3[%c0_17, %c1_18, %c0_19, %c0_20] : memref<3x3x1x16xf32, #tpu.memory_space<vmem>>, vector<1x1x1x16xf32>
    %15 = vector.shape_cast %14 : vector<1x1x1x16xf32> to vector<1x16xf32>
    %16 = vector.broadcast %15 : vector<1x16xf32> to vector<64x16xf32>
    %17 = arith.addf %13, %16 : vector<64x16xf32>
    %18 = vector.shape_cast %17 : vector<64x16xf32> to vector<8x8x16xf32>
    %c0_21 = arith.constant 0 : index
    %c0_22 = arith.constant 0 : index
    %c0_23 = arith.constant 0 : index
    %19 = vector.load %arg8[%c0_21, %c0_22, %c0_23] : memref<8x8x16xf32, #tpu.memory_space<vmem>>, vector<8x8x16xf32>
    tpu.vector_store %arg8[%c0_21, %c0_22, %c0_23], %18 {strides = array<i32>} : memref<8x8x16xf32, #tpu.memory_space<vmem>>, vector<8x8x16xf32>,
    %c0_24 = arith.constant 0 : index
    %c2 = arith.constant 2 : index
    %c0_25 = arith.constant 0 : index
    %c0_26 = arith.constant 0 : index
    %20 = vector.load %arg2[%c0_24, %c2, %c0_25, %c0_26] : memref<3x3x16x16xbf16, #tpu.memory_space<vmem>>, vector<1x1x16x16xbf16>
    %21 = vector.shape_cast %20 : vector<1x1x16x16xbf16> to vector<16x16xbf16>
    %cst_27 = arith.constant dense<0.000000e+00> : vector<64x16xf32>
    %22 = tpu.matmul %1, %21, %cst_27 {dimension_numbers = #tpu.dot_dimension_numbers<[1], [0], [0], [1], [0, 0, 1, 1], [], []>} : vector<64x16xbf16>, vector<16x16xbf16>, vector<64x16xf32> -> vector<64x16xf32>
    %c0_28 = arith.constant 0 : index
    %c2_29 = arith.constant 2 : index
    %c0_30 = arith.constant 0 : index
    %c0_31 = arith.constant 0 : index
    %23 = vector.load %arg3[%c0_28, %c2_29, %c0_30, %c0_31] : memref<3x3x1x16xf32, #tpu.memory_space<vmem>>, vector<1x1x1x16xf32>
    %24 = vector.shape_cast %23 : vector<1x1x1x16xf32> to vector<1x16xf32>
    %25 = vector.broadcast %24 : vector<1x16xf32> to vector<64x16xf32>
    %26 = arith.addf %22, %25 : vector<64x16xf32>
    %27 = vector.shape_cast %26 : vector<64x16xf32> to vector<8x8x16xf32>
    %c0_32 = arith.constant 0 : index
    %c0_33 = arith.constant 0 : index
    %c0_34 = arith.constant 0 : index
    %28 = vector.load %arg9[%c0_32, %c0_33, %c0_34] : memref<8x8x16xf32, #tpu.memory_space<vmem>>, vector<8x8x16xf32>
    tpu.vector_store %arg9[%c0_32, %c0_33, %c0_34], %27 {strides = array<i32>} : memref<8x8x16xf32, #tpu.memory_space<vmem>>, vector<8x8x16xf32>,
    %cst_35 = arith.constant 0.000000e+00 : f32
    %29 = vector.broadcast %cst_35 : f32 to vector<8x16xf32>
    %c0_36 = arith.constant 0 : index
    %c0_37 = arith.constant 0 : index
    %30 = vector.load %arg16[%c0_36, %c0_37] : memref<8x16xf32, #tpu.memory_space<vmem>>, vector<8x16xf32>
    tpu.vector_store %arg16[%c0_36, %c0_37], %29 {strides = array<i32>} : memref<8x16xf32, #tpu.memory_space<vmem>>, vector<8x16xf32>,
    %c1_38 = arith.constant 1 : index
    %c0_39 = arith.constant 0 : index
    %c0_40 = arith.constant 0 : index
    %c0_41 = arith.constant 0 : index
    %31 = vector.load %arg2[%c1_38, %c0_39, %c0_40, %c0_41] : memref<3x3x16x16xbf16, #tpu.memory_space<vmem>>, vector<1x1x16x16xbf16>
    %32 = vector.shape_cast %31 : vector<1x1x16x16xbf16> to vector<16x16xbf16>
    %cst_42 = arith.constant dense<0.000000e+00> : vector<64x16xf32>
    %33 = tpu.matmul %1, %32, %cst_42 {dimension_numbers = #tpu.dot_dimension_numbers<[1], [0], [0], [1], [0, 0, 1, 1], [], []>} : vector<64x16xbf16>, vector<16x16xbf16>, vector<64x16xf32> -> vector<64x16xf32>
    %c1_43 = arith.constant 1 : index
    %c0_44 = arith.constant 0 : index
    %c0_45 = arith.constant 0 : index
    %c0_46 = arith.constant 0 : index
    %34 = vector.load %arg3[%c1_43, %c0_44, %c0_45, %c0_46] : memref<3x3x1x16xf32, #tpu.memory_space<vmem>>, vector<1x1x1x16xf32>
    %35 = vector.shape_cast %34 : vector<1x1x1x16xf32> to vector<1x16xf32>
    %36 = vector.broadcast %35 : vector<1x16xf32> to vector<64x16xf32>
    %37 = arith.addf %33, %36 : vector<64x16xf32>
    %38 = vector.shape_cast %37 : vector<64x16xf32> to vector<8x8x16xf32>
    %c0_47 = arith.constant 0 : index
    %c0_48 = arith.constant 0 : index
    %c0_49 = arith.constant 0 : index
    %39 = vector.load %arg10[%c0_47, %c0_48, %c0_49] : memref<8x8x16xf32, #tpu.memory_space<vmem>>, vector<8x8x16xf32>
    tpu.vector_store %arg10[%c0_47, %c0_48, %c0_49], %38 {strides = array<i32>} : memref<8x8x16xf32, #tpu.memory_space<vmem>>, vector<8x8x16xf32>,
    %c1_50 = arith.constant 1 : index
    %c1_51 = arith.constant 1 : index
    %c0_52 = arith.constant 0 : index
    %c0_53 = arith.constant 0 : index
    %40 = vector.load %arg2[%c1_50, %c1_51, %c0_52, %c0_53] : memref<3x3x16x16xbf16, #tpu.memory_space<vmem>>, vector<1x1x16x16xbf16>
    %41 = vector.shape_cast %40 : vector<1x1x16x16xbf16> to vector<16x16xbf16>
    %cst_54 = arith.constant dense<0.000000e+00> : vector<64x16xf32>
    %42 = tpu.matmul %1, %41, %cst_54 {dimension_numbers = #tpu.dot_dimension_numbers<[1], [0], [0], [1], [0, 0, 1, 1], [], []>} : vector<64x16xbf16>, vector<16x16xbf16>, vector<64x16xf32> -> vector<64x16xf32>
    %c1_55 = arith.constant 1 : index
    %c1_56 = arith.constant 1 : index
    %c0_57 = arith.constant 0 : index
    %c0_58 = arith.constant 0 : index
    %43 = vector.load %arg3[%c1_55, %c1_56, %c0_57, %c0_58] : memref<3x3x1x16xf32, #tpu.memory_space<vmem>>, vector<1x1x1x16xf32>
    %44 = vector.shape_cast %43 : vector<1x1x1x16xf32> to vector<1x16xf32>
    %45 = vector.broadcast %44 : vector<1x16xf32> to vector<64x16xf32>
    %46 = arith.addf %42, %45 : vector<64x16xf32>
    %47 = vector.shape_cast %46 : vector<64x16xf32> to vector<8x8x16xf32>
    %c0_59 = arith.constant 0 : index
    %c0_60 = arith.constant 0 : index
    %c0_61 = arith.constant 0 : index
    %48 = vector.load %arg11[%c0_59, %c0_60, %c0_61] : memref<8x8x16xf32, #tpu.memory_space<vmem>>, vector<8x8x16xf32>
    tpu.vector_store %arg11[%c0_59, %c0_60, %c0_61], %47 {strides = array<i32>} : memref<8x8x16xf32, #tpu.memory_space<vmem>>, vector<8x8x16xf32>,
    %c1_62 = arith.constant 1 : index
    %c2_63 = arith.constant 2 : index
    %c0_64 = arith.constant 0 : index
    %c0_65 = arith.constant 0 : index
    %49 = vector.load %arg2[%c1_62, %c2_63, %c0_64, %c0_65] : memref<3x3x16x16xbf16, #tpu.memory_space<vmem>>, vector<1x1x16x16xbf16>
    %50 = vector.shape_cast %49 : vector<1x1x16x16xbf16> to vector<16x16xbf16>
    %cst_66 = arith.constant dense<0.000000e+00> : vector<64x16xf32>
    %51 = tpu.matmul %1, %50, %cst_66 {dimension_numbers = #tpu.dot_dimension_numbers<[1], [0], [0], [1], [0, 0, 1, 1], [], []>} : vector<64x16xbf16>, vector<16x16xbf16>, vector<64x16xf32> -> vector<64x16xf32>
    %c1_67 = arith.constant 1 : index
    %c2_68 = arith.constant 2 : index
    %c0_69 = arith.constant 0 : index
    %c0_70 = arith.constant 0 : index
    %52 = vector.load %arg3[%c1_67, %c2_68, %c0_69, %c0_70] : memref<3x3x1x16xf32, #tpu.memory_space<vmem>>, vector<1x1x1x16xf32>
    %53 = vector.shape_cast %52 : vector<1x1x1x16xf32> to vector<1x16xf32>
    %54 = vector.broadcast %53 : vector<1x16xf32> to vector<64x16xf32>
    %55 = arith.addf %51, %54 : vector<64x16xf32>
    %56 = vector.shape_cast %55 : vector<64x16xf32> to vector<8x8x16xf32>
    %c0_71 = arith.constant 0 : index
    %c0_72 = arith.constant 0 : index
    %c0_73 = arith.constant 0 : index
    %57 = vector.load %arg12[%c0_71, %c0_72, %c0_73] : memref<8x8x16xf32, #tpu.memory_space<vmem>>, vector<8x8x16xf32>
    tpu.vector_store %arg12[%c0_71, %c0_72, %c0_73], %56 {strides = array<i32>} : memref<8x8x16xf32, #tpu.memory_space<vmem>>, vector<8x8x16xf32>,
    %cst_74 = arith.constant 0.000000e+00 : f32
    %58 = vector.broadcast %cst_74 : f32 to vector<8x16xf32>
    %c0_75 = arith.constant 0 : index
    %c0_76 = arith.constant 0 : index
    %59 = vector.load %arg17[%c0_75, %c0_76] : memref<8x16xf32, #tpu.memory_space<vmem>>, vector<8x16xf32>
    tpu.vector_store %arg17[%c0_75, %c0_76], %58 {strides = array<i32>} : memref<8x16xf32, #tpu.memory_space<vmem>>, vector<8x16xf32>,
    %c2_77 = arith.constant 2 : index
    %c0_78 = arith.constant 0 : index
    %c0_79 = arith.constant 0 : index
    %c0_80 = arith.constant 0 : index
    %60 = vector.load %arg2[%c2_77, %c0_78, %c0_79, %c0_80] : memref<3x3x16x16xbf16, #tpu.memory_space<vmem>>, vector<1x1x16x16xbf16>
    %61 = vector.shape_cast %60 : vector<1x1x16x16xbf16> to vector<16x16xbf16>
    %cst_81 = arith.constant dense<0.000000e+00> : vector<64x16xf32>
    %62 = tpu.matmul %1, %61, %cst_81 {dimension_numbers = #tpu.dot_dimension_numbers<[1], [0], [0], [1], [0, 0, 1, 1], [], []>} : vector<64x16xbf16>, vector<16x16xbf16>, vector<64x16xf32> -> vector<64x16xf32>
    %c2_82 = arith.constant 2 : index
    %c0_83 = arith.constant 0 : index
    %c0_84 = arith.constant 0 : index
    %c0_85 = arith.constant 0 : index
    %63 = vector.load %arg3[%c2_82, %c0_83, %c0_84, %c0_85] : memref<3x3x1x16xf32, #tpu.memory_space<vmem>>, vector<1x1x1x16xf32>
    %64 = vector.shape_cast %63 : vector<1x1x1x16xf32> to vector<1x16xf32>
    %65 = vector.broadcast %64 : vector<1x16xf32> to vector<64x16xf32>
    %66 = arith.addf %62, %65 : vector<64x16xf32>
    %67 = vector.shape_cast %66 : vector<64x16xf32> to vector<8x8x16xf32>
    %c0_86 = arith.constant 0 : index
    %c0_87 = arith.constant 0 : index
    %c0_88 = arith.constant 0 : index
    %68 = vector.load %arg13[%c0_86, %c0_87, %c0_88] : memref<8x8x16xf32, #tpu.memory_space<vmem>>, vector<8x8x16xf32>
    tpu.vector_store %arg13[%c0_86, %c0_87, %c0_88], %67 {strides = array<i32>} : memref<8x8x16xf32, #tpu.memory_space<vmem>>, vector<8x8x16xf32>,
    %c2_89 = arith.constant 2 : index
    %c1_90 = arith.constant 1 : index
    %c0_91 = arith.constant 0 : index
    %c0_92 = arith.constant 0 : index
    %69 = vector.load %arg2[%c2_89, %c1_90, %c0_91, %c0_92] : memref<3x3x16x16xbf16, #tpu.memory_space<vmem>>, vector<1x1x16x16xbf16>
    %70 = vector.shape_cast %69 : vector<1x1x16x16xbf16> to vector<16x16xbf16>
    %cst_93 = arith.constant dense<0.000000e+00> : vector<64x16xf32>
    %71 = tpu.matmul %1, %70, %cst_93 {dimension_numbers = #tpu.dot_dimension_numbers<[1], [0], [0], [1], [0, 0, 1, 1], [], []>} : vector<64x16xbf16>, vector<16x16xbf16>, vector<64x16xf32> -> vector<64x16xf32>
    %c2_94 = arith.constant 2 : index
    %c1_95 = arith.constant 1 : index
    %c0_96 = arith.constant 0 : index
    %c0_97 = arith.constant 0 : index
    %72 = vector.load %arg3[%c2_94, %c1_95, %c0_96, %c0_97] : memref<3x3x1x16xf32, #tpu.memory_space<vmem>>, vector<1x1x1x16xf32>
    %73 = vector.shape_cast %72 : vector<1x1x1x16xf32> to vector<1x16xf32>
    %74 = vector.broadcast %73 : vector<1x16xf32> to vector<64x16xf32>
    %75 = arith.addf %71, %74 : vector<64x16xf32>
    %76 = vector.shape_cast %75 : vector<64x16xf32> to vector<8x8x16xf32>
    %c0_98 = arith.constant 0 : index
    %c0_99 = arith.constant 0 : index
    %c0_100 = arith.constant 0 : index
    %77 = vector.load %arg14[%c0_98, %c0_99, %c0_100] : memref<8x8x16xf32, #tpu.memory_space<vmem>>, vector<8x8x16xf32>
    tpu.vector_store %arg14[%c0_98, %c0_99, %c0_100], %76 {strides = array<i32>} : memref<8x8x16xf32, #tpu.memory_space<vmem>>, vector<8x8x16xf32>,
    %c2_101 = arith.constant 2 : index
    %c2_102 = arith.constant 2 : index
    %c0_103 = arith.constant 0 : index
    %c0_104 = arith.constant 0 : index
    %78 = vector.load %arg2[%c2_101, %c2_102, %c0_103, %c0_104] : memref<3x3x16x16xbf16, #tpu.memory_space<vmem>>, vector<1x1x16x16xbf16>
    %79 = vector.shape_cast %78 : vector<1x1x16x16xbf16> to vector<16x16xbf16>
    %cst_105 = arith.constant dense<0.000000e+00> : vector<64x16xf32>
    %80 = tpu.matmul %1, %79, %cst_105 {dimension_numbers = #tpu.dot_dimension_numbers<[1], [0], [0], [1], [0, 0, 1, 1], [], []>} : vector<64x16xbf16>, vector<16x16xbf16>, vector<64x16xf32> -> vector<64x16xf32>
    %c2_106 = arith.constant 2 : index
    %c2_107 = arith.constant 2 : index
    %c0_108 = arith.constant 0 : index
    %c0_109 = arith.constant 0 : index
    %81 = vector.load %arg3[%c2_106, %c2_107, %c0_108, %c0_109] : memref<3x3x1x16xf32, #tpu.memory_space<vmem>>, vector<1x1x1x16xf32>
    %82 = vector.shape_cast %81 : vector<1x1x1x16xf32> to vector<1x16xf32>
    %83 = vector.broadcast %82 : vector<1x16xf32> to vector<64x16xf32>
    %84 = arith.addf %80, %83 : vector<64x16xf32>
    %85 = vector.shape_cast %84 : vector<64x16xf32> to vector<8x8x16xf32>
    %c0_110 = arith.constant 0 : index
    %c0_111 = arith.constant 0 : index
    %c0_112 = arith.constant 0 : index
    %86 = vector.load %arg15[%c0_110, %c0_111, %c0_112] : memref<8x8x16xf32, #tpu.memory_space<vmem>>, vector<8x8x16xf32>
    tpu.vector_store %arg15[%c0_110, %c0_111, %c0_112], %85 {strides = array<i32>} : memref<8x8x16xf32, #tpu.memory_space<vmem>>, vector<8x8x16xf32>,
    %cst_113 = arith.constant 0.000000e+00 : f32
    %87 = vector.broadcast %cst_113 : f32 to vector<8x16xf32>
    %c0_114 = arith.constant 0 : index
    %c0_115 = arith.constant 0 : index
    %88 = vector.load %arg18[%c0_114, %c0_115] : memref<8x16xf32, #tpu.memory_space<vmem>>, vector<8x16xf32>
    tpu.vector_store %arg18[%c0_114, %c0_115], %87 {strides = array<i32>} : memref<8x16xf32, #tpu.memory_space<vmem>>, vector<8x16xf32>,
    %c0_116 = arith.constant 0 : index
    %c0_117 = arith.constant 0 : index
    %c0_118 = arith.constant 0 : index
    %89 = vector.load %arg4[%c0_116, %c0_117, %c0_118] : memref<3x16x48xbf16, #tpu.memory_space<vmem>>, vector<3x16x48xbf16>
    %c0_119 = arith.constant 0 : index
    %c0_120 = arith.constant 0 : index
    %c0_121 = arith.constant 0 : index
    %90 = vector.load %arg5[%c0_119, %c0_120, %c0_121] : memref<3x1x48xf32, #tpu.memory_space<vmem>>, vector<3x1x48xf32>
    %c0_i32 = arith.constant 0 : i32
    %c0_122 = arith.constant 0 : index
    %c0_123 = arith.constant 0 : index
    %91 = vector.load %arg16[%c0_122, %c0_123] : memref<8x16xf32, #tpu.memory_space<vmem>>, vector<8x16xf32>
    %92 = arith.truncf %91 : vector<8x16xf32> to vector<8x16xbf16>
    %93 = vector.extract_strided_slice %89 {offsets = [0, 0, 0], sizes = [1, 16, 48], strides = [1, 1, 1]} : vector<3x16x48xbf16> to vector<1x16x48xbf16>
    %94 = vector.shape_cast %93 : vector<1x16x48xbf16> to vector<16x48xbf16>
    %cst_124 = arith.constant dense<0.000000e+00> : vector<8x48xf32>
    %95 = tpu.matmul %92, %94, %cst_124 {dimension_numbers = #tpu.dot_dimension_numbers<[1], [0], [0], [1], [0, 0, 1, 1], [], []>} : vector<8x16xbf16>, vector<16x48xbf16>, vector<8x48xf32> -> vector<8x48xf32>
    %96 = vector.extract_strided_slice %90 {offsets = [0, 0, 0], sizes = [1, 1, 48], strides = [1, 1, 1]} : vector<3x1x48xf32> to vector<1x1x48xf32>
    %97 = vector.shape_cast %96 : vector<1x1x48xf32> to vector<1x48xf32>
    %98 = vector.broadcast %97 : vector<1x48xf32> to vector<8x48xf32>
    %99 = arith.addf %95, %98 : vector<8x48xf32>
    %100 = arith.index_cast %c0_i32 : i32 to index
    %c0_125 = arith.constant 0 : index
    %c0_126 = arith.constant 0 : index
    %101 = vector.load %arg7[%100, %c0_125, %c0_126] : memref<8x8x16xf32, #tpu.memory_space<vmem>>, vector<1x8x16xf32>
    %102 = vector.shape_cast %101 : vector<1x8x16xf32> to vector<8x16xf32>
    %103 = vector.extract_strided_slice %99 {offsets = [0, 0], sizes = [8, 16], strides = [1, 1]} : vector<8x48xf32> to vector<8x16xf32>
    %104 = arith.addf %102, %103 : vector<8x16xf32>
    %105 = arith.negf %104 : vector<8x16xf32>
    %106 = math.exp %105 : vector<8x16xf32>
    %cst_127 = arith.constant 1.000000e+00 : f32
    %107 = vector.broadcast %cst_127 : f32 to vector<8x16xf32>
    %108 = arith.addf %107, %106 : vector<8x16xf32>
    %109 = arith.divf %107, %108 : vector<8x16xf32>
    %110 = arith.index_cast %c0_i32 : i32 to index
    %c0_128 = arith.constant 0 : index
    %c0_129 = arith.constant 0 : index
    %111 = vector.load %arg8[%110, %c0_128, %c0_129] : memref<8x8x16xf32, #tpu.memory_space<vmem>>, vector<1x8x16xf32>
    %112 = vector.shape_cast %111 : vector<1x8x16xf32> to vector<8x16xf32>
    %113 = vector.extract_strided_slice %99 {offsets = [0, 16], sizes = [8, 16], strides = [1, 1]} : vector<8x48xf32> to vector<8x16xf32>
    %114 = arith.addf %112, %113 : vector<8x16xf32>
    %115 = arith.negf %114 : vector<8x16xf32>
    %116 = math.exp %115 : vector<8x16xf32>
    %cst_130 = arith.constant 1.000000e+00 : f32
    %117 = vector.broadcast %cst_130 : f32 to vector<8x16xf32>
    %118 = arith.addf %117, %116 : vector<8x16xf32>
    %119 = arith.divf %117, %118 : vector<8x16xf32>
    %120 = arith.index_cast %c0_i32 : i32 to index
    %c0_131 = arith.constant 0 : index
    %c0_132 = arith.constant 0 : index
    %121 = vector.load %arg9[%120, %c0_131, %c0_132] : memref<8x8x16xf32, #tpu.memory_space<vmem>>, vector<1x8x16xf32>
    %122 = vector.shape_cast %121 : vector<1x8x16xf32> to vector<8x16xf32>
    %123 = vector.extract_strided_slice %99 {offsets = [0, 32], sizes = [8, 16], strides = [1, 1]} : vector<8x48xf32> to vector<8x16xf32>
    %124 = arith.mulf %109, %123 : vector<8x16xf32>
    %125 = arith.addf %122, %124 : vector<8x16xf32>
    %126 = math.tanh %125 : vector<8x16xf32>
    %cst_133 = arith.constant 1.000000e+00 : f32
    %127 = vector.broadcast %cst_133 : f32 to vector<8x16xf32>
    %128 = arith.subf %127, %119 : vector<8x16xf32>
    %129 = arith.mulf %128, %126 : vector<8x16xf32>
    %130 = arith.mulf %119, %91 : vector<8x16xf32>
    %131 = arith.addf %129, %130 : vector<8x16xf32>
    %c0_134 = arith.constant 0 : index
    %c0_135 = arith.constant 0 : index
    %132 = vector.load %arg16[%c0_134, %c0_135] : memref<8x16xf32, #tpu.memory_space<vmem>>, vector<8x16xf32>
    tpu.vector_store %arg16[%c0_134, %c0_135], %131 {strides = array<i32>} : memref<8x16xf32, #tpu.memory_space<vmem>>, vector<8x16xf32>,
    %c0_136 = arith.constant 0 : index
    %c0_137 = arith.constant 0 : index
    %133 = vector.load %arg17[%c0_136, %c0_137] : memref<8x16xf32, #tpu.memory_space<vmem>>, vector<8x16xf32>
    %134 = arith.truncf %133 : vector<8x16xf32> to vector<8x16xbf16>
    %135 = vector.extract_strided_slice %89 {offsets = [1, 0, 0], sizes = [1, 16, 48], strides = [1, 1, 1]} : vector<3x16x48xbf16> to vector<1x16x48xbf16>
    %136 = vector.shape_cast %135 : vector<1x16x48xbf16> to vector<16x48xbf16>
    %cst_138 = arith.constant dense<0.000000e+00> : vector<8x48xf32>
    %137 = tpu.matmul %134, %136, %cst_138 {dimension_numbers = #tpu.dot_dimension_numbers<[1], [0], [0], [1], [0, 0, 1, 1], [], []>} : vector<8x16xbf16>, vector<16x48xbf16>, vector<8x48xf32> -> vector<8x48xf32>
    %138 = vector.extract_strided_slice %90 {offsets = [1, 0, 0], sizes = [1, 1, 48], strides = [1, 1, 1]} : vector<3x1x48xf32> to vector<1x1x48xf32>
    %139 = vector.shape_cast %138 : vector<1x1x48xf32> to vector<1x48xf32>
    %140 = vector.broadcast %139 : vector<1x48xf32> to vector<8x48xf32>
    %141 = arith.addf %137, %140 : vector<8x48xf32>
    %142 = arith.index_cast %c0_i32 : i32 to index
    %c0_139 = arith.constant 0 : index
    %c0_140 = arith.constant 0 : index
    %143 = vector.load %arg10[%142, %c0_139, %c0_140] : memref<8x8x16xf32, #tpu.memory_space<vmem>>, vector<1x8x16xf32>
    %144 = vector.shape_cast %143 : vector<1x8x16xf32> to vector<8x16xf32>
    %145 = vector.extract_strided_slice %141 {offsets = [0, 0], sizes = [8, 16], strides = [1, 1]} : vector<8x48xf32> to vector<8x16xf32>
    %146 = arith.addf %144, %145 : vector<8x16xf32>
    %147 = arith.negf %146 : vector<8x16xf32>
    %148 = math.exp %147 : vector<8x16xf32>
    %cst_141 = arith.constant 1.000000e+00 : f32
    %149 = vector.broadcast %cst_141 : f32 to vector<8x16xf32>
    %150 = arith.addf %149, %148 : vector<8x16xf32>
    %151 = arith.divf %149, %150 : vector<8x16xf32>
    %152 = arith.index_cast %c0_i32 : i32 to index
    %c0_142 = arith.constant 0 : index
    %c0_143 = arith.constant 0 : index
    %153 = vector.load %arg11[%152, %c0_142, %c0_143] : memref<8x8x16xf32, #tpu.memory_space<vmem>>, vector<1x8x16xf32>
    %154 = vector.shape_cast %153 : vector<1x8x16xf32> to vector<8x16xf32>
    %155 = vector.extract_strided_slice %141 {offsets = [0, 16], sizes = [8, 16], strides = [1, 1]} : vector<8x48xf32> to vector<8x16xf32>
    %156 = arith.addf %154, %155 : vector<8x16xf32>
    %157 = arith.negf %156 : vector<8x16xf32>
    %158 = math.exp %157 : vector<8x16xf32>
    %cst_144 = arith.constant 1.000000e+00 : f32
    %159 = vector.broadcast %cst_144 : f32 to vector<8x16xf32>
    %160 = arith.addf %159, %158 : vector<8x16xf32>
    %161 = arith.divf %159, %160 : vector<8x16xf32>
    %162 = arith.index_cast %c0_i32 : i32 to index
    %c0_145 = arith.constant 0 : index
    %c0_146 = arith.constant 0 : index
    %163 = vector.load %arg12[%162, %c0_145, %c0_146] : memref<8x8x16xf32, #tpu.memory_space<vmem>>, vector<1x8x16xf32>
    %164 = vector.shape_cast %163 : vector<1x8x16xf32> to vector<8x16xf32>
    %165 = vector.extract_strided_slice %141 {offsets = [0, 32], sizes = [8, 16], strides = [1, 1]} : vector<8x48xf32> to vector<8x16xf32>
    %166 = arith.mulf %151, %165 : vector<8x16xf32>
    %167 = arith.addf %164, %166 : vector<8x16xf32>
    %168 = math.tanh %167 : vector<8x16xf32>
    %cst_147 = arith.constant 1.000000e+00 : f32
    %169 = vector.broadcast %cst_147 : f32 to vector<8x16xf32>
    %170 = arith.subf %169, %161 : vector<8x16xf32>
    %171 = arith.mulf %170, %168 : vector<8x16xf32>
    %172 = arith.mulf %161, %133 : vector<8x16xf32>
    %173 = arith.addf %171, %172 : vector<8x16xf32>
    %c0_148 = arith.constant 0 : index
    %c0_149 = arith.constant 0 : index
    %174 = vector.load %arg17[%c0_148, %c0_149] : memref<8x16xf32, #tpu.memory_space<vmem>>, vector<8x16xf32>
    tpu.vector_store %arg17[%c0_148, %c0_149], %173 {strides = array<i32>} : memref<8x16xf32, #tpu.memory_space<vmem>>, vector<8x16xf32>,
    %c0_150 = arith.constant 0 : index
    %c0_151 = arith.constant 0 : index
    %175 = vector.load %arg18[%c0_150, %c0_151] : memref<8x16xf32, #tpu.memory_space<vmem>>, vector<8x16xf32>
    %176 = arith.truncf %175 : vector<8x16xf32> to vector<8x16xbf16>
    %177 = vector.extract_strided_slice %89 {offsets = [2, 0, 0], sizes = [1, 16, 48], strides = [1, 1, 1]} : vector<3x16x48xbf16> to vector<1x16x48xbf16>
    %178 = vector.shape_cast %177 : vector<1x16x48xbf16> to vector<16x48xbf16>
    %cst_152 = arith.constant dense<0.000000e+00> : vector<8x48xf32>
    %179 = tpu.matmul %176, %178, %cst_152 {dimension_numbers = #tpu.dot_dimension_numbers<[1], [0], [0], [1], [0, 0, 1, 1], [], []>} : vector<8x16xbf16>, vector<16x48xbf16>, vector<8x48xf32> -> vector<8x48xf32>
    %180 = vector.extract_strided_slice %90 {offsets = [2, 0, 0], sizes = [1, 1, 48], strides = [1, 1, 1]} : vector<3x1x48xf32> to vector<1x1x48xf32>
    %181 = vector.shape_cast %180 : vector<1x1x48xf32> to vector<1x48xf32>
    %182 = vector.broadcast %181 : vector<1x48xf32> to vector<8x48xf32>
    %183 = arith.addf %179, %182 : vector<8x48xf32>
    %184 = arith.index_cast %c0_i32 : i32 to index
    %c0_153 = arith.constant 0 : index
    %c0_154 = arith.constant 0 : index
    %185 = vector.load %arg13[%184, %c0_153, %c0_154] : memref<8x8x16xf32, #tpu.memory_space<vmem>>, vector<1x8x16xf32>
    %186 = vector.shape_cast %185 : vector<1x8x16xf32> to vector<8x16xf32>
    %187 = vector.extract_strided_slice %183 {offsets = [0, 0], sizes = [8, 16], strides = [1, 1]} : vector<8x48xf32> to vector<8x16xf32>
    %188 = arith.addf %186, %187 : vector<8x16xf32>
    %189 = arith.negf %188 : vector<8x16xf32>
    %190 = math.exp %189 : vector<8x16xf32>
    %cst_155 = arith.constant 1.000000e+00 : f32
    %191 = vector.broadcast %cst_155 : f32 to vector<8x16xf32>
    %192 = arith.addf %191, %190 : vector<8x16xf32>
    %193 = arith.divf %191, %192 : vector<8x16xf32>
    %194 = arith.index_cast %c0_i32 : i32 to index
    %c0_156 = arith.constant 0 : index
    %c0_157 = arith.constant 0 : index
    %195 = vector.load %arg14[%194, %c0_156, %c0_157] : memref<8x8x16xf32, #tpu.memory_space<vmem>>, vector<1x8x16xf32>
    %196 = vector.shape_cast %195 : vector<1x8x16xf32> to vector<8x16xf32>
    %197 = vector.extract_strided_slice %183 {offsets = [0, 16], sizes = [8, 16], strides = [1, 1]} : vector<8x48xf32> to vector<8x16xf32>
    %198 = arith.addf %196, %197 : vector<8x16xf32>
    %199 = arith.negf %198 : vector<8x16xf32>
    %200 = math.exp %199 : vector<8x16xf32>
    %cst_158 = arith.constant 1.000000e+00 : f32
    %201 = vector.broadcast %cst_158 : f32 to vector<8x16xf32>
    %202 = arith.addf %201, %200 : vector<8x16xf32>
    %203 = arith.divf %201, %202 : vector<8x16xf32>
    %204 = arith.index_cast %c0_i32 : i32 to index
    %c0_159 = arith.constant 0 : index
    %c0_160 = arith.constant 0 : index
    %205 = vector.load %arg15[%204, %c0_159, %c0_160] : memref<8x8x16xf32, #tpu.memory_space<vmem>>, vector<1x8x16xf32>
    %206 = vector.shape_cast %205 : vector<1x8x16xf32> to vector<8x16xf32>
    %207 = vector.extract_strided_slice %183 {offsets = [0, 32], sizes = [8, 16], strides = [1, 1]} : vector<8x48xf32> to vector<8x16xf32>
    %208 = arith.mulf %193, %207 : vector<8x16xf32>
    %209 = arith.addf %206, %208 : vector<8x16xf32>
    %210 = math.tanh %209 : vector<8x16xf32>
    %cst_161 = arith.constant 1.000000e+00 : f32
    %211 = vector.broadcast %cst_161 : f32 to vector<8x16xf32>
    %212 = arith.subf %211, %203 : vector<8x16xf32>
    %213 = arith.mulf %212, %210 : vector<8x16xf32>
    %214 = arith.mulf %203, %175 : vector<8x16xf32>
    %215 = arith.addf %213, %214 : vector<8x16xf32>
    %c0_162 = arith.constant 0 : index
    %c0_163 = arith.constant 0 : index
    %216 = vector.load %arg18[%c0_162, %c0_163] : memref<8x16xf32, #tpu.memory_space<vmem>>, vector<8x16xf32>
    tpu.vector_store %arg18[%c0_162, %c0_163], %215 {strides = array<i32>} : memref<8x16xf32, #tpu.memory_space<vmem>>, vector<8x16xf32>,
    %217 = vector.shape_cast %131 : vector<8x16xf32> to vector<1x8x16xf32>
    %218 = vector.shape_cast %173 : vector<8x16xf32> to vector<1x8x16xf32>
    %219 = vector.shape_cast %215 : vector<8x16xf32> to vector<1x8x16xf32>
    %220 = tpu.concatenate %217, %218, %219 in 0 : vector<1x8x16xf32>, vector<1x8x16xf32>, vector<1x8x16xf32> -> vector<3x8x16xf32>
    %221 = arith.truncf %220 : vector<3x8x16xf32> to vector<3x8x16xbf16>
    %222 = arith.index_cast %c0_i32 : i32 to index
    %c0_164 = arith.constant 0 : index
    %c0_165 = arith.constant 0 : index
    %c0_166 = arith.constant 0 : index
    %223 = vector.load %arg6[%222, %c0_164, %c0_165, %c0_166] : memref<8x3x8x16xbf16, #tpu.memory_space<vmem>>, vector<1x3x8x16xbf16>
    %224 = vector.shape_cast %223 : vector<1x3x8x16xbf16> to vector<3x8x16xbf16>
    %225 = vector.shape_cast %221 : vector<3x8x16xbf16> to vector<1x3x8x16xbf16>
    tpu.vector_store %arg6[%222, %c0_164, %c0_165, %c0_166], %225 {strides = array<i32>} : memref<8x3x8x16xbf16, #tpu.memory_space<vmem>>, vector<1x3x8x16xbf16>,
    %c1_i32 = arith.constant 1 : i32
    %c0_167 = arith.constant 0 : index
    %c0_168 = arith.constant 0 : index
    %226 = vector.load %arg16[%c0_167, %c0_168] : memref<8x16xf32, #tpu.memory_space<vmem>>, vector<8x16xf32>
    %227 = arith.truncf %226 : vector<8x16xf32> to vector<8x16xbf16>
    %228 = vector.extract_strided_slice %89 {offsets = [0, 0, 0], sizes = [1, 16, 48], strides = [1, 1, 1]} : vector<3x16x48xbf16> to vector<1x16x48xbf16>
    %229 = vector.shape_cast %228 : vector<1x16x48xbf16> to vector<16x48xbf16>
    %cst_169 = arith.constant dense<0.000000e+00> : vector<8x48xf32>
    %230 = tpu.matmul %227, %229, %cst_169 {dimension_numbers = #tpu.dot_dimension_numbers<[1], [0], [0], [1], [0, 0, 1, 1], [], []>} : vector<8x16xbf16>, vector<16x48xbf16>, vector<8x48xf32> -> vector<8x48xf32>
    %231 = vector.extract_strided_slice %90 {offsets = [0, 0, 0], sizes = [1, 1, 48], strides = [1, 1, 1]} : vector<3x1x48xf32> to vector<1x1x48xf32>
    %232 = vector.shape_cast %231 : vector<1x1x48xf32> to vector<1x48xf32>
    %233 = vector.broadcast %232 : vector<1x48xf32> to vector<8x48xf32>
    %234 = arith.addf %230, %233 : vector<8x48xf32>
    %235 = arith.index_cast %c1_i32 : i32 to index
    %c0_170 = arith.constant 0 : index
    %c0_171 = arith.constant 0 : index
    %236 = vector.load %arg7[%235, %c0_170, %c0_171] : memref<8x8x16xf32, #tpu.memory_space<vmem>>, vector<1x8x16xf32>
    %237 = vector.shape_cast %236 : vector<1x8x16xf32> to vector<8x16xf32>
    %238 = vector.extract_strided_slice %234 {offsets = [0, 0], sizes = [8, 16], strides = [1, 1]} : vector<8x48xf32> to vector<8x16xf32>
    %239 = arith.addf %237, %238 : vector<8x16xf32>
    %240 = arith.negf %239 : vector<8x16xf32>
    %241 = math.exp %240 : vector<8x16xf32>
    %cst_172 = arith.constant 1.000000e+00 : f32
    %242 = vector.broadcast %cst_172 : f32 to vector<8x16xf32>
    %243 = arith.addf %242, %241 : vector<8x16xf32>
    %244 = arith.divf %242, %243 : vector<8x16xf32>
    %245 = arith.index_cast %c1_i32 : i32 to index
    %c0_173 = arith.constant 0 : index
    %c0_174 = arith.constant 0 : index
    %246 = vector.load %arg8[%245, %c0_173, %c0_174] : memref<8x8x16xf32, #tpu.memory_space<vmem>>, vector<1x8x16xf32>
    %247 = vector.shape_cast %246 : vector<1x8x16xf32> to vector<8x16xf32>
    %248 = vector.extract_strided_slice %234 {offsets = [0, 16], sizes = [8, 16], strides = [1, 1]} : vector<8x48xf32> to vector<8x16xf32>
    %249 = arith.addf %247, %248 : vector<8x16xf32>
    %250 = arith.negf %249 : vector<8x16xf32>
    %251 = math.exp %250 : vector<8x16xf32>
    %cst_175 = arith.constant 1.000000e+00 : f32
    %252 = vector.broadcast %cst_175 : f32 to vector<8x16xf32>
    %253 = arith.addf %252, %251 : vector<8x16xf32>
    %254 = arith.divf %252, %253 : vector<8x16xf32>
    %255 = arith.index_cast %c1_i32 : i32 to index
    %c0_176 = arith.constant 0 : index
    %c0_177 = arith.constant 0 : index
    %256 = vector.load %arg9[%255, %c0_176, %c0_177] : memref<8x8x16xf32, #tpu.memory_space<vmem>>, vector<1x8x16xf32>
    %257 = vector.shape_cast %256 : vector<1x8x16xf32> to vector<8x16xf32>
    %258 = vector.extract_strided_slice %234 {offsets = [0, 32], sizes = [8, 16], strides = [1, 1]} : vector<8x48xf32> to vector<8x16xf32>
    %259 = arith.mulf %244, %258 : vector<8x16xf32>
    %260 = arith.addf %257, %259 : vector<8x16xf32>
    %261 = math.tanh %260 : vector<8x16xf32>
    %cst_178 = arith.constant 1.000000e+00 : f32
    %262 = vector.broadcast %cst_178 : f32 to vector<8x16xf32>
    %263 = arith.subf %262, %254 : vector<8x16xf32>
    %264 = arith.mulf %263, %261 : vector<8x16xf32>
    %265 = arith.mulf %254, %226 : vector<8x16xf32>
    %266 = arith.addf %264, %265 : vector<8x16xf32>
    %c0_179 = arith.constant 0 : index
    %c0_180 = arith.constant 0 : index
    %267 = vector.load %arg16[%c0_179, %c0_180] : memref<8x16xf32, #tpu.memory_space<vmem>>, vector<8x16xf32>
    tpu.vector_store %arg16[%c0_179, %c0_180], %266 {strides = array<i32>} : memref<8x16xf32, #tpu.memory_space<vmem>>, vector<8x16xf32>,
    %c0_181 = arith.constant 0 : index
    %c0_182 = arith.constant 0 : index
    %268 = vector.load %arg17[%c0_181, %c0_182] : memref<8x16xf32, #tpu.memory_space<vmem>>, vector<8x16xf32>
    %269 = arith.truncf %268 : vector<8x16xf32> to vector<8x16xbf16>
    %270 = vector.extract_strided_slice %89 {offsets = [1, 0, 0], sizes = [1, 16, 48], strides = [1, 1, 1]} : vector<3x16x48xbf16> to vector<1x16x48xbf16>
    %271 = vector.shape_cast %270 : vector<1x16x48xbf16> to vector<16x48xbf16>
    %cst_183 = arith.constant dense<0.000000e+00> : vector<8x48xf32>
    %272 = tpu.matmul %269, %271, %cst_183 {dimension_numbers = #tpu.dot_dimension_numbers<[1], [0], [0], [1], [0, 0, 1, 1], [], []>} : vector<8x16xbf16>, vector<16x48xbf16>, vector<8x48xf32> -> vector<8x48xf32>
    %273 = vector.extract_strided_slice %90 {offsets = [1, 0, 0], sizes = [1, 1, 48], strides = [1, 1, 1]} : vector<3x1x48xf32> to vector<1x1x48xf32>
    %274 = vector.shape_cast %273 : vector<1x1x48xf32> to vector<1x48xf32>
    %275 = vector.broadcast %274 : vector<1x48xf32> to vector<8x48xf32>
    %276 = arith.addf %272, %275 : vector<8x48xf32>
    %277 = arith.index_cast %c1_i32 : i32 to index
    %c0_184 = arith.constant 0 : index
    %c0_185 = arith.constant 0 : index
    %278 = vector.load %arg10[%277, %c0_184, %c0_185] : memref<8x8x16xf32, #tpu.memory_space<vmem>>, vector<1x8x16xf32>
    %279 = vector.shape_cast %278 : vector<1x8x16xf32> to vector<8x16xf32>
    %280 = vector.extract_strided_slice %276 {offsets = [0, 0], sizes = [8, 16], strides = [1, 1]} : vector<8x48xf32> to vector<8x16xf32>
    %281 = arith.addf %279, %280 : vector<8x16xf32>
    %282 = arith.negf %281 : vector<8x16xf32>
    %283 = math.exp %282 : vector<8x16xf32>
    %cst_186 = arith.constant 1.000000e+00 : f32
    %284 = vector.broadcast %cst_186 : f32 to vector<8x16xf32>
    %285 = arith.addf %284, %283 : vector<8x16xf32>
    %286 = arith.divf %284, %285 : vector<8x16xf32>
    %287 = arith.index_cast %c1_i32 : i32 to index
    %c0_187 = arith.constant 0 : index
    %c0_188 = arith.constant 0 : index
    %288 = vector.load %arg11[%287, %c0_187, %c0_188] : memref<8x8x16xf32, #tpu.memory_space<vmem>>, vector<1x8x16xf32>
    %289 = vector.shape_cast %288 : vector<1x8x16xf32> to vector<8x16xf32>
    %290 = vector.extract_strided_slice %276 {offsets = [0, 16], sizes = [8, 16], strides = [1, 1]} : vector<8x48xf32> to vector<8x16xf32>
    %291 = arith.addf %289, %290 : vector<8x16xf32>
    %292 = arith.negf %291 : vector<8x16xf32>
    %293 = math.exp %292 : vector<8x16xf32>
    %cst_189 = arith.constant 1.000000e+00 : f32
    %294 = vector.broadcast %cst_189 : f32 to vector<8x16xf32>
    %295 = arith.addf %294, %293 : vector<8x16xf32>
    %296 = arith.divf %294, %295 : vector<8x16xf32>
    %297 = arith.index_cast %c1_i32 : i32 to index
    %c0_190 = arith.constant 0 : index
    %c0_191 = arith.constant 0 : index
    %298 = vector.load %arg12[%297, %c0_190, %c0_191] : memref<8x8x16xf32, #tpu.memory_space<vmem>>, vector<1x8x16xf32>
    %299 = vector.shape_cast %298 : vector<1x8x16xf32> to vector<8x16xf32>
    %300 = vector.extract_strided_slice %276 {offsets = [0, 32], sizes = [8, 16], strides = [1, 1]} : vector<8x48xf32> to vector<8x16xf32>
    %301 = arith.mulf %286, %300 : vector<8x16xf32>
    %302 = arith.addf %299, %301 : vector<8x16xf32>
    %303 = math.tanh %302 : vector<8x16xf32>
    %cst_192 = arith.constant 1.000000e+00 : f32
    %304 = vector.broadcast %cst_192 : f32 to vector<8x16xf32>
    %305 = arith.subf %304, %296 : vector<8x16xf32>
    %306 = arith.mulf %305, %303 : vector<8x16xf32>
    %307 = arith.mulf %296, %268 : vector<8x16xf32>
    %308 = arith.addf %306, %307 : vector<8x16xf32>
    %c0_193 = arith.constant 0 : index
    %c0_194 = arith.constant 0 : index
    %309 = vector.load %arg17[%c0_193, %c0_194] : memref<8x16xf32, #tpu.memory_space<vmem>>, vector<8x16xf32>
    tpu.vector_store %arg17[%c0_193, %c0_194], %308 {strides = array<i32>} : memref<8x16xf32, #tpu.memory_space<vmem>>, vector<8x16xf32>,
    %c0_195 = arith.constant 0 : index
    %c0_196 = arith.constant 0 : index
    %310 = vector.load %arg18[%c0_195, %c0_196] : memref<8x16xf32, #tpu.memory_space<vmem>>, vector<8x16xf32>
    %311 = arith.truncf %310 : vector<8x16xf32> to vector<8x16xbf16>
    %312 = vector.extract_strided_slice %89 {offsets = [2, 0, 0], sizes = [1, 16, 48], strides = [1, 1, 1]} : vector<3x16x48xbf16> to vector<1x16x48xbf16>
    %313 = vector.shape_cast %312 : vector<1x16x48xbf16> to vector<16x48xbf16>
    %cst_197 = arith.constant dense<0.000000e+00> : vector<8x48xf32>
    %314 = tpu.matmul %311, %313, %cst_197 {dimension_numbers = #tpu.dot_dimension_numbers<[1], [0], [0], [1], [0, 0, 1, 1], [], []>} : vector<8x16xbf16>, vector<16x48xbf16>, vector<8x48xf32> -> vector<8x48xf32>
    %315 = vector.extract_strided_slice %90 {offsets = [2, 0, 0], sizes = [1, 1, 48], strides = [1, 1, 1]} : vector<3x1x48xf32> to vector<1x1x48xf32>
    %316 = vector.shape_cast %315 : vector<1x1x48xf32> to vector<1x48xf32>
    %317 = vector.broadcast %316 : vector<1x48xf32> to vector<8x48xf32>
    %318 = arith.addf %314, %317 : vector<8x48xf32>
    %319 = arith.index_cast %c1_i32 : i32 to index
    %c0_198 = arith.constant 0 : index
    %c0_199 = arith.constant 0 : index
    %320 = vector.load %arg13[%319, %c0_198, %c0_199] : memref<8x8x16xf32, #tpu.memory_space<vmem>>, vector<1x8x16xf32>
    %321 = vector.shape_cast %320 : vector<1x8x16xf32> to vector<8x16xf32>
    %322 = vector.extract_strided_slice %318 {offsets = [0, 0], sizes = [8, 16], strides = [1, 1]} : vector<8x48xf32> to vector<8x16xf32>
    %323 = arith.addf %321, %322 : vector<8x16xf32>
    %324 = arith.negf %323 : vector<8x16xf32>
    %325 = math.exp %324 : vector<8x16xf32>
    %cst_200 = arith.constant 1.000000e+00 : f32
    %326 = vector.broadcast %cst_200 : f32 to vector<8x16xf32>
    %327 = arith.addf %326, %325 : vector<8x16xf32>
    %328 = arith.divf %326, %327 : vector<8x16xf32>
    %329 = arith.index_cast %c1_i32 : i32 to index
    %c0_201 = arith.constant 0 : index
    %c0_202 = arith.constant 0 : index
    %330 = vector.load %arg14[%329, %c0_201, %c0_202] : memref<8x8x16xf32, #tpu.memory_space<vmem>>, vector<1x8x16xf32>
    %331 = vector.shape_cast %330 : vector<1x8x16xf32> to vector<8x16xf32>
    %332 = vector.extract_strided_slice %318 {offsets = [0, 16], sizes = [8, 16], strides = [1, 1]} : vector<8x48xf32> to vector<8x16xf32>
    %333 = arith.addf %331, %332 : vector<8x16xf32>
    %334 = arith.negf %333 : vector<8x16xf32>
    %335 = math.exp %334 : vector<8x16xf32>
    %cst_203 = arith.constant 1.000000e+00 : f32
    %336 = vector.broadcast %cst_203 : f32 to vector<8x16xf32>
    %337 = arith.addf %336, %335 : vector<8x16xf32>
    %338 = arith.divf %336, %337 : vector<8x16xf32>
    %339 = arith.index_cast %c1_i32 : i32 to index
    %c0_204 = arith.constant 0 : index
    %c0_205 = arith.constant 0 : index
    %340 = vector.load %arg15[%339, %c0_204, %c0_205] : memref<8x8x16xf32, #tpu.memory_space<vmem>>, vector<1x8x16xf32>
    %341 = vector.shape_cast %340 : vector<1x8x16xf32> to vector<8x16xf32>
    %342 = vector.extract_strided_slice %318 {offsets = [0, 32], sizes = [8, 16], strides = [1, 1]} : vector<8x48xf32> to vector<8x16xf32>
    %343 = arith.mulf %328, %342 : vector<8x16xf32>
    %344 = arith.addf %341, %343 : vector<8x16xf32>
    %345 = math.tanh %344 : vector<8x16xf32>
    %cst_206 = arith.constant 1.000000e+00 : f32
    %346 = vector.broadcast %cst_206 : f32 to vector<8x16xf32>
    %347 = arith.subf %346, %338 : vector<8x16xf32>
    %348 = arith.mulf %347, %345 : vector<8x16xf32>
    %349 = arith.mulf %338, %310 : vector<8x16xf32>
    %350 = arith.addf %348, %349 : vector<8x16xf32>
    %c0_207 = arith.constant 0 : index
    %c0_208 = arith.constant 0 : index
    %351 = vector.load %arg18[%c0_207, %c0_208] : memref<8x16xf32, #tpu.memory_space<vmem>>, vector<8x16xf32>
    tpu.vector_store %arg18[%c0_207, %c0_208], %350 {strides = array<i32>} : memref<8x16xf32, #tpu.memory_space<vmem>>, vector<8x16xf32>,
    %352 = vector.shape_cast %266 : vector<8x16xf32> to vector<1x8x16xf32>
    %353 = vector.shape_cast %308 : vector<8x16xf32> to vector<1x8x16xf32>
    %354 = vector.shape_cast %350 : vector<8x16xf32> to vector<1x8x16xf32>
    %355 = tpu.concatenate %352, %353, %354 in 0 : vector<1x8x16xf32>, vector<1x8x16xf32>, vector<1x8x16xf32> -> vector<3x8x16xf32>
    %356 = arith.truncf %355 : vector<3x8x16xf32> to vector<3x8x16xbf16>
    %357 = arith.index_cast %c1_i32 : i32 to index
    %c0_209 = arith.constant 0 : index
    %c0_210 = arith.constant 0 : index
    %c0_211 = arith.constant 0 : index
    %358 = vector.load %arg6[%357, %c0_209, %c0_210, %c0_211] : memref<8x3x8x16xbf16, #tpu.memory_space<vmem>>, vector<1x3x8x16xbf16>
    %359 = vector.shape_cast %358 : vector<1x3x8x16xbf16> to vector<3x8x16xbf16>
    %360 = vector.shape_cast %356 : vector<3x8x16xbf16> to vector<1x3x8x16xbf16>
    tpu.vector_store %arg6[%357, %c0_209, %c0_210, %c0_211], %360 {strides = array<i32>} : memref<8x3x8x16xbf16, #tpu.memory_space<vmem>>, vector<1x3x8x16xbf16>,
    %c2_i32 = arith.constant 2 : i32
    %c0_212 = arith.constant 0 : index
    %c0_213 = arith.constant 0 : index
    %361 = vector.load %arg16[%c0_212, %c0_213] : memref<8x16xf32, #tpu.memory_space<vmem>>, vector<8x16xf32>
    %362 = arith.truncf %361 : vector<8x16xf32> to vector<8x16xbf16>
    %363 = vector.extract_strided_slice %89 {offsets = [0, 0, 0], sizes = [1, 16, 48], strides = [1, 1, 1]} : vector<3x16x48xbf16> to vector<1x16x48xbf16>
    %364 = vector.shape_cast %363 : vector<1x16x48xbf16> to vector<16x48xbf16>
    %cst_214 = arith.constant dense<0.000000e+00> : vector<8x48xf32>
    %365 = tpu.matmul %362, %364, %cst_214 {dimension_numbers = #tpu.dot_dimension_numbers<[1], [0], [0], [1], [0, 0, 1, 1], [], []>} : vector<8x16xbf16>, vector<16x48xbf16>, vector<8x48xf32> -> vector<8x48xf32>
    %366 = vector.extract_strided_slice %90 {offsets = [0, 0, 0], sizes = [1, 1, 48], strides = [1, 1, 1]} : vector<3x1x48xf32> to vector<1x1x48xf32>
    %367 = vector.shape_cast %366 : vector<1x1x48xf32> to vector<1x48xf32>
    %368 = vector.broadcast %367 : vector<1x48xf32> to vector<8x48xf32>
    %369 = arith.addf %365, %368 : vector<8x48xf32>
    %370 = arith.index_cast %c2_i32 : i32 to index
    %c0_215 = arith.constant 0 : index
    %c0_216 = arith.constant 0 : index
    %371 = vector.load %arg7[%370, %c0_215, %c0_216] : memref<8x8x16xf32, #tpu.memory_space<vmem>>, vector<1x8x16xf32>
    %372 = vector.shape_cast %371 : vector<1x8x16xf32> to vector<8x16xf32>
    %373 = vector.extract_strided_slice %369 {offsets = [0, 0], sizes = [8, 16], strides = [1, 1]} : vector<8x48xf32> to vector<8x16xf32>
    %374 = arith.addf %372, %373 : vector<8x16xf32>
    %375 = arith.negf %374 : vector<8x16xf32>
    %376 = math.exp %375 : vector<8x16xf32>
    %cst_217 = arith.constant 1.000000e+00 : f32
    %377 = vector.broadcast %cst_217 : f32 to vector<8x16xf32>
    %378 = arith.addf %377, %376 : vector<8x16xf32>
    %379 = arith.divf %377, %378 : vector<8x16xf32>
    %380 = arith.index_cast %c2_i32 : i32 to index
    %c0_218 = arith.constant 0 : index
    %c0_219 = arith.constant 0 : index
    %381 = vector.load %arg8[%380, %c0_218, %c0_219] : memref<8x8x16xf32, #tpu.memory_space<vmem>>, vector<1x8x16xf32>
    %382 = vector.shape_cast %381 : vector<1x8x16xf32> to vector<8x16xf32>
    %383 = vector.extract_strided_slice %369 {offsets = [0, 16], sizes = [8, 16], strides = [1, 1]} : vector<8x48xf32> to vector<8x16xf32>
    %384 = arith.addf %382, %383 : vector<8x16xf32>
    %385 = arith.negf %384 : vector<8x16xf32>
    %386 = math.exp %385 : vector<8x16xf32>
    %cst_220 = arith.constant 1.000000e+00 : f32
    %387 = vector.broadcast %cst_220 : f32 to vector<8x16xf32>
    %388 = arith.addf %387, %386 : vector<8x16xf32>
    %389 = arith.divf %387, %388 : vector<8x16xf32>
    %390 = arith.index_cast %c2_i32 : i32 to index
    %c0_221 = arith.constant 0 : index
    %c0_222 = arith.constant 0 : index
    %391 = vector.load %arg9[%390, %c0_221, %c0_222] : memref<8x8x16xf32, #tpu.memory_space<vmem>>, vector<1x8x16xf32>
    %392 = vector.shape_cast %391 : vector<1x8x16xf32> to vector<8x16xf32>
    %393 = vector.extract_strided_slice %369 {offsets = [0, 32], sizes = [8, 16], strides = [1, 1]} : vector<8x48xf32> to vector<8x16xf32>
    %394 = arith.mulf %379, %393 : vector<8x16xf32>
    %395 = arith.addf %392, %394 : vector<8x16xf32>
    %396 = math.tanh %395 : vector<8x16xf32>
    %cst_223 = arith.constant 1.000000e+00 : f32
    %397 = vector.broadcast %cst_223 : f32 to vector<8x16xf32>
    %398 = arith.subf %397, %389 : vector<8x16xf32>
    %399 = arith.mulf %398, %396 : vector<8x16xf32>
    %400 = arith.mulf %389, %361 : vector<8x16xf32>
    %401 = arith.addf %399, %400 : vector<8x16xf32>
    %c0_224 = arith.constant 0 : index
    %c0_225 = arith.constant 0 : index
    %402 = vector.load %arg16[%c0_224, %c0_225] : memref<8x16xf32, #tpu.memory_space<vmem>>, vector<8x16xf32>
    tpu.vector_store %arg16[%c0_224, %c0_225], %401 {strides = array<i32>} : memref<8x16xf32, #tpu.memory_space<vmem>>, vector<8x16xf32>,
    %c0_226 = arith.constant 0 : index
    %c0_227 = arith.constant 0 : index
    %403 = vector.load %arg17[%c0_226, %c0_227] : memref<8x16xf32, #tpu.memory_space<vmem>>, vector<8x16xf32>
    %404 = arith.truncf %403 : vector<8x16xf32> to vector<8x16xbf16>
    %405 = vector.extract_strided_slice %89 {offsets = [1, 0, 0], sizes = [1, 16, 48], strides = [1, 1, 1]} : vector<3x16x48xbf16> to vector<1x16x48xbf16>
    %406 = vector.shape_cast %405 : vector<1x16x48xbf16> to vector<16x48xbf16>
    %cst_228 = arith.constant dense<0.000000e+00> : vector<8x48xf32>
    %407 = tpu.matmul %404, %406, %cst_228 {dimension_numbers = #tpu.dot_dimension_numbers<[1], [0], [0], [1], [0, 0, 1, 1], [], []>} : vector<8x16xbf16>, vector<16x48xbf16>, vector<8x48xf32> -> vector<8x48xf32>
    %408 = vector.extract_strided_slice %90 {offsets = [1, 0, 0], sizes = [1, 1, 48], strides = [1, 1, 1]} : vector<3x1x48xf32> to vector<1x1x48xf32>
    %409 = vector.shape_cast %408 : vector<1x1x48xf32> to vector<1x48xf32>
    %410 = vector.broadcast %409 : vector<1x48xf32> to vector<8x48xf32>
    %411 = arith.addf %407, %410 : vector<8x48xf32>
    %412 = arith.index_cast %c2_i32 : i32 to index
    %c0_229 = arith.constant 0 : index
    %c0_230 = arith.constant 0 : index
    %413 = vector.load %arg10[%412, %c0_229, %c0_230] : memref<8x8x16xf32, #tpu.memory_space<vmem>>, vector<1x8x16xf32>
    %414 = vector.shape_cast %413 : vector<1x8x16xf32> to vector<8x16xf32>
    %415 = vector.extract_strided_slice %411 {offsets = [0, 0], sizes = [8, 16], strides = [1, 1]} : vector<8x48xf32> to vector<8x16xf32>
    %416 = arith.addf %414, %415 : vector<8x16xf32>
    %417 = arith.negf %416 : vector<8x16xf32>
    %418 = math.exp %417 : vector<8x16xf32>
    %cst_231 = arith.constant 1.000000e+00 : f32
    %419 = vector.broadcast %cst_231 : f32 to vector<8x16xf32>
    %420 = arith.addf %419, %418 : vector<8x16xf32>
    %421 = arith.divf %419, %420 : vector<8x16xf32>
    %422 = arith.index_cast %c2_i32 : i32 to index
    %c0_232 = arith.constant 0 : index
    %c0_233 = arith.constant 0 : index
    %423 = vector.load %arg11[%422, %c0_232, %c0_233] : memref<8x8x16xf32, #tpu.memory_space<vmem>>, vector<1x8x16xf32>
    %424 = vector.shape_cast %423 : vector<1x8x16xf32> to vector<8x16xf32>
    %425 = vector.extract_strided_slice %411 {offsets = [0, 16], sizes = [8, 16], strides = [1, 1]} : vector<8x48xf32> to vector<8x16xf32>
    %426 = arith.addf %424, %425 : vector<8x16xf32>
    %427 = arith.negf %426 : vector<8x16xf32>
    %428 = math.exp %427 : vector<8x16xf32>
    %cst_234 = arith.constant 1.000000e+00 : f32
    %429 = vector.broadcast %cst_234 : f32 to vector<8x16xf32>
    %430 = arith.addf %429, %428 : vector<8x16xf32>
    %431 = arith.divf %429, %430 : vector<8x16xf32>
    %432 = arith.index_cast %c2_i32 : i32 to index
    %c0_235 = arith.constant 0 : index
    %c0_236 = arith.constant 0 : index
    %433 = vector.load %arg12[%432, %c0_235, %c0_236] : memref<8x8x16xf32, #tpu.memory_space<vmem>>, vector<1x8x16xf32>
    %434 = vector.shape_cast %433 : vector<1x8x16xf32> to vector<8x16xf32>
    %435 = vector.extract_strided_slice %411 {offsets = [0, 32], sizes = [8, 16], strides = [1, 1]} : vector<8x48xf32> to vector<8x16xf32>
    %436 = arith.mulf %421, %435 : vector<8x16xf32>
    %437 = arith.addf %434, %436 : vector<8x16xf32>
    %438 = math.tanh %437 : vector<8x16xf32>
    %cst_237 = arith.constant 1.000000e+00 : f32
    %439 = vector.broadcast %cst_237 : f32 to vector<8x16xf32>
    %440 = arith.subf %439, %431 : vector<8x16xf32>
    %441 = arith.mulf %440, %438 : vector<8x16xf32>
    %442 = arith.mulf %431, %403 : vector<8x16xf32>
    %443 = arith.addf %441, %442 : vector<8x16xf32>
    %c0_238 = arith.constant 0 : index
    %c0_239 = arith.constant 0 : index
    %444 = vector.load %arg17[%c0_238, %c0_239] : memref<8x16xf32, #tpu.memory_space<vmem>>, vector<8x16xf32>
    tpu.vector_store %arg17[%c0_238, %c0_239], %443 {strides = array<i32>} : memref<8x16xf32, #tpu.memory_space<vmem>>, vector<8x16xf32>,
    %c0_240 = arith.constant 0 : index
    %c0_241 = arith.constant 0 : index
    %445 = vector.load %arg18[%c0_240, %c0_241] : memref<8x16xf32, #tpu.memory_space<vmem>>, vector<8x16xf32>
    %446 = arith.truncf %445 : vector<8x16xf32> to vector<8x16xbf16>
    %447 = vector.extract_strided_slice %89 {offsets = [2, 0, 0], sizes = [1, 16, 48], strides = [1, 1, 1]} : vector<3x16x48xbf16> to vector<1x16x48xbf16>
    %448 = vector.shape_cast %447 : vector<1x16x48xbf16> to vector<16x48xbf16>
    %cst_242 = arith.constant dense<0.000000e+00> : vector<8x48xf32>
    %449 = tpu.matmul %446, %448, %cst_242 {dimension_numbers = #tpu.dot_dimension_numbers<[1], [0], [0], [1], [0, 0, 1, 1], [], []>} : vector<8x16xbf16>, vector<16x48xbf16>, vector<8x48xf32> -> vector<8x48xf32>
    %450 = vector.extract_strided_slice %90 {offsets = [2, 0, 0], sizes = [1, 1, 48], strides = [1, 1, 1]} : vector<3x1x48xf32> to vector<1x1x48xf32>
    %451 = vector.shape_cast %450 : vector<1x1x48xf32> to vector<1x48xf32>
    %452 = vector.broadcast %451 : vector<1x48xf32> to vector<8x48xf32>
    %453 = arith.addf %449, %452 : vector<8x48xf32>
    %454 = arith.index_cast %c2_i32 : i32 to index
    %c0_243 = arith.constant 0 : index
    %c0_244 = arith.constant 0 : index
    %455 = vector.load %arg13[%454, %c0_243, %c0_244] : memref<8x8x16xf32, #tpu.memory_space<vmem>>, vector<1x8x16xf32>
    %456 = vector.shape_cast %455 : vector<1x8x16xf32> to vector<8x16xf32>
    %457 = vector.extract_strided_slice %453 {offsets = [0, 0], sizes = [8, 16], strides = [1, 1]} : vector<8x48xf32> to vector<8x16xf32>
    %458 = arith.addf %456, %457 : vector<8x16xf32>
    %459 = arith.negf %458 : vector<8x16xf32>
    %460 = math.exp %459 : vector<8x16xf32>
    %cst_245 = arith.constant 1.000000e+00 : f32
    %461 = vector.broadcast %cst_245 : f32 to vector<8x16xf32>
    %462 = arith.addf %461, %460 : vector<8x16xf32>
    %463 = arith.divf %461, %462 : vector<8x16xf32>
    %464 = arith.index_cast %c2_i32 : i32 to index
    %c0_246 = arith.constant 0 : index
    %c0_247 = arith.constant 0 : index
    %465 = vector.load %arg14[%464, %c0_246, %c0_247] : memref<8x8x16xf32, #tpu.memory_space<vmem>>, vector<1x8x16xf32>
    %466 = vector.shape_cast %465 : vector<1x8x16xf32> to vector<8x16xf32>
    %467 = vector.extract_strided_slice %453 {offsets = [0, 16], sizes = [8, 16], strides = [1, 1]} : vector<8x48xf32> to vector<8x16xf32>
    %468 = arith.addf %466, %467 : vector<8x16xf32>
    %469 = arith.negf %468 : vector<8x16xf32>
    %470 = math.exp %469 : vector<8x16xf32>
    %cst_248 = arith.constant 1.000000e+00 : f32
    %471 = vector.broadcast %cst_248 : f32 to vector<8x16xf32>
    %472 = arith.addf %471, %470 : vector<8x16xf32>
    %473 = arith.divf %471, %472 : vector<8x16xf32>
    %474 = arith.index_cast %c2_i32 : i32 to index
    %c0_249 = arith.constant 0 : index
    %c0_250 = arith.constant 0 : index
    %475 = vector.load %arg15[%474, %c0_249, %c0_250] : memref<8x8x16xf32, #tpu.memory_space<vmem>>, vector<1x8x16xf32>
    %476 = vector.shape_cast %475 : vector<1x8x16xf32> to vector<8x16xf32>
    %477 = vector.extract_strided_slice %453 {offsets = [0, 32], sizes = [8, 16], strides = [1, 1]} : vector<8x48xf32> to vector<8x16xf32>
    %478 = arith.mulf %463, %477 : vector<8x16xf32>
    %479 = arith.addf %476, %478 : vector<8x16xf32>
    %480 = math.tanh %479 : vector<8x16xf32>
    %cst_251 = arith.constant 1.000000e+00 : f32
    %481 = vector.broadcast %cst_251 : f32 to vector<8x16xf32>
    %482 = arith.subf %481, %473 : vector<8x16xf32>
    %483 = arith.mulf %482, %480 : vector<8x16xf32>
    %484 = arith.mulf %473, %445 : vector<8x16xf32>
    %485 = arith.addf %483, %484 : vector<8x16xf32>
    %c0_252 = arith.constant 0 : index
    %c0_253 = arith.constant 0 : index
    %486 = vector.load %arg18[%c0_252, %c0_253] : memref<8x16xf32, #tpu.memory_space<vmem>>, vector<8x16xf32>
    tpu.vector_store %arg18[%c0_252, %c0_253], %485 {strides = array<i32>} : memref<8x16xf32, #tpu.memory_space<vmem>>, vector<8x16xf32>,
    %487 = vector.shape_cast %401 : vector<8x16xf32> to vector<1x8x16xf32>
    %488 = vector.shape_cast %443 : vector<8x16xf32> to vector<1x8x16xf32>
    %489 = vector.shape_cast %485 : vector<8x16xf32> to vector<1x8x16xf32>
    %490 = tpu.concatenate %487, %488, %489 in 0 : vector<1x8x16xf32>, vector<1x8x16xf32>, vector<1x8x16xf32> -> vector<3x8x16xf32>
    %491 = arith.truncf %490 : vector<3x8x16xf32> to vector<3x8x16xbf16>
    %492 = arith.index_cast %c2_i32 : i32 to index
    %c0_254 = arith.constant 0 : index
    %c0_255 = arith.constant 0 : index
    %c0_256 = arith.constant 0 : index
    %493 = vector.load %arg6[%492, %c0_254, %c0_255, %c0_256] : memref<8x3x8x16xbf16, #tpu.memory_space<vmem>>, vector<1x3x8x16xbf16>
    %494 = vector.shape_cast %493 : vector<1x3x8x16xbf16> to vector<3x8x16xbf16>
    %495 = vector.shape_cast %491 : vector<3x8x16xbf16> to vector<1x3x8x16xbf16>
    tpu.vector_store %arg6[%492, %c0_254, %c0_255, %c0_256], %495 {strides = array<i32>} : memref<8x3x8x16xbf16, #tpu.memory_space<vmem>>, vector<1x3x8x16xbf16>,
    %c3_i32 = arith.constant 3 : i32
    %c0_257 = arith.constant 0 : index
    %c0_258 = arith.constant 0 : index
    %496 = vector.load %arg16[%c0_257, %c0_258] : memref<8x16xf32, #tpu.memory_space<vmem>>, vector<8x16xf32>
    %497 = arith.truncf %496 : vector<8x16xf32> to vector<8x16xbf16>
    %498 = vector.extract_strided_slice %89 {offsets = [0, 0, 0], sizes = [1, 16, 48], strides = [1, 1, 1]} : vector<3x16x48xbf16> to vector<1x16x48xbf16>
    %499 = vector.shape_cast %498 : vector<1x16x48xbf16> to vector<16x48xbf16>
    %cst_259 = arith.constant dense<0.000000e+00> : vector<8x48xf32>
    %500 = tpu.matmul %497, %499, %cst_259 {dimension_numbers = #tpu.dot_dimension_numbers<[1], [0], [0], [1], [0, 0, 1, 1], [], []>} : vector<8x16xbf16>, vector<16x48xbf16>, vector<8x48xf32> -> vector<8x48xf32>
    %501 = vector.extract_strided_slice %90 {offsets = [0, 0, 0], sizes = [1, 1, 48], strides = [1, 1, 1]} : vector<3x1x48xf32> to vector<1x1x48xf32>
    %502 = vector.shape_cast %501 : vector<1x1x48xf32> to vector<1x48xf32>
    %503 = vector.broadcast %502 : vector<1x48xf32> to vector<8x48xf32>
    %504 = arith.addf %500, %503 : vector<8x48xf32>
    %505 = arith.index_cast %c3_i32 : i32 to index
    %c0_260 = arith.constant 0 : index
    %c0_261 = arith.constant 0 : index
    %506 = vector.load %arg7[%505, %c0_260, %c0_261] : memref<8x8x16xf32, #tpu.memory_space<vmem>>, vector<1x8x16xf32>
    %507 = vector.shape_cast %506 : vector<1x8x16xf32> to vector<8x16xf32>
    %508 = vector.extract_strided_slice %504 {offsets = [0, 0], sizes = [8, 16], strides = [1, 1]} : vector<8x48xf32> to vector<8x16xf32>
    %509 = arith.addf %507, %508 : vector<8x16xf32>
    %510 = arith.negf %509 : vector<8x16xf32>
    %511 = math.exp %510 : vector<8x16xf32>
    %cst_262 = arith.constant 1.000000e+00 : f32
    %512 = vector.broadcast %cst_262 : f32 to vector<8x16xf32>
    %513 = arith.addf %512, %511 : vector<8x16xf32>
    %514 = arith.divf %512, %513 : vector<8x16xf32>
    %515 = arith.index_cast %c3_i32 : i32 to index
    %c0_263 = arith.constant 0 : index
    %c0_264 = arith.constant 0 : index
    %516 = vector.load %arg8[%515, %c0_263, %c0_264] : memref<8x8x16xf32, #tpu.memory_space<vmem>>, vector<1x8x16xf32>
    %517 = vector.shape_cast %516 : vector<1x8x16xf32> to vector<8x16xf32>
    %518 = vector.extract_strided_slice %504 {offsets = [0, 16], sizes = [8, 16], strides = [1, 1]} : vector<8x48xf32> to vector<8x16xf32>
    %519 = arith.addf %517, %518 : vector<8x16xf32>
    %520 = arith.negf %519 : vector<8x16xf32>
    %521 = math.exp %520 : vector<8x16xf32>
    %cst_265 = arith.constant 1.000000e+00 : f32
    %522 = vector.broadcast %cst_265 : f32 to vector<8x16xf32>
    %523 = arith.addf %522, %521 : vector<8x16xf32>
    %524 = arith.divf %522, %523 : vector<8x16xf32>
    %525 = arith.index_cast %c3_i32 : i32 to index
    %c0_266 = arith.constant 0 : index
    %c0_267 = arith.constant 0 : index
    %526 = vector.load %arg9[%525, %c0_266, %c0_267] : memref<8x8x16xf32, #tpu.memory_space<vmem>>, vector<1x8x16xf32>
    %527 = vector.shape_cast %526 : vector<1x8x16xf32> to vector<8x16xf32>
    %528 = vector.extract_strided_slice %504 {offsets = [0, 32], sizes = [8, 16], strides = [1, 1]} : vector<8x48xf32> to vector<8x16xf32>
    %529 = arith.mulf %514, %528 : vector<8x16xf32>
    %530 = arith.addf %527, %529 : vector<8x16xf32>
    %531 = math.tanh %530 : vector<8x16xf32>
    %cst_268 = arith.constant 1.000000e+00 : f32
    %532 = vector.broadcast %cst_268 : f32 to vector<8x16xf32>
    %533 = arith.subf %532, %524 : vector<8x16xf32>
    %534 = arith.mulf %533, %531 : vector<8x16xf32>
    %535 = arith.mulf %524, %496 : vector<8x16xf32>
    %536 = arith.addf %534, %535 : vector<8x16xf32>
    %c0_269 = arith.constant 0 : index
    %c0_270 = arith.constant 0 : index
    %537 = vector.load %arg16[%c0_269, %c0_270] : memref<8x16xf32, #tpu.memory_space<vmem>>, vector<8x16xf32>
    tpu.vector_store %arg16[%c0_269, %c0_270], %536 {strides = array<i32>} : memref<8x16xf32, #tpu.memory_space<vmem>>, vector<8x16xf32>,
    %c0_271 = arith.constant 0 : index
    %c0_272 = arith.constant 0 : index
    %538 = vector.load %arg17[%c0_271, %c0_272] : memref<8x16xf32, #tpu.memory_space<vmem>>, vector<8x16xf32>
    %539 = arith.truncf %538 : vector<8x16xf32> to vector<8x16xbf16>
    %540 = vector.extract_strided_slice %89 {offsets = [1, 0, 0], sizes = [1, 16, 48], strides = [1, 1, 1]} : vector<3x16x48xbf16> to vector<1x16x48xbf16>
    %541 = vector.shape_cast %540 : vector<1x16x48xbf16> to vector<16x48xbf16>
    %cst_273 = arith.constant dense<0.000000e+00> : vector<8x48xf32>
    %542 = tpu.matmul %539, %541, %cst_273 {dimension_numbers = #tpu.dot_dimension_numbers<[1], [0], [0], [1], [0, 0, 1, 1], [], []>} : vector<8x16xbf16>, vector<16x48xbf16>, vector<8x48xf32> -> vector<8x48xf32>
    %543 = vector.extract_strided_slice %90 {offsets = [1, 0, 0], sizes = [1, 1, 48], strides = [1, 1, 1]} : vector<3x1x48xf32> to vector<1x1x48xf32>
    %544 = vector.shape_cast %543 : vector<1x1x48xf32> to vector<1x48xf32>
    %545 = vector.broadcast %544 : vector<1x48xf32> to vector<8x48xf32>
    %546 = arith.addf %542, %545 : vector<8x48xf32>
    %547 = arith.index_cast %c3_i32 : i32 to index
    %c0_274 = arith.constant 0 : index
    %c0_275 = arith.constant 0 : index
    %548 = vector.load %arg10[%547, %c0_274, %c0_275] : memref<8x8x16xf32, #tpu.memory_space<vmem>>, vector<1x8x16xf32>
    %549 = vector.shape_cast %548 : vector<1x8x16xf32> to vector<8x16xf32>
    %550 = vector.extract_strided_slice %546 {offsets = [0, 0], sizes = [8, 16], strides = [1, 1]} : vector<8x48xf32> to vector<8x16xf32>
    %551 = arith.addf %549, %550 : vector<8x16xf32>
    %552 = arith.negf %551 : vector<8x16xf32>
    %553 = math.exp %552 : vector<8x16xf32>
    %cst_276 = arith.constant 1.000000e+00 : f32
    %554 = vector.broadcast %cst_276 : f32 to vector<8x16xf32>
    %555 = arith.addf %554, %553 : vector<8x16xf32>
    %556 = arith.divf %554, %555 : vector<8x16xf32>
    %557 = arith.index_cast %c3_i32 : i32 to index
    %c0_277 = arith.constant 0 : index
    %c0_278 = arith.constant 0 : index
    %558 = vector.load %arg11[%557, %c0_277, %c0_278] : memref<8x8x16xf32, #tpu.memory_space<vmem>>, vector<1x8x16xf32>
    %559 = vector.shape_cast %558 : vector<1x8x16xf32> to vector<8x16xf32>
    %560 = vector.extract_strided_slice %546 {offsets = [0, 16], sizes = [8, 16], strides = [1, 1]} : vector<8x48xf32> to vector<8x16xf32>
    %561 = arith.addf %559, %560 : vector<8x16xf32>
    %562 = arith.negf %561 : vector<8x16xf32>
    %563 = math.exp %562 : vector<8x16xf32>
    %cst_279 = arith.constant 1.000000e+00 : f32
    %564 = vector.broadcast %cst_279 : f32 to vector<8x16xf32>
    %565 = arith.addf %564, %563 : vector<8x16xf32>
    %566 = arith.divf %564, %565 : vector<8x16xf32>
    %567 = arith.index_cast %c3_i32 : i32 to index
    %c0_280 = arith.constant 0 : index
    %c0_281 = arith.constant 0 : index
    %568 = vector.load %arg12[%567, %c0_280, %c0_281] : memref<8x8x16xf32, #tpu.memory_space<vmem>>, vector<1x8x16xf32>
    %569 = vector.shape_cast %568 : vector<1x8x16xf32> to vector<8x16xf32>
    %570 = vector.extract_strided_slice %546 {offsets = [0, 32], sizes = [8, 16], strides = [1, 1]} : vector<8x48xf32> to vector<8x16xf32>
    %571 = arith.mulf %556, %570 : vector<8x16xf32>
    %572 = arith.addf %569, %571 : vector<8x16xf32>
    %573 = math.tanh %572 : vector<8x16xf32>
    %cst_282 = arith.constant 1.000000e+00 : f32
    %574 = vector.broadcast %cst_282 : f32 to vector<8x16xf32>
    %575 = arith.subf %574, %566 : vector<8x16xf32>
    %576 = arith.mulf %575, %573 : vector<8x16xf32>
    %577 = arith.mulf %566, %538 : vector<8x16xf32>
    %578 = arith.addf %576, %577 : vector<8x16xf32>
    %c0_283 = arith.constant 0 : index
    %c0_284 = arith.constant 0 : index
    %579 = vector.load %arg17[%c0_283, %c0_284] : memref<8x16xf32, #tpu.memory_space<vmem>>, vector<8x16xf32>
    tpu.vector_store %arg17[%c0_283, %c0_284], %578 {strides = array<i32>} : memref<8x16xf32, #tpu.memory_space<vmem>>, vector<8x16xf32>,
    %c0_285 = arith.constant 0 : index
    %c0_286 = arith.constant 0 : index
    %580 = vector.load %arg18[%c0_285, %c0_286] : memref<8x16xf32, #tpu.memory_space<vmem>>, vector<8x16xf32>
    %581 = arith.truncf %580 : vector<8x16xf32> to vector<8x16xbf16>
    %582 = vector.extract_strided_slice %89 {offsets = [2, 0, 0], sizes = [1, 16, 48], strides = [1, 1, 1]} : vector<3x16x48xbf16> to vector<1x16x48xbf16>
    %583 = vector.shape_cast %582 : vector<1x16x48xbf16> to vector<16x48xbf16>
    %cst_287 = arith.constant dense<0.000000e+00> : vector<8x48xf32>
    %584 = tpu.matmul %581, %583, %cst_287 {dimension_numbers = #tpu.dot_dimension_numbers<[1], [0], [0], [1], [0, 0, 1, 1], [], []>} : vector<8x16xbf16>, vector<16x48xbf16>, vector<8x48xf32> -> vector<8x48xf32>
    %585 = vector.extract_strided_slice %90 {offsets = [2, 0, 0], sizes = [1, 1, 48], strides = [1, 1, 1]} : vector<3x1x48xf32> to vector<1x1x48xf32>
    %586 = vector.shape_cast %585 : vector<1x1x48xf32> to vector<1x48xf32>
    %587 = vector.broadcast %586 : vector<1x48xf32> to vector<8x48xf32>
    %588 = arith.addf %584, %587 : vector<8x48xf32>
    %589 = arith.index_cast %c3_i32 : i32 to index
    %c0_288 = arith.constant 0 : index
    %c0_289 = arith.constant 0 : index
    %590 = vector.load %arg13[%589, %c0_288, %c0_289] : memref<8x8x16xf32, #tpu.memory_space<vmem>>, vector<1x8x16xf32>
    %591 = vector.shape_cast %590 : vector<1x8x16xf32> to vector<8x16xf32>
    %592 = vector.extract_strided_slice %588 {offsets = [0, 0], sizes = [8, 16], strides = [1, 1]} : vector<8x48xf32> to vector<8x16xf32>
    %593 = arith.addf %591, %592 : vector<8x16xf32>
    %594 = arith.negf %593 : vector<8x16xf32>
    %595 = math.exp %594 : vector<8x16xf32>
    %cst_290 = arith.constant 1.000000e+00 : f32
    %596 = vector.broadcast %cst_290 : f32 to vector<8x16xf32>
    %597 = arith.addf %596, %595 : vector<8x16xf32>
    %598 = arith.divf %596, %597 : vector<8x16xf32>
    %599 = arith.index_cast %c3_i32 : i32 to index
    %c0_291 = arith.constant 0 : index
    %c0_292 = arith.constant 0 : index
    %600 = vector.load %arg14[%599, %c0_291, %c0_292] : memref<8x8x16xf32, #tpu.memory_space<vmem>>, vector<1x8x16xf32>
    %601 = vector.shape_cast %600 : vector<1x8x16xf32> to vector<8x16xf32>
    %602 = vector.extract_strided_slice %588 {offsets = [0, 16], sizes = [8, 16], strides = [1, 1]} : vector<8x48xf32> to vector<8x16xf32>
    %603 = arith.addf %601, %602 : vector<8x16xf32>
    %604 = arith.negf %603 : vector<8x16xf32>
    %605 = math.exp %604 : vector<8x16xf32>
    %cst_293 = arith.constant 1.000000e+00 : f32
    %606 = vector.broadcast %cst_293 : f32 to vector<8x16xf32>
    %607 = arith.addf %606, %605 : vector<8x16xf32>
    %608 = arith.divf %606, %607 : vector<8x16xf32>
    %609 = arith.index_cast %c3_i32 : i32 to index
    %c0_294 = arith.constant 0 : index
    %c0_295 = arith.constant 0 : index
    %610 = vector.load %arg15[%609, %c0_294, %c0_295] : memref<8x8x16xf32, #tpu.memory_space<vmem>>, vector<1x8x16xf32>
    %611 = vector.shape_cast %610 : vector<1x8x16xf32> to vector<8x16xf32>
    %612 = vector.extract_strided_slice %588 {offsets = [0, 32], sizes = [8, 16], strides = [1, 1]} : vector<8x48xf32> to vector<8x16xf32>
    %613 = arith.mulf %598, %612 : vector<8x16xf32>
    %614 = arith.addf %611, %613 : vector<8x16xf32>
    %615 = math.tanh %614 : vector<8x16xf32>
    %cst_296 = arith.constant 1.000000e+00 : f32
    %616 = vector.broadcast %cst_296 : f32 to vector<8x16xf32>
    %617 = arith.subf %616, %608 : vector<8x16xf32>
    %618 = arith.mulf %617, %615 : vector<8x16xf32>
    %619 = arith.mulf %608, %580 : vector<8x16xf32>
    %620 = arith.addf %618, %619 : vector<8x16xf32>
    %c0_297 = arith.constant 0 : index
    %c0_298 = arith.constant 0 : index
    %621 = vector.load %arg18[%c0_297, %c0_298] : memref<8x16xf32, #tpu.memory_space<vmem>>, vector<8x16xf32>
    tpu.vector_store %arg18[%c0_297, %c0_298], %620 {strides = array<i32>} : memref<8x16xf32, #tpu.memory_space<vmem>>, vector<8x16xf32>,
    %622 = vector.shape_cast %536 : vector<8x16xf32> to vector<1x8x16xf32>
    %623 = vector.shape_cast %578 : vector<8x16xf32> to vector<1x8x16xf32>
    %624 = vector.shape_cast %620 : vector<8x16xf32> to vector<1x8x16xf32>
    %625 = tpu.concatenate %622, %623, %624 in 0 : vector<1x8x16xf32>, vector<1x8x16xf32>, vector<1x8x16xf32> -> vector<3x8x16xf32>
    %626 = arith.truncf %625 : vector<3x8x16xf32> to vector<3x8x16xbf16>
    %627 = arith.index_cast %c3_i32 : i32 to index
    %c0_299 = arith.constant 0 : index
    %c0_300 = arith.constant 0 : index
    %c0_301 = arith.constant 0 : index
    %628 = vector.load %arg6[%627, %c0_299, %c0_300, %c0_301] : memref<8x3x8x16xbf16, #tpu.memory_space<vmem>>, vector<1x3x8x16xbf16>
    %629 = vector.shape_cast %628 : vector<1x3x8x16xbf16> to vector<3x8x16xbf16>
    %630 = vector.shape_cast %626 : vector<3x8x16xbf16> to vector<1x3x8x16xbf16>
    tpu.vector_store %arg6[%627, %c0_299, %c0_300, %c0_301], %630 {strides = array<i32>} : memref<8x3x8x16xbf16, #tpu.memory_space<vmem>>, vector<1x3x8x16xbf16>,
    %c4_i32 = arith.constant 4 : i32
    %c0_302 = arith.constant 0 : index
    %c0_303 = arith.constant 0 : index
    %631 = vector.load %arg16[%c0_302, %c0_303] : memref<8x16xf32, #tpu.memory_space<vmem>>, vector<8x16xf32>
    %632 = arith.truncf %631 : vector<8x16xf32> to vector<8x16xbf16>
    %633 = vector.extract_strided_slice %89 {offsets = [0, 0, 0], sizes = [1, 16, 48], strides = [1, 1, 1]} : vector<3x16x48xbf16> to vector<1x16x48xbf16>
    %634 = vector.shape_cast %633 : vector<1x16x48xbf16> to vector<16x48xbf16>
    %cst_304 = arith.constant dense<0.000000e+00> : vector<8x48xf32>
    %635 = tpu.matmul %632, %634, %cst_304 {dimension_numbers = #tpu.dot_dimension_numbers<[1], [0], [0], [1], [0, 0, 1, 1], [], []>} : vector<8x16xbf16>, vector<16x48xbf16>, vector<8x48xf32> -> vector<8x48xf32>
    %636 = vector.extract_strided_slice %90 {offsets = [0, 0, 0], sizes = [1, 1, 48], strides = [1, 1, 1]} : vector<3x1x48xf32> to vector<1x1x48xf32>
    %637 = vector.shape_cast %636 : vector<1x1x48xf32> to vector<1x48xf32>
    %638 = vector.broadcast %637 : vector<1x48xf32> to vector<8x48xf32>
    %639 = arith.addf %635, %638 : vector<8x48xf32>
    %640 = arith.index_cast %c4_i32 : i32 to index
    %c0_305 = arith.constant 0 : index
    %c0_306 = arith.constant 0 : index
    %641 = vector.load %arg7[%640, %c0_305, %c0_306] : memref<8x8x16xf32, #tpu.memory_space<vmem>>, vector<1x8x16xf32>
    %642 = vector.shape_cast %641 : vector<1x8x16xf32> to vector<8x16xf32>
    %643 = vector.extract_strided_slice %639 {offsets = [0, 0], sizes = [8, 16], strides = [1, 1]} : vector<8x48xf32> to vector<8x16xf32>
    %644 = arith.addf %642, %643 : vector<8x16xf32>
    %645 = arith.negf %644 : vector<8x16xf32>
    %646 = math.exp %645 : vector<8x16xf32>
    %cst_307 = arith.constant 1.000000e+00 : f32
    %647 = vector.broadcast %cst_307 : f32 to vector<8x16xf32>
    %648 = arith.addf %647, %646 : vector<8x16xf32>
    %649 = arith.divf %647, %648 : vector<8x16xf32>
    %650 = arith.index_cast %c4_i32 : i32 to index
    %c0_308 = arith.constant 0 : index
    %c0_309 = arith.constant 0 : index
    %651 = vector.load %arg8[%650, %c0_308, %c0_309] : memref<8x8x16xf32, #tpu.memory_space<vmem>>, vector<1x8x16xf32>
    %652 = vector.shape_cast %651 : vector<1x8x16xf32> to vector<8x16xf32>
    %653 = vector.extract_strided_slice %639 {offsets = [0, 16], sizes = [8, 16], strides = [1, 1]} : vector<8x48xf32> to vector<8x16xf32>
    %654 = arith.addf %652, %653 : vector<8x16xf32>
    %655 = arith.negf %654 : vector<8x16xf32>
    %656 = math.exp %655 : vector<8x16xf32>
    %cst_310 = arith.constant 1.000000e+00 : f32
    %657 = vector.broadcast %cst_310 : f32 to vector<8x16xf32>
    %658 = arith.addf %657, %656 : vector<8x16xf32>
    %659 = arith.divf %657, %658 : vector<8x16xf32>
    %660 = arith.index_cast %c4_i32 : i32 to index
    %c0_311 = arith.constant 0 : index
    %c0_312 = arith.constant 0 : index
    %661 = vector.load %arg9[%660, %c0_311, %c0_312] : memref<8x8x16xf32, #tpu.memory_space<vmem>>, vector<1x8x16xf32>
    %662 = vector.shape_cast %661 : vector<1x8x16xf32> to vector<8x16xf32>
    %663 = vector.extract_strided_slice %639 {offsets = [0, 32], sizes = [8, 16], strides = [1, 1]} : vector<8x48xf32> to vector<8x16xf32>
    %664 = arith.mulf %649, %663 : vector<8x16xf32>
    %665 = arith.addf %662, %664 : vector<8x16xf32>
    %666 = math.tanh %665 : vector<8x16xf32>
    %cst_313 = arith.constant 1.000000e+00 : f32
    %667 = vector.broadcast %cst_313 : f32 to vector<8x16xf32>
    %668 = arith.subf %667, %659 : vector<8x16xf32>
    %669 = arith.mulf %668, %666 : vector<8x16xf32>
    %670 = arith.mulf %659, %631 : vector<8x16xf32>
    %671 = arith.addf %669, %670 : vector<8x16xf32>
    %c0_314 = arith.constant 0 : index
    %c0_315 = arith.constant 0 : index
    %672 = vector.load %arg16[%c0_314, %c0_315] : memref<8x16xf32, #tpu.memory_space<vmem>>, vector<8x16xf32>
    tpu.vector_store %arg16[%c0_314, %c0_315], %671 {strides = array<i32>} : memref<8x16xf32, #tpu.memory_space<vmem>>, vector<8x16xf32>,
    %c0_316 = arith.constant 0 : index
    %c0_317 = arith.constant 0 : index
    %673 = vector.load %arg17[%c0_316, %c0_317] : memref<8x16xf32, #tpu.memory_space<vmem>>, vector<8x16xf32>
    %674 = arith.truncf %673 : vector<8x16xf32> to vector<8x16xbf16>
    %675 = vector.extract_strided_slice %89 {offsets = [1, 0, 0], sizes = [1, 16, 48], strides = [1, 1, 1]} : vector<3x16x48xbf16> to vector<1x16x48xbf16>
    %676 = vector.shape_cast %675 : vector<1x16x48xbf16> to vector<16x48xbf16>
    %cst_318 = arith.constant dense<0.000000e+00> : vector<8x48xf32>
    %677 = tpu.matmul %674, %676, %cst_318 {dimension_numbers = #tpu.dot_dimension_numbers<[1], [0], [0], [1], [0, 0, 1, 1], [], []>} : vector<8x16xbf16>, vector<16x48xbf16>, vector<8x48xf32> -> vector<8x48xf32>
    %678 = vector.extract_strided_slice %90 {offsets = [1, 0, 0], sizes = [1, 1, 48], strides = [1, 1, 1]} : vector<3x1x48xf32> to vector<1x1x48xf32>
    %679 = vector.shape_cast %678 : vector<1x1x48xf32> to vector<1x48xf32>
    %680 = vector.broadcast %679 : vector<1x48xf32> to vector<8x48xf32>
    %681 = arith.addf %677, %680 : vector<8x48xf32>
    %682 = arith.index_cast %c4_i32 : i32 to index
    %c0_319 = arith.constant 0 : index
    %c0_320 = arith.constant 0 : index
    %683 = vector.load %arg10[%682, %c0_319, %c0_320] : memref<8x8x16xf32, #tpu.memory_space<vmem>>, vector<1x8x16xf32>
    %684 = vector.shape_cast %683 : vector<1x8x16xf32> to vector<8x16xf32>
    %685 = vector.extract_strided_slice %681 {offsets = [0, 0], sizes = [8, 16], strides = [1, 1]} : vector<8x48xf32> to vector<8x16xf32>
    %686 = arith.addf %684, %685 : vector<8x16xf32>
    %687 = arith.negf %686 : vector<8x16xf32>
    %688 = math.exp %687 : vector<8x16xf32>
    %cst_321 = arith.constant 1.000000e+00 : f32
    %689 = vector.broadcast %cst_321 : f32 to vector<8x16xf32>
    %690 = arith.addf %689, %688 : vector<8x16xf32>
    %691 = arith.divf %689, %690 : vector<8x16xf32>
    %692 = arith.index_cast %c4_i32 : i32 to index
    %c0_322 = arith.constant 0 : index
    %c0_323 = arith.constant 0 : index
    %693 = vector.load %arg11[%692, %c0_322, %c0_323] : memref<8x8x16xf32, #tpu.memory_space<vmem>>, vector<1x8x16xf32>
    %694 = vector.shape_cast %693 : vector<1x8x16xf32> to vector<8x16xf32>
    %695 = vector.extract_strided_slice %681 {offsets = [0, 16], sizes = [8, 16], strides = [1, 1]} : vector<8x48xf32> to vector<8x16xf32>
    %696 = arith.addf %694, %695 : vector<8x16xf32>
    %697 = arith.negf %696 : vector<8x16xf32>
    %698 = math.exp %697 : vector<8x16xf32>
    %cst_324 = arith.constant 1.000000e+00 : f32
    %699 = vector.broadcast %cst_324 : f32 to vector<8x16xf32>
    %700 = arith.addf %699, %698 : vector<8x16xf32>
    %701 = arith.divf %699, %700 : vector<8x16xf32>
    %702 = arith.index_cast %c4_i32 : i32 to index
    %c0_325 = arith.constant 0 : index
    %c0_326 = arith.constant 0 : index
    %703 = vector.load %arg12[%702, %c0_325, %c0_326] : memref<8x8x16xf32, #tpu.memory_space<vmem>>, vector<1x8x16xf32>
    %704 = vector.shape_cast %703 : vector<1x8x16xf32> to vector<8x16xf32>
    %705 = vector.extract_strided_slice %681 {offsets = [0, 32], sizes = [8, 16], strides = [1, 1]} : vector<8x48xf32> to vector<8x16xf32>
    %706 = arith.mulf %691, %705 : vector<8x16xf32>
    %707 = arith.addf %704, %706 : vector<8x16xf32>
    %708 = math.tanh %707 : vector<8x16xf32>
    %cst_327 = arith.constant 1.000000e+00 : f32
    %709 = vector.broadcast %cst_327 : f32 to vector<8x16xf32>
    %710 = arith.subf %709, %701 : vector<8x16xf32>
    %711 = arith.mulf %710, %708 : vector<8x16xf32>
    %712 = arith.mulf %701, %673 : vector<8x16xf32>
    %713 = arith.addf %711, %712 : vector<8x16xf32>
    %c0_328 = arith.constant 0 : index
    %c0_329 = arith.constant 0 : index
    %714 = vector.load %arg17[%c0_328, %c0_329] : memref<8x16xf32, #tpu.memory_space<vmem>>, vector<8x16xf32>
    tpu.vector_store %arg17[%c0_328, %c0_329], %713 {strides = array<i32>} : memref<8x16xf32, #tpu.memory_space<vmem>>, vector<8x16xf32>,
    %c0_330 = arith.constant 0 : index
    %c0_331 = arith.constant 0 : index
    %715 = vector.load %arg18[%c0_330, %c0_331] : memref<8x16xf32, #tpu.memory_space<vmem>>, vector<8x16xf32>
    %716 = arith.truncf %715 : vector<8x16xf32> to vector<8x16xbf16>
    %717 = vector.extract_strided_slice %89 {offsets = [2, 0, 0], sizes = [1, 16, 48], strides = [1, 1, 1]} : vector<3x16x48xbf16> to vector<1x16x48xbf16>
    %718 = vector.shape_cast %717 : vector<1x16x48xbf16> to vector<16x48xbf16>
    %cst_332 = arith.constant dense<0.000000e+00> : vector<8x48xf32>
    %719 = tpu.matmul %716, %718, %cst_332 {dimension_numbers = #tpu.dot_dimension_numbers<[1], [0], [0], [1], [0, 0, 1, 1], [], []>} : vector<8x16xbf16>, vector<16x48xbf16>, vector<8x48xf32> -> vector<8x48xf32>
    %720 = vector.extract_strided_slice %90 {offsets = [2, 0, 0], sizes = [1, 1, 48], strides = [1, 1, 1]} : vector<3x1x48xf32> to vector<1x1x48xf32>
    %721 = vector.shape_cast %720 : vector<1x1x48xf32> to vector<1x48xf32>
    %722 = vector.broadcast %721 : vector<1x48xf32> to vector<8x48xf32>
    %723 = arith.addf %719, %722 : vector<8x48xf32>
    %724 = arith.index_cast %c4_i32 : i32 to index
    %c0_333 = arith.constant 0 : index
    %c0_334 = arith.constant 0 : index
    %725 = vector.load %arg13[%724, %c0_333, %c0_334] : memref<8x8x16xf32, #tpu.memory_space<vmem>>, vector<1x8x16xf32>
    %726 = vector.shape_cast %725 : vector<1x8x16xf32> to vector<8x16xf32>
    %727 = vector.extract_strided_slice %723 {offsets = [0, 0], sizes = [8, 16], strides = [1, 1]} : vector<8x48xf32> to vector<8x16xf32>
    %728 = arith.addf %726, %727 : vector<8x16xf32>
    %729 = arith.negf %728 : vector<8x16xf32>
    %730 = math.exp %729 : vector<8x16xf32>
    %cst_335 = arith.constant 1.000000e+00 : f32
    %731 = vector.broadcast %cst_335 : f32 to vector<8x16xf32>
    %732 = arith.addf %731, %730 : vector<8x16xf32>
    %733 = arith.divf %731, %732 : vector<8x16xf32>
    %734 = arith.index_cast %c4_i32 : i32 to index
    %c0_336 = arith.constant 0 : index
    %c0_337 = arith.constant 0 : index
    %735 = vector.load %arg14[%734, %c0_336, %c0_337] : memref<8x8x16xf32, #tpu.memory_space<vmem>>, vector<1x8x16xf32>
    %736 = vector.shape_cast %735 : vector<1x8x16xf32> to vector<8x16xf32>
    %737 = vector.extract_strided_slice %723 {offsets = [0, 16], sizes = [8, 16], strides = [1, 1]} : vector<8x48xf32> to vector<8x16xf32>
    %738 = arith.addf %736, %737 : vector<8x16xf32>
    %739 = arith.negf %738 : vector<8x16xf32>
    %740 = math.exp %739 : vector<8x16xf32>
    %cst_338 = arith.constant 1.000000e+00 : f32
    %741 = vector.broadcast %cst_338 : f32 to vector<8x16xf32>
    %742 = arith.addf %741, %740 : vector<8x16xf32>
    %743 = arith.divf %741, %742 : vector<8x16xf32>
    %744 = arith.index_cast %c4_i32 : i32 to index
    %c0_339 = arith.constant 0 : index
    %c0_340 = arith.constant 0 : index
    %745 = vector.load %arg15[%744, %c0_339, %c0_340] : memref<8x8x16xf32, #tpu.memory_space<vmem>>, vector<1x8x16xf32>
    %746 = vector.shape_cast %745 : vector<1x8x16xf32> to vector<8x16xf32>
    %747 = vector.extract_strided_slice %723 {offsets = [0, 32], sizes = [8, 16], strides = [1, 1]} : vector<8x48xf32> to vector<8x16xf32>
    %748 = arith.mulf %733, %747 : vector<8x16xf32>
    %749 = arith.addf %746, %748 : vector<8x16xf32>
    %750 = math.tanh %749 : vector<8x16xf32>
    %cst_341 = arith.constant 1.000000e+00 : f32
    %751 = vector.broadcast %cst_341 : f32 to vector<8x16xf32>
    %752 = arith.subf %751, %743 : vector<8x16xf32>
    %753 = arith.mulf %752, %750 : vector<8x16xf32>
    %754 = arith.mulf %743, %715 : vector<8x16xf32>
    %755 = arith.addf %753, %754 : vector<8x16xf32>
    %c0_342 = arith.constant 0 : index
    %c0_343 = arith.constant 0 : index
    %756 = vector.load %arg18[%c0_342, %c0_343] : memref<8x16xf32, #tpu.memory_space<vmem>>, vector<8x16xf32>
    tpu.vector_store %arg18[%c0_342, %c0_343], %755 {strides = array<i32>} : memref<8x16xf32, #tpu.memory_space<vmem>>, vector<8x16xf32>,
    %757 = vector.shape_cast %671 : vector<8x16xf32> to vector<1x8x16xf32>
    %758 = vector.shape_cast %713 : vector<8x16xf32> to vector<1x8x16xf32>
    %759 = vector.shape_cast %755 : vector<8x16xf32> to vector<1x8x16xf32>
    %760 = tpu.concatenate %757, %758, %759 in 0 : vector<1x8x16xf32>, vector<1x8x16xf32>, vector<1x8x16xf32> -> vector<3x8x16xf32>
    %761 = arith.truncf %760 : vector<3x8x16xf32> to vector<3x8x16xbf16>
    %762 = arith.index_cast %c4_i32 : i32 to index
    %c0_344 = arith.constant 0 : index
    %c0_345 = arith.constant 0 : index
    %c0_346 = arith.constant 0 : index
    %763 = vector.load %arg6[%762, %c0_344, %c0_345, %c0_346] : memref<8x3x8x16xbf16, #tpu.memory_space<vmem>>, vector<1x3x8x16xbf16>
    %764 = vector.shape_cast %763 : vector<1x3x8x16xbf16> to vector<3x8x16xbf16>
    %765 = vector.shape_cast %761 : vector<3x8x16xbf16> to vector<1x3x8x16xbf16>
    tpu.vector_store %arg6[%762, %c0_344, %c0_345, %c0_346], %765 {strides = array<i32>} : memref<8x3x8x16xbf16, #tpu.memory_space<vmem>>, vector<1x3x8x16xbf16>,
    %c5_i32 = arith.constant 5 : i32
    %c0_347 = arith.constant 0 : index
    %c0_348 = arith.constant 0 : index
    %766 = vector.load %arg16[%c0_347, %c0_348] : memref<8x16xf32, #tpu.memory_space<vmem>>, vector<8x16xf32>
    %767 = arith.truncf %766 : vector<8x16xf32> to vector<8x16xbf16>
    %768 = vector.extract_strided_slice %89 {offsets = [0, 0, 0], sizes = [1, 16, 48], strides = [1, 1, 1]} : vector<3x16x48xbf16> to vector<1x16x48xbf16>
    %769 = vector.shape_cast %768 : vector<1x16x48xbf16> to vector<16x48xbf16>
    %cst_349 = arith.constant dense<0.000000e+00> : vector<8x48xf32>
    %770 = tpu.matmul %767, %769, %cst_349 {dimension_numbers = #tpu.dot_dimension_numbers<[1], [0], [0], [1], [0, 0, 1, 1], [], []>} : vector<8x16xbf16>, vector<16x48xbf16>, vector<8x48xf32> -> vector<8x48xf32>
    %771 = vector.extract_strided_slice %90 {offsets = [0, 0, 0], sizes = [1, 1, 48], strides = [1, 1, 1]} : vector<3x1x48xf32> to vector<1x1x48xf32>
    %772 = vector.shape_cast %771 : vector<1x1x48xf32> to vector<1x48xf32>
    %773 = vector.broadcast %772 : vector<1x48xf32> to vector<8x48xf32>
    %774 = arith.addf %770, %773 : vector<8x48xf32>
    %775 = arith.index_cast %c5_i32 : i32 to index
    %c0_350 = arith.constant 0 : index
    %c0_351 = arith.constant 0 : index
    %776 = vector.load %arg7[%775, %c0_350, %c0_351] : memref<8x8x16xf32, #tpu.memory_space<vmem>>, vector<1x8x16xf32>
    %777 = vector.shape_cast %776 : vector<1x8x16xf32> to vector<8x16xf32>
    %778 = vector.extract_strided_slice %774 {offsets = [0, 0], sizes = [8, 16], strides = [1, 1]} : vector<8x48xf32> to vector<8x16xf32>
    %779 = arith.addf %777, %778 : vector<8x16xf32>
    %780 = arith.negf %779 : vector<8x16xf32>
    %781 = math.exp %780 : vector<8x16xf32>
    %cst_352 = arith.constant 1.000000e+00 : f32
    %782 = vector.broadcast %cst_352 : f32 to vector<8x16xf32>
    %783 = arith.addf %782, %781 : vector<8x16xf32>
    %784 = arith.divf %782, %783 : vector<8x16xf32>
    %785 = arith.index_cast %c5_i32 : i32 to index
    %c0_353 = arith.constant 0 : index
    %c0_354 = arith.constant 0 : index
    %786 = vector.load %arg8[%785, %c0_353, %c0_354] : memref<8x8x16xf32, #tpu.memory_space<vmem>>, vector<1x8x16xf32>
    %787 = vector.shape_cast %786 : vector<1x8x16xf32> to vector<8x16xf32>
    %788 = vector.extract_strided_slice %774 {offsets = [0, 16], sizes = [8, 16], strides = [1, 1]} : vector<8x48xf32> to vector<8x16xf32>
    %789 = arith.addf %787, %788 : vector<8x16xf32>
    %790 = arith.negf %789 : vector<8x16xf32>
    %791 = math.exp %790 : vector<8x16xf32>
    %cst_355 = arith.constant 1.000000e+00 : f32
    %792 = vector.broadcast %cst_355 : f32 to vector<8x16xf32>
    %793 = arith.addf %792, %791 : vector<8x16xf32>
    %794 = arith.divf %792, %793 : vector<8x16xf32>
    %795 = arith.index_cast %c5_i32 : i32 to index
    %c0_356 = arith.constant 0 : index
    %c0_357 = arith.constant 0 : index
    %796 = vector.load %arg9[%795, %c0_356, %c0_357] : memref<8x8x16xf32, #tpu.memory_space<vmem>>, vector<1x8x16xf32>
    %797 = vector.shape_cast %796 : vector<1x8x16xf32> to vector<8x16xf32>
    %798 = vector.extract_strided_slice %774 {offsets = [0, 32], sizes = [8, 16], strides = [1, 1]} : vector<8x48xf32> to vector<8x16xf32>
    %799 = arith.mulf %784, %798 : vector<8x16xf32>
    %800 = arith.addf %797, %799 : vector<8x16xf32>
    %801 = math.tanh %800 : vector<8x16xf32>
    %cst_358 = arith.constant 1.000000e+00 : f32
    %802 = vector.broadcast %cst_358 : f32 to vector<8x16xf32>
    %803 = arith.subf %802, %794 : vector<8x16xf32>
    %804 = arith.mulf %803, %801 : vector<8x16xf32>
    %805 = arith.mulf %794, %766 : vector<8x16xf32>
    %806 = arith.addf %804, %805 : vector<8x16xf32>
    %c0_359 = arith.constant 0 : index
    %c0_360 = arith.constant 0 : index
    %807 = vector.load %arg16[%c0_359, %c0_360] : memref<8x16xf32, #tpu.memory_space<vmem>>, vector<8x16xf32>
    tpu.vector_store %arg16[%c0_359, %c0_360], %806 {strides = array<i32>} : memref<8x16xf32, #tpu.memory_space<vmem>>, vector<8x16xf32>,
    %c0_361 = arith.constant 0 : index
    %c0_362 = arith.constant 0 : index
    %808 = vector.load %arg17[%c0_361, %c0_362] : memref<8x16xf32, #tpu.memory_space<vmem>>, vector<8x16xf32>
    %809 = arith.truncf %808 : vector<8x16xf32> to vector<8x16xbf16>
    %810 = vector.extract_strided_slice %89 {offsets = [1, 0, 0], sizes = [1, 16, 48], strides = [1, 1, 1]} : vector<3x16x48xbf16> to vector<1x16x48xbf16>
    %811 = vector.shape_cast %810 : vector<1x16x48xbf16> to vector<16x48xbf16>
    %cst_363 = arith.constant dense<0.000000e+00> : vector<8x48xf32>
    %812 = tpu.matmul %809, %811, %cst_363 {dimension_numbers = #tpu.dot_dimension_numbers<[1], [0], [0], [1], [0, 0, 1, 1], [], []>} : vector<8x16xbf16>, vector<16x48xbf16>, vector<8x48xf32> -> vector<8x48xf32>
    %813 = vector.extract_strided_slice %90 {offsets = [1, 0, 0], sizes = [1, 1, 48], strides = [1, 1, 1]} : vector<3x1x48xf32> to vector<1x1x48xf32>
    %814 = vector.shape_cast %813 : vector<1x1x48xf32> to vector<1x48xf32>
    %815 = vector.broadcast %814 : vector<1x48xf32> to vector<8x48xf32>
    %816 = arith.addf %812, %815 : vector<8x48xf32>
    %817 = arith.index_cast %c5_i32 : i32 to index
    %c0_364 = arith.constant 0 : index
    %c0_365 = arith.constant 0 : index
    %818 = vector.load %arg10[%817, %c0_364, %c0_365] : memref<8x8x16xf32, #tpu.memory_space<vmem>>, vector<1x8x16xf32>
    %819 = vector.shape_cast %818 : vector<1x8x16xf32> to vector<8x16xf32>
    %820 = vector.extract_strided_slice %816 {offsets = [0, 0], sizes = [8, 16], strides = [1, 1]} : vector<8x48xf32> to vector<8x16xf32>
    %821 = arith.addf %819, %820 : vector<8x16xf32>
    %822 = arith.negf %821 : vector<8x16xf32>
    %823 = math.exp %822 : vector<8x16xf32>
    %cst_366 = arith.constant 1.000000e+00 : f32
    %824 = vector.broadcast %cst_366 : f32 to vector<8x16xf32>
    %825 = arith.addf %824, %823 : vector<8x16xf32>
    %826 = arith.divf %824, %825 : vector<8x16xf32>
    %827 = arith.index_cast %c5_i32 : i32 to index
    %c0_367 = arith.constant 0 : index
    %c0_368 = arith.constant 0 : index
    %828 = vector.load %arg11[%827, %c0_367, %c0_368] : memref<8x8x16xf32, #tpu.memory_space<vmem>>, vector<1x8x16xf32>
    %829 = vector.shape_cast %828 : vector<1x8x16xf32> to vector<8x16xf32>
    %830 = vector.extract_strided_slice %816 {offsets = [0, 16], sizes = [8, 16], strides = [1, 1]} : vector<8x48xf32> to vector<8x16xf32>
    %831 = arith.addf %829, %830 : vector<8x16xf32>
    %832 = arith.negf %831 : vector<8x16xf32>
    %833 = math.exp %832 : vector<8x16xf32>
    %cst_369 = arith.constant 1.000000e+00 : f32
    %834 = vector.broadcast %cst_369 : f32 to vector<8x16xf32>
    %835 = arith.addf %834, %833 : vector<8x16xf32>
    %836 = arith.divf %834, %835 : vector<8x16xf32>
    %837 = arith.index_cast %c5_i32 : i32 to index
    %c0_370 = arith.constant 0 : index
    %c0_371 = arith.constant 0 : index
    %838 = vector.load %arg12[%837, %c0_370, %c0_371] : memref<8x8x16xf32, #tpu.memory_space<vmem>>, vector<1x8x16xf32>
    %839 = vector.shape_cast %838 : vector<1x8x16xf32> to vector<8x16xf32>
    %840 = vector.extract_strided_slice %816 {offsets = [0, 32], sizes = [8, 16], strides = [1, 1]} : vector<8x48xf32> to vector<8x16xf32>
    %841 = arith.mulf %826, %840 : vector<8x16xf32>
    %842 = arith.addf %839, %841 : vector<8x16xf32>
    %843 = math.tanh %842 : vector<8x16xf32>
    %cst_372 = arith.constant 1.000000e+00 : f32
    %844 = vector.broadcast %cst_372 : f32 to vector<8x16xf32>
    %845 = arith.subf %844, %836 : vector<8x16xf32>
    %846 = arith.mulf %845, %843 : vector<8x16xf32>
    %847 = arith.mulf %836, %808 : vector<8x16xf32>
    %848 = arith.addf %846, %847 : vector<8x16xf32>
    %c0_373 = arith.constant 0 : index
    %c0_374 = arith.constant 0 : index
    %849 = vector.load %arg17[%c0_373, %c0_374] : memref<8x16xf32, #tpu.memory_space<vmem>>, vector<8x16xf32>
    tpu.vector_store %arg17[%c0_373, %c0_374], %848 {strides = array<i32>} : memref<8x16xf32, #tpu.memory_space<vmem>>, vector<8x16xf32>,
    %c0_375 = arith.constant 0 : index
    %c0_376 = arith.constant 0 : index
    %850 = vector.load %arg18[%c0_375, %c0_376] : memref<8x16xf32, #tpu.memory_space<vmem>>, vector<8x16xf32>
    %851 = arith.truncf %850 : vector<8x16xf32> to vector<8x16xbf16>
    %852 = vector.extract_strided_slice %89 {offsets = [2, 0, 0], sizes = [1, 16, 48], strides = [1, 1, 1]} : vector<3x16x48xbf16> to vector<1x16x48xbf16>
    %853 = vector.shape_cast %852 : vector<1x16x48xbf16> to vector<16x48xbf16>
    %cst_377 = arith.constant dense<0.000000e+00> : vector<8x48xf32>
    %854 = tpu.matmul %851, %853, %cst_377 {dimension_numbers = #tpu.dot_dimension_numbers<[1], [0], [0], [1], [0, 0, 1, 1], [], []>} : vector<8x16xbf16>, vector<16x48xbf16>, vector<8x48xf32> -> vector<8x48xf32>
    %855 = vector.extract_strided_slice %90 {offsets = [2, 0, 0], sizes = [1, 1, 48], strides = [1, 1, 1]} : vector<3x1x48xf32> to vector<1x1x48xf32>
    %856 = vector.shape_cast %855 : vector<1x1x48xf32> to vector<1x48xf32>
    %857 = vector.broadcast %856 : vector<1x48xf32> to vector<8x48xf32>
    %858 = arith.addf %854, %857 : vector<8x48xf32>
    %859 = arith.index_cast %c5_i32 : i32 to index
    %c0_378 = arith.constant 0 : index
    %c0_379 = arith.constant 0 : index
    %860 = vector.load %arg13[%859, %c0_378, %c0_379] : memref<8x8x16xf32, #tpu.memory_space<vmem>>, vector<1x8x16xf32>
    %861 = vector.shape_cast %860 : vector<1x8x16xf32> to vector<8x16xf32>
    %862 = vector.extract_strided_slice %858 {offsets = [0, 0], sizes = [8, 16], strides = [1, 1]} : vector<8x48xf32> to vector<8x16xf32>
    %863 = arith.addf %861, %862 : vector<8x16xf32>
    %864 = arith.negf %863 : vector<8x16xf32>
    %865 = math.exp %864 : vector<8x16xf32>
    %cst_380 = arith.constant 1.000000e+00 : f32
    %866 = vector.broadcast %cst_380 : f32 to vector<8x16xf32>
    %867 = arith.addf %866, %865 : vector<8x16xf32>
    %868 = arith.divf %866, %867 : vector<8x16xf32>
    %869 = arith.index_cast %c5_i32 : i32 to index
    %c0_381 = arith.constant 0 : index
    %c0_382 = arith.constant 0 : index
    %870 = vector.load %arg14[%869, %c0_381, %c0_382] : memref<8x8x16xf32, #tpu.memory_space<vmem>>, vector<1x8x16xf32>
    %871 = vector.shape_cast %870 : vector<1x8x16xf32> to vector<8x16xf32>
    %872 = vector.extract_strided_slice %858 {offsets = [0, 16], sizes = [8, 16], strides = [1, 1]} : vector<8x48xf32> to vector<8x16xf32>
    %873 = arith.addf %871, %872 : vector<8x16xf32>
    %874 = arith.negf %873 : vector<8x16xf32>
    %875 = math.exp %874 : vector<8x16xf32>
    %cst_383 = arith.constant 1.000000e+00 : f32
    %876 = vector.broadcast %cst_383 : f32 to vector<8x16xf32>
    %877 = arith.addf %876, %875 : vector<8x16xf32>
    %878 = arith.divf %876, %877 : vector<8x16xf32>
    %879 = arith.index_cast %c5_i32 : i32 to index
    %c0_384 = arith.constant 0 : index
    %c0_385 = arith.constant 0 : index
    %880 = vector.load %arg15[%879, %c0_384, %c0_385] : memref<8x8x16xf32, #tpu.memory_space<vmem>>, vector<1x8x16xf32>
    %881 = vector.shape_cast %880 : vector<1x8x16xf32> to vector<8x16xf32>
    %882 = vector.extract_strided_slice %858 {offsets = [0, 32], sizes = [8, 16], strides = [1, 1]} : vector<8x48xf32> to vector<8x16xf32>
    %883 = arith.mulf %868, %882 : vector<8x16xf32>
    %884 = arith.addf %881, %883 : vector<8x16xf32>
    %885 = math.tanh %884 : vector<8x16xf32>
    %cst_386 = arith.constant 1.000000e+00 : f32
    %886 = vector.broadcast %cst_386 : f32 to vector<8x16xf32>
    %887 = arith.subf %886, %878 : vector<8x16xf32>
    %888 = arith.mulf %887, %885 : vector<8x16xf32>
    %889 = arith.mulf %878, %850 : vector<8x16xf32>
    %890 = arith.addf %888, %889 : vector<8x16xf32>
    %c0_387 = arith.constant 0 : index
    %c0_388 = arith.constant 0 : index
    %891 = vector.load %arg18[%c0_387, %c0_388] : memref<8x16xf32, #tpu.memory_space<vmem>>, vector<8x16xf32>
    tpu.vector_store %arg18[%c0_387, %c0_388], %890 {strides = array<i32>} : memref<8x16xf32, #tpu.memory_space<vmem>>, vector<8x16xf32>,
    %892 = vector.shape_cast %806 : vector<8x16xf32> to vector<1x8x16xf32>
    %893 = vector.shape_cast %848 : vector<8x16xf32> to vector<1x8x16xf32>
    %894 = vector.shape_cast %890 : vector<8x16xf32> to vector<1x8x16xf32>
    %895 = tpu.concatenate %892, %893, %894 in 0 : vector<1x8x16xf32>, vector<1x8x16xf32>, vector<1x8x16xf32> -> vector<3x8x16xf32>
    %896 = arith.truncf %895 : vector<3x8x16xf32> to vector<3x8x16xbf16>
    %897 = arith.index_cast %c5_i32 : i32 to index
    %c0_389 = arith.constant 0 : index
    %c0_390 = arith.constant 0 : index
    %c0_391 = arith.constant 0 : index
    %898 = vector.load %arg6[%897, %c0_389, %c0_390, %c0_391] : memref<8x3x8x16xbf16, #tpu.memory_space<vmem>>, vector<1x3x8x16xbf16>
    %899 = vector.shape_cast %898 : vector<1x3x8x16xbf16> to vector<3x8x16xbf16>
    %900 = vector.shape_cast %896 : vector<3x8x16xbf16> to vector<1x3x8x16xbf16>
    tpu.vector_store %arg6[%897, %c0_389, %c0_390, %c0_391], %900 {strides = array<i32>} : memref<8x3x8x16xbf16, #tpu.memory_space<vmem>>, vector<1x3x8x16xbf16>,
    %c6_i32 = arith.constant 6 : i32
    %c0_392 = arith.constant 0 : index
    %c0_393 = arith.constant 0 : index
    %901 = vector.load %arg16[%c0_392, %c0_393] : memref<8x16xf32, #tpu.memory_space<vmem>>, vector<8x16xf32>
    %902 = arith.truncf %901 : vector<8x16xf32> to vector<8x16xbf16>
    %903 = vector.extract_strided_slice %89 {offsets = [0, 0, 0], sizes = [1, 16, 48], strides = [1, 1, 1]} : vector<3x16x48xbf16> to vector<1x16x48xbf16>
    %904 = vector.shape_cast %903 : vector<1x16x48xbf16> to vector<16x48xbf16>
    %cst_394 = arith.constant dense<0.000000e+00> : vector<8x48xf32>
    %905 = tpu.matmul %902, %904, %cst_394 {dimension_numbers = #tpu.dot_dimension_numbers<[1], [0], [0], [1], [0, 0, 1, 1], [], []>} : vector<8x16xbf16>, vector<16x48xbf16>, vector<8x48xf32> -> vector<8x48xf32>
    %906 = vector.extract_strided_slice %90 {offsets = [0, 0, 0], sizes = [1, 1, 48], strides = [1, 1, 1]} : vector<3x1x48xf32> to vector<1x1x48xf32>
    %907 = vector.shape_cast %906 : vector<1x1x48xf32> to vector<1x48xf32>
    %908 = vector.broadcast %907 : vector<1x48xf32> to vector<8x48xf32>
    %909 = arith.addf %905, %908 : vector<8x48xf32>
    %910 = arith.index_cast %c6_i32 : i32 to index
    %c0_395 = arith.constant 0 : index
    %c0_396 = arith.constant 0 : index
    %911 = vector.load %arg7[%910, %c0_395, %c0_396] : memref<8x8x16xf32, #tpu.memory_space<vmem>>, vector<1x8x16xf32>
    %912 = vector.shape_cast %911 : vector<1x8x16xf32> to vector<8x16xf32>
    %913 = vector.extract_strided_slice %909 {offsets = [0, 0], sizes = [8, 16], strides = [1, 1]} : vector<8x48xf32> to vector<8x16xf32>
    %914 = arith.addf %912, %913 : vector<8x16xf32>
    %915 = arith.negf %914 : vector<8x16xf32>
    %916 = math.exp %915 : vector<8x16xf32>
    %cst_397 = arith.constant 1.000000e+00 : f32
    %917 = vector.broadcast %cst_397 : f32 to vector<8x16xf32>
    %918 = arith.addf %917, %916 : vector<8x16xf32>
    %919 = arith.divf %917, %918 : vector<8x16xf32>
    %920 = arith.index_cast %c6_i32 : i32 to index
    %c0_398 = arith.constant 0 : index
    %c0_399 = arith.constant 0 : index
    %921 = vector.load %arg8[%920, %c0_398, %c0_399] : memref<8x8x16xf32, #tpu.memory_space<vmem>>, vector<1x8x16xf32>
    %922 = vector.shape_cast %921 : vector<1x8x16xf32> to vector<8x16xf32>
    %923 = vector.extract_strided_slice %909 {offsets = [0, 16], sizes = [8, 16], strides = [1, 1]} : vector<8x48xf32> to vector<8x16xf32>
    %924 = arith.addf %922, %923 : vector<8x16xf32>
    %925 = arith.negf %924 : vector<8x16xf32>
    %926 = math.exp %925 : vector<8x16xf32>
    %cst_400 = arith.constant 1.000000e+00 : f32
    %927 = vector.broadcast %cst_400 : f32 to vector<8x16xf32>
    %928 = arith.addf %927, %926 : vector<8x16xf32>
    %929 = arith.divf %927, %928 : vector<8x16xf32>
    %930 = arith.index_cast %c6_i32 : i32 to index
    %c0_401 = arith.constant 0 : index
    %c0_402 = arith.constant 0 : index
    %931 = vector.load %arg9[%930, %c0_401, %c0_402] : memref<8x8x16xf32, #tpu.memory_space<vmem>>, vector<1x8x16xf32>
    %932 = vector.shape_cast %931 : vector<1x8x16xf32> to vector<8x16xf32>
    %933 = vector.extract_strided_slice %909 {offsets = [0, 32], sizes = [8, 16], strides = [1, 1]} : vector<8x48xf32> to vector<8x16xf32>
    %934 = arith.mulf %919, %933 : vector<8x16xf32>
    %935 = arith.addf %932, %934 : vector<8x16xf32>
    %936 = math.tanh %935 : vector<8x16xf32>
    %cst_403 = arith.constant 1.000000e+00 : f32
    %937 = vector.broadcast %cst_403 : f32 to vector<8x16xf32>
    %938 = arith.subf %937, %929 : vector<8x16xf32>
    %939 = arith.mulf %938, %936 : vector<8x16xf32>
    %940 = arith.mulf %929, %901 : vector<8x16xf32>
    %941 = arith.addf %939, %940 : vector<8x16xf32>
    %c0_404 = arith.constant 0 : index
    %c0_405 = arith.constant 0 : index
    %942 = vector.load %arg16[%c0_404, %c0_405] : memref<8x16xf32, #tpu.memory_space<vmem>>, vector<8x16xf32>
    tpu.vector_store %arg16[%c0_404, %c0_405], %941 {strides = array<i32>} : memref<8x16xf32, #tpu.memory_space<vmem>>, vector<8x16xf32>,
    %c0_406 = arith.constant 0 : index
    %c0_407 = arith.constant 0 : index
    %943 = vector.load %arg17[%c0_406, %c0_407] : memref<8x16xf32, #tpu.memory_space<vmem>>, vector<8x16xf32>
    %944 = arith.truncf %943 : vector<8x16xf32> to vector<8x16xbf16>
    %945 = vector.extract_strided_slice %89 {offsets = [1, 0, 0], sizes = [1, 16, 48], strides = [1, 1, 1]} : vector<3x16x48xbf16> to vector<1x16x48xbf16>
    %946 = vector.shape_cast %945 : vector<1x16x48xbf16> to vector<16x48xbf16>
    %cst_408 = arith.constant dense<0.000000e+00> : vector<8x48xf32>
    %947 = tpu.matmul %944, %946, %cst_408 {dimension_numbers = #tpu.dot_dimension_numbers<[1], [0], [0], [1], [0, 0, 1, 1], [], []>} : vector<8x16xbf16>, vector<16x48xbf16>, vector<8x48xf32> -> vector<8x48xf32>
    %948 = vector.extract_strided_slice %90 {offsets = [1, 0, 0], sizes = [1, 1, 48], strides = [1, 1, 1]} : vector<3x1x48xf32> to vector<1x1x48xf32>
    %949 = vector.shape_cast %948 : vector<1x1x48xf32> to vector<1x48xf32>
    %950 = vector.broadcast %949 : vector<1x48xf32> to vector<8x48xf32>
    %951 = arith.addf %947, %950 : vector<8x48xf32>
    %952 = arith.index_cast %c6_i32 : i32 to index
    %c0_409 = arith.constant 0 : index
    %c0_410 = arith.constant 0 : index
    %953 = vector.load %arg10[%952, %c0_409, %c0_410] : memref<8x8x16xf32, #tpu.memory_space<vmem>>, vector<1x8x16xf32>
    %954 = vector.shape_cast %953 : vector<1x8x16xf32> to vector<8x16xf32>
    %955 = vector.extract_strided_slice %951 {offsets = [0, 0], sizes = [8, 16], strides = [1, 1]} : vector<8x48xf32> to vector<8x16xf32>
    %956 = arith.addf %954, %955 : vector<8x16xf32>
    %957 = arith.negf %956 : vector<8x16xf32>
    %958 = math.exp %957 : vector<8x16xf32>
    %cst_411 = arith.constant 1.000000e+00 : f32
    %959 = vector.broadcast %cst_411 : f32 to vector<8x16xf32>
    %960 = arith.addf %959, %958 : vector<8x16xf32>
    %961 = arith.divf %959, %960 : vector<8x16xf32>
    %962 = arith.index_cast %c6_i32 : i32 to index
    %c0_412 = arith.constant 0 : index
    %c0_413 = arith.constant 0 : index
    %963 = vector.load %arg11[%962, %c0_412, %c0_413] : memref<8x8x16xf32, #tpu.memory_space<vmem>>, vector<1x8x16xf32>
    %964 = vector.shape_cast %963 : vector<1x8x16xf32> to vector<8x16xf32>
    %965 = vector.extract_strided_slice %951 {offsets = [0, 16], sizes = [8, 16], strides = [1, 1]} : vector<8x48xf32> to vector<8x16xf32>
    %966 = arith.addf %964, %965 : vector<8x16xf32>
    %967 = arith.negf %966 : vector<8x16xf32>
    %968 = math.exp %967 : vector<8x16xf32>
    %cst_414 = arith.constant 1.000000e+00 : f32
    %969 = vector.broadcast %cst_414 : f32 to vector<8x16xf32>
    %970 = arith.addf %969, %968 : vector<8x16xf32>
    %971 = arith.divf %969, %970 : vector<8x16xf32>
    %972 = arith.index_cast %c6_i32 : i32 to index
    %c0_415 = arith.constant 0 : index
    %c0_416 = arith.constant 0 : index
    %973 = vector.load %arg12[%972, %c0_415, %c0_416] : memref<8x8x16xf32, #tpu.memory_space<vmem>>, vector<1x8x16xf32>
    %974 = vector.shape_cast %973 : vector<1x8x16xf32> to vector<8x16xf32>
    %975 = vector.extract_strided_slice %951 {offsets = [0, 32], sizes = [8, 16], strides = [1, 1]} : vector<8x48xf32> to vector<8x16xf32>
    %976 = arith.mulf %961, %975 : vector<8x16xf32>
    %977 = arith.addf %974, %976 : vector<8x16xf32>
    %978 = math.tanh %977 : vector<8x16xf32>
    %cst_417 = arith.constant 1.000000e+00 : f32
    %979 = vector.broadcast %cst_417 : f32 to vector<8x16xf32>
    %980 = arith.subf %979, %971 : vector<8x16xf32>
    %981 = arith.mulf %980, %978 : vector<8x16xf32>
    %982 = arith.mulf %971, %943 : vector<8x16xf32>
    %983 = arith.addf %981, %982 : vector<8x16xf32>
    %c0_418 = arith.constant 0 : index
    %c0_419 = arith.constant 0 : index
    %984 = vector.load %arg17[%c0_418, %c0_419] : memref<8x16xf32, #tpu.memory_space<vmem>>, vector<8x16xf32>
    tpu.vector_store %arg17[%c0_418, %c0_419], %983 {strides = array<i32>} : memref<8x16xf32, #tpu.memory_space<vmem>>, vector<8x16xf32>,
    %c0_420 = arith.constant 0 : index
    %c0_421 = arith.constant 0 : index
    %985 = vector.load %arg18[%c0_420, %c0_421] : memref<8x16xf32, #tpu.memory_space<vmem>>, vector<8x16xf32>
    %986 = arith.truncf %985 : vector<8x16xf32> to vector<8x16xbf16>
    %987 = vector.extract_strided_slice %89 {offsets = [2, 0, 0], sizes = [1, 16, 48], strides = [1, 1, 1]} : vector<3x16x48xbf16> to vector<1x16x48xbf16>
    %988 = vector.shape_cast %987 : vector<1x16x48xbf16> to vector<16x48xbf16>
    %cst_422 = arith.constant dense<0.000000e+00> : vector<8x48xf32>
    %989 = tpu.matmul %986, %988, %cst_422 {dimension_numbers = #tpu.dot_dimension_numbers<[1], [0], [0], [1], [0, 0, 1, 1], [], []>} : vector<8x16xbf16>, vector<16x48xbf16>, vector<8x48xf32> -> vector<8x48xf32>
    %990 = vector.extract_strided_slice %90 {offsets = [2, 0, 0], sizes = [1, 1, 48], strides = [1, 1, 1]} : vector<3x1x48xf32> to vector<1x1x48xf32>
    %991 = vector.shape_cast %990 : vector<1x1x48xf32> to vector<1x48xf32>
    %992 = vector.broadcast %991 : vector<1x48xf32> to vector<8x48xf32>
    %993 = arith.addf %989, %992 : vector<8x48xf32>
    %994 = arith.index_cast %c6_i32 : i32 to index
    %c0_423 = arith.constant 0 : index
    %c0_424 = arith.constant 0 : index
    %995 = vector.load %arg13[%994, %c0_423, %c0_424] : memref<8x8x16xf32, #tpu.memory_space<vmem>>, vector<1x8x16xf32>
    %996 = vector.shape_cast %995 : vector<1x8x16xf32> to vector<8x16xf32>
    %997 = vector.extract_strided_slice %993 {offsets = [0, 0], sizes = [8, 16], strides = [1, 1]} : vector<8x48xf32> to vector<8x16xf32>
    %998 = arith.addf %996, %997 : vector<8x16xf32>
    %999 = arith.negf %998 : vector<8x16xf32>
    %1000 = math.exp %999 : vector<8x16xf32>
    %cst_425 = arith.constant 1.000000e+00 : f32
    %1001 = vector.broadcast %cst_425 : f32 to vector<8x16xf32>
    %1002 = arith.addf %1001, %1000 : vector<8x16xf32>
    %1003 = arith.divf %1001, %1002 : vector<8x16xf32>
    %1004 = arith.index_cast %c6_i32 : i32 to index
    %c0_426 = arith.constant 0 : index
    %c0_427 = arith.constant 0 : index
    %1005 = vector.load %arg14[%1004, %c0_426, %c0_427] : memref<8x8x16xf32, #tpu.memory_space<vmem>>, vector<1x8x16xf32>
    %1006 = vector.shape_cast %1005 : vector<1x8x16xf32> to vector<8x16xf32>
    %1007 = vector.extract_strided_slice %993 {offsets = [0, 16], sizes = [8, 16], strides = [1, 1]} : vector<8x48xf32> to vector<8x16xf32>
    %1008 = arith.addf %1006, %1007 : vector<8x16xf32>
    %1009 = arith.negf %1008 : vector<8x16xf32>
    %1010 = math.exp %1009 : vector<8x16xf32>
    %cst_428 = arith.constant 1.000000e+00 : f32
    %1011 = vector.broadcast %cst_428 : f32 to vector<8x16xf32>
    %1012 = arith.addf %1011, %1010 : vector<8x16xf32>
    %1013 = arith.divf %1011, %1012 : vector<8x16xf32>
    %1014 = arith.index_cast %c6_i32 : i32 to index
    %c0_429 = arith.constant 0 : index
    %c0_430 = arith.constant 0 : index
    %1015 = vector.load %arg15[%1014, %c0_429, %c0_430] : memref<8x8x16xf32, #tpu.memory_space<vmem>>, vector<1x8x16xf32>
    %1016 = vector.shape_cast %1015 : vector<1x8x16xf32> to vector<8x16xf32>
    %1017 = vector.extract_strided_slice %993 {offsets = [0, 32], sizes = [8, 16], strides = [1, 1]} : vector<8x48xf32> to vector<8x16xf32>
    %1018 = arith.mulf %1003, %1017 : vector<8x16xf32>
    %1019 = arith.addf %1016, %1018 : vector<8x16xf32>
    %1020 = math.tanh %1019 : vector<8x16xf32>
    %cst_431 = arith.constant 1.000000e+00 : f32
    %1021 = vector.broadcast %cst_431 : f32 to vector<8x16xf32>
    %1022 = arith.subf %1021, %1013 : vector<8x16xf32>
    %1023 = arith.mulf %1022, %1020 : vector<8x16xf32>
    %1024 = arith.mulf %1013, %985 : vector<8x16xf32>
    %1025 = arith.addf %1023, %1024 : vector<8x16xf32>
    %c0_432 = arith.constant 0 : index
    %c0_433 = arith.constant 0 : index
    %1026 = vector.load %arg18[%c0_432, %c0_433] : memref<8x16xf32, #tpu.memory_space<vmem>>, vector<8x16xf32>
    tpu.vector_store %arg18[%c0_432, %c0_433], %1025 {strides = array<i32>} : memref<8x16xf32, #tpu.memory_space<vmem>>, vector<8x16xf32>,
    %1027 = vector.shape_cast %941 : vector<8x16xf32> to vector<1x8x16xf32>
    %1028 = vector.shape_cast %983 : vector<8x16xf32> to vector<1x8x16xf32>
    %1029 = vector.shape_cast %1025 : vector<8x16xf32> to vector<1x8x16xf32>
    %1030 = tpu.concatenate %1027, %1028, %1029 in 0 : vector<1x8x16xf32>, vector<1x8x16xf32>, vector<1x8x16xf32> -> vector<3x8x16xf32>
    %1031 = arith.truncf %1030 : vector<3x8x16xf32> to vector<3x8x16xbf16>
    %1032 = arith.index_cast %c6_i32 : i32 to index
    %c0_434 = arith.constant 0 : index
    %c0_435 = arith.constant 0 : index
    %c0_436 = arith.constant 0 : index
    %1033 = vector.load %arg6[%1032, %c0_434, %c0_435, %c0_436] : memref<8x3x8x16xbf16, #tpu.memory_space<vmem>>, vector<1x3x8x16xbf16>
    %1034 = vector.shape_cast %1033 : vector<1x3x8x16xbf16> to vector<3x8x16xbf16>
    %1035 = vector.shape_cast %1031 : vector<3x8x16xbf16> to vector<1x3x8x16xbf16>
    tpu.vector_store %arg6[%1032, %c0_434, %c0_435, %c0_436], %1035 {strides = array<i32>} : memref<8x3x8x16xbf16, #tpu.memory_space<vmem>>, vector<1x3x8x16xbf16>,
    %c7_i32 = arith.constant 7 : i32
    %c0_437 = arith.constant 0 : index
    %c0_438 = arith.constant 0 : index
    %1036 = vector.load %arg16[%c0_437, %c0_438] : memref<8x16xf32, #tpu.memory_space<vmem>>, vector<8x16xf32>
    %1037 = arith.truncf %1036 : vector<8x16xf32> to vector<8x16xbf16>
    %1038 = vector.extract_strided_slice %89 {offsets = [0, 0, 0], sizes = [1, 16, 48], strides = [1, 1, 1]} : vector<3x16x48xbf16> to vector<1x16x48xbf16>
    %1039 = vector.shape_cast %1038 : vector<1x16x48xbf16> to vector<16x48xbf16>
    %cst_439 = arith.constant dense<0.000000e+00> : vector<8x48xf32>
    %1040 = tpu.matmul %1037, %1039, %cst_439 {dimension_numbers = #tpu.dot_dimension_numbers<[1], [0], [0], [1], [0, 0, 1, 1], [], []>} : vector<8x16xbf16>, vector<16x48xbf16>, vector<8x48xf32> -> vector<8x48xf32>
    %1041 = vector.extract_strided_slice %90 {offsets = [0, 0, 0], sizes = [1, 1, 48], strides = [1, 1, 1]} : vector<3x1x48xf32> to vector<1x1x48xf32>
    %1042 = vector.shape_cast %1041 : vector<1x1x48xf32> to vector<1x48xf32>
    %1043 = vector.broadcast %1042 : vector<1x48xf32> to vector<8x48xf32>
    %1044 = arith.addf %1040, %1043 : vector<8x48xf32>
    %1045 = arith.index_cast %c7_i32 : i32 to index
    %c0_440 = arith.constant 0 : index
    %c0_441 = arith.constant 0 : index
    %1046 = vector.load %arg7[%1045, %c0_440, %c0_441] : memref<8x8x16xf32, #tpu.memory_space<vmem>>, vector<1x8x16xf32>
    %1047 = vector.shape_cast %1046 : vector<1x8x16xf32> to vector<8x16xf32>
    %1048 = vector.extract_strided_slice %1044 {offsets = [0, 0], sizes = [8, 16], strides = [1, 1]} : vector<8x48xf32> to vector<8x16xf32>
    %1049 = arith.addf %1047, %1048 : vector<8x16xf32>
    %1050 = arith.negf %1049 : vector<8x16xf32>
    %1051 = math.exp %1050 : vector<8x16xf32>
    %cst_442 = arith.constant 1.000000e+00 : f32
    %1052 = vector.broadcast %cst_442 : f32 to vector<8x16xf32>
    %1053 = arith.addf %1052, %1051 : vector<8x16xf32>
    %1054 = arith.divf %1052, %1053 : vector<8x16xf32>
    %1055 = arith.index_cast %c7_i32 : i32 to index
    %c0_443 = arith.constant 0 : index
    %c0_444 = arith.constant 0 : index
    %1056 = vector.load %arg8[%1055, %c0_443, %c0_444] : memref<8x8x16xf32, #tpu.memory_space<vmem>>, vector<1x8x16xf32>
    %1057 = vector.shape_cast %1056 : vector<1x8x16xf32> to vector<8x16xf32>
    %1058 = vector.extract_strided_slice %1044 {offsets = [0, 16], sizes = [8, 16], strides = [1, 1]} : vector<8x48xf32> to vector<8x16xf32>
    %1059 = arith.addf %1057, %1058 : vector<8x16xf32>
    %1060 = arith.negf %1059 : vector<8x16xf32>
    %1061 = math.exp %1060 : vector<8x16xf32>
    %cst_445 = arith.constant 1.000000e+00 : f32
    %1062 = vector.broadcast %cst_445 : f32 to vector<8x16xf32>
    %1063 = arith.addf %1062, %1061 : vector<8x16xf32>
    %1064 = arith.divf %1062, %1063 : vector<8x16xf32>
    %1065 = arith.index_cast %c7_i32 : i32 to index
    %c0_446 = arith.constant 0 : index
    %c0_447 = arith.constant 0 : index
    %1066 = vector.load %arg9[%1065, %c0_446, %c0_447] : memref<8x8x16xf32, #tpu.memory_space<vmem>>, vector<1x8x16xf32>
    %1067 = vector.shape_cast %1066 : vector<1x8x16xf32> to vector<8x16xf32>
    %1068 = vector.extract_strided_slice %1044 {offsets = [0, 32], sizes = [8, 16], strides = [1, 1]} : vector<8x48xf32> to vector<8x16xf32>
    %1069 = arith.mulf %1054, %1068 : vector<8x16xf32>
    %1070 = arith.addf %1067, %1069 : vector<8x16xf32>
    %1071 = math.tanh %1070 : vector<8x16xf32>
    %cst_448 = arith.constant 1.000000e+00 : f32
    %1072 = vector.broadcast %cst_448 : f32 to vector<8x16xf32>
    %1073 = arith.subf %1072, %1064 : vector<8x16xf32>
    %1074 = arith.mulf %1073, %1071 : vector<8x16xf32>
    %1075 = arith.mulf %1064, %1036 : vector<8x16xf32>
    %1076 = arith.addf %1074, %1075 : vector<8x16xf32>
    %c0_449 = arith.constant 0 : index
    %c0_450 = arith.constant 0 : index
    %1077 = vector.load %arg16[%c0_449, %c0_450] : memref<8x16xf32, #tpu.memory_space<vmem>>, vector<8x16xf32>
    tpu.vector_store %arg16[%c0_449, %c0_450], %1076 {strides = array<i32>} : memref<8x16xf32, #tpu.memory_space<vmem>>, vector<8x16xf32>,
    %c0_451 = arith.constant 0 : index
    %c0_452 = arith.constant 0 : index
    %1078 = vector.load %arg17[%c0_451, %c0_452] : memref<8x16xf32, #tpu.memory_space<vmem>>, vector<8x16xf32>
    %1079 = arith.truncf %1078 : vector<8x16xf32> to vector<8x16xbf16>
    %1080 = vector.extract_strided_slice %89 {offsets = [1, 0, 0], sizes = [1, 16, 48], strides = [1, 1, 1]} : vector<3x16x48xbf16> to vector<1x16x48xbf16>
    %1081 = vector.shape_cast %1080 : vector<1x16x48xbf16> to vector<16x48xbf16>
    %cst_453 = arith.constant dense<0.000000e+00> : vector<8x48xf32>
    %1082 = tpu.matmul %1079, %1081, %cst_453 {dimension_numbers = #tpu.dot_dimension_numbers<[1], [0], [0], [1], [0, 0, 1, 1], [], []>} : vector<8x16xbf16>, vector<16x48xbf16>, vector<8x48xf32> -> vector<8x48xf32>
    %1083 = vector.extract_strided_slice %90 {offsets = [1, 0, 0], sizes = [1, 1, 48], strides = [1, 1, 1]} : vector<3x1x48xf32> to vector<1x1x48xf32>
    %1084 = vector.shape_cast %1083 : vector<1x1x48xf32> to vector<1x48xf32>
    %1085 = vector.broadcast %1084 : vector<1x48xf32> to vector<8x48xf32>
    %1086 = arith.addf %1082, %1085 : vector<8x48xf32>
    %1087 = arith.index_cast %c7_i32 : i32 to index
    %c0_454 = arith.constant 0 : index
    %c0_455 = arith.constant 0 : index
    %1088 = vector.load %arg10[%1087, %c0_454, %c0_455] : memref<8x8x16xf32, #tpu.memory_space<vmem>>, vector<1x8x16xf32>
    %1089 = vector.shape_cast %1088 : vector<1x8x16xf32> to vector<8x16xf32>
    %1090 = vector.extract_strided_slice %1086 {offsets = [0, 0], sizes = [8, 16], strides = [1, 1]} : vector<8x48xf32> to vector<8x16xf32>
    %1091 = arith.addf %1089, %1090 : vector<8x16xf32>
    %1092 = arith.negf %1091 : vector<8x16xf32>
    %1093 = math.exp %1092 : vector<8x16xf32>
    %cst_456 = arith.constant 1.000000e+00 : f32
    %1094 = vector.broadcast %cst_456 : f32 to vector<8x16xf32>
    %1095 = arith.addf %1094, %1093 : vector<8x16xf32>
    %1096 = arith.divf %1094, %1095 : vector<8x16xf32>
    %1097 = arith.index_cast %c7_i32 : i32 to index
    %c0_457 = arith.constant 0 : index
    %c0_458 = arith.constant 0 : index
    %1098 = vector.load %arg11[%1097, %c0_457, %c0_458] : memref<8x8x16xf32, #tpu.memory_space<vmem>>, vector<1x8x16xf32>
    %1099 = vector.shape_cast %1098 : vector<1x8x16xf32> to vector<8x16xf32>
    %1100 = vector.extract_strided_slice %1086 {offsets = [0, 16], sizes = [8, 16], strides = [1, 1]} : vector<8x48xf32> to vector<8x16xf32>
    %1101 = arith.addf %1099, %1100 : vector<8x16xf32>
    %1102 = arith.negf %1101 : vector<8x16xf32>
    %1103 = math.exp %1102 : vector<8x16xf32>
    %cst_459 = arith.constant 1.000000e+00 : f32
    %1104 = vector.broadcast %cst_459 : f32 to vector<8x16xf32>
    %1105 = arith.addf %1104, %1103 : vector<8x16xf32>
    %1106 = arith.divf %1104, %1105 : vector<8x16xf32>
    %1107 = arith.index_cast %c7_i32 : i32 to index
    %c0_460 = arith.constant 0 : index
    %c0_461 = arith.constant 0 : index
    %1108 = vector.load %arg12[%1107, %c0_460, %c0_461] : memref<8x8x16xf32, #tpu.memory_space<vmem>>, vector<1x8x16xf32>
    %1109 = vector.shape_cast %1108 : vector<1x8x16xf32> to vector<8x16xf32>
    %1110 = vector.extract_strided_slice %1086 {offsets = [0, 32], sizes = [8, 16], strides = [1, 1]} : vector<8x48xf32> to vector<8x16xf32>
    %1111 = arith.mulf %1096, %1110 : vector<8x16xf32>
    %1112 = arith.addf %1109, %1111 : vector<8x16xf32>
    %1113 = math.tanh %1112 : vector<8x16xf32>
    %cst_462 = arith.constant 1.000000e+00 : f32
    %1114 = vector.broadcast %cst_462 : f32 to vector<8x16xf32>
    %1115 = arith.subf %1114, %1106 : vector<8x16xf32>
    %1116 = arith.mulf %1115, %1113 : vector<8x16xf32>
    %1117 = arith.mulf %1106, %1078 : vector<8x16xf32>
    %1118 = arith.addf %1116, %1117 : vector<8x16xf32>
    %c0_463 = arith.constant 0 : index
    %c0_464 = arith.constant 0 : index
    %1119 = vector.load %arg17[%c0_463, %c0_464] : memref<8x16xf32, #tpu.memory_space<vmem>>, vector<8x16xf32>
    tpu.vector_store %arg17[%c0_463, %c0_464], %1118 {strides = array<i32>} : memref<8x16xf32, #tpu.memory_space<vmem>>, vector<8x16xf32>,
    %c0_465 = arith.constant 0 : index
    %c0_466 = arith.constant 0 : index
    %1120 = vector.load %arg18[%c0_465, %c0_466] : memref<8x16xf32, #tpu.memory_space<vmem>>, vector<8x16xf32>
    %1121 = arith.truncf %1120 : vector<8x16xf32> to vector<8x16xbf16>
    %1122 = vector.extract_strided_slice %89 {offsets = [2, 0, 0], sizes = [1, 16, 48], strides = [1, 1, 1]} : vector<3x16x48xbf16> to vector<1x16x48xbf16>
    %1123 = vector.shape_cast %1122 : vector<1x16x48xbf16> to vector<16x48xbf16>
    %cst_467 = arith.constant dense<0.000000e+00> : vector<8x48xf32>
    %1124 = tpu.matmul %1121, %1123, %cst_467 {dimension_numbers = #tpu.dot_dimension_numbers<[1], [0], [0], [1], [0, 0, 1, 1], [], []>} : vector<8x16xbf16>, vector<16x48xbf16>, vector<8x48xf32> -> vector<8x48xf32>
    %1125 = vector.extract_strided_slice %90 {offsets = [2, 0, 0], sizes = [1, 1, 48], strides = [1, 1, 1]} : vector<3x1x48xf32> to vector<1x1x48xf32>
    %1126 = vector.shape_cast %1125 : vector<1x1x48xf32> to vector<1x48xf32>
    %1127 = vector.broadcast %1126 : vector<1x48xf32> to vector<8x48xf32>
    %1128 = arith.addf %1124, %1127 : vector<8x48xf32>
    %1129 = arith.index_cast %c7_i32 : i32 to index
    %c0_468 = arith.constant 0 : index
    %c0_469 = arith.constant 0 : index
    %1130 = vector.load %arg13[%1129, %c0_468, %c0_469] : memref<8x8x16xf32, #tpu.memory_space<vmem>>, vector<1x8x16xf32>
    %1131 = vector.shape_cast %1130 : vector<1x8x16xf32> to vector<8x16xf32>
    %1132 = vector.extract_strided_slice %1128 {offsets = [0, 0], sizes = [8, 16], strides = [1, 1]} : vector<8x48xf32> to vector<8x16xf32>
    %1133 = arith.addf %1131, %1132 : vector<8x16xf32>
    %1134 = arith.negf %1133 : vector<8x16xf32>
    %1135 = math.exp %1134 : vector<8x16xf32>
    %cst_470 = arith.constant 1.000000e+00 : f32
    %1136 = vector.broadcast %cst_470 : f32 to vector<8x16xf32>
    %1137 = arith.addf %1136, %1135 : vector<8x16xf32>
    %1138 = arith.divf %1136, %1137 : vector<8x16xf32>
    %1139 = arith.index_cast %c7_i32 : i32 to index
    %c0_471 = arith.constant 0 : index
    %c0_472 = arith.constant 0 : index
    %1140 = vector.load %arg14[%1139, %c0_471, %c0_472] : memref<8x8x16xf32, #tpu.memory_space<vmem>>, vector<1x8x16xf32>
    %1141 = vector.shape_cast %1140 : vector<1x8x16xf32> to vector<8x16xf32>
    %1142 = vector.extract_strided_slice %1128 {offsets = [0, 16], sizes = [8, 16], strides = [1, 1]} : vector<8x48xf32> to vector<8x16xf32>
    %1143 = arith.addf %1141, %1142 : vector<8x16xf32>
    %1144 = arith.negf %1143 : vector<8x16xf32>
    %1145 = math.exp %1144 : vector<8x16xf32>
    %cst_473 = arith.constant 1.000000e+00 : f32
    %1146 = vector.broadcast %cst_473 : f32 to vector<8x16xf32>
    %1147 = arith.addf %1146, %1145 : vector<8x16xf32>
    %1148 = arith.divf %1146, %1147 : vector<8x16xf32>
    %1149 = arith.index_cast %c7_i32 : i32 to index
    %c0_474 = arith.constant 0 : index
    %c0_475 = arith.constant 0 : index
    %1150 = vector.load %arg15[%1149, %c0_474, %c0_475] : memref<8x8x16xf32, #tpu.memory_space<vmem>>, vector<1x8x16xf32>
    %1151 = vector.shape_cast %1150 : vector<1x8x16xf32> to vector<8x16xf32>
    %1152 = vector.extract_strided_slice %1128 {offsets = [0, 32], sizes = [8, 16], strides = [1, 1]} : vector<8x48xf32> to vector<8x16xf32>
    %1153 = arith.mulf %1138, %1152 : vector<8x16xf32>
    %1154 = arith.addf %1151, %1153 : vector<8x16xf32>
    %1155 = math.tanh %1154 : vector<8x16xf32>
    %cst_476 = arith.constant 1.000000e+00 : f32
    %1156 = vector.broadcast %cst_476 : f32 to vector<8x16xf32>
    %1157 = arith.subf %1156, %1148 : vector<8x16xf32>
    %1158 = arith.mulf %1157, %1155 : vector<8x16xf32>
    %1159 = arith.mulf %1148, %1120 : vector<8x16xf32>
    %1160 = arith.addf %1158, %1159 : vector<8x16xf32>
    %c0_477 = arith.constant 0 : index
    %c0_478 = arith.constant 0 : index
    %1161 = vector.load %arg18[%c0_477, %c0_478] : memref<8x16xf32, #tpu.memory_space<vmem>>, vector<8x16xf32>
    tpu.vector_store %arg18[%c0_477, %c0_478], %1160 {strides = array<i32>} : memref<8x16xf32, #tpu.memory_space<vmem>>, vector<8x16xf32>,
    %1162 = vector.shape_cast %1076 : vector<8x16xf32> to vector<1x8x16xf32>
    %1163 = vector.shape_cast %1118 : vector<8x16xf32> to vector<1x8x16xf32>
    %1164 = vector.shape_cast %1160 : vector<8x16xf32> to vector<1x8x16xf32>
    %1165 = tpu.concatenate %1162, %1163, %1164 in 0 : vector<1x8x16xf32>, vector<1x8x16xf32>, vector<1x8x16xf32> -> vector<3x8x16xf32>
    %1166 = arith.truncf %1165 : vector<3x8x16xf32> to vector<3x8x16xbf16>
    %1167 = arith.index_cast %c7_i32 : i32 to index
    %c0_479 = arith.constant 0 : index
    %c0_480 = arith.constant 0 : index
    %c0_481 = arith.constant 0 : index
    %1168 = vector.load %arg6[%1167, %c0_479, %c0_480, %c0_481] : memref<8x3x8x16xbf16, #tpu.memory_space<vmem>>, vector<1x3x8x16xbf16>
    %1169 = vector.shape_cast %1168 : vector<1x3x8x16xbf16> to vector<3x8x16xbf16>
    %1170 = vector.shape_cast %1166 : vector<3x8x16xbf16> to vector<1x3x8x16xbf16>
    tpu.vector_store %arg6[%1167, %c0_479, %c0_480, %c0_481], %1170 {strides = array<i32>} : memref<8x3x8x16xbf16, #tpu.memory_space<vmem>>, vector<1x3x8x16xbf16>,
    %c8_i32 = arith.constant 8 : i32
    return
  }
  func.func @transform_0(%arg0: i32) -> (i32, i32, i32) {
    %c0_i32 = arith.constant 0 : i32
    %c0_i32_0 = arith.constant 0 : i32
    %c0_i32_1 = arith.constant 0 : i32
    return %c0_i32, %arg0, %c0_i32_0 : i32, i32, i32
  }
  func.func @transform_1(%arg0: i32) -> (i32, i32, i32, i32) {
    %c0_i32 = arith.constant 0 : i32
    %c0_i32_0 = arith.constant 0 : i32
    %c0_i32_1 = arith.constant 0 : i32
    %c0_i32_2 = arith.constant 0 : i32
    %c0_i32_3 = arith.constant 0 : i32
    return %c0_i32, %c0_i32_0, %c0_i32_1, %c0_i32_2 : i32, i32, i32, i32
  }
  func.func @transform_2(%arg0: i32) -> (i32, i32, i32, i32) {
    %c0_i32 = arith.constant 0 : i32
    %c0_i32_0 = arith.constant 0 : i32
    %c0_i32_1 = arith.constant 0 : i32
    %c0_i32_2 = arith.constant 0 : i32
    %c0_i32_3 = arith.constant 0 : i32
    return %c0_i32, %c0_i32_0, %c0_i32_1, %c0_i32_2 : i32, i32, i32, i32
  }
  func.func @transform_3(%arg0: i32) -> (i32, i32, i32) {
    %c0_i32 = arith.constant 0 : i32
    %c0_i32_0 = arith.constant 0 : i32
    %c0_i32_1 = arith.constant 0 : i32
    %c0_i32_2 = arith.constant 0 : i32
    return %c0_i32, %c0_i32_0, %c0_i32_1 : i32, i32, i32
  }
  func.func @transform_4(%arg0: i32) -> (i32, i32, i32) {
    %c0_i32 = arith.constant 0 : i32
    %c0_i32_0 = arith.constant 0 : i32
    %c0_i32_1 = arith.constant 0 : i32
    %c0_i32_2 = arith.constant 0 : i32
    return %c0_i32, %c0_i32_0, %c0_i32_1 : i32, i32, i32
  }
  func.func @transform_5(%arg0: i32) -> (i32, i32, i32, i32) {
    %c0_i32 = arith.constant 0 : i32
    %c0_i32_0 = arith.constant 0 : i32
    %c0_i32_1 = arith.constant 0 : i32
    %c0_i32_2 = arith.constant 0 : i32
    return %c0_i32, %c0_i32_0, %arg0, %c0_i32_1 : i32, i32, i32, i32
  }
}

module attributes {stable_mosaic.version = 11 : i64} {
  func.func @_post_kernel(%arg0: i32, %arg1: memref<48x16xbf16, #tpu.memory_space<vmem>>, %arg2: memref<48x16xf32, #tpu.memory_space<vmem>>, %arg3: memref<16x16xbf16, #tpu.memory_space<vmem>>, %arg4: memref<1x16xf32, #tpu.memory_space<vmem>>, %arg5: memref<1x16xf32, #tpu.memory_space<vmem>>, %arg6: memref<1x16xf32, #tpu.memory_space<vmem>>, %arg7: memref<16x64xbf16, #tpu.memory_space<vmem>>, %arg8: memref<1x64xf32, #tpu.memory_space<vmem>>, %arg9: memref<64x16xbf16, #tpu.memory_space<vmem>>, %arg10: memref<1x16xf32, #tpu.memory_space<vmem>>, %arg11: memref<1x16xf32, #tpu.memory_space<vmem>>, %arg12: memref<1x16xf32, #tpu.memory_space<vmem>>, %arg13: memref<48x16xf32, #tpu.memory_space<vmem>>) attributes {dimension_semantics = [#tpu.dimension_semantics<parallel>], iteration_bounds = array<i64: 2>, scalar_prefetch = 0 : i64, scratch_operands = 0 : i64, tpu.core_type = #tpu.core_type<tc>, window_params = [{transform_indices = @transform_0, window_bounds = array<i64: 48, 16>}, {transform_indices = @transform_1, window_bounds = array<i64: 48, 16>}, {pipeline_mode = #tpu.pipeline_mode<synchronous>, transform_indices = @transform_2, window_bounds = array<i64: 16, 16>}, {pipeline_mode = #tpu.pipeline_mode<synchronous>, transform_indices = @transform_3, window_bounds = array<i64: 1, 16>}, {pipeline_mode = #tpu.pipeline_mode<synchronous>, transform_indices = @transform_4, window_bounds = array<i64: 1, 16>}, {pipeline_mode = #tpu.pipeline_mode<synchronous>, transform_indices = @transform_5, window_bounds = array<i64: 1, 16>}, {pipeline_mode = #tpu.pipeline_mode<synchronous>, transform_indices = @transform_6, window_bounds = array<i64: 16, 64>}, {pipeline_mode = #tpu.pipeline_mode<synchronous>, transform_indices = @transform_7, window_bounds = array<i64: 1, 64>}, {pipeline_mode = #tpu.pipeline_mode<synchronous>, transform_indices = @transform_8, window_bounds = array<i64: 64, 16>}, {pipeline_mode = #tpu.pipeline_mode<synchronous>, transform_indices = @transform_9, window_bounds = array<i64: 1, 16>}, {pipeline_mode = #tpu.pipeline_mode<synchronous>, transform_indices = @transform_10, window_bounds = array<i64: 1, 16>}, {pipeline_mode = #tpu.pipeline_mode<synchronous>, transform_indices = @transform_11, window_bounds = array<i64: 1, 16>}, {transform_indices = @transform_12, window_bounds = array<i64: 48, 16>}]} {
    %c0 = arith.constant 0 : index
    %c0_0 = arith.constant 0 : index
    %0 = vector.load %arg1[%c0, %c0_0] : memref<48x16xbf16, #tpu.memory_space<vmem>>, vector<48x16xbf16>
    %c0_1 = arith.constant 0 : index
    %c0_2 = arith.constant 0 : index
    %1 = vector.load %arg2[%c0_1, %c0_2] : memref<48x16xf32, #tpu.memory_space<vmem>>, vector<48x16xf32>
    %c0_3 = arith.constant 0 : index
    %c0_4 = arith.constant 0 : index
    %2 = vector.load %arg3[%c0_3, %c0_4] : memref<16x16xbf16, #tpu.memory_space<vmem>>, vector<16x16xbf16>
    %cst = arith.constant dense<0.000000e+00> : vector<48x16xf32>
    %3 = tpu.matmul %0, %2, %cst {dimension_numbers = #tpu.dot_dimension_numbers<[1], [0], [0], [1], [0, 0, 1, 1], [], []>} : vector<48x16xbf16>, vector<16x16xbf16>, vector<48x16xf32> -> vector<48x16xf32>
    %c0_5 = arith.constant 0 : index
    %c0_6 = arith.constant 0 : index
    %4 = vector.load %arg4[%c0_5, %c0_6] : memref<1x16xf32, #tpu.memory_space<vmem>>, vector<1x16xf32>
    %5 = vector.broadcast %4 : vector<1x16xf32> to vector<48x16xf32>
    %6 = arith.addf %3, %5 : vector<48x16xf32>
    %7 = arith.addf %1, %6 : vector<48x16xf32>
    %c0_7 = arith.constant 0 : index
    %c0_8 = arith.constant 0 : index
    %8 = vector.load %arg5[%c0_7, %c0_8] : memref<1x16xf32, #tpu.memory_space<vmem>>, vector<1x16xf32>
    %c0_9 = arith.constant 0 : index
    %c0_10 = arith.constant 0 : index
    %9 = vector.load %arg6[%c0_9, %c0_10] : memref<1x16xf32, #tpu.memory_space<vmem>>, vector<1x16xf32>
    %cst_11 = arith.constant dense<0.000000e+00> : vector<48xf32>
    %10 = vector.multi_reduction <add>, %7, %cst_11 [1] : vector<48x16xf32> to vector<48xf32>
    %11 = vector.shape_cast %10 : vector<48xf32> to vector<48x1xf32>
    %cst_12 = arith.constant 1.600000e+01 : f32
    %12 = vector.broadcast %cst_12 : f32 to vector<48x1xf32>
    %13 = arith.divf %11, %12 : vector<48x1xf32>
    %14 = vector.broadcast %13 : vector<48x1xf32> to vector<48x16xf32>
    %15 = arith.subf %7, %14 : vector<48x16xf32>
    %16 = arith.mulf %15, %15 : vector<48x16xf32>
    %cst_13 = arith.constant dense<0.000000e+00> : vector<48xf32>
    %17 = vector.multi_reduction <add>, %16, %cst_13 [1] : vector<48x16xf32> to vector<48xf32>
    %18 = vector.shape_cast %17 : vector<48xf32> to vector<48x1xf32>
    %cst_14 = arith.constant 1.600000e+01 : f32
    %19 = vector.broadcast %cst_14 : f32 to vector<48x1xf32>
    %20 = arith.divf %18, %19 : vector<48x1xf32>
    %21 = vector.broadcast %13 : vector<48x1xf32> to vector<48x16xf32>
    %22 = arith.subf %7, %21 : vector<48x16xf32>
    %cst_15 = arith.constant 9.99999974E-6 : f32
    %23 = vector.broadcast %cst_15 : f32 to vector<48x1xf32>
    %24 = arith.addf %20, %23 : vector<48x1xf32>
    %25 = math.rsqrt %24 : vector<48x1xf32>
    %26 = vector.broadcast %25 : vector<48x1xf32> to vector<48x16xf32>
    %27 = arith.mulf %22, %26 : vector<48x16xf32>
    %28 = vector.broadcast %8 : vector<1x16xf32> to vector<48x16xf32>
    %29 = arith.mulf %27, %28 : vector<48x16xf32>
    %30 = vector.broadcast %9 : vector<1x16xf32> to vector<48x16xf32>
    %31 = arith.addf %29, %30 : vector<48x16xf32>
    %32 = arith.truncf %31 : vector<48x16xf32> to vector<48x16xbf16>
    %c0_16 = arith.constant 0 : index
    %c0_17 = arith.constant 0 : index
    %33 = vector.load %arg7[%c0_16, %c0_17] : memref<16x64xbf16, #tpu.memory_space<vmem>>, vector<16x64xbf16>
    %cst_18 = arith.constant dense<0.000000e+00> : vector<48x64xf32>
    %34 = tpu.matmul %32, %33, %cst_18 {dimension_numbers = #tpu.dot_dimension_numbers<[1], [0], [0], [1], [0, 0, 1, 1], [], []>} : vector<48x16xbf16>, vector<16x64xbf16>, vector<48x64xf32> -> vector<48x64xf32>
    %c0_19 = arith.constant 0 : index
    %c0_20 = arith.constant 0 : index
    %35 = vector.load %arg8[%c0_19, %c0_20] : memref<1x64xf32, #tpu.memory_space<vmem>>, vector<1x64xf32>
    %36 = vector.broadcast %35 : vector<1x64xf32> to vector<48x64xf32>
    %37 = arith.addf %34, %36 : vector<48x64xf32>
    %cst_21 = arith.constant 0.000000e+00 : f32
    %38 = vector.broadcast %cst_21 : f32 to vector<48x64xf32>
    %39 = arith.maximumf %37, %38 : vector<48x64xf32>
    %40 = arith.truncf %39 : vector<48x64xf32> to vector<48x64xbf16>
    %c0_22 = arith.constant 0 : index
    %c0_23 = arith.constant 0 : index
    %41 = vector.load %arg9[%c0_22, %c0_23] : memref<64x16xbf16, #tpu.memory_space<vmem>>, vector<64x16xbf16>
    %cst_24 = arith.constant dense<0.000000e+00> : vector<48x16xf32>
    %42 = tpu.matmul %40, %41, %cst_24 {dimension_numbers = #tpu.dot_dimension_numbers<[1], [0], [0], [1], [0, 0, 1, 1], [], []>} : vector<48x64xbf16>, vector<64x16xbf16>, vector<48x16xf32> -> vector<48x16xf32>
    %c0_25 = arith.constant 0 : index
    %c0_26 = arith.constant 0 : index
    %43 = vector.load %arg10[%c0_25, %c0_26] : memref<1x16xf32, #tpu.memory_space<vmem>>, vector<1x16xf32>
    %44 = vector.broadcast %43 : vector<1x16xf32> to vector<48x16xf32>
    %45 = arith.addf %42, %44 : vector<48x16xf32>
    %46 = arith.addf %31, %45 : vector<48x16xf32>
    %c0_27 = arith.constant 0 : index
    %c0_28 = arith.constant 0 : index
    %47 = vector.load %arg11[%c0_27, %c0_28] : memref<1x16xf32, #tpu.memory_space<vmem>>, vector<1x16xf32>
    %c0_29 = arith.constant 0 : index
    %c0_30 = arith.constant 0 : index
    %48 = vector.load %arg12[%c0_29, %c0_30] : memref<1x16xf32, #tpu.memory_space<vmem>>, vector<1x16xf32>
    %cst_31 = arith.constant dense<0.000000e+00> : vector<48xf32>
    %49 = vector.multi_reduction <add>, %46, %cst_31 [1] : vector<48x16xf32> to vector<48xf32>
    %50 = vector.shape_cast %49 : vector<48xf32> to vector<48x1xf32>
    %cst_32 = arith.constant 1.600000e+01 : f32
    %51 = vector.broadcast %cst_32 : f32 to vector<48x1xf32>
    %52 = arith.divf %50, %51 : vector<48x1xf32>
    %53 = vector.broadcast %52 : vector<48x1xf32> to vector<48x16xf32>
    %54 = arith.subf %46, %53 : vector<48x16xf32>
    %55 = arith.mulf %54, %54 : vector<48x16xf32>
    %cst_33 = arith.constant dense<0.000000e+00> : vector<48xf32>
    %56 = vector.multi_reduction <add>, %55, %cst_33 [1] : vector<48x16xf32> to vector<48xf32>
    %57 = vector.shape_cast %56 : vector<48xf32> to vector<48x1xf32>
    %cst_34 = arith.constant 1.600000e+01 : f32
    %58 = vector.broadcast %cst_34 : f32 to vector<48x1xf32>
    %59 = arith.divf %57, %58 : vector<48x1xf32>
    %60 = vector.broadcast %52 : vector<48x1xf32> to vector<48x16xf32>
    %61 = arith.subf %46, %60 : vector<48x16xf32>
    %cst_35 = arith.constant 9.99999974E-6 : f32
    %62 = vector.broadcast %cst_35 : f32 to vector<48x1xf32>
    %63 = arith.addf %59, %62 : vector<48x1xf32>
    %64 = math.rsqrt %63 : vector<48x1xf32>
    %65 = vector.broadcast %64 : vector<48x1xf32> to vector<48x16xf32>
    %66 = arith.mulf %61, %65 : vector<48x16xf32>
    %67 = vector.broadcast %47 : vector<1x16xf32> to vector<48x16xf32>
    %68 = arith.mulf %66, %67 : vector<48x16xf32>
    %69 = vector.broadcast %48 : vector<1x16xf32> to vector<48x16xf32>
    %70 = arith.addf %68, %69 : vector<48x16xf32>
    %c0_36 = arith.constant 0 : index
    %c0_37 = arith.constant 0 : index
    %71 = vector.load %arg13[%c0_36, %c0_37] : memref<48x16xf32, #tpu.memory_space<vmem>>, vector<48x16xf32>
    tpu.vector_store %arg13[%c0_36, %c0_37], %70 {strides = array<i32>} : memref<48x16xf32, #tpu.memory_space<vmem>>, vector<48x16xf32>,
    return
  }
  func.func @transform_0(%arg0: i32) -> (i32, i32) {
    %c0_i32 = arith.constant 0 : i32
    %c0_i32_0 = arith.constant 0 : i32
    return %arg0, %c0_i32 : i32, i32
  }
  func.func @transform_1(%arg0: i32) -> (i32, i32) {
    %c0_i32 = arith.constant 0 : i32
    %c0_i32_0 = arith.constant 0 : i32
    return %arg0, %c0_i32 : i32, i32
  }
  func.func @transform_2(%arg0: i32) -> (i32, i32) {
    %c0_i32 = arith.constant 0 : i32
    %c0_i32_0 = arith.constant 0 : i32
    %c0_i32_1 = arith.constant 0 : i32
    return %c0_i32, %c0_i32_0 : i32, i32
  }
  func.func @transform_3(%arg0: i32) -> (i32, i32) {
    %c0_i32 = arith.constant 0 : i32
    %c0_i32_0 = arith.constant 0 : i32
    %c0_i32_1 = arith.constant 0 : i32
    return %c0_i32, %c0_i32_0 : i32, i32
  }
  func.func @transform_4(%arg0: i32) -> (i32, i32) {
    %c0_i32 = arith.constant 0 : i32
    %c0_i32_0 = arith.constant 0 : i32
    %c0_i32_1 = arith.constant 0 : i32
    return %c0_i32, %c0_i32_0 : i32, i32
  }
  func.func @transform_5(%arg0: i32) -> (i32, i32) {
    %c0_i32 = arith.constant 0 : i32
    %c0_i32_0 = arith.constant 0 : i32
    %c0_i32_1 = arith.constant 0 : i32
    return %c0_i32, %c0_i32_0 : i32, i32
  }
  func.func @transform_6(%arg0: i32) -> (i32, i32) {
    %c0_i32 = arith.constant 0 : i32
    %c0_i32_0 = arith.constant 0 : i32
    %c0_i32_1 = arith.constant 0 : i32
    return %c0_i32, %c0_i32_0 : i32, i32
  }
  func.func @transform_7(%arg0: i32) -> (i32, i32) {
    %c0_i32 = arith.constant 0 : i32
    %c0_i32_0 = arith.constant 0 : i32
    %c0_i32_1 = arith.constant 0 : i32
    return %c0_i32, %c0_i32_0 : i32, i32
  }
  func.func @transform_8(%arg0: i32) -> (i32, i32) {
    %c0_i32 = arith.constant 0 : i32
    %c0_i32_0 = arith.constant 0 : i32
    %c0_i32_1 = arith.constant 0 : i32
    return %c0_i32, %c0_i32_0 : i32, i32
  }
  func.func @transform_9(%arg0: i32) -> (i32, i32) {
    %c0_i32 = arith.constant 0 : i32
    %c0_i32_0 = arith.constant 0 : i32
    %c0_i32_1 = arith.constant 0 : i32
    return %c0_i32, %c0_i32_0 : i32, i32
  }
  func.func @transform_10(%arg0: i32) -> (i32, i32) {
    %c0_i32 = arith.constant 0 : i32
    %c0_i32_0 = arith.constant 0 : i32
    %c0_i32_1 = arith.constant 0 : i32
    return %c0_i32, %c0_i32_0 : i32, i32
  }
  func.func @transform_11(%arg0: i32) -> (i32, i32) {
    %c0_i32 = arith.constant 0 : i32
    %c0_i32_0 = arith.constant 0 : i32
    %c0_i32_1 = arith.constant 0 : i32
    return %c0_i32, %c0_i32_0 : i32, i32
  }
  func.func @transform_12(%arg0: i32) -> (i32, i32) {
    %c0_i32 = arith.constant 0 : i32
    %c0_i32_0 = arith.constant 0 : i32
    return %arg0, %c0_i32 : i32, i32
  }
}

</mosaic_0001>

<bundles_post_ra>
// kernel: tem_self_attention_forward.5
= control target key start
LH: loop header
LB: loop body
LE: loop exit
PB: predicated region body
PF: predicated region fallthrough
CT: control target
= control target key end

     0   :  { %s1261_s21 = smov 0   ;;  %s1447_s0 = inlined_call_operand.vmem [shape: bf16[96,16], index: 0, kind: input, shape index: {}]   ;;  %s1448_s1 = inlined_call_operand.vmem [shape: f32[96,16], index: 1, kind: input, shape index: {}]   ;;  %s1449_s2 = inlined_call_operand.vmem [shape: bf16[16,16], index: 2, kind: input, shape index: {}]   ;;  %s1450_s3 = inlined_call_operand.vmem [shape: f32[1,16], index: 3, kind: input, shape index: {}]   ;;  %s1451_s4 = inlined_call_operand.vmem [shape: f32[1,16], index: 4, kind: input, shape index: {}]   ;;  %s1452_s5 = inlined_call_operand.vmem [shape: f32[1,16], index: 5, kind: input, shape index: {}]   ;;  %s1453_s6 = inlined_call_operand.vmem [shape: bf16[16,64], index: 6, kind: input, shape index: {}]   ;;  %s1454_s7 = inlined_call_operand.vmem [shape: f32[1,64], index: 7, kind: input, shape index: {}]   ;;  %s1455_s8 = inlined_call_operand.vmem [shape: bf16[64,16], index: 8, kind: input, shape index: {}]   ;;  %s1456_s9 = inlined_call_operand.vmem [shape: f32[1,16], index: 9, kind: input, shape index: {}]   ;;  %s1457_s10 = inlined_call_operand.vmem [shape: f32[1,16], index: 10, kind: input, shape index: {}]   ;;  %s1458_s11 = inlined_call_operand.vmem [shape: f32[1,16], index: 11, kind: input, shape index: {}]   ;;  %s1459_s12 = inlined_call_operand.vmem [shape: f32[96,16], index: 12, kind: output, shape index: {}]  }
   0x1 LB: > { %s1043_s22 = sadd.s32 4294967295, %s1192_s21   ;;  %p1047_p0 = scmp.ge.s32.totalorder %s1192_s21, 1  ;;  %s1192_s21 = sphi %s1261_s21, %s22_s21  }
   0x2   : > { %p374_p1 = scmp.lt.s32.totalorder %s1192_s21, 3 }
   0x4   : > { %p375_p2 = pnand %p1047_p0, %p374_p1 }
   0x5   : > { %v1153_v0 = vld [vmem:[%s1449_s2] sm:$0xff] (!%p375_p2)   ;;  %v1194_v1 = vmov (!%p375_p2), 0.0   ;;  %s421_s25 = smul.u32 (!%p375_p2), 6, %s1043_s22  ;;  %vm1195_vm0 = vmmov (!%p375_p2), 0   ;;  %vm482_vm1 = vcmask (!%p375_p2), 130048   ;;  %vm792_vm2 = vcmask (!%p375_p2), 523264  }
   0x6   : > { %378 = sbr.rel (%p375_p2) target bundleno = 1320 (0x528), region = 68  ;;  %1093 = vmatprep.subr.bf16.mxu0 (!%p375_p2), %v1194_v1  ;;  %1141 = vmatprep.subr.bf16.mxu1 (!%p375_p2), %v1194_v1  ;;  %v1051_v5 = vld [vmem:[%s1450_s3] ss:$0 sm:$0xff] (!%p375_p2) }
   0x7   : > { %1094 = vmatpush3.bf16.msra.mxu0 (!%p375_p2), %v1153_v0  ;;  %1095 = vmatprep.mubr.msk.bf16.mxu0 (!%p375_p2), %vm1195_vm0, %v1194_v1  ;;  %p422_p3 = scmp.lt.s32.totalorder (!%p375_p2), %s421_s25, 11 }
   0x8   : > { %1142 = vmatpush3.bf16.msra.mxu1 (!%p375_p2), %v1153_v0  ;;  %1103 = vmatprep.mubr.msk.bf16.mxu1 (!%p375_p2), %vm1195_vm0, %v1194_v1 }
   0x9   : > { %1107 = vmatprep.subr.bf16.mxu1 (!%p375_p2), %v1194_v1  ;;  %1121 = vmatprep.subr.bf16.mxu0 (!%p375_p2), %v1194_v1 }
   0xd   : > { %s1461_s25 = smov (!%p422_p3, %s421_s25), 11 }
   0xe   : > { %s1048_s26 = sshll.u32 %s1461_s25, 2  ;;  %s1049_s30 = sshll.u32 %s1461_s25, 3 }
   0xf   : > { %s425_s29 = scalar_lea.vmem %s1447_s0, %s1048_s26  ;;  %s1301_s15 = scalar_lea.vmem %s1448_s1, %s1049_s30 }
  0x10   : > { %v1154_v2 = vld [vmem:[%s425_s29] sm:$0xff]   ;;  %v1156_v3 = vld [vmem:[%s425_s29 + $0x10] sm:$0xff]   ;;  %v1155_v4 = vld [vmem:[%s425_s29 + $0x8] sm:$0xff]   ;;  %s1430_s29 = scalar_lea.vmem %s1459_s12, %s1049_s30 }
  0x11   : > { %1096 = vmatmul.mubr.msk.bf16.vlgmr.msra.gmra.mrb[0].mxu0 %vm482_vm1, %v1154_v2  ;;  %1104 = vmatmul.mubr.msk.bf16.vlgmr.msra.gmra.mrb[0].mxu1 %vm482_vm1, %v1156_v3  ;;  %v446_v7 = vld [vmem:[%s1301_s15] sm:$0xff]  ;;  %v447_v12 = vld [vmem:[%s1301_s15 + $0x8] sm:$0xff]  ;;  %v448_v25 = vld [vmem:[%s1301_s15 + $0x10] sm:$0xff] }
  0x12   : > { %1099 = vmatprep.mubr.msk.bf16.mxu0 %vm1195_vm0, %v1194_v1  ;;  %1109 = vmatprep.mubr.msk.bf16.mxu1 %vm1195_vm0, %v1194_v1  ;;  %v450_v18 = vld [vmem:[%s1301_s15 + $0x20] sm:$0xff]  ;;  %v449_v30 = vld [vmem:[%s1301_s15 + $0x18] sm:$0xff]  ;;  %v451_v36 = vld [vmem:[%s1301_s15 + $0x28] sm:$0xff] }
  0x19   : > { %1100 = vmatmul.mubr.msk.bf16.gmra.mrb[4].mxu0 %vm482_vm1, %v1155_v4 }
  0x1a   : > { %1129 = vmatprep.mubr.msk.bf16.mxu0 %vm1195_vm0, %v1194_v1 }
  0xe4   : > { %v526_v6 = vpop.f32.mrb[0].mxu0  ;;  %v542_v11 = vpop.f32.mrb[0].mxu1 }
  0xe5   : > { %v527_v8 = vadd.f32 %v1051_v5, %v526_v6  ;;  %v1097_v9 = vpop.f32.mrb[1].mxu0  ;;  %v543_v16 = vadd.f32 %v1051_v5, %v542_v11  ;;  %v1105_v17 = vpop.f32.mrb[1].mxu1  ;;  %v1159_v11 = vld [vmem:[%s1455_s8 + $0x8] sm:$0xff]  }
  0xe6   : > { %v529_v10 = vpop.f32.mrb[2].mxu0  ;;  %v545_v19 = vpop.f32.mrb[2].mxu1  ;;  %v1157_v9 = vld [vmem:[%s1453_s6] sm:$0xff]  }
  0xe7   : > { %v530_v13 = vadd.f32 %v1051_v5, %v529_v10  ;;  %v1098_v14 = vpop.f32.mrb[3].mxu0  ;;  %v549_v15 = vadd.f32 %v527_v8, %v446_v7  ;;  %v1106_v22 = vpop.f32.mrb[3].mxu1  ;;  %v553_v23 = vadd.f32 %v543_v16, %v450_v18  ;;  %v546_v35 = vadd.f32 %v1051_v5, %v545_v19  ;;  %1108 = vmatpush3.bf16.msra.mxu1 %v1157_v9  ;;  %v1158_v10 = vld [vmem:[%s1455_s8] sm:$0xff]  }
  0xe8   : > { %1122 = vmatpush3.bf16.msra.mxu0 %v1158_v10 }
  0xe9   : > { %v557_v20 = vsel %vm482_vm1, %v549_v15, 0.0  ;;  %v550_v21 = vadd.f32 %v530_v13, %v447_v12  ;;  %v569_v33 = vsel %vm482_vm1, %v553_v23, 0.0  ;;  %v554_v39 = vadd.f32 %v546_v35, %v451_v36  ;;  %1123 = vmatprep.subr.bf16.mxu0 %v1194_v1  ;;  %v1060_v36 = vld [vmem:[%s1452_s5] ss:$0 sm:$0xff] }
  0xea   : > { %558 = vadd.xlane.f32.xlu0 %v557_v20 }
  0xeb   : > { %v560_v28 = vsel %vm482_vm1, %v550_v21, 0.0  ;;  %v572_v41 = vsel %vm482_vm1, %v554_v39, 0.0 }
  0xec   : > { %v534_v24 = vpop.f32.mrb[4].mxu0  ;;  %1124 = vmatpush3.bf16.msra.mxu0 %v1159_v11 }
  0xed   : > { %v535_v26 = vadd.f32 %v1051_v5, %v534_v24  ;;  %v1101_v27 = vpop.f32.mrb[5].mxu0  ;;  %1125 = vmatprep.subr.bf16.mxu0 %v1194_v1 }
  0xee   : > { %561 = vadd.xlane.f32.xlu0 %v560_v28  ;;  %v537_v29 = vpop.f32.mrb[6].mxu0 }
  0xef   : > { %v538_v31 = vadd.f32 %v1051_v5, %v537_v29  ;;  %v1102_v32 = vpop.f32.mrb[7].mxu0  ;;  %v551_v34 = vadd.f32 %v535_v26, %v448_v25 }
  0xf1   : > { %v563_v37 = vsel %vm482_vm1, %v551_v34, 0.0  ;;  %v552_v38 = vadd.f32 %v538_v31, %v449_v30  ;;  %v1059_v30 = vld [vmem:[%s1451_s4] ss:$0 sm:$0xff] }
  0xf2   : > { %570 = vadd.xlane.f32.xlu0 %v569_v33  ;;  %564 = vadd.xlane.f32.xlu1 %v563_v37 }
  0xf3   : > { %v566_v40 = vsel %vm482_vm1, %v552_v38, 0.0 }
  0xf6   : > { %567 = vadd.xlane.f32.xlu1 %v566_v40 }
  0xfa   : > { %573 = vadd.xlane.f32.xlu1 %v572_v41 }
 0x177   : > { %v559_v42 = vpop.xlane.xlu0 %558 }
 0x178   : > { %v576_v43 = vmul.f32 0.0625, %v559_v42 }
 0x17a   : > { %v582_v44 = vsub.f32 %v549_v15, %v576_v43 }
 0x17b   : > { %v562_v45 = vpop.xlane.xlu0 %561 }
 0x17c   : > { %v577_v46 = vmul.f32 0.0625, %v562_v45  ;;  %v588_v47 = vmul.f32 %v582_v44, %v582_v44 }
 0x17e   : > { %v1318_v48 = vsub.f32 %v550_v21, %v577_v46  ;;  %v594_v49 = vsel %vm482_vm1, %v588_v47, 0.0 }
 0x17f   : > { %595 = vadd.xlane.f32.xlu0 %v594_v49  ;;  %v571_v50 = vpop.xlane.xlu0 %570  ;;  %v565_v51 = vpop.xlane.xlu1 %564 }
 0x180   : > { %v580_v52 = vmul.f32 0.0625, %v571_v50  ;;  %v578_v53 = vmul.f32 0.0625, %v565_v51  ;;  %v589_v54 = vmul.f32 %v1318_v48, %v1318_v48 }
 0x182   : > { %v1323_v55 = vsub.f32 %v553_v23, %v580_v52  ;;  %v1325_v56 = vsub.f32 %v551_v34, %v578_v53  ;;  %v597_v57 = vsel %vm482_vm1, %v589_v54, 0.0 }
 0x183   : > { %598 = vadd.xlane.f32.xlu1 %v597_v57  ;;  %v568_v58 = vpop.xlane.xlu1 %567 }
 0x184   : > { %v579_v59 = vmul.f32 0.0625, %v568_v58  ;;  %v590_v60 = vmul.f32 %v1325_v56, %v1325_v56  ;;  %v592_v63 = vmul.f32 %v1323_v55, %v1323_v55 }
 0x186   : > { %v585_v61 = vsub.f32 %v552_v38, %v579_v59  ;;  %v600_v62 = vsel %vm482_vm1, %v590_v60, 0.0  ;;  %v606_v5 = vsel %vm482_vm1, %v592_v63, 0.0  ;;  %v1160_v59 = vld [vmem:[%s1455_s8 + $0x10] sm:$0xff]   ;;  %v1161_v60 = vld [vmem:[%s1455_s8 + $0x18] sm:$0xff]  }
 0x187   : > { %601 = vadd.xlane.f32.xlu0 %v600_v62  ;;  %v574_v0 = vpop.xlane.xlu1 %573  ;;  %1126 = vmatpush3.bf16.msra.mxu0 %v1160_v59 }
 0x188   : > { %v581_v2 = vmul.f32 0.0625, %v574_v0  ;;  %v591_v3 = vmul.f32 %v585_v61, %v585_v61  ;;  %1127 = vmatprep.subr.bf16.mxu0 %v1194_v1 }
 0x18a   : > { %v587_v4 = vsub.f32 %v554_v39, %v581_v2  ;;  %v603_v6 = vsel %vm482_vm1, %v591_v3, 0.0 }
 0x18b   : > { %607 = vadd.xlane.f32.xlu0 %v606_v5  ;;  %604 = vadd.xlane.f32.xlu1 %v603_v6 }
 0x18c   : > { %v593_v7 = vmul.f32 %v587_v4, %v587_v4  ;;  %1128 = vmatpush3.bf16.msra.mxu0 %v1161_v60 }
 0x18e   : > { %v609_v8 = vsel %vm482_vm1, %v593_v7, 0.0 }
 0x18f   : > { %610 = vadd.xlane.f32.xlu1 %v609_v8 }
 0x20c   : > { %v596_v12 = vpop.xlane.xlu0 %595 }
 0x20d   : > { %v612_v13 = vmul.f32 0.0625, %v596_v12 }
 0x20f   : > { %v618_v14 = vadd.f32 1e-05, %v612_v13 }
 0x210   : > { %v599_v15 = vpop.xlane.xlu1 %598 }
 0x211   : > { %1162 = vrsqrt.f32 %v618_v14  ;;  %v613_v16 = vmul.f32 0.0625, %v599_v15 }
 0x213   : > { %v619_v17 = vadd.f32 1e-05, %v613_v16 }
 0x214   : > { %v602_v18 = vpop.xlane.xlu0 %601 }
 0x215   : > { %1164 = vrsqrt.f32 %v619_v17  ;;  %v614_v19 = vmul.f32 0.0625, %v602_v18 }
 0x217   : > { %v620_v20 = vadd.f32 1e-05, %v614_v19 }
 0x218   : > { %v608_v21 = vpop.xlane.xlu0 %607  ;;  %v605_v22 = vpop.xlane.xlu1 %604 }
 0x219   : > { %1166 = vrsqrt.f32 %v620_v20  ;;  %v616_v23 = vmul.f32 0.0625, %v608_v21  ;;  %v615_v24 = vmul.f32 0.0625, %v605_v22 }
 0x21b   : > { %v1163_v25 = vpop.eup %1162  ;;  %v621_v26 = vadd.f32 1e-05, %v615_v24  ;;  %v622_v28 = vadd.f32 1e-05, %v616_v23 }
 0x21c   : > { %v630_v27 = vmul.f32 %v1163_v25, %v582_v44  ;;  %v611_v29 = vpop.xlane.xlu1 %610 }
 0x21d   : > { %v617_v31 = vmul.f32 0.0625, %v611_v29  ;;  %1168 = vrsqrt.f32 %v621_v26  ;;  %v1066_v26 = vld [vmem:[%s1456_s9] ss:$0 sm:$0xff] }
 0x21e   : > { %v642_v34 = vmul.f32 %v1059_v30, %v630_v27  ;;  %1170 = vrsqrt.f32 %v622_v28 }
 0x21f   : > { %v1165_v32 = vpop.eup %1164  ;;  %v623_v33 = vadd.f32 1e-05, %v617_v31 }
 0x220   : > { %v631_v35 = vmul.f32 %v1165_v32, %v1318_v48  ;;  %v1354_v39 = vadd.f32 %v1060_v36, %v642_v34 }
 0x221   : > { %1172 = vrsqrt.f32 %v623_v33 }
 0x222   : > { %v643_v37 = vmul.f32 %v1059_v30, %v631_v35 }
 0x223   : > { %v1167_v38 = vpop.eup %1166 }
 0x224   : > { %v1356_v40 = vadd.f32 %v1060_v36, %v643_v37  ;;  %v632_v41 = vmul.f32 %v1167_v38, %v1325_v56 }
 0x226   : > { %v660_v42 = vpack.c.bf16 %v1356_v40, %v1354_v39  ;;  %v644_v45 = vmul.f32 %v1059_v30, %v632_v41 }
 0x227   : > { %v1169_v43 = vpop.eup %1168 }
 0x228   : > { %1110 = vmatmul.mubr.msk.bf16.vlgmr.msra.gmra.mrb[4].mxu1 %vm482_vm1, %v660_v42  ;;  %v633_v44 = vmul.f32 %v1169_v43, %v585_v61  ;;  %v1171_v46 = vpop.eup %1170  ;;  %v1365_v51 = vadd.f32 %v1060_v36, %v644_v45  ;;  %v1061_v61 = vld [vmem:[%s1454_s7] ss:$0 sm:$0xff] }
 0x229   : > { %1113 = vmatprep.mubr.msk.bf16.mxu1 %vm1195_vm0, %v1194_v1  ;;  %v634_v50 = vmul.f32 %v1171_v46, %v1323_v55 }
 0x22a   : > { %v645_v48 = vmul.f32 %v1059_v30, %v633_v44 }
 0x22b   : > { %v1173_v47 = vpop.eup %1172  ;;  %v646_v56 = vmul.f32 %v1059_v30, %v634_v50 }
 0x22c   : > { %v635_v49 = vmul.f32 %v1173_v47, %v587_v4  ;;  %v1367_v52 = vadd.f32 %v1060_v36, %v645_v48 }
 0x22d   : > { %v1376_v58 = vadd.f32 %v1060_v36, %v646_v56 }
 0x22e   : > { %v661_v53 = vpack.c.bf16 %v1367_v52, %v1365_v51  ;;  %v647_v54 = vmul.f32 %v1059_v30, %v635_v49 }
 0x230   : > { %1114 = vmatmul.mubr.msk.bf16.gmra.mrb[8].mxu1 %vm482_vm1, %v661_v53  ;;  %v1374_v57 = vadd.f32 %v1060_v36, %v647_v54 }
 0x231   : > { %1117 = vmatprep.mubr.msk.bf16.mxu1 %vm1195_vm0, %v1194_v1 }
 0x232   : > { %v662_v55 = vpack.c.bf16 %v1374_v57, %v1376_v58 }
 0x238   : > { %1118 = vmatmul.mubr.msk.bf16.gmra.mrb[12].mxu1 %vm482_vm1, %v662_v55 }
 0x2fb   : > { %v721_v62 = vpop.f32.mrb[4].mxu1 }
 0x2fc   : > { %v722_v63 = vadd.f32 %v1061_v61, %v721_v62  ;;  %v1111_v0 = vpop.f32.mrb[5].mxu1 }
 0x2fd   : > { %v724_v2 = vpop.f32.mrb[6].mxu1 }
 0x2fe   : > { %v725_v3 = vadd.f32 %v1061_v61, %v724_v2  ;;  %v1112_v4 = vpop.f32.mrb[7].mxu1  ;;  %v744_v5 = vmax.f32 %v722_v63, 0.0 }
 0x300   : > { %v745_v6 = vmax.f32 %v725_v3, 0.0 }
 0x302   : > { %v750_v7 = vpack.c.bf16 %v745_v6, %v744_v5 }
 0x303   : > { %v729_v8 = vpop.f32.mrb[8].mxu1 }
 0x304   : > { %1130 = vmatmul.mubr.msk.bf16.vlgmr.msra.gmra.mrb[8].mxu0 %vm792_vm2, %v750_v7  ;;  %v730_v9 = vadd.f32 %v1061_v61, %v729_v8  ;;  %v1115_v10 = vpop.f32.mrb[9].mxu1 }
 0x305   : > { %1133 = vmatprep.mubr.msk.bf16.mxu0 %vm1195_vm0, %v1194_v1  ;;  %v732_v11 = vpop.f32.mrb[10].mxu1 }
 0x306   : > { %v733_v12 = vadd.f32 %v1061_v61, %v732_v11  ;;  %v1116_v13 = vpop.f32.mrb[11].mxu1  ;;  %v746_v14 = vmax.f32 %v730_v9, 0.0 }
 0x308   : > { %v747_v15 = vmax.f32 %v733_v12, 0.0 }
 0x30a   : > { %v751_v16 = vpack.c.bf16 %v747_v15, %v746_v14 }
 0x30b   : > { %v737_v17 = vpop.f32.mrb[12].mxu1 }
 0x30c   : > { %v738_v18 = vadd.f32 %v1061_v61, %v737_v17  ;;  %v1119_v19 = vpop.f32.mrb[13].mxu1  ;;  %1134 = vmatmul.mubr.msk.bf16.gmra.mrb[12].mxu0 %vm792_vm2, %v751_v16 }
 0x30d   : > { %v740_v20 = vpop.f32.mrb[14].mxu1  ;;  %1137 = vmatprep.mubr.msk.bf16.mxu0 %vm1195_vm0, %v1194_v1 }
 0x30e   : > { %v741_v21 = vadd.f32 %v1061_v61, %v740_v20  ;;  %v1120_v22 = vpop.f32.mrb[15].mxu1  ;;  %v748_v23 = vmax.f32 %v738_v18, 0.0 }
 0x310   : > { %v749_v24 = vmax.f32 %v741_v21, 0.0 }
 0x312   : > { %v752_v25 = vpack.c.bf16 %v749_v24, %v748_v23 }
 0x314   : > { %1138 = vmatmul.mubr.msk.bf16.gmra.mrb[16].mxu0 %vm792_vm2, %v752_v25 }
 0x3d7   : > { %v836_v27 = vpop.f32.mrb[8].mxu0 }
 0x3d8   : > { %v837_v28 = vadd.f32 %v1066_v26, %v836_v27  ;;  %v1131_v29 = vpop.f32.mrb[9].mxu0 }
 0x3d9   : > { %v839_v30 = vpop.f32.mrb[10].mxu0 }
 0x3da   : > { %v840_v31 = vadd.f32 %v1066_v26, %v839_v30  ;;  %v1132_v32 = vpop.f32.mrb[11].mxu0  ;;  %v859_v33 = vadd.f32 %v837_v28, %v1354_v39 }
 0x3dc   : > { %v867_v1 = vsel %vm482_vm1, %v859_v33, 0.0  ;;  %v860_v34 = vadd.f32 %v840_v31, %v1356_v40 }
 0x3dd   : > { %868 = vadd.xlane.f32.xlu0 %v867_v1 }
 0x3de   : > { %v870_v35 = vsel %vm482_vm1, %v860_v34, 0.0 }
 0x3df   : > { %871 = vadd.xlane.f32.xlu1 %v870_v35  ;;  %v844_v36 = vpop.f32.mrb[12].mxu0  ;;  %v1074_v35 = vld [vmem:[%s1457_s10] ss:$0 sm:$0xff] }
 0x3e0   : > { %v845_v37 = vadd.f32 %v1066_v26, %v844_v36  ;;  %v1135_v38 = vpop.f32.mrb[13].mxu0 }
 0x3e1   : > { %v847_v41 = vpop.f32.mrb[14].mxu0  ;;  %v1075_v38 = vld [vmem:[%s1458_s11] ss:$0 sm:$0xff] }
 0x3e2   : > { %v848_v42 = vadd.f32 %v1066_v26, %v847_v41  ;;  %v1136_v43 = vpop.f32.mrb[15].mxu0  ;;  %v861_v44 = vadd.f32 %v845_v37, %v1365_v51 }
 0x3e4   : > { %v873_v45 = vsel %vm482_vm1, %v861_v44, 0.0  ;;  %v862_v39 = vadd.f32 %v848_v42, %v1367_v52 }
 0x3e5   : > { %874 = vadd.xlane.f32.xlu0 %v873_v45 }
 0x3e6   : > { %v876_v46 = vsel %vm482_vm1, %v862_v39, 0.0 }
 0x3e7   : > { %877 = vadd.xlane.f32.xlu1 %v876_v46  ;;  %v852_v40 = vpop.f32.mrb[16].mxu0 }
 0x3e8   : > { %v853_v47 = vadd.f32 %v1066_v26, %v852_v40  ;;  %v1139_v48 = vpop.f32.mrb[17].mxu0 }
 0x3e9   : > { %v855_v49 = vpop.f32.mrb[18].mxu0 }
 0x3ea   : > { %v856_v50 = vadd.f32 %v1066_v26, %v855_v49  ;;  %v1140_v53 = vpop.f32.mrb[19].mxu0  ;;  %v863_v54 = vadd.f32 %v853_v47, %v1376_v58 }
 0x3ec   : > { %v879_v56 = vsel %vm482_vm1, %v863_v54, 0.0  ;;  %v864_v51 = vadd.f32 %v856_v50, %v1374_v57 }
 0x3ed   : > { %880 = vadd.xlane.f32.xlu0 %v879_v56 }
 0x3ee   : > { %v882_v55 = vsel %vm482_vm1, %v864_v51, 0.0 }
 0x3ef   : > { %883 = vadd.xlane.f32.xlu1 %v882_v55 }
 0x46a   : > { %v869_v52 = vpop.xlane.xlu0 %868 }
 0x46b   : > { %v885_v59 = vmul.f32 0.0625, %v869_v52 }
 0x46c   : > { %v872_v60 = vpop.xlane.xlu1 %871 }
 0x46d   : > { %v891_v61 = vsub.f32 %v859_v33, %v885_v59  ;;  %v886_v62 = vmul.f32 0.0625, %v872_v60 }
 0x46f   : > { %v892_v63 = vsub.f32 %v860_v34, %v886_v62  ;;  %v897_v0 = vmul.f32 %v891_v61, %v891_v61 }
 0x471   : > { %v903_v2 = vsel %vm482_vm1, %v897_v0, 0.0  ;;  %v898_v3 = vmul.f32 %v892_v63, %v892_v63 }
 0x472   : > { %904 = vadd.xlane.f32.xlu0 %v903_v2  ;;  %v875_v58 = vpop.xlane.xlu0 %874 }
 0x473   : > { %v906_v4 = vsel %vm482_vm1, %v898_v3, 0.0  ;;  %v887_v5 = vmul.f32 0.0625, %v875_v58 }
 0x474   : > { %907 = vadd.xlane.f32.xlu1 %v906_v4  ;;  %v878_v57 = vpop.xlane.xlu1 %877 }
 0x475   : > { %v893_v6 = vsub.f32 %v861_v44, %v887_v5  ;;  %v888_v7 = vmul.f32 0.0625, %v878_v57 }
 0x477   : > { %v894_v8 = vsub.f32 %v862_v39, %v888_v7  ;;  %v899_v9 = vmul.f32 %v893_v6, %v893_v6 }
 0x479   : > { %v909_v10 = vsel %vm482_vm1, %v899_v9, 0.0  ;;  %v900_v11 = vmul.f32 %v894_v8, %v894_v8 }
 0x47a   : > { %910 = vadd.xlane.f32.xlu0 %v909_v10  ;;  %v881_v12 = vpop.xlane.xlu0 %880 }
 0x47b   : > { %v889_v13 = vmul.f32 0.0625, %v881_v12  ;;  %v912_v14 = vsel %vm482_vm1, %v900_v11, 0.0 }
 0x47c   : > { %913 = vadd.xlane.f32.xlu1 %v912_v14  ;;  %v884_v15 = vpop.xlane.xlu1 %883 }
 0x47d   : > { %v895_v16 = vsub.f32 %v863_v54, %v889_v13  ;;  %v890_v17 = vmul.f32 0.0625, %v884_v15 }
 0x47f   : > { %v896_v18 = vsub.f32 %v864_v51, %v890_v17  ;;  %v901_v19 = vmul.f32 %v895_v16, %v895_v16 }
 0x481   : > { %v915_v20 = vsel %vm482_vm1, %v901_v19, 0.0  ;;  %v902_v21 = vmul.f32 %v896_v18, %v896_v18 }
 0x482   : > { %916 = vadd.xlane.f32.xlu0 %v915_v20 }
 0x483   : > { %v918_v22 = vsel %vm482_vm1, %v902_v21, 0.0 }
 0x484   : > { %919 = vadd.xlane.f32.xlu1 %v918_v22 }
 0x4ff   : > { %v905_v23 = vpop.xlane.xlu0 %904 }
 0x500   : > { %v921_v24 = vmul.f32 0.0625, %v905_v23 }
 0x501   : > { %v908_v25 = vpop.xlane.xlu1 %907 }
 0x502   : > { %v927_v26 = vadd.f32 1e-05, %v921_v24  ;;  %v922_v27 = vmul.f32 0.0625, %v908_v25 }
 0x504   : > { %1174 = vrsqrt.f32 %v927_v26  ;;  %v928_v28 = vadd.f32 1e-05, %v922_v27 }
 0x506   : > { %1176 = vrsqrt.f32 %v928_v28 }
 0x507   : > { %v911_v29 = vpop.xlane.xlu0 %910 }
 0x508   : > { %v923_v30 = vmul.f32 0.0625, %v911_v29 }
 0x509   : > { %v914_v31 = vpop.xlane.xlu1 %913 }
 0x50a   : > { %v929_v32 = vadd.f32 1e-05, %v923_v30  ;;  %v924_v33 = vmul.f32 0.0625, %v914_v31 }
 0x50c   : > { %1178 = vrsqrt.f32 %v929_v32  ;;  %v930_v1 = vadd.f32 1e-05, %v924_v33 }
 0x50e   : > { %v1175_v34 = vpop.eup %1174  ;;  %1180 = vrsqrt.f32 %v930_v1 }
 0x50f   : > { %v939_v36 = vmul.f32 %v1175_v34, %v891_v61  ;;  %v917_v41 = vpop.xlane.xlu0 %916 }
 0x510   : > { %v1177_v37 = vpop.eup %1176  ;;  %v925_v44 = vmul.f32 0.0625, %v917_v41 }
 0x511   : > { %v951_v42 = vmul.f32 %v1074_v35, %v939_v36  ;;  %v940_v43 = vmul.f32 %v1177_v37, %v892_v63  ;;  %v920_v45 = vpop.xlane.xlu1 %919 }
 0x512   : > { %v931_v40 = vadd.f32 1e-05, %v925_v44  ;;  %v926_v47 = vmul.f32 0.0625, %v920_v45 }
 0x513   : > { %v963_v39 = vadd.f32 %v1075_v38, %v951_v42  ;;  %v952_v46 = vmul.f32 %v1074_v35, %v940_v43 }
 0x514   : > { %1182 = vrsqrt.f32 %v931_v40  ;;  %v932_v49 = vadd.f32 1e-05, %v926_v47 }
 0x515   : > { %969 = vst.msk [vmem:[%s1430_s29] sm:$0xff] %vm482_vm1, %v963_v39  ;;  %v964_v48 = vadd.f32 %v1075_v38, %v952_v46 }
 0x516   : > { %v1179_v50 = vpop.eup %1178  ;;  %1184 = vrsqrt.f32 %v932_v49 }
 0x517   : > { %970 = vst.msk [vmem:[%s1430_s29 + $0x8] sm:$0xff] %vm482_vm1, %v964_v48  ;;  %v941_v53 = vmul.f32 %v1179_v50, %v893_v6 }
 0x518   : > { %v1181_v54 = vpop.eup %1180 }
 0x519   : > { %v953_v56 = vmul.f32 %v1074_v35, %v941_v53  ;;  %v942_v51 = vmul.f32 %v1181_v54, %v894_v8 }
 0x51b   : > { %v965_v55 = vadd.f32 %v1075_v38, %v953_v56  ;;  %v954_v52 = vmul.f32 %v1074_v35, %v942_v51 }
 0x51d   : > { %971 = vst.msk [vmem:[%s1430_s29 + $0x10] sm:$0xff] %vm482_vm1, %v965_v55  ;;  %v966_v59 = vadd.f32 %v1075_v38, %v954_v52 }
 0x51e   : > { %v1183_v60 = vpop.eup %1182 }
 0x51f   : > { %972 = vst.msk [vmem:[%s1430_s29 + $0x18] sm:$0xff] %vm482_vm1, %v966_v59  ;;  %v943_v61 = vmul.f32 %v1183_v60, %v895_v16 }
 0x520   : > { %v1185_v62 = vpop.eup %1184 }
 0x521   : > { %v955_v63 = vmul.f32 %v1074_v35, %v943_v61  ;;  %v944_v0 = vmul.f32 %v1185_v62, %v896_v18 }
 0x523   : > { %v967_v2 = vadd.f32 %v1075_v38, %v955_v63  ;;  %v956_v3 = vmul.f32 %v1074_v35, %v944_v0 }
 0x525   : > { %973 = vst.msk [vmem:[%s1430_s29 + $0x20] sm:$0xff] %vm482_vm1, %v967_v2  ;;  %v968_v58 = vadd.f32 %v1075_v38, %v956_v3 }
 0x527   : > { %974 = vst.msk [vmem:[%s1430_s29 + $0x28] sm:$0xff] %vm482_vm1, %v968_v58 }
 0x528 PF: > { %s22_s21 = sadd.s32 1, %s1192_s21  }
 0x529   : > { %p19_p4 = scmp.ge.s32.totalorder %s22_s21, 4  }
 0x52b   :  { %21 = sbr.rel (!%p19_p4) target bundleno = 1 (0x1), region = 101 }

// kernel: tem_self_attention_forward.4
= control target key start
LH: loop header
LB: loop body
LE: loop exit
PB: predicated region body
PF: predicated region fallthrough
CT: control target
= control target key end

     0   :  { %s5016_s15 = smov 0   ;;  %s6184_s0 = inlined_call_operand.vmem [shape: bf16[16,6,16], index: 0, kind: input, shape index: {}]   ;;  %s6185_s1 = inlined_call_operand.vmem [shape: bf16[16,6,16], index: 1, kind: input, shape index: {}]   ;;  %s6186_s2 = inlined_call_operand.vmem [shape: bf16[16,6,16], index: 2, kind: input, shape index: {}]   ;;  %s6187_s3 = inlined_call_operand.vmem [shape: f32[4,4,6,6], index: 3, kind: input, shape index: {}]   ;;  %s6188_s4 = inlined_call_operand.vmem [shape: bf16[16,6,16], index: 4, kind: output, shape index: {}]  }
   0x1 LB: > { %s4120_s16 = sadd.s32 4294967295, %s4981_s15   ;;  %p4124_p0 = scmp.ge.s32.totalorder %s4981_s15, 1  ;;  %s4981_s15 = sphi %s5016_s15, %s14_s15  }
   0x2   : > { %p185_p1 = scmp.lt.s32.totalorder %s4981_s15, 3 }
   0x4   : > { %p186_p2 = pnand %p4124_p0, %p185_p1 }
   0x6   : > { %189 = sbr.rel (%p186_p2) target bundleno = 2889 (0xb49), region = 36 }
   0xd   : > { %s4125_s17 = sshll.u32 %s4120_s16, 3  ;;  %v6189_v0 = vmov 0.0   ;;  %vm4984_vm0 = vmmov 0   ;;  %vm270_vm1 = vcmask 31744   ;;  %v647_v27 = vld [vmem:[%s6187_s3] sm:$0x3f] }
   0xe   : > { %4363 = vmatprep.subr.bf16.mxu0 %v6189_v0  ;;  %4369 = vmatprep.subr.bf16.mxu1 %v6189_v0  ;;  %p222_p3 = scmp.lt.s32.totalorder %s4125_s17, 15  ;;  %vm659_vm2 = vcmask 46080   ;;  %v648_v34 = vld [vmem:[%s6187_s3 + $0x8] sm:$0x3f]  ;;  %v649_v42 = vld [vmem:[%s6187_s3 + $0x10] sm:$0x3f] }
   0xf   : > { %4365 = vmatprep.mubr.msk.bf16.mxu0 %vm4984_vm0, %v6189_v0  ;;  %4371 = vmatprep.mubr.msk.bf16.mxu1 %vm4984_vm0, %v6189_v0  ;;  %v650_v50 = vld [vmem:[%s6187_s3 + $0x18] sm:$0x3f]  ;;  %vm760_vm3 = vcmask 1042432   ;;  %s4985_s10 = smov 124   ;;  %vm756_vm4 = vcmask 48128   ;;  %s4987_s30 = smov 116  }
  0x10   : > { %s6199_s17 = smov (!%p222_p3, %s4125_s17), 15  ;;  %s4988_s13 = smov 4   ;;  %vm4005_vm5 = vcmask 64512   ;;  %vm4014_vm6 = vcmask 97280   ;;  %vm4031_vm7 = vcmask 124928  }
  0x11   : > { %s5030_s18 = sshll.u32 %s6199_s17, 2  ;;  %s4989_s14 = smov 8  }
  0x12   : > { %s5036_s21 = scalar_lea.vmem %s6185_s1, %s5030_s18  ;;  %s5052_s24 = scalar_lea.vmem %s6184_s0, %s5030_s18 }
  0x13   : > { %v5039_v1 = vld [vmem:[%s5036_s21] sm:$0x7]  ;;  %v5042_v2 = vld [vmem:[%s5036_s21 + $0x4] sm:$0x7]  ;;  %v5057_v5 = vld [vmem:[%s5036_s21 + $0x8] sm:$0x7]  ;;  %s5203_s9 = scalar_lea.vmem %s6186_s2, %s5030_s18  ;;  %s6141_s20 = scalar_lea.vmem %s6188_s4, %s5030_s18 }
  0x14   : > { %v275_v3 = vsel %vm270_vm1, %v5039_v1, 0  ;;  %v321_v4 = vsel %vm270_vm1, %v5042_v2, 0  ;;  %v5060_v6 = vld [vmem:[%s5036_s21 + $0xc] sm:$0x7]  ;;  %v5063_v7 = vld [vmem:[%s5052_s24] sm:$0x7] }
  0x15   : > { %4364 = vmatpush3.bf16.xpose.msra.mxu0 %v275_v3  ;;  %4370 = vmatpush3.bf16.xpose.msra.mxu1 %v321_v4  ;;  %v5066_v8 = vld [vmem:[%s5052_s24 + $0x4] sm:$0x7]  ;;  %v367_v9 = vsel %vm270_vm1, %v5057_v5, 0  ;;  %v413_v10 = vsel %vm270_vm1, %v5060_v6, 0  ;;  %v5083_v11 = vld [vmem:[%s5036_s21 + $0x10] sm:$0x7] }
  0x16   : > { %4375 = vmatprep.subr.bf16.mxu0 %v6189_v0  ;;  %4381 = vmatprep.subr.bf16.mxu1 %v6189_v0  ;;  %v5086_v12 = vld [vmem:[%s5036_s21 + $0x14] sm:$0x7]  ;;  %v5089_v13 = vld [vmem:[%s5052_s24 + $0x8] sm:$0x7]  ;;  %v5092_v14 = vld [vmem:[%s5052_s24 + $0xc] sm:$0x7] }
  0x17   : > { %v459_v15 = vsel %vm270_vm1, %v5083_v11, 0  ;;  %v505_v16 = vsel %vm270_vm1, %v5086_v12, 0  ;;  %v5109_v17 = vld [vmem:[%s5036_s21 + $0x18] sm:$0x7]  ;;  %v5112_v18 = vld [vmem:[%s5036_s21 + $0x1c] sm:$0x7] }
  0x18   : > { %v5115_v19 = vld [vmem:[%s5052_s24 + $0x10] sm:$0x7]  ;;  %v5118_v20 = vld [vmem:[%s5052_s24 + $0x14] sm:$0x7]  ;;  %v551_v21 = vsel %vm270_vm1, %v5109_v17, 0  ;;  %v597_v22 = vsel %vm270_vm1, %v5112_v18, 0 }
  0x19   : > { %v5135_v23 = vld [vmem:[%s5052_s24 + $0x18] sm:$0x7]  ;;  %v5138_v24 = vld [vmem:[%s5052_s24 + $0x1c] sm:$0x7]  ;;  %s4986_s21 = smov 120   ;;  %s4990_s16 = smov 12  }
  0x1c   : > { %4366 = vmatmul.mubr.msk.bf16.vlgmr.msra.gmra.mrb[0].mxu0 %vm270_vm1, %v5063_v7  ;;  %4372 = vmatmul.mubr.msk.bf16.vlgmr.msra.gmra.mrb[0].mxu1 %vm270_vm1, %v5066_v8 }
  0x1d   : > { %4376 = vmatpush3.bf16.xpose.msra.mxu0 %v367_v9  ;;  %4382 = vmatpush3.bf16.xpose.msra.mxu1 %v413_v10 }
  0x1e   : > { %4377 = vmatprep.mubr.msk.bf16.mxu0 %vm4984_vm0, %v6189_v0  ;;  %4383 = vmatprep.mubr.msk.bf16.mxu1 %vm4984_vm0, %v6189_v0 }
  0x1f   : > { %4387 = vmatprep.subr.bf16.mxu0 %v6189_v0  ;;  %4393 = vmatprep.subr.bf16.mxu1 %v6189_v0 }
  0x24   : > { %4378 = vmatmul.mubr.msk.bf16.vlgmr.msra.gmra.mrb[4].mxu0 %vm270_vm1, %v5089_v13  ;;  %4384 = vmatmul.mubr.msk.bf16.vlgmr.msra.gmra.mrb[4].mxu1 %vm270_vm1, %v5092_v14 }
  0x25   : > { %4388 = vmatpush3.bf16.xpose.msra.mxu0 %v459_v15  ;;  %4394 = vmatpush3.bf16.xpose.msra.mxu1 %v505_v16 }
  0x26   : > { %4389 = vmatprep.mubr.msk.bf16.mxu0 %vm4984_vm0, %v6189_v0  ;;  %4395 = vmatprep.mubr.msk.bf16.mxu1 %vm4984_vm0, %v6189_v0 }
  0x27   : > { %4399 = vmatprep.subr.bf16.mxu0 %v6189_v0  ;;  %4405 = vmatprep.subr.bf16.mxu1 %v6189_v0 }
  0x2c   : > { %4390 = vmatmul.mubr.msk.bf16.vlgmr.msra.gmra.mrb[8].mxu0 %vm270_vm1, %v5115_v19  ;;  %4396 = vmatmul.mubr.msk.bf16.vlgmr.msra.gmra.mrb[8].mxu1 %vm270_vm1, %v5118_v20 }
  0x2d   : > { %4400 = vmatpush3.bf16.xpose.msra.mxu0 %v551_v21  ;;  %4406 = vmatpush3.bf16.xpose.msra.mxu1 %v597_v22 }
  0x2e   : > { %4401 = vmatprep.mubr.msk.bf16.mxu0 %vm4984_vm0, %v6189_v0  ;;  %4407 = vmatprep.mubr.msk.bf16.mxu1 %vm4984_vm0, %v6189_v0 }
  0x2f   : > { %4411 = vmatprep.subr.bf16.mxu0 %v6189_v0  ;;  %4417 = vmatprep.subr.bf16.mxu1 %v6189_v0 }
  0x34   : > { %4402 = vmatmul.mubr.msk.bf16.vlgmr.msra.gmra.mrb[12].mxu0 %vm270_vm1, %v5135_v23  ;;  %4408 = vmatmul.mubr.msk.bf16.vlgmr.msra.gmra.mrb[12].mxu1 %vm270_vm1, %v5138_v24 }
  0x35   : > { %4413 = vmatprep.mubr.msk.bf16.mxu0 %vm4984_vm0, %v6189_v0  ;;  %4419 = vmatprep.mubr.msk.bf16.mxu1 %vm4984_vm0, %v6189_v0 }
  0xef   : > { %v311_v25 = vpop.f32.mrb[0].mxu0  ;;  %v357_v26 = vpop.f32.mrb[0].mxu1 }
  0xf0   : > { %v639_v28 = vmul.f32 0.5, %v311_v25  ;;  %v640_v29 = vmul.f32 0.5, %v357_v26  ;;  %v4367_v30 = vpop.f32.mrb[1].mxu0  ;;  %v4373_v31 = vpop.f32.mrb[1].mxu1 }
  0xf1   : > { %v314_v32 = vpop.f32.mrb[2].mxu0  ;;  %v360_v33 = vpop.f32.mrb[2].mxu1 }
  0xf2   : > { %v4368_v35 = vpop.f32.mrb[3].mxu0  ;;  %v4374_v36 = vpop.f32.mrb[3].mxu1  ;;  %v651_v37 = vadd.f32 %v647_v27, %v639_v28  ;;  %v652_v39 = vadd.f32 %v648_v34, %v640_v29 }
  0xf4   : > { %v660_v38 = vsel %vm659_vm2, %v651_v37, -inf  ;;  %v663_v47 = vsel %vm659_vm2, %v652_v39, -inf }
  0xf5   : > { %661 = vmax.xlane.f32.xlu0 %v660_v38 }
  0xf7   : > { %v403_v40 = vpop.f32.mrb[4].mxu0  ;;  %v449_v41 = vpop.f32.mrb[4].mxu1 }
  0xf8   : > { %v641_v43 = vmul.f32 0.5, %v403_v40  ;;  %v642_v44 = vmul.f32 0.5, %v449_v41  ;;  %v4379_v45 = vpop.f32.mrb[5].mxu0  ;;  %v4385_v46 = vpop.f32.mrb[5].mxu1 }
  0xf9   : > { %v452_v48 = vpop.f32.mrb[6].mxu1  ;;  %664 = vmax.xlane.f32.xlu0 %v663_v47  ;;  %v406_v49 = vpop.f32.mrb[6].mxu0 }
  0xfa   : > { %v4380_v51 = vpop.f32.mrb[7].mxu0  ;;  %v4386_v52 = vpop.f32.mrb[7].mxu1  ;;  %v653_v53 = vadd.f32 %v649_v42, %v641_v43  ;;  %v654_v55 = vadd.f32 %v650_v50, %v642_v44 }
  0xfc   : > { %v666_v54 = vsel %vm659_vm2, %v653_v53, -inf  ;;  %v669_v61 = vsel %vm659_vm2, %v654_v55, -inf }
  0xfd   : > { %667 = vmax.xlane.f32.xlu1 %v666_v54 }
  0xff   : > { %v495_v56 = vpop.f32.mrb[8].mxu0  ;;  %v541_v57 = vpop.f32.mrb[8].mxu1 }
 0x100   : > { %v643_v58 = vmul.f32 0.5, %v495_v56  ;;  %v644_v59 = vmul.f32 0.5, %v541_v57  ;;  %v4397_v60 = vpop.f32.mrb[9].mxu1  ;;  %v4391_v62 = vpop.f32.mrb[9].mxu0 }
 0x101   : > { %v544_v63 = vpop.f32.mrb[10].mxu1  ;;  %670 = vmax.xlane.f32.xlu1 %v669_v61  ;;  %v498_v3 = vpop.f32.mrb[10].mxu0 }
 0x102   : > { %v4398_v4 = vpop.f32.mrb[11].mxu1  ;;  %v656_v9 = vadd.f32 %v648_v34, %v644_v59  ;;  %v655_v10 = vadd.f32 %v647_v27, %v643_v58  ;;  %v4392_v15 = vpop.f32.mrb[11].mxu0 }
 0x104   : > { %v675_v16 = vsel %vm659_vm2, %v656_v9, -inf  ;;  %v672_v21 = vsel %vm659_vm2, %v655_v10, -inf }
 0x105   : > { %676 = vmax.xlane.f32.xlu1 %v675_v16  ;;  %673 = vmax.xlane.f32.xlu0 %v672_v21 }
 0x107   : > { %v587_v22 = vpop.f32.mrb[12].mxu0  ;;  %v633_v25 = vpop.f32.mrb[12].mxu1 }
 0x108   : > { %v645_v26 = vmul.f32 0.5, %v587_v22  ;;  %v646_v28 = vmul.f32 0.5, %v633_v25  ;;  %v4403_v29 = vpop.f32.mrb[13].mxu0  ;;  %v4409_v30 = vpop.f32.mrb[13].mxu1 }
 0x109   : > { %v590_v31 = vpop.f32.mrb[14].mxu0  ;;  %v636_v32 = vpop.f32.mrb[14].mxu1  ;;  %v5213_v29 = vcombine.low %v5042_v2, %v5042_v2  ;;  %v5216_v30 = vld [vmem:[%s5203_s9 + $0x4] sm:$0x7]  ;;  %v5231_v2 = vcombine.low %v5039_v1, %v5039_v1  ;;  %v5250_v1 = vcombine.low %v5083_v11, %v5083_v11  ;;  %v5268_v11 = vcombine.low %v5135_v23, %v5135_v23 }
 0x10a   : > { %v5166_v33 = vadd.f32 %v650_v50, %v646_v28  ;;  %v657_v35 = vadd.f32 %v649_v42, %v645_v26  ;;  %v4404_v34 = vpop.f32.mrb[15].mxu0  ;;  %v4410_v27 = vpop.f32.mrb[15].mxu1  ;;  %v5206_v26 = vld [vmem:[%s5203_s9] sm:$0x7]  ;;  %v808_v31 = vsel %vm760_vm3, %v5216_v30, 0  ;;  %v5225_v32 = vcombine.low %v5063_v7, %v5063_v7 }
 0x10b   : > { %v762_v28 = vsel %vm760_vm3, %v5206_v26, 0  ;;  %4418 = vmatpush3.bf16.msra.mxu1 %v808_v31  ;;  %v5244_v7 = vcombine.low %v5089_v13, %v5089_v13  ;;  %v5262_v13 = vcombine.low %v5109_v17, %v5109_v17  ;;  %v5278_v17 = vcombine.low %v5066_v8, %v5066_v8 }
 0x10c   : > { %v681_v36 = vsel %vm659_vm2, %v5166_v33, -inf  ;;  %v678_v38 = vsel %vm659_vm2, %v657_v35, -inf  ;;  %4412 = vmatpush3.bf16.msra.mxu0 %v762_v28  ;;  %4429 = vmatprep.subr.bf16.mxu1 %v6189_v0  ;;  %v5284_v23 = vcombine.low %v5060_v6, %v5060_v6  ;;  %v5296_v8 = vcombine.low %v5086_v12, %v5086_v12 }
 0x10d   : > { %682 = vmax.xlane.f32.xlu1 %v681_v36  ;;  %679 = vmax.xlane.f32.xlu0 %v678_v38  ;;  %v5290_v38 = vcombine.low %v5092_v14, %v5092_v14  ;;  %v5302_v6 = vcombine.low %v5118_v20, %v5118_v20  ;;  %v5308_v14 = vcombine.low %v5112_v18, %v5112_v18  ;;  %v5319_v18 = vld [vmem:[%s5203_s9 + $0x8] sm:$0x7] }
 0x10e   : > { %4423 = vmatprep.subr.bf16.mxu0 %v6189_v0  ;;  %v5314_v12 = vcombine.low %v5138_v24, %v5138_v24 }
 0x182   : > { %v662_v40 = vpop.xlane.xlu0 %661 }
 0x183   : > { %v684_v41 = vsub.f32 %v651_v37, %v662_v40 }
 0x185   : > { %v692_v43 = vmul.f32 1.442695, %v684_v41 }
 0x186   : > { %v665_v44 = vpop.xlane.xlu0 %664 }
 0x187   : > { %4847 = vpow2.f32 %v692_v43  ;;  %v685_v45 = vsub.f32 %v652_v39, %v665_v44 }
 0x189   : > { %v694_v46 = vmul.f32 1.442695, %v685_v45 }
 0x18a   : > { %v668_v47 = vpop.xlane.xlu1 %667 }
 0x18b   : > { %4849 = vpow2.f32 %v694_v46  ;;  %v686_v48 = vsub.f32 %v653_v53, %v668_v47  ;;  %v854_v46 = vsel %vm760_vm3, %v5319_v18, 0 }
 0x18d   : > { %v696_v42 = vmul.f32 1.442695, %v686_v48  ;;  %v5325_v48 = vld [vmem:[%s5203_s9 + $0xc] sm:$0x7] }
 0x18e   : > { %v671_v49 = vpop.xlane.xlu1 %670 }
 0x18f   : > { %4851 = vpow2.f32 %v696_v42  ;;  %v687_v50 = vsub.f32 %v654_v55, %v671_v49 }
 0x191   : > { %v5171_v51 = vpop.eup %4847  ;;  %v698_v52 = vmul.f32 1.442695, %v687_v50 }
 0x192   : > { %v677_v54 = vpop.xlane.xlu1 %676  ;;  %v674_v56 = vpop.xlane.xlu0 %673  ;;  %v708_v37 = vsel %vm659_vm2, %v5171_v51, 0.0 }
 0x193   : > { %4853 = vpow2.f32 %v698_v52  ;;  %v689_v57 = vsub.f32 %v656_v9, %v677_v54  ;;  %v688_v58 = vsub.f32 %v655_v10, %v674_v56  ;;  %709 = vadd.xlane.f32.xlu0 %v708_v37  ;;  %v900_v52 = vsel %vm760_vm3, %v5325_v48, 0  ;;  %v5335_v56 = vld [vmem:[%s5203_s9 + $0x10] sm:$0x7] }
 0x195   : > { %v5175_v39 = vpop.eup %4849  ;;  %v702_v59 = vmul.f32 1.442695, %v689_v57  ;;  %v700_v53 = vmul.f32 1.442695, %v688_v58  ;;  %v946_v58 = vsel %vm760_vm3, %v5335_v56, 0 }
 0x196   : > { %v711_v60 = vsel %vm659_vm2, %v5175_v39, 0.0 }
 0x197   : > { %4855 = vpow2.f32 %v702_v59  ;;  %712 = vadd.xlane.f32.xlu1 %v711_v60  ;;  %v5345_v59 = vld [vmem:[%s5203_s9 + $0x14] sm:$0x7] }
 0x198   : > { %4857 = vpow2.f32 %v700_v53 }
 0x199   : > { %v5179_v55 = vpop.eup %4851 }
 0x19a   : > { %v680_v61 = vpop.xlane.xlu0 %679  ;;  %v714_v62 = vsel %vm659_vm2, %v5179_v55, 0.0  ;;  %v683_v34 = vpop.xlane.xlu1 %682 }
 0x19b   : > { %v690_v63 = vsub.f32 %v657_v35, %v680_v61  ;;  %715 = vadd.xlane.f32.xlu0 %v714_v62  ;;  %v5237_v35 = vcombine.low %v5057_v5, %v5057_v5  ;;  %v691_v27 = vsub.f32 %v5166_v33, %v683_v34  ;;  %v5256_v5 = vcombine.low %v5115_v19, %v5115_v19 }
 0x19c   : > { %v992_v61 = vsel %vm760_vm3, %v5345_v59, 0 }
 0x19d   : > { %v5183_v3 = vpop.eup %4853  ;;  %v704_v4 = vmul.f32 1.442695, %v690_v63  ;;  %v706_v36 = vmul.f32 1.442695, %v691_v27 }
 0x19e   : > { %v717_v9 = vsel %vm659_vm2, %v5183_v3, 0.0 }
 0x19f   : > { %718 = vadd.xlane.f32.xlu1 %v717_v9  ;;  %4859 = vpow2.f32 %v704_v4  ;;  %v5356_v4 = vld [vmem:[%s5203_s9 + $0x18] sm:$0x7] }
 0x1a0   : > { %4861 = vpow2.f32 %v706_v36 }
 0x1a1   : > { %v5187_v10 = vpop.eup %4855 }
 0x1a2   : > { %v5189_v15 = vpop.eup %4857  ;;  %v723_v16 = vsel %vm659_vm2, %v5187_v10, 0.0 }
 0x1a3   : > { %724 = vadd.xlane.f32.xlu1 %v723_v16  ;;  %v720_v21 = vsel %vm659_vm2, %v5189_v15, 0.0 }
 0x1a4   : > { %721 = vadd.xlane.f32.xlu0 %v720_v21  ;;  %v1038_v21 = vsel %vm760_vm3, %v5356_v4, 0 }
 0x1a9   : > { %v5195_v22 = vpop.eup %4859 }
 0x1aa   : > { %v726_v25 = vsel %vm659_vm2, %v5195_v22, 0.0  ;;  %v5270_v33 = vpop.eup %4861 }
 0x1ab   : > { %727 = vadd.xlane.f32.xlu0 %v726_v25  ;;  %v729_v19 = vsel %vm659_vm2, %v5270_v33, 0.0  ;;  %v5366_v25 = vld [vmem:[%s5203_s9 + $0x1c] sm:$0x7] }
 0x1b4   : > { %1190 = vrot.lane.b32.xlu1 %v5213_v29, %s4985_s10 }
 0x1b8   : > { %1129 = vrot.lane.b32.xlu1 %v5225_v32, %s4985_s10 }
 0x1c1   : > { %1134 = vrot.lane.b32.xlu0 %v5231_v2, %s4985_s10 }
 0x1c5   : > { %1246 = vrot.lane.b32.xlu0 %v5237_v35, %s4985_s10 }
 0x1c9   : > { %1241 = vrot.lane.b32.xlu0 %v5244_v7, %s4985_s10 }
 0x1cd   : > { %1358 = vrot.lane.b32.xlu0 %v5250_v1, %s4985_s10 }
 0x1d1   : > { %1353 = vrot.lane.b32.xlu0 %v5256_v5, %s4985_s10 }
 0x1d5   : > { %1470 = vrot.lane.b32.xlu0 %v5262_v13, %s4985_s10 }
 0x1d9   : > { %1465 = vrot.lane.b32.xlu0 %v5268_v11, %s4985_s10 }
 0x1dc   : > { %730 = vadd.xlane.f32.xlu1 %v729_v19 }
 0x1ed   : > { %1185 = vrot.lane.b32.xlu1 %v5278_v17, %s4985_s10 }
 0x1f1   : > { %1302 = vrot.lane.b32.xlu1 %v5284_v23, %s4985_s10 }
 0x1f5   : > { %1297 = vrot.lane.b32.xlu1 %v5290_v38, %s4985_s10 }
 0x1f9   : > { %1414 = vrot.lane.b32.xlu1 %v5296_v8, %s4985_s10 }
 0x1fd   : > { %1409 = vrot.lane.b32.xlu1 %v5302_v6, %s4985_s10 }
 0x201   : > { %1526 = vrot.lane.b32.xlu1 %v5308_v14, %s4985_s10 }
 0x205   : > { %1521 = vrot.lane.b32.xlu1 %v5314_v12, %s4985_s10 }
 0x220   : > { %v710_v20 = vpop.xlane.xlu0 %709 }
 0x221   : > { %4863 = vrcp.f32 %v710_v20 }
 0x224   : > { %v713_v40 = vpop.xlane.xlu1 %712 }
 0x225   : > { %4865 = vrcp.f32 %v713_v40 }
 0x228   : > { %v716_v41 = vpop.xlane.xlu0 %715 }
 0x229   : > { %4867 = vrcp.f32 %v716_v41 }
 0x22b   : > { %v4864_v43 = vpop.eup %4863 }
 0x22c   : > { %v719_v44 = vpop.xlane.xlu1 %718  ;;  %v740_v45 = vmul.f32 %v4864_v43, %v5171_v51 }
 0x22d   : > { %4869 = vrcp.f32 %v719_v44 }
 0x22e   : > { %v748_v24 = vpack.c.bf16 %v740_v45, %v740_v45 }
 0x22f   : > { %v4866_v47 = vpop.eup %4865 }
 0x230   : > { %v725_v42 = vpop.xlane.xlu1 %724  ;;  %4414 = vmatmul.mubr.msk.bf16.vlgmr.msra.gmra.mrb[16].mxu0 %vm756_vm4, %v748_v24  ;;  %v741_v49 = vmul.f32 %v4866_v47, %v5175_v39 }
 0x231   : > { %4871 = vrcp.f32 %v725_v42  ;;  %v722_v50 = vpop.xlane.xlu0 %721  ;;  %4424 = vmatpush3.bf16.msra.mxu0 %v854_v46  ;;  %4425 = vmatprep.mubr.msk.bf16.mxu0 %vm4984_vm0, %v6189_v0 }
 0x232   : > { %4873 = vrcp.f32 %v722_v50  ;;  %v749_v51 = vpack.c.bf16 %v741_v49, %v741_v49  ;;  %4435 = vmatprep.subr.bf16.mxu0 %v6189_v0 }
 0x233   : > { %v4868_v54 = vpop.eup %4867 }
 0x234   : > { %4420 = vmatmul.mubr.msk.bf16.vlgmr.msra.gmra.mrb[16].mxu1 %vm756_vm4, %v749_v51  ;;  %v742_v37 = vmul.f32 %v4868_v54, %v5179_v55  ;;  %v1191_v20 = vpop.permute.xlu1 %1190 }
 0x235   : > { %4430 = vmatpush3.bf16.msra.mxu1 %v900_v52  ;;  %4431 = vmatprep.mubr.msk.bf16.mxu1 %vm4984_vm0, %v6189_v0 }
 0x236   : > { %v750_v57 = vpack.c.bf16 %v742_v37, %v742_v37  ;;  %4441 = vmatprep.subr.bf16.mxu1 %v6189_v0  ;;  %v1196_v37 = vsel %vm270_vm1, %v1191_v20, 0 }
 0x237   : > { %v4870_v39 = vpop.eup %4869 }
 0x238   : > { %4426 = vmatmul.mubr.msk.bf16.vlgmr.msra.gmra.mrb[20].mxu0 %vm756_vm4, %v750_v57  ;;  %v743_v53 = vmul.f32 %v4870_v39, %v5183_v3  ;;  %v728_v60 = vpop.xlane.xlu0 %727  ;;  %v1130_v41 = vpop.permute.xlu1 %1129 }
 0x239   : > { %4436 = vmatpush3.bf16.msra.mxu0 %v946_v58  ;;  %4437 = vmatprep.mubr.msk.bf16.mxu0 %vm4984_vm0, %v6189_v0  ;;  %4875 = vrcp.f32 %v728_v60  ;;  %v5419_v60 = vcombine.low %v5206_v26, %v5206_v26  ;;  %v5434_v26 = vcombine.low %v5216_v30, %v5216_v30 }
 0x23a   : > { %v751_v55 = vpack.c.bf16 %v743_v53, %v743_v53  ;;  %4447 = vmatprep.subr.bf16.mxu0 %v6189_v0 }
 0x23b   : > { %v4872_v62 = vpop.eup %4871  ;;  %1694 = vrot.lane.b32.xlu0 %v5419_v60, %s4985_s10  ;;  %1745 = vrot.lane.b32.xlu1 %v5434_v26, %s4985_s10 }
 0x23c   : > { %v4874_v63 = vpop.eup %4873  ;;  %4432 = vmatmul.mubr.msk.bf16.vlgmr.msra.gmra.mrb[20].mxu1 %vm756_vm4, %v751_v55  ;;  %v745_v9 = vmul.f32 %v4872_v62, %v5187_v10  ;;  %v1135_v31 = vpop.permute.xlu0 %1134 }
 0x23d   : > { %v744_v3 = vmul.f32 %v4874_v63, %v5189_v15  ;;  %4442 = vmatpush3.bf16.msra.mxu1 %v992_v61  ;;  %4443 = vmatprep.mubr.msk.bf16.mxu1 %vm4984_vm0, %v6189_v0  ;;  %v1084_v15 = vsel %vm760_vm3, %v5366_v25, 0  ;;  %v1140_v36 = vsel %vm270_vm1, %v1135_v31, 0  ;;  %v5440_v63 = vcombine.low %v5319_v18, %v5319_v18 }
 0x23e   : > { %4453 = vmatprep.subr.bf16.mxu1 %v6189_v0  ;;  %v753_v28 = vpack.c.bf16 %v745_v9, %v745_v9 }
 0x23f   : > { %v752_v16 = vpack.c.bf16 %v744_v3, %v744_v3  ;;  %1796 = vrot.lane.b32.xlu1 %v5440_v63, %s4985_s10  ;;  %v5446_v3 = vcombine.low %v5325_v48, %v5325_v48 }
 0x240   : > { %v1247_v19 = vpop.permute.xlu0 %1246 }
 0x241   : > { %4438 = vmatmul.mubr.msk.bf16.vlgmr.msra.gmra.mrb[24].mxu0 %vm756_vm4, %v752_v16  ;;  %v1252_v40 = vsel %vm270_vm1, %v1247_v19, 0 }
 0x242   : > { %4448 = vmatpush3.bf16.msra.mxu0 %v1038_v21  ;;  %4449 = vmatprep.mubr.msk.bf16.mxu0 %vm4984_vm0, %v6189_v0 }
 0x243   : > { %4459 = vmatprep.subr.bf16.mxu0 %v6189_v0  ;;  %v4876_v10 = vpop.eup %4875  ;;  %1847 = vrot.lane.b32.xlu1 %v5446_v3, %s4985_s10 }
 0x244   : > { %4444 = vmatmul.mubr.msk.bf16.vlgmr.msra.gmra.mrb[24].mxu1 %vm756_vm4, %v753_v28  ;;  %v746_v34 = vmul.f32 %v4876_v10, %v5195_v22  ;;  %v1242_v22 = vpop.permute.xlu0 %1241 }
 0x245   : > { %4454 = vmatpush3.bf16.msra.mxu1 %v1084_v15  ;;  %4455 = vmatprep.mubr.msk.bf16.mxu1 %vm4984_vm0, %v6189_v0 }
 0x246   : > { %4465 = vmatprep.subr.bf16.mxu1 %v6189_v0  ;;  %v754_v27 = vpack.c.bf16 %v746_v34, %v746_v34 }
 0x248   : > { %v1359_v43 = vpop.permute.xlu0 %1358 }
 0x249   : > { %4450 = vmatmul.mubr.msk.bf16.vlgmr.msra.gmra.mrb[28].mxu0 %vm756_vm4, %v754_v27  ;;  %v1364_v45 = vsel %vm270_vm1, %v1359_v43, 0 }
 0x24a   : > { %4461 = vmatprep.mubr.msk.bf16.mxu0 %vm4984_vm0, %v6189_v0 }
 0x24b   : > { %4460 = vmatpush3.bf16.xpose.msra.mxu0 %v1140_v36 }
 0x24c   : > { %4471 = vmatprep.subr.bf16.mxu0 %v6189_v0  ;;  %v1354_v44 = vpop.permute.xlu0 %1353 }
 0x250   : > { %v1471_v24 = vpop.permute.xlu0 %1470 }
 0x251   : > { %v1476_v46 = vsel %vm270_vm1, %v1471_v24, 0 }
 0x252   : > { %4462 = vmatmul.mubr.msk.bf16.vlgmr.msra.gmra.mrb[32].mxu0 %vm270_vm1, %v1130_v41 }
 0x253   : > { %4472 = vmatpush3.bf16.xpose.msra.mxu0 %v1252_v40  ;;  %4473 = vmatprep.mubr.msk.bf16.mxu0 %vm4984_vm0, %v6189_v0 }
 0x254   : > { %4483 = vmatprep.subr.bf16.mxu0 %v6189_v0  ;;  %v1466_v47 = vpop.permute.xlu0 %1465 }
 0x25a   : > { %4474 = vmatmul.mubr.msk.bf16.vlgmr.msra.gmra.mrb[36].mxu0 %vm270_vm1, %v1242_v22 }
 0x25b   : > { %4484 = vmatpush3.bf16.xpose.msra.mxu0 %v1364_v45  ;;  %4485 = vmatprep.mubr.msk.bf16.mxu0 %vm4984_vm0, %v6189_v0 }
 0x25c   : > { %4495 = vmatprep.subr.bf16.mxu0 %v6189_v0 }
 0x262   : > { %4486 = vmatmul.mubr.msk.bf16.vlgmr.msra.gmra.mrb[40].mxu0 %vm270_vm1, %v1354_v44 }
 0x263   : > { %4496 = vmatpush3.bf16.xpose.msra.mxu0 %v1476_v46  ;;  %4497 = vmatprep.mubr.msk.bf16.mxu0 %vm4984_vm0, %v6189_v0 }
 0x264   : > { %4507 = vmatprep.subr.bf16.mxu0 %v6189_v0 }
 0x269   : > { %v731_v42 = vpop.xlane.xlu1 %730 }
 0x26a   : > { %4877 = vrcp.f32 %v731_v42  ;;  %4498 = vmatmul.mubr.msk.bf16.vlgmr.msra.gmra.mrb[44].mxu0 %vm270_vm1, %v1466_v47 }
 0x26b   : > { %4509 = vmatprep.mubr.msk.bf16.mxu0 %vm4984_vm0, %v6189_v0 }
 0x26d   : > { %v1186_v49 = vpop.permute.xlu1 %1185 }
 0x271   : > { %v1303_v54 = vpop.permute.xlu1 %1302 }
 0x272   : > { %v1308_v58 = vsel %vm270_vm1, %v1303_v54, 0 }
 0x274   : > { %v4878_v50 = vpop.eup %4877 }
 0x275   : > { %v747_v51 = vmul.f32 %v4878_v50, %v5270_v33  ;;  %v1298_v57 = vpop.permute.xlu1 %1297 }
 0x277   : > { %v755_v52 = vpack.c.bf16 %v747_v51, %v747_v51 }
 0x279   : > { %4456 = vmatmul.mubr.msk.bf16.vlgmr.msra.gmra.mrb[28].mxu1 %vm756_vm4, %v755_v52  ;;  %v1415_v33 = vpop.permute.xlu1 %1414 }
 0x27a   : > { %4466 = vmatpush3.bf16.xpose.msra.mxu1 %v1196_v37  ;;  %4467 = vmatprep.mubr.msk.bf16.mxu1 %vm4984_vm0, %v6189_v0  ;;  %v1420_v39 = vsel %vm270_vm1, %v1415_v33, 0  ;;  %v4173_v33 = vld [vmem:[%s6187_s3 + $0x20] sm:$0x3f] }
 0x27b   : > { %4477 = vmatprep.subr.bf16.mxu1 %v6189_v0 }
 0x27d   : > { %v1410_v53 = vpop.permute.xlu1 %1409 }
 0x281   : > { %4468 = vmatmul.mubr.msk.bf16.vlgmr.msra.gmra.mrb[32].mxu1 %vm270_vm1, %v1186_v49  ;;  %v1527_v55 = vpop.permute.xlu1 %1526 }
 0x282   : > { %4478 = vmatpush3.bf16.xpose.msra.mxu1 %v1308_v58  ;;  %4479 = vmatprep.mubr.msk.bf16.mxu1 %vm4984_vm0, %v6189_v0  ;;  %v1532_v61 = vsel %vm270_vm1, %v1527_v55, 0 }
 0x283   : > { %4489 = vmatprep.subr.bf16.mxu1 %v6189_v0 }
 0x285   : > { %v1522_v62 = vpop.permute.xlu1 %1521 }
 0x289   : > { %4480 = vmatmul.mubr.msk.bf16.vlgmr.msra.gmra.mrb[36].mxu1 %vm270_vm1, %v1298_v57 }
 0x28a   : > { %4490 = vmatpush3.bf16.xpose.msra.mxu1 %v1420_v39  ;;  %4491 = vmatprep.mubr.msk.bf16.mxu1 %vm4984_vm0, %v6189_v0 }
 0x28b   : > { %4501 = vmatprep.subr.bf16.mxu1 %v6189_v0 }
 0x291   : > { %4492 = vmatmul.mubr.msk.bf16.vlgmr.msra.gmra.mrb[40].mxu1 %vm270_vm1, %v1410_v53 }
 0x292   : > { %4502 = vmatpush3.bf16.xpose.msra.mxu1 %v1532_v61  ;;  %4503 = vmatprep.mubr.msk.bf16.mxu1 %vm4984_vm0, %v6189_v0 }
 0x293   : > { %4513 = vmatprep.subr.bf16.mxu1 %v6189_v0 }
 0x299   : > { %4504 = vmatmul.mubr.msk.bf16.vlgmr.msra.gmra.mrb[44].mxu1 %vm270_vm1, %v1522_v62 }
 0x29a   : > { %4515 = vmatprep.mubr.msk.bf16.mxu1 %vm4984_vm0, %v6189_v0 }
 0x2ad   : > { %v1695_v52 = vpop.permute.xlu0 %1694  ;;  %v1746_v37 = vpop.permute.xlu1 %1745 }
 0x2ae   : > { %v1700_v54 = vsel %vm760_vm3, %v1695_v52, 0  ;;  %v1751_v57 = vsel %vm760_vm3, %v1746_v37, 0 }
 0x2af   : > { %4508 = vmatpush3.bf16.msra.mxu0 %v1700_v54  ;;  %4514 = vmatpush3.bf16.msra.mxu1 %v1751_v57  ;;  %v4174_v54 = vld [vmem:[%s6187_s3 + $0x28] sm:$0x3f] }
 0x2b0   : > { %4519 = vmatprep.subr.bf16.mxu0 %v6189_v0  ;;  %4525 = vmatprep.subr.bf16.mxu1 %v6189_v0 }
 0x303   : > { %v5450_v9 = vpop.f32.mrb[16].mxu0 }
 0x304   : > { %v4415_v30 = vpop.f32.mrb[17].mxu0 }
 0x305   : > { %v801_v16 = vpop.f32.mrb[18].mxu0 }
 0x306   : > { %v4416_v21 = vpop.f32.mrb[19].mxu0 }
 0x307   : > { %v5452_v28 = vpop.f32.mrb[16].mxu1  ;;  %v4175_v21 = vld [vmem:[%s6187_s3 + $0x30] sm:$0x3f] }
 0x308   : > { %v4421_v15 = vpop.f32.mrb[17].mxu1 }
 0x309   : > { %v847_v18 = vpop.f32.mrb[18].mxu1 }
 0x30a   : > { %v4422_v10 = vpop.f32.mrb[19].mxu1 }
 0x30b   : > { %v5454_v31 = vpop.f32.mrb[20].mxu0 }
 0x30c   : > { %6191 = vst [vmem:[#allocation2_spill] sm:$0xff] %v5454_v31  ;;  %v4427_v34 = vpop.f32.mrb[21].mxu0 }
 0x30d   : > { %v893_v27 = vpop.f32.mrb[22].mxu0 }
 0x30e   : > { %v4428_v36 = vpop.f32.mrb[23].mxu0 }
 0x30f   : > { %v5456_v48 = vpop.f32.mrb[20].mxu1 }
 0x310   : > { %v4433_v19 = vpop.f32.mrb[21].mxu1 }
 0x311   : > { %v939_v20 = vpop.f32.mrb[22].mxu1 }
 0x312   : > { %v4434_v22 = vpop.f32.mrb[23].mxu1 }
 0x314   : > { %v5458_v40 = vpop.f32.mrb[24].mxu0 }
 0x315   : > { %v4439_v41 = vpop.f32.mrb[25].mxu0 }
 0x316   : > { %v985_v43 = vpop.f32.mrb[26].mxu0 }
 0x317   : > { %v4440_v44 = vpop.f32.mrb[27].mxu0  ;;  %v5460_v45 = vpop.f32.mrb[24].mxu1 }
 0x318   : > { %v4445_v24 = vpop.f32.mrb[25].mxu1 }
 0x319   : > { %v1031_v46 = vpop.f32.mrb[26].mxu1 }
 0x31a   : > { %v4446_v47 = vpop.f32.mrb[27].mxu1 }
 0x31c   : > { %v5462_v42 = vpop.f32.mrb[28].mxu0 }
 0x31d   : > { %v4451_v49 = vpop.f32.mrb[29].mxu0 }
 0x31e   : > { %v1077_v50 = vpop.f32.mrb[30].mxu0 }
 0x31f   : > { %v4452_v51 = vpop.f32.mrb[31].mxu0 }
 0x325   : > { %v1176_v58 = vpop.f32.mrb[32].mxu0 }
 0x326   : > { %v1574_v39 = vmul.f32 0.5, %v1176_v58  ;;  %v4463_v53 = vpop.f32.mrb[33].mxu0 }
 0x327   : > { %v1179_v55 = vpop.f32.mrb[34].mxu0 }
 0x328   : > { %v4464_v61 = vpop.f32.mrb[35].mxu0  ;;  %v5471_v62 = vadd.f32 %v4173_v33, %v1574_v39 }
 0x32a   : > { %v1595_v30 = vsel %vm659_vm2, %v5471_v62, -inf }
 0x32b   : > { %1596 = vmax.xlane.f32.xlu0 %v1595_v30 }
 0x32d   : > { %v1288_v16 = vpop.f32.mrb[36].mxu0 }
 0x32e   : > { %v1576_v15 = vmul.f32 0.5, %v1288_v16  ;;  %v4475_v18 = vpop.f32.mrb[37].mxu0  ;;  %v4176_v16 = vld [vmem:[%s6187_s3 + $0x38] sm:$0x3f] }
 0x32f   : > { %v1291_v10 = vpop.f32.mrb[38].mxu0 }
 0x330   : > { %v5478_v34 = vadd.f32 %v4175_v21, %v1576_v15  ;;  %v4476_v27 = vpop.f32.mrb[39].mxu0 }
 0x332   : > { %v1601_v36 = vsel %vm659_vm2, %v5478_v34, -inf }
 0x333   : > { %1602 = vmax.xlane.f32.xlu0 %v1601_v36 }
 0x335   : > { %v1400_v19 = vpop.f32.mrb[40].mxu0 }
 0x336   : > { %v4487_v20 = vpop.f32.mrb[41].mxu0  ;;  %v1578_v61 = vmul.f32 0.5, %v1400_v19 }
 0x337   : > { %v1403_v22 = vpop.f32.mrb[42].mxu0 }
 0x338   : > { %v4488_v41 = vpop.f32.mrb[43].mxu0  ;;  %v1591_v22 = vadd.f32 %v4173_v33, %v1578_v61 }
 0x33d   : > { %v1512_v43 = vpop.f32.mrb[44].mxu0 }
 0x33e   : > { %v4499_v44 = vpop.f32.mrb[45].mxu0  ;;  %v1580_v20 = vmul.f32 0.5, %v1512_v43 }
 0x33f   : > { %v1515_v24 = vpop.f32.mrb[46].mxu0  ;;  %v1607_v44 = vsel %vm659_vm2, %v1591_v22, -inf }
 0x340   : > { %v4500_v46 = vpop.f32.mrb[47].mxu0  ;;  %v5493_v24 = vadd.f32 %v4175_v21, %v1580_v20  ;;  %v5500_v21 = vcombine.low %v5345_v59, %v5345_v59 }
 0x34c   : > { %v5482_v47 = vpop.f32.mrb[28].mxu1 }
 0x34d   : > { %v4457_v49 = vpop.f32.mrb[29].mxu1 }
 0x34e   : > { %v1123_v50 = vpop.f32.mrb[30].mxu1 }
 0x34f   : > { %v4458_v51 = vpop.f32.mrb[31].mxu1 }
 0x354   : > { %v1232_v52 = vpop.f32.mrb[32].mxu1 }
 0x355   : > { %v1575_v37 = vmul.f32 0.5, %v1232_v52  ;;  %v4469_v57 = vpop.f32.mrb[33].mxu1  ;;  %v1613_v52 = vsel %vm659_vm2, %v5493_v24, -inf }
 0x356   : > { %v1235_v58 = vpop.f32.mrb[34].mxu1 }
 0x357   : > { %v4470_v39 = vpop.f32.mrb[35].mxu1  ;;  %v1588_v53 = vadd.f32 %v4174_v54, %v1575_v37 }
 0x359   : > { %v1598_v55 = vsel %vm659_vm2, %v1588_v53, -inf }
 0x35a   : > { %1599 = vmax.xlane.f32.xlu1 %v1598_v55 }
 0x35c   : > { %v1344_v30 = vpop.f32.mrb[36].mxu1 }
 0x35d   : > { %v1577_v15 = vmul.f32 0.5, %v1344_v30  ;;  %v4481_v18 = vpop.f32.mrb[37].mxu1 }
 0x35e   : > { %v1347_v10 = vpop.f32.mrb[38].mxu1 }
 0x35f   : > { %v4482_v27 = vpop.f32.mrb[39].mxu1  ;;  %v1590_v36 = vadd.f32 %v4176_v16, %v1577_v15 }
 0x361   : > { %v1604_v41 = vsel %vm659_vm2, %v1590_v36, -inf }
 0x362   : > { %1605 = vmax.xlane.f32.xlu0 %v1604_v41 }
 0x364   : > { %v1456_v19 = vpop.f32.mrb[40].mxu1 }
 0x365   : > { %v1579_v46 = vmul.f32 0.5, %v1456_v19  ;;  %v4493_v49 = vpop.f32.mrb[41].mxu1 }
 0x366   : > { %1608 = vmax.xlane.f32.xlu0 %v1607_v44  ;;  %v1459_v50 = vpop.f32.mrb[42].mxu1 }
 0x367   : > { %v1592_v51 = vadd.f32 %v4174_v54, %v1579_v46  ;;  %v4494_v37 = vpop.f32.mrb[43].mxu1  ;;  %v5506_v54 = vcombine.low %v5335_v56, %v5335_v56 }
 0x369   : > { %v1610_v43 = vsel %vm659_vm2, %v1592_v51, -inf }
 0x36a   : > { %1611 = vmax.xlane.f32.xlu1 %v1610_v43  ;;  %1614 = vmax.xlane.f32.xlu0 %v1613_v52 }
 0x36c   : > { %v1568_v33 = vpop.f32.mrb[44].mxu1 }
 0x36d   : > { %v4505_v57 = vpop.f32.mrb[45].mxu1  ;;  %v1581_v55 = vmul.f32 0.5, %v1568_v33 }
 0x36e   : > { %v1571_v58 = vpop.f32.mrb[46].mxu1 }
 0x36f   : > { %v4506_v39 = vpop.f32.mrb[47].mxu1  ;;  %v5510_v61 = vadd.f32 %v4176_v16, %v1581_v55 }
 0x371   : > { %v1616_v30 = vsel %vm659_vm2, %v5510_v61, -inf }
 0x37b   : > { %1949 = vrot.lane.b32.xlu1 %v5500_v21, %s4985_s10 }
 0x380   : > { %1898 = vrot.lane.b32.xlu0 %v5506_v54, %s4985_s10 }
 0x39f   : > { %1617 = vmax.xlane.f32.xlu1 %v1616_v30 }
 0x3b8   : > { %v1597_v15 = vpop.xlane.xlu0 %1596 }
 0x3b9   : > { %v1619_v59 = vsub.f32 %v5471_v62, %v1597_v15  ;;  %v5524_v62 = vpop.permute.xlu1 %1796  ;;  %v5548_v15 = vcombine.low %v5356_v4, %v5356_v4 }
 0x3bb   : > { %v1627_v18 = vmul.f32 1.442695, %v1619_v59 }
 0x3bd   : > { %4879 = vpow2.f32 %v1627_v18  ;;  %v5526_v19 = vpop.permute.xlu1 %1847 }
 0x3c0   : > { %v1603_v10 = vpop.xlane.xlu0 %1602 }
 0x3c1   : > { %v1621_v27 = vsub.f32 %v5478_v34, %v1603_v10 }
 0x3c3   : > { %v1631_v56 = vmul.f32 1.442695, %v1621_v27 }
 0x3c5   : > { %4881 = vpow2.f32 %v1631_v56 }
 0x3c7   : > { %v5516_v20 = vpop.eup %4879 }
 0x3c8   : > { %v1643_v16 = vsel %vm659_vm2, %v5516_v20, 0.0 }
 0x3c9   : > { %1644 = vadd.xlane.f32.xlu0 %v1643_v16 }
 0x3cf   : > { %v5520_v41 = vpop.eup %4881 }
 0x3d0   : > { %v1649_v44 = vsel %vm659_vm2, %v5520_v41, 0.0 }
 0x3d1   : > { %1650 = vadd.xlane.f32.xlu0 %v1649_v44 }
 0x3e7   : > { %v1600_v46 = vpop.xlane.xlu1 %1599 }
 0x3e8   : > { %v1620_v34 = vsub.f32 %v1588_v53, %v1600_v46 }
 0x3ea   : > { %v1629_v49 = vmul.f32 1.442695, %v1620_v34 }
 0x3ec   : > { %4883 = vpow2.f32 %v1629_v49 }
 0x3ef   : > { %v1606_v50 = vpop.xlane.xlu0 %1605 }
 0x3f0   : > { %v1622_v52 = vsub.f32 %v1590_v36, %v1606_v50 }
 0x3f2   : > { %v1633_v37 = vmul.f32 1.442695, %v1622_v52 }
 0x3f3   : > { %v1609_v43 = vpop.xlane.xlu0 %1608 }
 0x3f4   : > { %4885 = vpow2.f32 %v1633_v37  ;;  %v1623_v33 = vsub.f32 %v1591_v22, %v1609_v43  ;;  %v5542_v22 = vcombine.low %v5366_v25, %v5366_v25 }
 0x3f6   : > { %v5528_v57 = vpop.eup %4883  ;;  %v1635_v58 = vmul.f32 1.442695, %v1623_v33 }
 0x3f7   : > { %v1646_v39 = vsel %vm659_vm2, %v5528_v57, 0.0  ;;  %v1612_v59 = vpop.xlane.xlu1 %1611  ;;  %v1615_v10 = vpop.xlane.xlu0 %1614 }
 0x3f8   : > { %4887 = vpow2.f32 %v1635_v58  ;;  %1647 = vadd.xlane.f32.xlu1 %v1646_v39  ;;  %v1624_v18 = vsub.f32 %v1592_v51, %v1612_v59  ;;  %v1625_v56 = vsub.f32 %v5493_v24, %v1615_v10  ;;  %v1802_v39 = vsel %vm760_vm3, %v5524_v62, 0 }
 0x3fa   : > { %v1637_v27 = vmul.f32 1.442695, %v1624_v18  ;;  %v1639_v16 = vmul.f32 1.442695, %v1625_v56 }
 0x3fb   : > { %v5563_v24 = vpop.permute.xlu1 %1949  ;;  %v1899_v51 = vpop.permute.xlu0 %1898 }
 0x3fc   : > { %4889 = vpow2.f32 %v1637_v27  ;;  %v1904_v62 = vsel %vm760_vm3, %v1899_v51, 0 }
 0x3fd   : > { %4891 = vpow2.f32 %v1639_v16 }
 0x3fe   : > { %v5532_v55 = vpop.eup %4885 }
 0x3ff   : > { %v1652_v53 = vsel %vm659_vm2, %v5532_v55, 0.0 }
 0x400   : > { %1653 = vadd.xlane.f32.xlu1 %v1652_v53 }
 0x402   : > { %v5536_v30 = vpop.eup %4887 }
 0x403   : > { %v1655_v36 = vsel %vm659_vm2, %v5536_v30, 0.0 }
 0x404   : > { %1656 = vadd.xlane.f32.xlu0 %v1655_v36 }
 0x406   : > { %v5553_v25 = vpop.eup %4889 }
 0x407   : > { %v1658_v44 = vsel %vm659_vm2, %v5553_v25, 0.0  ;;  %v5557_v46 = vpop.eup %4891 }
 0x408   : > { %v1661_v4 = vsel %vm659_vm2, %v5557_v46, 0.0 }
 0x411   : > { %2051 = vrot.lane.b32.xlu1 %v5542_v22, %s4985_s10 }
 0x41a   : > { %2000 = vrot.lane.b32.xlu0 %v5548_v15, %s4985_s10 }
 0x42c   : > { %v1618_v34 = vpop.xlane.xlu1 %1617 }
 0x42d   : > { %v1626_v49 = vsub.f32 %v5510_v61, %v1618_v34 }
 0x42f   : > { %v1641_v52 = vmul.f32 1.442695, %v1626_v49  ;;  %v1955_v49 = vsel %vm760_vm3, %v5563_v24, 0 }
 0x435   : > { %1659 = vadd.xlane.f32.xlu1 %v1658_v44  ;;  %v1853_v44 = vsel %vm760_vm3, %v5526_v19, 0 }
 0x439   : > { %1662 = vadd.xlane.f32.xlu0 %v1661_v4 }
 0x446   : > { %2151 = vrot.lane.b32.xlu1 %v5213_v29, %s4986_s21 }
 0x44f   : > { %2101 = vrot.lane.b32.xlu0 %v5231_v2, %s4986_s21 }
 0x453   : > { %2099 = vrot.lane.b32.xlu0 %v5225_v32, %s4986_s21 }
 0x456   : > { %v1645_v50 = vpop.xlane.xlu0 %1644 }
 0x457   : > { %4893 = vrcp.f32 %v1645_v50  ;;  %2201 = vrot.lane.b32.xlu0 %v5237_v35, %s4986_s21 }
 0x458   : > { %4895 = vpow2.f32 %v1641_v52 }
 0x45b   : > { %2199 = vrot.lane.b32.xlu0 %v5244_v7, %s4986_s21 }
 0x45e   : > { %v1651_v37 = vpop.xlane.xlu0 %1650 }
 0x45f   : > { %4897 = vrcp.f32 %v1651_v37  ;;  %2301 = vrot.lane.b32.xlu0 %v5250_v1, %s4986_s21 }
 0x461   : > { %v4894_v43 = vpop.eup %4893 }
 0x462   : > { %v1675_v33 = vmul.f32 %v4894_v43, %v5516_v20  ;;  %v5579_v58 = vpop.eup %4895 }
 0x463   : > { %2299 = vrot.lane.b32.xlu0 %v5256_v5, %s4986_s21  ;;  %v1664_v53 = vsel %vm659_vm2, %v5579_v58, 0.0 }
 0x464   : > { %v1683_v61 = vpack.c.bf16 %v1675_v33, %v1675_v33 }
 0x466   : > { %4510 = vmatmul.mubr.msk.bf16.vlgmr.msra.gmra.mrb[48].mxu0 %vm756_vm4, %v1683_v61 }
 0x467   : > { %4520 = vmatpush3.bf16.msra.mxu0 %v1802_v39  ;;  %4521 = vmatprep.mubr.msk.bf16.mxu0 %vm4984_vm0, %v6189_v0 }
 0x468   : > { %4531 = vmatprep.subr.bf16.mxu0 %v6189_v0  ;;  %2401 = vrot.lane.b32.xlu0 %v5262_v13, %s4986_s21 }
 0x469   : > { %v4898_v20 = vpop.eup %4897 }
 0x46a   : > { %1665 = vadd.xlane.f32.xlu1 %v1664_v53  ;;  %v1677_v36 = vmul.f32 %v4898_v20, %v5520_v41 }
 0x46c   : > { %v1685_v59 = vpack.c.bf16 %v1677_v36, %v1677_v36  ;;  %2399 = vrot.lane.b32.xlu0 %v5268_v11, %s4986_s21 }
 0x46e   : > { %4522 = vmatmul.mubr.msk.bf16.vlgmr.msra.gmra.mrb[52].mxu0 %vm756_vm4, %v1685_v59 }
 0x46f   : > { %4532 = vmatpush3.bf16.msra.mxu0 %v1904_v62  ;;  %4533 = vmatprep.mubr.msk.bf16.mxu0 %vm4984_vm0, %v6189_v0 }
 0x470   : > { %4543 = vmatprep.subr.bf16.mxu0 %v6189_v0  ;;  %2616 = vrot.lane.b32.xlu0 %v5419_v60, %s4986_s21 }
 0x47b   : > { %2149 = vrot.lane.b32.xlu1 %v5278_v17, %s4986_s21 }
 0x47f   : > { %2251 = vrot.lane.b32.xlu1 %v5284_v23, %s4986_s21 }
 0x483   : > { %2249 = vrot.lane.b32.xlu1 %v5290_v38, %s4986_s21 }
 0x485   : > { %v1648_v41 = vpop.xlane.xlu1 %1647 }
 0x486   : > { %4899 = vrcp.f32 %v1648_v41 }
 0x487   : > { %2351 = vrot.lane.b32.xlu1 %v5296_v8, %s4986_s21 }
 0x48b   : > { %2349 = vrot.lane.b32.xlu1 %v5302_v6, %s4986_s21 }
 0x48d   : > { %v1654_v18 = vpop.xlane.xlu1 %1653 }
 0x48e   : > { %4901 = vrcp.f32 %v1654_v18 }
 0x48f   : > { %2451 = vrot.lane.b32.xlu1 %v5308_v14, %s4986_s21 }
 0x490   : > { %v4900_v10 = vpop.eup %4899 }
 0x491   : > { %v1657_v27 = vpop.xlane.xlu0 %1656  ;;  %v1676_v56 = vmul.f32 %v4900_v10, %v5528_v57 }
 0x492   : > { %4903 = vrcp.f32 %v1657_v27 }
 0x493   : > { %v1684_v16 = vpack.c.bf16 %v1676_v56, %v1676_v56  ;;  %2449 = vrot.lane.b32.xlu1 %v5314_v12, %s4986_s21 }
 0x495   : > { %4516 = vmatmul.mubr.msk.bf16.vlgmr.msra.gmra.mrb[48].mxu1 %vm756_vm4, %v1684_v16  ;;  %v2001_v19 = vpop.permute.xlu0 %2000 }
 0x496   : > { %4526 = vmatpush3.bf16.msra.mxu1 %v1853_v44  ;;  %4527 = vmatprep.mubr.msk.bf16.mxu1 %vm4984_vm0, %v6189_v0 }
 0x497   : > { %4537 = vmatprep.subr.bf16.mxu1 %v6189_v0  ;;  %2664 = vrot.lane.b32.xlu1 %v5434_v26, %s4986_s21 }
 0x498   : > { %v4902_v57 = vpop.eup %4901 }
 0x499   : > { %v1678_v4 = vmul.f32 %v4902_v57, %v5532_v55  ;;  %v2006_v55 = vsel %vm760_vm3, %v2001_v19, 0 }
 0x49b   : > { %v1686_v51 = vpack.c.bf16 %v1678_v4, %v1678_v4  ;;  %2712 = vrot.lane.b32.xlu1 %v5440_v63, %s4986_s21 }
 0x49c   : > { %v4904_v34 = vpop.eup %4903 }
 0x49d   : > { %v1679_v50 = vmul.f32 %v4904_v34, %v5536_v30  ;;  %4528 = vmatmul.mubr.msk.bf16.vlgmr.msra.gmra.mrb[52].mxu1 %vm756_vm4, %v1686_v51  ;;  %v2052_v30 = vpop.permute.xlu1 %2051 }
 0x49e   : > { %4538 = vmatpush3.bf16.msra.mxu1 %v1955_v49  ;;  %4539 = vmatprep.mubr.msk.bf16.mxu1 %vm4984_vm0, %v6189_v0  ;;  %v2057_v36 = vsel %vm760_vm3, %v2052_v30, 0 }
 0x49f   : > { %v1687_v52 = vpack.c.bf16 %v1679_v50, %v1679_v50  ;;  %4549 = vmatprep.subr.bf16.mxu1 %v6189_v0  ;;  %2760 = vrot.lane.b32.xlu1 %v5446_v3, %s4986_s21 }
 0x4a1   : > { %4534 = vmatmul.mubr.msk.bf16.vlgmr.msra.gmra.mrb[56].mxu0 %vm756_vm4, %v1687_v52 }
 0x4a2   : > { %4544 = vmatpush3.bf16.msra.mxu0 %v2006_v55  ;;  %4545 = vmatprep.mubr.msk.bf16.mxu0 %vm4984_vm0, %v6189_v0 }
 0x4a3   : > { %4555 = vmatprep.subr.bf16.mxu0 %v6189_v0 }
 0x4c2   : > { %v1660_v24 = vpop.xlane.xlu1 %1659 }
 0x4c3   : > { %4905 = vrcp.f32 %v1660_v24 }
 0x4c6   : > { %v1663_v37 = vpop.xlane.xlu0 %1662  ;;  %v2152_v57 = vpop.permute.xlu1 %2151 }
 0x4c7   : > { %4907 = vrcp.f32 %v1663_v37  ;;  %v2157_v55 = vsel %vm270_vm1, %v2152_v57, 0 }
 0x4ca   : > { %v2102_v43 = vpop.permute.xlu0 %2101 }
 0x4cb   : > { %v2107_v59 = vsel %vm270_vm1, %v2102_v43, 0 }
 0x4cd   : > { %v4906_v33 = vpop.eup %4905 }
 0x4ce   : > { %v1680_v61 = vmul.f32 %v4906_v33, %v5553_v25  ;;  %v2100_v39 = vpop.permute.xlu0 %2099 }
 0x4d0   : > { %v1688_v20 = vpack.c.bf16 %v1680_v61, %v1680_v61 }
 0x4d1   : > { %v4908_v53 = vpop.eup %4907 }
 0x4d2   : > { %v1681_v62 = vmul.f32 %v4908_v53, %v5557_v46  ;;  %4540 = vmatmul.mubr.msk.bf16.vlgmr.msra.gmra.mrb[56].mxu1 %vm756_vm4, %v1688_v20  ;;  %v2202_v18 = vpop.permute.xlu0 %2201 }
 0x4d3   : > { %4550 = vmatpush3.bf16.msra.mxu1 %v2057_v36  ;;  %4551 = vmatprep.mubr.msk.bf16.mxu1 %vm4984_vm0, %v6189_v0  ;;  %v2207_v46 = vsel %vm270_vm1, %v2202_v18, 0 }
 0x4d4   : > { %v1689_v41 = vpack.c.bf16 %v1681_v62, %v1681_v62  ;;  %4561 = vmatprep.subr.bf16.mxu1 %v6189_v0 }
 0x4d6   : > { %4546 = vmatmul.mubr.msk.bf16.vlgmr.msra.gmra.mrb[60].mxu0 %vm756_vm4, %v1689_v41  ;;  %v2200_v25 = vpop.permute.xlu0 %2199 }
 0x4d7   : > { %4556 = vmatpush3.bf16.xpose.msra.mxu0 %v2107_v59  ;;  %4557 = vmatprep.mubr.msk.bf16.mxu0 %vm4984_vm0, %v6189_v0 }
 0x4d8   : > { %4567 = vmatprep.subr.bf16.mxu0 %v6189_v0 }
 0x4da   : > { %v2302_v10 = vpop.permute.xlu0 %2301 }
 0x4db   : > { %v2307_v56 = vsel %vm270_vm1, %v2302_v10, 0 }
 0x4de   : > { %4558 = vmatmul.mubr.msk.bf16.vlgmr.msra.gmra.mrb[64].mxu0 %vm270_vm1, %v2100_v39  ;;  %v2300_v27 = vpop.permute.xlu0 %2299 }
 0x4df   : > { %4568 = vmatpush3.bf16.xpose.msra.mxu0 %v2207_v46  ;;  %4569 = vmatprep.mubr.msk.bf16.mxu0 %vm4984_vm0, %v6189_v0 }
 0x4e0   : > { %4579 = vmatprep.subr.bf16.mxu0 %v6189_v0 }
 0x4e2   : > { %v2402_v16 = vpop.permute.xlu0 %2401 }
 0x4e3   : > { %v2407_v44 = vsel %vm270_vm1, %v2402_v16, 0 }
 0x4e6   : > { %4570 = vmatmul.mubr.msk.bf16.vlgmr.msra.gmra.mrb[68].mxu0 %vm270_vm1, %v2200_v25  ;;  %v2400_v4 = vpop.permute.xlu0 %2399 }
 0x4e7   : > { %4580 = vmatpush3.bf16.xpose.msra.mxu0 %v2307_v56  ;;  %4581 = vmatprep.mubr.msk.bf16.mxu0 %vm4984_vm0, %v6189_v0 }
 0x4e8   : > { %4591 = vmatprep.subr.bf16.mxu0 %v6189_v0 }
 0x4ee   : > { %4582 = vmatmul.mubr.msk.bf16.vlgmr.msra.gmra.mrb[72].mxu0 %vm270_vm1, %v2300_v27 }
 0x4ef   : > { %4592 = vmatpush3.bf16.xpose.msra.mxu0 %v2407_v44  ;;  %4593 = vmatprep.mubr.msk.bf16.mxu0 %vm4984_vm0, %v6189_v0 }
 0x4f0   : > { %4603 = vmatprep.subr.bf16.mxu0 %v6189_v0 }
 0x4f6   : > { %4594 = vmatmul.mubr.msk.bf16.vlgmr.msra.gmra.mrb[76].mxu0 %vm270_vm1, %v2400_v4 }
 0x4f7   : > { %v1666_v51 = vpop.xlane.xlu1 %1665  ;;  %4605 = vmatprep.mubr.msk.bf16.mxu0 %vm4984_vm0, %v6189_v0 }
 0x4f8   : > { %4909 = vrcp.f32 %v1666_v51 }
 0x4fb   : > { %v2150_v34 = vpop.permute.xlu1 %2149 }
 0x4ff   : > { %v2252_v52 = vpop.permute.xlu1 %2251 }
 0x500   : > { %v2257_v24 = vsel %vm270_vm1, %v2252_v52, 0 }
 0x502   : > { %v4910_v19 = vpop.eup %4909 }
 0x503   : > { %v1682_v49 = vmul.f32 %v4910_v19, %v5579_v58  ;;  %v2250_v30 = vpop.permute.xlu1 %2249 }
 0x505   : > { %v1690_v50 = vpack.c.bf16 %v1682_v49, %v1682_v49 }
 0x507   : > { %4552 = vmatmul.mubr.msk.bf16.vlgmr.msra.gmra.mrb[60].mxu1 %vm756_vm4, %v1690_v50  ;;  %v2352_v58 = vpop.permute.xlu1 %2351 }
 0x508   : > { %4562 = vmatpush3.bf16.xpose.msra.mxu1 %v2157_v55  ;;  %4563 = vmatprep.mubr.msk.bf16.mxu1 %vm4984_vm0, %v6189_v0  ;;  %v2357_v37 = vsel %vm270_vm1, %v2352_v58, 0 }
 0x509   : > { %4573 = vmatprep.subr.bf16.mxu1 %v6189_v0 }
 0x50b   : > { %v2350_v43 = vpop.permute.xlu1 %2349 }
 0x50f   : > { %4564 = vmatmul.mubr.msk.bf16.vlgmr.msra.gmra.mrb[64].mxu1 %vm270_vm1, %v2150_v34  ;;  %v2452_v33 = vpop.permute.xlu1 %2451 }
 0x510   : > { %4574 = vmatpush3.bf16.xpose.msra.mxu1 %v2257_v24  ;;  %4575 = vmatprep.mubr.msk.bf16.mxu1 %vm4984_vm0, %v6189_v0  ;;  %v2457_v61 = vsel %vm270_vm1, %v2452_v33, 0 }
 0x511   : > { %4585 = vmatprep.subr.bf16.mxu1 %v6189_v0 }
 0x513   : > { %v2450_v39 = vpop.permute.xlu1 %2449 }
 0x517   : > { %4576 = vmatmul.mubr.msk.bf16.vlgmr.msra.gmra.mrb[68].mxu1 %vm270_vm1, %v2250_v30 }
 0x518   : > { %4586 = vmatpush3.bf16.xpose.msra.mxu1 %v2357_v37  ;;  %4587 = vmatprep.mubr.msk.bf16.mxu1 %vm4984_vm0, %v6189_v0 }
 0x519   : > { %4597 = vmatprep.subr.bf16.mxu1 %v6189_v0 }
 0x51f   : > { %4588 = vmatmul.mubr.msk.bf16.vlgmr.msra.gmra.mrb[72].mxu1 %vm270_vm1, %v2350_v43 }
 0x520   : > { %4598 = vmatpush3.bf16.xpose.msra.mxu1 %v2457_v61  ;;  %4599 = vmatprep.mubr.msk.bf16.mxu1 %vm4984_vm0, %v6189_v0 }
 0x521   : > { %4609 = vmatprep.subr.bf16.mxu1 %v6189_v0 }
 0x527   : > { %4600 = vmatmul.mubr.msk.bf16.vlgmr.msra.gmra.mrb[76].mxu1 %vm270_vm1, %v2450_v39 }
 0x528   : > { %4611 = vmatprep.mubr.msk.bf16.mxu1 %vm4984_vm0, %v6189_v0 }
 0x539   : > { %v5695_v20 = vpop.f32.mrb[48].mxu0 }
 0x53a   : > { %v4511_v53 = vpop.f32.mrb[49].mxu0 }
 0x53b   : > { %v1739_v36 = vpop.f32.mrb[50].mxu0  ;;  %v2665_v53 = vpop.permute.xlu1 %2664 }
 0x53c   : > { %v4512_v62 = vpop.f32.mrb[51].mxu0  ;;  %v2617_v36 = vpop.permute.xlu0 %2616 }
 0x53d   : > { %v2670_v62 = vsel %vm760_vm3, %v2665_v53, 0 }
 0x53e   : > { %4610 = vmatpush3.bf16.msra.mxu1 %v2670_v62 }
 0x53f   : > { %4621 = vmatprep.subr.bf16.mxu1 %v6189_v0 }
 0x541   : > { %v5697_v59 = vpop.f32.mrb[52].mxu0 }
 0x542   : > { %v4523_v41 = vpop.f32.mrb[53].mxu0 }
 0x543   : > { %v1841_v18 = vpop.f32.mrb[54].mxu0  ;;  %v2622_v41 = vsel %vm760_vm3, %v2617_v36, 0 }
 0x544   : > { %v4524_v25 = vpop.f32.mrb[55].mxu0  ;;  %4604 = vmatpush3.bf16.msra.mxu0 %v2622_v41 }
 0x545   : > { %4615 = vmatprep.subr.bf16.mxu0 %v6189_v0  ;;  %v4201_v25 = vld [vmem:[%s6187_s3 + $0x40] sm:$0x3f] }
 0x568   : > { %v5699_v46 = vpop.f32.mrb[48].mxu1 }
 0x569   : > { %v4517_v27 = vpop.f32.mrb[49].mxu1 }
 0x56a   : > { %v1790_v56 = vpop.f32.mrb[50].mxu1 }
 0x56b   : > { %v4518_v16 = vpop.f32.mrb[51].mxu1 }
 0x570   : > { %v5703_v44 = vpop.f32.mrb[52].mxu1 }
 0x571   : > { %v4529_v4 = vpop.f32.mrb[53].mxu1 }
 0x572   : > { %v1892_v51 = vpop.f32.mrb[54].mxu1 }
 0x573   : > { %v4530_v34 = vpop.f32.mrb[55].mxu1 }
 0x574   : > { %v5707_v19 = vpop.f32.mrb[56].mxu0 }
 0x575   : > { %v4535_v49 = vpop.f32.mrb[57].mxu0 }
 0x576   : > { %v1943_v50 = vpop.f32.mrb[58].mxu0 }
 0x577   : > { %v4536_v52 = vpop.f32.mrb[59].mxu0  ;;  %v4203_v50 = vld [vmem:[%s6187_s3 + $0x50] sm:$0x3f] }
 0x5a5   : > { %v5709_v55 = vpop.f32.mrb[56].mxu1 }
 0x5a6   : > { %v4541_v24 = vpop.f32.mrb[57].mxu1 }
 0x5a7   : > { %v1994_v58 = vpop.f32.mrb[58].mxu1 }
 0x5a8   : > { %v4542_v37 = vpop.f32.mrb[59].mxu1 }
 0x5a9   : > { %v5713_v43 = vpop.f32.mrb[60].mxu0 }
 0x5aa   : > { %v4547_v33 = vpop.f32.mrb[61].mxu0 }
 0x5ab   : > { %v2045_v61 = vpop.f32.mrb[62].mxu0 }
 0x5ac   : > { %v4548_v39 = vpop.f32.mrb[63].mxu0 }
 0x5b1   : > { %v2143_v18 = vpop.f32.mrb[64].mxu0 }
 0x5b2   : > { %v2499_v27 = vmul.f32 0.5, %v2143_v18  ;;  %v4559_v56 = vpop.f32.mrb[65].mxu0 }
 0x5b3   : > { %v2146_v16 = vpop.f32.mrb[66].mxu0 }
 0x5b4   : > { %v5722_v4 = vadd.f32 %v4201_v25, %v2499_v27  ;;  %v4560_v51 = vpop.f32.mrb[67].mxu0 }
 0x5b6   : > { %v2520_v34 = vsel %vm659_vm2, %v5722_v4, -inf }
 0x5b7   : > { %2521 = vmax.xlane.f32.xlu0 %v2520_v34 }
 0x5b9   : > { %v2243_v49 = vpop.f32.mrb[68].mxu0 }
 0x5ba   : > { %v2501_v52 = vmul.f32 0.5, %v2243_v49  ;;  %v4571_v24 = vpop.f32.mrb[69].mxu0 }
 0x5bb   : > { %v2246_v58 = vpop.f32.mrb[70].mxu0 }
 0x5bc   : > { %v5729_v37 = vadd.f32 %v4203_v50, %v2501_v52  ;;  %v4572_v33 = vpop.f32.mrb[71].mxu0  ;;  %v4202_v58 = vld [vmem:[%s6187_s3 + $0x48] sm:$0x3f] }
 0x5be   : > { %v2526_v61 = vsel %vm659_vm2, %v5729_v37, -inf }
 0x5bf   : > { %2527 = vmax.xlane.f32.xlu0 %v2526_v61 }
 0x5c1   : > { %v2343_v39 = vpop.f32.mrb[72].mxu0 }
 0x5c2   : > { %v4583_v53 = vpop.f32.mrb[73].mxu0 }
 0x5c3   : > { %v2346_v36 = vpop.f32.mrb[74].mxu0 }
 0x5c4   : > { %v4584_v62 = vpop.f32.mrb[75].mxu0 }
 0x5c9   : > { %v2443_v41 = vpop.f32.mrb[76].mxu0 }
 0x5ca   : > { %v4595_v18 = vpop.f32.mrb[77].mxu0  ;;  %v2505_v10 = vmul.f32 0.5, %v2443_v41 }
 0x5cb   : > { %v2446_v27 = vpop.f32.mrb[78].mxu0 }
 0x5cc   : > { %v4596_v56 = vpop.f32.mrb[79].mxu0  ;;  %v2503_v27 = vmul.f32 0.5, %v2343_v39 }
 0x5da   : > { %v5733_v16 = vpop.f32.mrb[60].mxu1 }
 0x5db   : > { %v4553_v34 = vpop.f32.mrb[61].mxu1 }
 0x5dc   : > { %v2096_v49 = vpop.f32.mrb[62].mxu1  ;;  %v4204_v34 = vld [vmem:[%s6187_s3 + $0x58] sm:$0x3f] }
 0x5dd   : > { %v4554_v52 = vpop.f32.mrb[63].mxu1 }
 0x5e2   : > { %v2193_v24 = vpop.f32.mrb[64].mxu1 }
 0x5e3   : > { %v2500_v33 = vmul.f32 0.5, %v2193_v24  ;;  %v4565_v61 = vpop.f32.mrb[65].mxu1  ;;  %v2516_v24 = vadd.f32 %v4201_v25, %v2503_v27 }
 0x5e4   : > { %v2196_v53 = vpop.f32.mrb[66].mxu1 }
 0x5e5   : > { %v4566_v36 = vpop.f32.mrb[67].mxu1  ;;  %v2513_v62 = vadd.f32 %v4202_v58, %v2500_v33  ;;  %v2532_v33 = vsel %vm659_vm2, %v2516_v24, -inf  ;;  %v5746_v53 = vadd.f32 %v4203_v50, %v2505_v10 }
 0x5e7   : > { %v2523_v18 = vsel %vm659_vm2, %v2513_v62, -inf }
 0x5e8   : > { %2524 = vmax.xlane.f32.xlu1 %v2523_v18 }
 0x5ea   : > { %v2293_v56 = vpop.f32.mrb[68].mxu1 }
 0x5eb   : > { %v2502_v49 = vmul.f32 0.5, %v2293_v56  ;;  %v4577_v52 = vpop.f32.mrb[69].mxu1 }
 0x5ec   : > { %v2296_v51 = vpop.f32.mrb[70].mxu1 }
 0x5ed   : > { %v4578_v57 = vpop.f32.mrb[71].mxu1  ;;  %v2515_v30 = vadd.f32 %v4204_v34, %v2502_v49  ;;  %v2538_v51 = vsel %vm659_vm2, %v5746_v53, -inf }
 0x5ef   : > { %v2529_v61 = vsel %vm659_vm2, %v2515_v30, -inf }
 0x5f0   : > { %2530 = vmax.xlane.f32.xlu0 %v2529_v61 }
 0x5f2   : > { %v2393_v39 = vpop.f32.mrb[72].mxu1 }
 0x5f3   : > { %v2504_v36 = vmul.f32 0.5, %v2393_v39  ;;  %v4589_v18 = vpop.f32.mrb[73].mxu1 }
 0x5f4   : > { %2533 = vmax.xlane.f32.xlu0 %v2532_v33  ;;  %v2396_v0 = vpop.f32.mrb[74].mxu1 }
 0x5f5   : > { %v2517_v31 = vadd.f32 %v4202_v58, %v2504_v36  ;;  %v4590_v57 = vpop.f32.mrb[75].mxu1 }
 0x5f7   : > { %v2535_v41 = vsel %vm659_vm2, %v2517_v31, -inf }
 0x5f8   : > { %2536 = vmax.xlane.f32.xlu1 %v2535_v41  ;;  %2539 = vmax.xlane.f32.xlu0 %v2538_v51 }
 0x5fa   : > { %v2493_v25 = vpop.f32.mrb[76].mxu1 }
 0x5fb   : > { %v4601_v27 = vpop.f32.mrb[77].mxu1  ;;  %v2506_v0 = vmul.f32 0.5, %v2493_v25 }
 0x5fc   : > { %v2496_v56 = vpop.f32.mrb[78].mxu1 }
 0x5fd   : > { %v4602_v49 = vpop.f32.mrb[79].mxu1  ;;  %v5755_v10 = vadd.f32 %v4204_v34, %v2506_v0 }
 0x5ff   : > { %v2541_v50 = vsel %vm659_vm2, %v5755_v10, -inf }
 0x609   : > { %2856 = vrot.lane.b32.xlu1 %v5500_v21, %s4986_s21 }
 0x60e   : > { %2808 = vrot.lane.b32.xlu0 %v5506_v54, %s4986_s21 }
 0x62d   : > { %2542 = vmax.xlane.f32.xlu1 %v2541_v50 }
 0x644   : > { %v2522_v58 = vpop.xlane.xlu0 %2521 }
 0x645   : > { %v2544_v52 = vsub.f32 %v5722_v4, %v2522_v58  ;;  %v2713_v4 = vpop.permute.xlu1 %2712 }
 0x647   : > { %v2552_v61 = vmul.f32 1.442695, %v2544_v52 }
 0x649   : > { %4911 = vpow2.f32 %v2552_v61  ;;  %v5769_v41 = vpop.permute.xlu1 %2760 }
 0x64c   : > { %v2528_v33 = vpop.xlane.xlu0 %2527 }
 0x64d   : > { %v2546_v39 = vsub.f32 %v5729_v37, %v2528_v33 }
 0x64f   : > { %v2556_v36 = vmul.f32 1.442695, %v2546_v39 }
 0x651   : > { %4913 = vpow2.f32 %v2556_v36 }
 0x653   : > { %v5761_v18 = vpop.eup %4911 }
 0x654   : > { %v2568_v34 = vsel %vm659_vm2, %v5761_v18, 0.0 }
 0x655   : > { %2569 = vadd.xlane.f32.xlu0 %v2568_v34 }
 0x65b   : > { %v5765_v51 = vpop.eup %4913 }
 0x65c   : > { %v2574_v57 = vsel %vm659_vm2, %v5765_v51, 0.0 }
 0x65d   : > { %2575 = vadd.xlane.f32.xlu0 %v2574_v57 }
 0x675   : > { %v2525_v25 = vpop.xlane.xlu1 %2524 }
 0x676   : > { %v2545_v27 = vsub.f32 %v2513_v62, %v2525_v25 }
 0x678   : > { %v2554_v37 = vmul.f32 1.442695, %v2545_v27 }
 0x67a   : > { %4915 = vpow2.f32 %v2554_v37 }
 0x67d   : > { %v2531_v56 = vpop.xlane.xlu0 %2530 }
 0x67e   : > { %v2547_v49 = vsub.f32 %v2515_v30, %v2531_v56 }
 0x680   : > { %v2558_v0 = vmul.f32 1.442695, %v2547_v49 }
 0x681   : > { %v2534_v50 = vpop.xlane.xlu0 %2533 }
 0x682   : > { %4917 = vpow2.f32 %v2558_v0  ;;  %v2548_v58 = vsub.f32 %v2516_v24, %v2534_v50 }
 0x684   : > { %v5771_v52 = vpop.eup %4915  ;;  %v2560_v61 = vmul.f32 1.442695, %v2548_v58 }
 0x685   : > { %v2571_v33 = vsel %vm659_vm2, %v5771_v52, 0.0  ;;  %v2537_v24 = vpop.xlane.xlu1 %2536  ;;  %v2540_v57 = vpop.xlane.xlu0 %2539 }
 0x686   : > { %4919 = vpow2.f32 %v2560_v61  ;;  %2572 = vadd.xlane.f32.xlu1 %v2571_v33  ;;  %v2549_v34 = vsub.f32 %v2517_v31, %v2537_v24  ;;  %v2550_v27 = vsub.f32 %v5746_v53, %v2540_v57 }
 0x688   : > { %v2562_v25 = vmul.f32 1.442695, %v2549_v34  ;;  %v2564_v37 = vmul.f32 1.442695, %v2550_v27 }
 0x689   : > { %v5798_v31 = vpop.permute.xlu1 %2856  ;;  %v2809_v53 = vpop.permute.xlu0 %2808 }
 0x68a   : > { %4921 = vpow2.f32 %v2562_v25 }
 0x68b   : > { %4923 = vpow2.f32 %v2564_v37 }
 0x68c   : > { %v5775_v39 = vpop.eup %4917 }
 0x68d   : > { %v2577_v62 = vsel %vm659_vm2, %v5775_v39, 0.0 }
 0x68e   : > { %2578 = vadd.xlane.f32.xlu1 %v2577_v62 }
 0x690   : > { %v5779_v36 = vpop.eup %4919 }
 0x691   : > { %v2580_v30 = vsel %vm659_vm2, %v5779_v36, 0.0 }
 0x692   : > { %2581 = vadd.xlane.f32.xlu0 %v2580_v30 }
 0x694   : > { %v5788_v56 = vpop.eup %4921 }
 0x695   : > { %v2583_v49 = vsel %vm659_vm2, %v5788_v56, 0.0  ;;  %v5792_v0 = vpop.eup %4923 }
 0x696   : > { %v2586_v50 = vsel %vm659_vm2, %v5792_v0, 0.0 }
 0x69f   : > { %2952 = vrot.lane.b32.xlu1 %v5542_v22, %s4986_s21 }
 0x6a8   : > { %2904 = vrot.lane.b32.xlu0 %v5548_v15, %s4986_s21 }
 0x6ba   : > { %v2543_v58 = vpop.xlane.xlu1 %2542 }
 0x6bb   : > { %v2551_v61 = vsub.f32 %v5755_v10, %v2543_v58  ;;  %v2718_v10 = vsel %vm760_vm3, %v2713_v4, 0 }
 0x6bd   : > { %v2566_v62 = vmul.f32 1.442695, %v2551_v61 }
 0x6c3   : > { %2584 = vadd.xlane.f32.xlu1 %v2583_v49 }
 0x6c7   : > { %2587 = vadd.xlane.f32.xlu0 %v2586_v50 }
 0x6d4   : > { %3052 = vrot.lane.b32.xlu1 %v5213_v29, %s4987_s30 }
 0x6dd   : > { %3002 = vrot.lane.b32.xlu0 %v5231_v2, %s4987_s30 }
 0x6e1   : > { %3000 = vrot.lane.b32.xlu0 %v5225_v32, %s4987_s30 }
 0x6e2   : > { %v2570_v33 = vpop.xlane.xlu0 %2569 }
 0x6e3   : > { %4925 = vrcp.f32 %v2570_v33 }
 0x6e4   : > { %4927 = vpow2.f32 %v2566_v62 }
 0x6e5   : > { %3102 = vrot.lane.b32.xlu0 %v5237_v35, %s4987_s30  ;;  %v6192_v35 = vmov 0.0  }
 0x6e9   : > { %3100 = vrot.lane.b32.xlu0 %v5244_v7, %s4987_s30 }
 0x6ea   : > { %v2576_v29 = vpop.xlane.xlu0 %2575 }
 0x6eb   : > { %4929 = vrcp.f32 %v2576_v29 }
 0x6ed   : > { %v4926_v30 = vpop.eup %4925  ;;  %3202 = vrot.lane.b32.xlu0 %v5250_v1, %s4987_s30 }
 0x6ee   : > { %v2600_v32 = vmul.f32 %v4926_v30, %v5761_v18  ;;  %v5818_v7 = vpop.eup %4927  ;;  %v2814_v18 = vsel %vm760_vm3, %v2809_v53, 0 }
 0x6f0   : > { %v2608_v2 = vpack.c.bf16 %v2600_v32, %v2600_v32 }
 0x6f1   : > { %3200 = vrot.lane.b32.xlu0 %v5256_v5, %s4987_s30  ;;  %v2589_v5 = vsel %vm659_vm2, %v5818_v7, 0.0 }
 0x6f2   : > { %4606 = vmatmul.mubr.msk.bf16.vlgmr.msra.gmra.mrb[80].mxu0 %vm756_vm4, %v2608_v2 }
 0x6f3   : > { %4616 = vmatpush3.bf16.msra.mxu0 %v2718_v10  ;;  %4617 = vmatprep.mubr.msk.bf16.mxu0 %vm4984_vm0, %v6192_v35 }
 0x6f4   : > { %4627 = vmatprep.subr.bf16.mxu0 %v6192_v35 }
 0x6f5   : > { %v4930_v24 = vpop.eup %4929  ;;  %3302 = vrot.lane.b32.xlu0 %v5262_v13, %s4987_s30 }
 0x6f6   : > { %v2602_v1 = vmul.f32 %v4930_v24, %v5765_v51 }
 0x6f8   : > { %2590 = vadd.xlane.f32.xlu1 %v2589_v5  ;;  %v2610_v4 = vpack.c.bf16 %v2602_v1, %v2602_v1 }
 0x6f9   : > { %3300 = vrot.lane.b32.xlu0 %v5268_v11, %s4987_s30 }
 0x6fa   : > { %4618 = vmatmul.mubr.msk.bf16.vlgmr.msra.gmra.mrb[84].mxu0 %vm756_vm4, %v2610_v4 }
 0x6fb   : > { %4628 = vmatpush3.bf16.msra.mxu0 %v2814_v18  ;;  %4629 = vmatprep.mubr.msk.bf16.mxu0 %vm4984_vm0, %v6192_v35 }
 0x6fc   : > { %4639 = vmatprep.subr.bf16.mxu0 %v6192_v35 }
 0x709   : > { %3050 = vrot.lane.b32.xlu1 %v5278_v17, %s4987_s30 }
 0x70d   : > { %3152 = vrot.lane.b32.xlu1 %v5284_v23, %s4987_s30 }
 0x711   : > { %3150 = vrot.lane.b32.xlu1 %v5290_v38, %s4987_s30  ;;  %v2766_v38 = vsel %vm760_vm3, %v5769_v41, 0 }
 0x713   : > { %v2573_v13 = vpop.xlane.xlu1 %2572 }
 0x714   : > { %4931 = vrcp.f32 %v2573_v13 }
 0x715   : > { %3252 = vrot.lane.b32.xlu1 %v5296_v8, %s4987_s30 }
 0x719   : > { %3250 = vrot.lane.b32.xlu1 %v5302_v6, %s4987_s30 }
 0x71b   : > { %v2579_v11 = vpop.xlane.xlu1 %2578 }
 0x71c   : > { %4933 = vrcp.f32 %v2579_v11 }
 0x71d   : > { %3352 = vrot.lane.b32.xlu1 %v5308_v14, %s4987_s30 }
 0x71e   : > { %v4932_v17 = vpop.eup %4931 }
 0x71f   : > { %v2601_v51 = vmul.f32 %v4932_v17, %v5771_v52  ;;  %v2582_v23 = vpop.xlane.xlu0 %2581 }
 0x720   : > { %4935 = vrcp.f32 %v2582_v23 }
 0x721   : > { %v2609_v34 = vpack.c.bf16 %v2601_v51, %v2601_v51  ;;  %3350 = vrot.lane.b32.xlu1 %v5314_v12, %s4987_s30  ;;  %v2862_v12 = vsel %vm760_vm3, %v5798_v31, 0 }
 0x723   : > { %4612 = vmatmul.mubr.msk.bf16.vlgmr.msra.gmra.mrb[80].mxu1 %vm756_vm4, %v2609_v34  ;;  %v2905_v57 = vpop.permute.xlu0 %2904 }
 0x724   : > { %4622 = vmatpush3.bf16.msra.mxu1 %v2766_v38  ;;  %4623 = vmatprep.mubr.msk.bf16.mxu1 %vm4984_vm0, %v6192_v35  ;;  %v2910_v27 = vsel %vm760_vm3, %v2905_v57, 0 }
 0x725   : > { %4633 = vmatprep.subr.bf16.mxu1 %v6192_v35 }
 0x726   : > { %v4934_v8 = vpop.eup %4933 }
 0x727   : > { %v2603_v6 = vmul.f32 %v4934_v8, %v5775_v39  ;;  %v2953_v39 = vpop.permute.xlu1 %2952 }
 0x728   : > { %v2958_v33 = vsel %vm760_vm3, %v2953_v39, 0 }
 0x729   : > { %v2611_v14 = vpack.c.bf16 %v2603_v6, %v2603_v6 }
 0x72a   : > { %v4936_v52 = vpop.eup %4935 }
 0x72b   : > { %v2604_v25 = vmul.f32 %v4936_v52, %v5779_v36  ;;  %4624 = vmatmul.mubr.msk.bf16.vlgmr.msra.gmra.mrb[84].mxu1 %vm756_vm4, %v2611_v14 }
 0x72c   : > { %4634 = vmatpush3.bf16.msra.mxu1 %v2862_v12  ;;  %4635 = vmatprep.mubr.msk.bf16.mxu1 %vm4984_vm0, %v6192_v35 }
 0x72d   : > { %v2612_v41 = vpack.c.bf16 %v2604_v25, %v2604_v25  ;;  %4645 = vmatprep.subr.bf16.mxu1 %v6192_v35 }
 0x72f   : > { %4630 = vmatmul.mubr.msk.bf16.vlgmr.msra.gmra.mrb[88].mxu0 %vm756_vm4, %v2612_v41 }
 0x730   : > { %4640 = vmatpush3.bf16.msra.mxu0 %v2910_v27  ;;  %4641 = vmatprep.mubr.msk.bf16.mxu0 %vm4984_vm0, %v6192_v35 }
 0x731   : > { %4651 = vmatprep.subr.bf16.mxu0 %v6192_v35 }
 0x750   : > { %v2585_v36 = vpop.xlane.xlu1 %2584 }
 0x751   : > { %4937 = vrcp.f32 %v2585_v36 }
 0x754   : > { %v2588_v37 = vpop.xlane.xlu0 %2587  ;;  %v3053_v18 = vpop.permute.xlu1 %3052 }
 0x755   : > { %4939 = vrcp.f32 %v2588_v37  ;;  %v3058_v38 = vsel %vm270_vm1, %v3053_v18, 0 }
 0x758   : > { %v3003_v49 = vpop.permute.xlu0 %3002 }
 0x759   : > { %v3008_v29 = vsel %vm270_vm1, %v3003_v49, 0 }
 0x75b   : > { %v4938_v50 = vpop.eup %4937 }
 0x75c   : > { %v2605_v31 = vmul.f32 %v4938_v50, %v5788_v56  ;;  %v3001_v53 = vpop.permute.xlu0 %3000 }
 0x75e   : > { %v2613_v58 = vpack.c.bf16 %v2605_v31, %v2605_v31 }
 0x75f   : > { %v4940_v61 = vpop.eup %4939 }
 0x760   : > { %v2606_v62 = vmul.f32 %v4940_v61, %v5792_v0  ;;  %4636 = vmatmul.mubr.msk.bf16.vlgmr.msra.gmra.mrb[88].mxu1 %vm756_vm4, %v2613_v58  ;;  %v3103_v32 = vpop.permute.xlu0 %3102 }
 0x761   : > { %4646 = vmatpush3.bf16.msra.mxu1 %v2958_v33  ;;  %4647 = vmatprep.mubr.msk.bf16.mxu1 %vm4984_vm0, %v6192_v35  ;;  %v3108_v0 = vsel %vm270_vm1, %v3103_v32, 0 }
 0x762   : > { %v2614_v30 = vpack.c.bf16 %v2606_v62, %v2606_v62  ;;  %4657 = vmatprep.subr.bf16.mxu1 %v6192_v35 }
 0x764   : > { %4642 = vmatmul.mubr.msk.bf16.vlgmr.msra.gmra.mrb[92].mxu0 %vm756_vm4, %v2614_v30  ;;  %v3101_v56 = vpop.permute.xlu0 %3100 }
 0x765   : > { %4652 = vmatpush3.bf16.xpose.msra.mxu0 %v3008_v29  ;;  %4653 = vmatprep.mubr.msk.bf16.mxu0 %vm4984_vm0, %v6192_v35 }
 0x766   : > { %4663 = vmatprep.subr.bf16.mxu0 %v6192_v35 }
 0x768   : > { %v3203_v2 = vpop.permute.xlu0 %3202 }
 0x769   : > { %v3208_v24 = vsel %vm270_vm1, %v3203_v2, 0 }
 0x76c   : > { %4654 = vmatmul.mubr.msk.bf16.vlgmr.msra.gmra.mrb[96].mxu0 %vm270_vm1, %v3001_v53  ;;  %v3201_v10 = vpop.permute.xlu0 %3200 }
 0x76d   : > { %4664 = vmatpush3.bf16.xpose.msra.mxu0 %v3108_v0  ;;  %4665 = vmatprep.mubr.msk.bf16.mxu0 %vm4984_vm0, %v6192_v35 }
 0x76e   : > { %4675 = vmatprep.subr.bf16.mxu0 %v6192_v35 }
 0x770   : > { %v3303_v1 = vpop.permute.xlu0 %3302 }
 0x771   : > { %v3308_v5 = vsel %vm270_vm1, %v3303_v1, 0 }
 0x774   : > { %4666 = vmatmul.mubr.msk.bf16.vlgmr.msra.gmra.mrb[100].mxu0 %vm270_vm1, %v3101_v56  ;;  %v3301_v4 = vpop.permute.xlu0 %3300 }
 0x775   : > { %4676 = vmatpush3.bf16.xpose.msra.mxu0 %v3208_v24  ;;  %4677 = vmatprep.mubr.msk.bf16.mxu0 %vm4984_vm0, %v6192_v35 }
 0x776   : > { %4687 = vmatprep.subr.bf16.mxu0 %v6192_v35 }
 0x77c   : > { %4678 = vmatmul.mubr.msk.bf16.vlgmr.msra.gmra.mrb[104].mxu0 %vm270_vm1, %v3201_v10 }
 0x77d   : > { %4688 = vmatpush3.bf16.xpose.msra.mxu0 %v3308_v5  ;;  %4689 = vmatprep.mubr.msk.bf16.mxu0 %vm4984_vm0, %v6192_v35 }
 0x77e   : > { %4699 = vmatprep.subr.bf16.mxu0 %v6192_v35 }
 0x784   : > { %4690 = vmatmul.mubr.msk.bf16.vlgmr.msra.gmra.mrb[108].mxu0 %vm270_vm1, %v3301_v4 }
 0x785   : > { %v2591_v13 = vpop.xlane.xlu1 %2590  ;;  %4701 = vmatprep.mubr.msk.bf16.mxu0 %vm4984_vm0, %v6192_v35 }
 0x786   : > { %4941 = vrcp.f32 %v2591_v13 }
 0x789   : > { %v3051_v11 = vpop.permute.xlu1 %3050 }
 0x78d   : > { %v3153_v34 = vpop.permute.xlu1 %3152 }
 0x78e   : > { %v3158_v6 = vsel %vm270_vm1, %v3153_v34, 0 }
 0x790   : > { %v4942_v17 = vpop.eup %4941 }
 0x791   : > { %v2607_v51 = vmul.f32 %v4942_v17, %v5818_v7  ;;  %v3151_v8 = vpop.permute.xlu1 %3150 }
 0x793   : > { %v2615_v23 = vpack.c.bf16 %v2607_v51, %v2607_v51 }
 0x795   : > { %4648 = vmatmul.mubr.msk.bf16.vlgmr.msra.gmra.mrb[92].mxu1 %vm756_vm4, %v2615_v23  ;;  %v3253_v7 = vpop.permute.xlu1 %3252 }
 0x796   : > { %4658 = vmatpush3.bf16.xpose.msra.mxu1 %v3058_v38  ;;  %4659 = vmatprep.mubr.msk.bf16.mxu1 %vm4984_vm0, %v6192_v35  ;;  %v3258_v14 = vsel %vm270_vm1, %v3253_v7, 0 }
 0x797   : > { %4669 = vmatprep.subr.bf16.mxu1 %v6192_v35 }
 0x799   : > { %v3251_v52 = vpop.permute.xlu1 %3250 }
 0x79d   : > { %4660 = vmatmul.mubr.msk.bf16.vlgmr.msra.gmra.mrb[96].mxu1 %vm270_vm1, %v3051_v11  ;;  %v3353_v57 = vpop.permute.xlu1 %3352 }
 0x79e   : > { %4670 = vmatpush3.bf16.xpose.msra.mxu1 %v3158_v6  ;;  %4671 = vmatprep.mubr.msk.bf16.mxu1 %vm4984_vm0, %v6192_v35  ;;  %v3358_v12 = vsel %vm270_vm1, %v3353_v57, 0 }
 0x79f   : > { %4681 = vmatprep.subr.bf16.mxu1 %v6192_v35 }
 0x7a1   : > { %v3351_v25 = vpop.permute.xlu1 %3350 }
 0x7a5   : > { %4672 = vmatmul.mubr.msk.bf16.vlgmr.msra.gmra.mrb[100].mxu1 %vm270_vm1, %v3151_v8  ;;  %v4221_v8 = vld [vmem:[%s6187_s3 + $0x60] sm:$0x3f] }
 0x7a6   : > { %4682 = vmatpush3.bf16.xpose.msra.mxu1 %v3258_v14  ;;  %4683 = vmatprep.mubr.msk.bf16.mxu1 %vm4984_vm0, %v6192_v35 }
 0x7a7   : > { %4693 = vmatprep.subr.bf16.mxu1 %v6192_v35 }
 0x7ad   : > { %4684 = vmatmul.mubr.msk.bf16.vlgmr.msra.gmra.mrb[104].mxu1 %vm270_vm1, %v3251_v52 }
 0x7ae   : > { %4694 = vmatpush3.bf16.xpose.msra.mxu1 %v3358_v12  ;;  %4695 = vmatprep.mubr.msk.bf16.mxu1 %vm4984_vm0, %v6192_v35 }
 0x7af   : > { %4705 = vmatprep.subr.bf16.mxu1 %v6192_v35 }
 0x7b5   : > { %4696 = vmatmul.mubr.msk.bf16.vlgmr.msra.gmra.mrb[108].mxu1 %vm270_vm1, %v3351_v25 }
 0x7b6   : > { %4707 = vmatprep.mubr.msk.bf16.mxu1 %vm4984_vm0, %v6192_v35 }
 0x7c5   : > { %v5921_v41 = vpop.f32.mrb[80].mxu0 }
 0x7c6   : > { %v4607_v27 = vpop.f32.mrb[81].mxu0 }
 0x7c7   : > { %v2661_v39 = vpop.f32.mrb[82].mxu0  ;;  %v4223_v27 = vld [vmem:[%s6187_s3 + $0x70] sm:$0x3f] }
 0x7c8   : > { %v4608_v36 = vpop.f32.mrb[83].mxu0 }
 0x7cd   : > { %v5923_v37 = vpop.f32.mrb[84].mxu0 }
 0x7ce   : > { %v4619_v49 = vpop.f32.mrb[85].mxu0 }
 0x7cf   : > { %v2757_v50 = vpop.f32.mrb[86].mxu0 }
 0x7d0   : > { %v4620_v31 = vpop.f32.mrb[87].mxu0 }
 0x7f6   : > { %v5925_v53 = vpop.f32.mrb[80].mxu1 }
 0x7f7   : > { %v4783_v58 = vpack.i.bf16 %v5925_v53, %v5921_v41  ;;  %v4613_v61 = vpop.f32.mrb[81].mxu1 }
 0x7f8   : > { %v2709_v33 = vpop.f32.mrb[82].mxu1 }
 0x7f9   : > { %v4614_v62 = vpop.f32.mrb[83].mxu1 }
 0x7fe   : > { %v5929_v29 = vpop.f32.mrb[84].mxu1 }
 0x7ff   : > { %v4788_v30 = vpack.i.bf16 %v5929_v29, %v5923_v37  ;;  %v4625_v32 = vpop.f32.mrb[85].mxu1 }
 0x800   : > { %v2805_v56 = vpop.f32.mrb[86].mxu1 }
 0x801   : > { %v4626_v0 = vpop.f32.mrb[87].mxu1 }
 0x802   : > { %v5933_v2 = vpop.f32.mrb[88].mxu0 }
 0x803   : > { %v4631_v10 = vpop.f32.mrb[89].mxu0 }
 0x804   : > { %v2853_v24 = vpop.f32.mrb[90].mxu0 }
 0x805   : > { %v4632_v1 = vpop.f32.mrb[91].mxu0 }
 0x833   : > { %v5935_v5 = vpop.f32.mrb[88].mxu1 }
 0x834   : > { %v4793_v18 = vpack.i.bf16 %v5935_v5, %v5933_v2  ;;  %v4637_v4 = vpop.f32.mrb[89].mxu1  ;;  %v6195_v2 = vpack.i.bf16 %v5703_v44, %v5697_v59  ;;  %v6196_v5 = vpack.i.bf16 %v5733_v16, %v5713_v43 }
 0x835   : > { %v2901_v13 = vpop.f32.mrb[90].mxu1 }
 0x836   : > { %v4638_v11 = vpop.f32.mrb[91].mxu1 }
 0x837   : > { %v5939_v17 = vpop.f32.mrb[92].mxu0 }
 0x838   : > { %v4643_v51 = vpop.f32.mrb[93].mxu0 }
 0x839   : > { %v2949_v23 = vpop.f32.mrb[94].mxu0 }
 0x83a   : > { %v4644_v34 = vpop.f32.mrb[95].mxu0 }
 0x83f   : > { %v3044_v38 = vpop.f32.mrb[96].mxu0 }
 0x840   : > { %v3400_v6 = vmul.f32 0.5, %v3044_v38  ;;  %v4655_v7 = vpop.f32.mrb[97].mxu0  ;;  %v4222_v38 = vld [vmem:[%s6187_s3 + $0x68] sm:$0x3f] }
 0x841   : > { %v3047_v14 = vpop.f32.mrb[98].mxu0 }
 0x842   : > { %v5944_v52 = vadd.f32 %v4221_v8, %v3400_v6  ;;  %v4656_v57 = vpop.f32.mrb[99].mxu0 }
 0x844   : > { %v3421_v12 = vsel %vm659_vm2, %v5944_v52, -inf }
 0x845   : > { %3422 = vmax.xlane.f32.xlu0 %v3421_v12 }
 0x847   : > { %v3144_v25 = vpop.f32.mrb[100].mxu0 }
 0x848   : > { %v3402_v39 = vmul.f32 0.5, %v3144_v25  ;;  %v4667_v36 = vpop.f32.mrb[101].mxu0 }
 0x849   : > { %v3147_v49 = vpop.f32.mrb[102].mxu0 }
 0x84a   : > { %v5951_v50 = vadd.f32 %v4223_v27, %v3402_v39  ;;  %v4668_v31 = vpop.f32.mrb[103].mxu0  ;;  %v4224_v49 = vld [vmem:[%s6187_s3 + $0x78] sm:$0x3f] }
 0x84c   : > { %v3427_v61 = vsel %vm659_vm2, %v5951_v50, -inf }
 0x84d   : > { %3428 = vmax.xlane.f32.xlu0 %v3427_v61 }
 0x84f   : > { %v3244_v33 = vpop.f32.mrb[104].mxu0 }
 0x850   : > { %v4679_v62 = vpop.f32.mrb[105].mxu0  ;;  %v3404_v39 = vmul.f32 0.5, %v3244_v33 }
 0x851   : > { %v3247_v32 = vpop.f32.mrb[106].mxu0 }
 0x852   : > { %v4680_v56 = vpop.f32.mrb[107].mxu0 }
 0x857   : > { %v3344_v0 = vpop.f32.mrb[108].mxu0 }
 0x858   : > { %v4691_v10 = vpop.f32.mrb[109].mxu0 }
 0x859   : > { %v3347_v24 = vpop.f32.mrb[110].mxu0  ;;  %v3417_v10 = vadd.f32 %v4221_v8, %v3404_v39 }
 0x85a   : > { %v4692_v1 = vpop.f32.mrb[111].mxu0  ;;  %v3406_v24 = vmul.f32 0.5, %v3344_v0 }
 0x85b   : > { %v3433_v33 = vsel %vm659_vm2, %v3417_v10, -inf }
 0x868   : > { %v5955_v4 = vpop.f32.mrb[92].mxu1 }
 0x869   : > { %v4798_v13 = vpack.i.bf16 %v5955_v4, %v5939_v17  ;;  %v4649_v11 = vpop.f32.mrb[93].mxu1 }
 0x86a   : > { %v2997_v51 = vpop.f32.mrb[94].mxu1  ;;  %v3419_v11 = vadd.f32 %v4223_v27, %v3406_v24 }
 0x86b   : > { %v4650_v23 = vpop.f32.mrb[95].mxu1 }
 0x870   : > { %v3094_v34 = vpop.f32.mrb[96].mxu1 }
 0x871   : > { %v3401_v6 = vmul.f32 0.5, %v3094_v34  ;;  %v4661_v7 = vpop.f32.mrb[97].mxu1 }
 0x872   : > { %v3097_v14 = vpop.f32.mrb[98].mxu1 }
 0x873   : > { %v3414_v57 = vadd.f32 %v4222_v38, %v3401_v6  ;;  %v4662_v12 = vpop.f32.mrb[99].mxu1 }
 0x874   : > { %v3439_v12 = vsel %vm659_vm2, %v3419_v11, -inf }
 0x875   : > { %v3424_v25 = vsel %vm659_vm2, %v3414_v57, -inf }
 0x876   : > { %3425 = vmax.xlane.f32.xlu1 %v3424_v25 }
 0x878   : > { %v3194_v36 = vpop.f32.mrb[100].mxu1 }
 0x879   : > { %v3403_v31 = vmul.f32 0.5, %v3194_v36  ;;  %v4673_v61 = vpop.f32.mrb[101].mxu1 }
 0x87a   : > { %v3197_v62 = vpop.f32.mrb[102].mxu1 }
 0x87b   : > { %v5966_v32 = vadd.f32 %v4224_v49, %v3403_v31  ;;  %v4674_v56 = vpop.f32.mrb[103].mxu1 }
 0x87d   : > { %v3430_v1 = vsel %vm659_vm2, %v5966_v32, -inf }
 0x87e   : > { %3431 = vmax.xlane.f32.xlu0 %v3430_v1 }
 0x880   : > { %v3294_v51 = vpop.f32.mrb[104].mxu1 }
 0x881   : > { %v3405_v23 = vmul.f32 0.5, %v3294_v51  ;;  %v4685_v34 = vpop.f32.mrb[105].mxu1 }
 0x882   : > { %v3297_v6 = vpop.f32.mrb[106].mxu1  ;;  %3434 = vmax.xlane.f32.xlu0 %v3433_v33 }
 0x883   : > { %v5971_v7 = vadd.f32 %v4222_v38, %v3405_v23  ;;  %v4686_v14 = vpop.f32.mrb[107].mxu1 }
 0x885   : > { %v3436_v8 = vsel %vm659_vm2, %v5971_v7, -inf }
 0x886   : > { %3437 = vmax.xlane.f32.xlu1 %v3436_v8  ;;  %3440 = vmax.xlane.f32.xlu0 %v3439_v12 }
 0x888   : > { %v3394_v0 = vpop.f32.mrb[108].mxu1 }
 0x889   : > { %v3407_v25 = vmul.f32 0.5, %v3394_v0  ;;  %v4697_v27 = vpop.f32.mrb[109].mxu1 }
 0x88a   : > { %v3397_v39 = vpop.f32.mrb[110].mxu1 }
 0x88b   : > { %v5976_v36 = vadd.f32 %v4224_v49, %v3407_v25  ;;  %v4698_v31 = vpop.f32.mrb[111].mxu1 }
 0x88d   : > { %v3442_v38 = vsel %vm659_vm2, %v5976_v36, -inf }
 0x897   : > { %3565 = vrot.lane.b32.xlu1 %v5434_v26, %s4987_s30 }
 0x89b   : > { %3613 = vrot.lane.b32.xlu1 %v5440_v63, %s4987_s30 }
 0x89c   : > { %3517 = vrot.lane.b32.xlu0 %v5419_v60, %s4987_s30 }
 0x8bf   : > { %3443 = vmax.xlane.f32.xlu1 %v3442_v38 }
 0x8d0   : > { %3661 = vrot.lane.b32.xlu1 %v5446_v3, %s4987_s30 }
 0x8d2   : > { %v3423_v61 = vpop.xlane.xlu0 %3422 }
 0x8d3   : > { %v3445_v49 = vsub.f32 %v5944_v52, %v3423_v61 }
 0x8d5   : > { %v3453_v62 = vmul.f32 1.442695, %v3445_v49 }
 0x8d7   : > { %4943 = vpow2.f32 %v3453_v62 }
 0x8da   : > { %v3429_v56 = vpop.xlane.xlu0 %3428 }
 0x8db   : > { %v3447_v26 = vsub.f32 %v5951_v50, %v3429_v56 }
 0x8dd   : > { %v3457_v24 = vmul.f32 1.442695, %v3447_v26 }
 0x8df   : > { %4945 = vpow2.f32 %v3457_v24  ;;  %v6193_v24 = vpack.i.bf16 %v5699_v46, %v5695_v20 }
 0x8e1   : > { %v5990_v63 = vpop.eup %4943 }
 0x8e2   : > { %v3469_v60 = vsel %vm659_vm2, %v5990_v63, 0.0 }
 0x8e3   : > { %3470 = vadd.xlane.f32.xlu0 %v3469_v60  ;;  %v6194_v60 = vpack.i.bf16 %v5709_v55, %v5707_v19 }
 0x8e9   : > { %v5994_v1 = vpop.eup %4945 }
 0x8ea   : > { %v3475_v3 = vsel %vm659_vm2, %v5994_v1, 0.0 }
 0x8eb   : > { %3476 = vadd.xlane.f32.xlu0 %v3475_v3 }
 0x901   : > { %3709 = vrot.lane.b32.xlu0 %v5506_v54, %s4987_s30 }
 0x903   : > { %v3426_v52 = vpop.xlane.xlu1 %3425 }
 0x904   : > { %v3446_v33 = vsub.f32 %v3414_v57, %v3426_v52 }
 0x906   : > { %v3455_v50 = vmul.f32 1.442695, %v3446_v33 }
 0x908   : > { %4947 = vpow2.f32 %v3455_v50 }
 0x90b   : > { %v3432_v51 = vpop.xlane.xlu0 %3431 }
 0x90c   : > { %v3448_v49 = vsub.f32 %v5966_v32, %v3432_v51 }
 0x90e   : > { %v3459_v62 = vmul.f32 1.442695, %v3448_v49 }
 0x90f   : > { %v3435_v23 = vpop.xlane.xlu0 %3434 }
 0x910   : > { %v3449_v34 = vsub.f32 %v3417_v10, %v3435_v23 }
 0x912   : > { %v6000_v6 = vpop.eup %4947  ;;  %v3461_v14 = vmul.f32 1.442695, %v3449_v34 }
 0x913   : > { %v3438_v12 = vpop.xlane.xlu1 %3437  ;;  %v3441_v8 = vpop.xlane.xlu0 %3440  ;;  %v3472_v0 = vsel %vm659_vm2, %v6000_v6, 0.0 }
 0x914   : > { %4949 = vpow2.f32 %v3461_v14  ;;  %v3451_v25 = vsub.f32 %v3419_v11, %v3441_v8  ;;  %3473 = vadd.xlane.f32.xlu1 %v3472_v0  ;;  %v3450_v56 = vsub.f32 %v5971_v7, %v3438_v12 }
 0x916   : > { %v3465_v27 = vmul.f32 1.442695, %v3451_v25  ;;  %v3463_v26 = vmul.f32 1.442695, %v3450_v56 }
 0x917   : > { %v3566_v54 = vpop.permute.xlu1 %3565  ;;  %v3518_v39 = vpop.permute.xlu0 %3517 }
 0x918   : > { %v3571_v57 = vsel %vm760_vm3, %v3566_v54, 0  ;;  %v3523_v31 = vsel %vm760_vm3, %v3518_v39, 0  ;;  %4951 = vpow2.f32 %v3465_v27 }
 0x919   : > { %4706 = vmatpush3.bf16.msra.mxu1 %v3571_v57  ;;  %4700 = vmatpush3.bf16.msra.mxu0 %v3523_v31  ;;  %4953 = vpow2.f32 %v3459_v62 }
 0x91a   : > { %4711 = vmatprep.subr.bf16.mxu0 %v6192_v35  ;;  %4717 = vmatprep.subr.bf16.mxu1 %v6192_v35  ;;  %4955 = vpow2.f32 %v3463_v26 }
 0x91b   : > { %v3614_v32 = vpop.permute.xlu1 %3613 }
 0x91c   : > { %v3619_v59 = vsel %vm760_vm3, %v3614_v32, 0 }
 0x91e   : > { %v6008_v10 = vpop.eup %4949 }
 0x91f   : > { %v3481_v11 = vsel %vm659_vm2, %v6008_v10, 0.0 }
 0x920   : > { %3482 = vadd.xlane.f32.xlu0 %v3481_v11 }
 0x922   : > { %v6012_v38 = vpop.eup %4951 }
 0x923   : > { %v3487_v61 = vsel %vm659_vm2, %v6012_v38, 0.0 }
 0x924   : > { %3488 = vadd.xlane.f32.xlu0 %v3487_v61 }
 0x925   : > { %3757 = vrot.lane.b32.xlu1 %v5500_v21, %s4987_s30  ;;  %v6028_v21 = vpop.eup %4953 }
 0x926   : > { %v6035_v7 = vpop.eup %4955 }
 0x927   : > { %v3484_v46 = vsel %vm659_vm2, %v6035_v7, 0.0 }
 0x93a   : > { %3805 = vrot.lane.b32.xlu0 %v5548_v15, %s4987_s30  ;;  %v3478_v15 = vsel %vm659_vm2, %v6028_v21, 0.0 }
 0x93e   : > { %4764 = vrot.lane.b32.xlu0 %v6193_v24, %s4988_s13 }
 0x942   : > { %4774 = vrot.lane.b32.xlu0 %v6194_v60, %s4988_s13 }
 0x946   : > { %4784 = vrot.lane.b32.xlu0 %v4783_v58, %s4989_s14 }
 0x949   : > { %3479 = vadd.xlane.f32.xlu1 %v3478_v15 }
 0x94a   : > { %4794 = vrot.lane.b32.xlu0 %v4793_v18, %s4989_s14 }
 0x94c   : > { %v3444_v20 = vpop.xlane.xlu1 %3443 }
 0x94d   : > { %v3452_v19 = vsub.f32 %v5976_v36, %v3444_v20  ;;  %3485 = vadd.xlane.f32.xlu1 %v3484_v46 }
 0x94f   : > { %v3467_v55 = vmul.f32 1.442695, %v3452_v19 }
 0x951   : > { %4957 = vpow2.f32 %v3467_v55 }
 0x95b   : > { %v6043_v41 = vpop.eup %4957 }
 0x95c   : > { %v3490_v53 = vsel %vm659_vm2, %v6043_v41, 0.0 }
 0x95d   : > { %3491 = vadd.xlane.f32.xlu1 %v3490_v53 }
 0x96e   : > { %3853 = vrot.lane.b32.xlu1 %v5542_v22, %s4987_s30 }
 0x970   : > { %v3471_v58 = vpop.xlane.xlu0 %3470 }
 0x971   : > { %4959 = vrcp.f32 %v3471_v58 }
 0x972   : > { %4769 = vrot.lane.b32.xlu1 %v6195_v2, %s4988_s13 }
 0x976   : > { %4779 = vrot.lane.b32.xlu1 %v6196_v5, %s4988_s13 }
 0x978   : > { %v3477_v18 = vpop.xlane.xlu0 %3476 }
 0x979   : > { %4961 = vrcp.f32 %v3477_v18 }
 0x97a   : > { %4789 = vrot.lane.b32.xlu1 %v4788_v30, %s4989_s14  ;;  %v3662_v30 = vpop.permute.xlu1 %3661 }
 0x97b   : > { %v4960_v36 = vpop.eup %4959  ;;  %v3667_v52 = vsel %vm760_vm3, %v3662_v30, 0 }
 0x97c   : > { %v3501_v3 = vmul.f32 %v4960_v36, %v5990_v63  ;;  %v3710_v43 = vpop.permute.xlu0 %3709 }
 0x97d   : > { %v3715_v29 = vsel %vm760_vm3, %v3710_v43, 0 }
 0x97e   : > { %4799 = vrot.lane.b32.xlu1 %v4798_v13, %s4989_s14  ;;  %v3509_v22 = vpack.c.bf16 %v3501_v3, %v3501_v3 }
 0x980   : > { %4702 = vmatmul.mubr.msk.bf16.vlgmr.msra.gmra.mrb[112].mxu0 %vm756_vm4, %v3509_v22 }
 0x981   : > { %4712 = vmatpush3.bf16.msra.mxu0 %v3619_v59  ;;  %4713 = vmatprep.mubr.msk.bf16.mxu0 %vm4984_vm0, %v6192_v35 }
 0x982   : > { %4723 = vmatprep.subr.bf16.mxu0 %v6192_v35 }
 0x983   : > { %v4962_v44 = vpop.eup %4961 }
 0x984   : > { %v3503_v16 = vmul.f32 %v4962_v44, %v5994_v1 }
 0x986   : > { %v3511_v37 = vpack.c.bf16 %v3503_v16, %v3503_v16 }
 0x988   : > { %4714 = vmatmul.mubr.msk.bf16.vlgmr.msra.gmra.mrb[116].mxu0 %vm756_vm4, %v3511_v37 }
 0x989   : > { %4724 = vmatpush3.bf16.msra.mxu0 %v3715_v29  ;;  %4725 = vmatprep.mubr.msk.bf16.mxu0 %vm4984_vm0, %v6192_v35 }
 0x98a   : > { %4735 = vmatprep.subr.bf16.mxu0 %v6192_v35 }
 0x9a1   : > { %v3474_v17 = vpop.xlane.xlu1 %3473 }
 0x9a2   : > { %4963 = vrcp.f32 %v3474_v17 }
 0x9a5   : > { %v3758_v62 = vpop.permute.xlu1 %3757 }
 0x9a6   : > { %v3763_v32 = vsel %vm760_vm3, %v3758_v62, 0 }
 0x9ac   : > { %v4964_v4 = vpop.eup %4963 }
 0x9ad   : > { %v3502_v13 = vmul.f32 %v4964_v4, %v6000_v6  ;;  %v3483_v63 = vpop.xlane.xlu0 %3482 }
 0x9ae   : > { %4965 = vrcp.f32 %v3483_v63 }
 0x9af   : > { %v3510_v1 = vpack.c.bf16 %v3502_v13, %v3502_v13 }
 0x9b1   : > { %4708 = vmatmul.mubr.msk.bf16.vlgmr.msra.gmra.mrb[112].mxu1 %vm756_vm4, %v3510_v1  ;;  %v3489_v33 = vpop.xlane.xlu0 %3488 }
 0x9b2   : > { %4718 = vmatpush3.bf16.msra.mxu1 %v3667_v52  ;;  %4719 = vmatprep.mubr.msk.bf16.mxu1 %vm4984_vm0, %v6192_v35  ;;  %4967 = vrcp.f32 %v3489_v33 }
 0x9b3   : > { %4729 = vmatprep.subr.bf16.mxu1 %v6192_v35 }
 0x9b5   : > { %v3806_v50 = vpop.permute.xlu0 %3805 }
 0x9b6   : > { %v3811_v6 = vsel %vm760_vm3, %v3806_v50, 0 }
 0x9b8   : > { %v4966_v51 = vpop.eup %4965 }
 0x9b9   : > { %v3505_v23 = vmul.f32 %v4966_v51, %v6008_v10  ;;  %v6080_v34 = vpop.permute.xlu0 %4764 }
 0x9bb   : > { %v3513_v14 = vpack.c.bf16 %v3505_v23, %v3505_v23 }
 0x9bc   : > { %v4968_v12 = vpop.eup %4967 }
 0x9bd   : > { %4726 = vmatmul.mubr.msk.bf16.vlgmr.msra.gmra.mrb[120].mxu0 %vm756_vm4, %v3513_v14  ;;  %v4775_v8 = vpop.permute.xlu0 %4774  ;;  %v3507_v0 = vmul.f32 %v4968_v12, %v6012_v38 }
 0x9be   : > { %4736 = vmatpush3.bf16.msra.mxu0 %v3811_v6  ;;  %4737 = vmatprep.mubr.msk.bf16.mxu0 %vm4984_vm0, %v6192_v35  ;;  %v4777_v25 = vunpack.i.h.bf16 %v4775_v8  ;;  %v4776_v27 = vunpack.i.l.bf16 %v4775_v8 }
 0x9bf   : > { %v3515_v31 = vpack.c.bf16 %v3507_v0, %v3507_v0 }
 0x9c0   : > { %v4002_v54 = vsel %vm270_vm1, %v5460_v45, %v4777_v25  ;;  %v4001_v39 = vsel %vm270_vm1, %v5458_v40, %v4776_v27 }
 0x9c1   : > { %v6091_v57 = vpop.permute.xlu0 %4784 }
 0x9c5   : > { %4738 = vmatmul.mubr.msk.bf16.vlgmr.msra.gmra.mrb[124].mxu0 %vm756_vm4, %v3515_v31  ;;  %v4795_v10 = vpop.permute.xlu0 %4794 }
 0x9c6   : > { %v4797_v11 = vunpack.i.h.bf16 %v4795_v10  ;;  %v4796_v61 = vunpack.i.l.bf16 %v4795_v10 }
 0x9c8   : > { %v6095_v49 = vsel %vm4005_vm5, %v4001_v39, %v4796_v61  ;;  %v6098_v38 = vsel %vm4005_vm5, %v4002_v54, %v4797_v11 }
 0x9d6   : > { %v3480_v45 = vpop.xlane.xlu1 %3479 }
 0x9d7   : > { %4969 = vrcp.f32 %v3480_v45 }
 0x9da   : > { %v3486_v56 = vpop.xlane.xlu1 %3485 }
 0x9db   : > { %4971 = vrcp.f32 %v3486_v56 }
 0x9e1   : > { %v4970_v40 = vpop.eup %4969 }
 0x9e2   : > { %v3504_v26 = vmul.f32 %v4970_v40, %v6028_v21 }
 0x9e4   : > { %v3512_v24 = vpack.c.bf16 %v3504_v26, %v3504_v26 }
 0x9e5   : > { %v4972_v60 = vpop.eup %4971 }
 0x9e6   : > { %4720 = vmatmul.mubr.msk.bf16.vlgmr.msra.gmra.mrb[116].mxu1 %vm756_vm4, %v3512_v24  ;;  %v3506_v15 = vmul.f32 %v4972_v60, %v6035_v7 }
 0x9e7   : > { %4730 = vmatpush3.bf16.msra.mxu1 %v3763_v32  ;;  %4731 = vmatprep.mubr.msk.bf16.mxu1 %vm4984_vm0, %v6192_v35  ;;  %v4767_v32 = vunpack.i.h.bf16 %v6080_v34 }
 0x9e8   : > { %4741 = vmatprep.subr.bf16.mxu1 %v6192_v35  ;;  %v3514_v46 = vpack.c.bf16 %v3506_v15, %v3506_v15  ;;  %v4766_v15 = vunpack.i.l.bf16 %v6080_v34 }
 0x9ea   : > { %v3492_v20 = vpop.xlane.xlu1 %3491 }
 0x9eb   : > { %4973 = vrcp.f32 %v3492_v20  ;;  %v4787_v20 = vunpack.i.h.bf16 %v6091_v57 }
 0x9ee   : > { %4732 = vmatmul.mubr.msk.bf16.vlgmr.msra.gmra.mrb[120].mxu1 %vm756_vm4, %v3514_v46  ;;  %v3854_v21 = vpop.permute.xlu1 %3853  ;;  %v4786_v46 = vunpack.i.l.bf16 %v6091_v57 }
 0x9ef   : > { %v3859_v19 = vsel %vm760_vm3, %v3854_v21, 0  ;;  %4743 = vmatprep.mubr.msk.bf16.mxu1 %vm4984_vm0, %v6192_v35 }
 0x9f0   : > { %4742 = vmatpush3.bf16.msra.mxu1 %v3859_v19  ;;  %v3998_v19 = vsel %vm270_vm1, %v5452_v28, %v4767_v32 }
 0x9f2   : > { %v6111_v55 = vpop.permute.xlu1 %4769 }
 0x9f5   : > { %v4974_v53 = vpop.eup %4973 }
 0x9f6   : > { %v3508_v58 = vmul.f32 %v4974_v53, %v6043_v41  ;;  %v4780_v7 = vpop.permute.xlu1 %4779  ;;  %v3997_v53 = vsel %vm270_vm1, %v5450_v9, %v4766_v15 }
 0x9f7   : > { %v4782_v18 = vunpack.i.h.bf16 %v4780_v7  ;;  %v4781_v36 = vunpack.i.l.bf16 %v4780_v7 }
 0x9f8   : > { %v3516_v2 = vpack.c.bf16 %v3508_v58, %v3508_v58 }
 0x9f9   : > { %v4004_v35 = vsel %vm270_vm1, %v5482_v47, %v4782_v18  ;;  %v4003_v44 = vsel %vm270_vm1, %v5462_v42, %v4781_v36  ;;  %v4007_v18 = vsel %vm4005_vm5, %v3998_v19, %v4787_v20  ;;  %v4772_v36 = vunpack.i.h.bf16 %v6111_v55 }
 0x9fa   : > { %4744 = vmatmul.mubr.msk.bf16.vlgmr.msra.gmra.mrb[124].mxu1 %vm756_vm4, %v3516_v2  ;;  %v6115_v5 = vpop.permute.xlu1 %4789  ;;  %v4006_v2 = vsel %vm4005_vm5, %v3997_v53, %v4786_v46 }
 0x9fe   : > { %v4800_v3 = vpop.permute.xlu1 %4799 }
 0x9ff   : > { %v4802_v22 = vunpack.i.h.bf16 %v4800_v3  ;;  %v4801_v59 = vunpack.i.l.bf16 %v4800_v3  ;;  %v4771_v3 = vunpack.i.l.bf16 %v6111_v55 }
 0xa01   : > { %v6122_v43 = vsel %vm4005_vm5, %v4003_v44, %v4801_v59  ;;  %v6125_v41 = vsel %vm4005_vm5, %v4004_v35, %v4802_v22  ;;  %v4792_v22 = vunpack.i.h.bf16 %v6115_v5  ;;  %v4791_v59 = vunpack.i.l.bf16 %v6115_v5 }
 0xa02   : > { %v4000_v44 = vsel %vm270_vm1, %v5456_v48, %v4772_v36 }
 0xa53   : > { %v3559_v16 = vpop.f32.mrb[112].mxu0 }
 0xa54   : > { %v4703_v37 = vpop.f32.mrb[113].mxu0 }
 0xa55   : > { %v3562_v29 = vpop.f32.mrb[114].mxu0 }
 0xa56   : > { %v4704_v30 = vpop.f32.mrb[115].mxu0 }
 0xa5b   : > { %v3655_v17 = vpop.f32.mrb[116].mxu0 }
 0xa5c   : > { %v4715_v4 = vpop.f32.mrb[117].mxu0 }
 0xa5d   : > { %v3658_v13 = vpop.f32.mrb[118].mxu0  ;;  %v4009_v4 = vsel %vm4005_vm5, %v4000_v44, %v4792_v22 }
 0xa5e   : > { %v4716_v63 = vpop.f32.mrb[119].mxu0 }
 0xa84   : > { %v3607_v1 = vpop.f32.mrb[112].mxu1 }
 0xa85   : > { %v4803_v52 = vpack.i.bf16 %v3607_v1, %v3559_v16  ;;  %v4709_v47 = vpop.f32.mrb[113].mxu1  ;;  %v6197_v16 = vld [vmem:[#allocation2_spill] sm:$0xff] }
 0xa86   : > { %v3610_v33 = vpop.f32.mrb[114].mxu1  ;;  %v3999_v37 = vsel %vm270_vm1, %v6197_v16, %v4771_v3 }
 0xa87   : > { %v4710_v50 = vpop.f32.mrb[115].mxu1  ;;  %4804 = vrot.lane.b32.xlu0 %v4803_v52, %s4990_s16 }
 0xa90   : > { %v3751_v42 = vpop.f32.mrb[120].mxu0 }
 0xa91   : > { %v4727_v51 = vpop.f32.mrb[121].mxu0 }
 0xa92   : > { %v3754_v23 = vpop.f32.mrb[122].mxu0 }
 0xa93   : > { %v4728_v6 = vpop.f32.mrb[123].mxu0 }
 0xa98   : > { %v3847_v14 = vpop.f32.mrb[124].mxu0 }
 0xa99   : > { %v4739_v12 = vpop.f32.mrb[125].mxu0 }
 0xa9a   : > { %v3850_v8 = vpop.f32.mrb[126].mxu0 }
 0xa9b   : > { %v4740_v0 = vpop.f32.mrb[127].mxu0 }
 0xab9   : > { %v3703_v25 = vpop.f32.mrb[116].mxu1 }
 0xaba   : > { %v4808_v27 = vpack.i.bf16 %v3703_v25, %v3655_v17  ;;  %v4721_v54 = vpop.f32.mrb[117].mxu1  ;;  %v4008_v17 = vsel %vm4005_vm5, %v3999_v37, %v4791_v59 }
 0xabb   : > { %v3706_v39 = vpop.f32.mrb[118].mxu1 }
 0xabc   : > { %v4722_v31 = vpop.f32.mrb[119].mxu1  ;;  %4809 = vrot.lane.b32.xlu1 %v4808_v27, %s4990_s16 }
 0xac1   : > { %v3799_v10 = vpop.f32.mrb[120].mxu1 }
 0xac2   : > { %v4813_v11 = vpack.i.bf16 %v3799_v10, %v3751_v42  ;;  %v4733_v61 = vpop.f32.mrb[121].mxu1 }
 0xac3   : > { %v3802_v62 = vpop.f32.mrb[122].mxu1 }
 0xac4   : > { %v4734_v45 = vpop.f32.mrb[123].mxu1  ;;  %4814 = vrot.lane.b32.xlu0 %v4813_v11, %s4990_s16 }
 0xacd   : > { %v3895_v56 = vpop.f32.mrb[124].mxu1 }
 0xace   : > { %v4818_v40 = vpack.i.bf16 %v3895_v56, %v3847_v14  ;;  %v4745_v26 = vpop.f32.mrb[125].mxu1 }
 0xacf   : > { %v3898_v24 = vpop.f32.mrb[126].mxu1 }
 0xad0   : > { %v4746_v60 = vpop.f32.mrb[127].mxu1  ;;  %4819 = vrot.lane.b32.xlu1 %v4818_v40, %s4990_s16 }
 0xaf9   : > { %v4805_v21 = vpop.permute.xlu0 %4804 }
 0xafa   : > { %v4807_v58 = vunpack.i.h.bf16 %v4805_v21  ;;  %v4806_v7 = vunpack.i.l.bf16 %v4805_v21 }
 0xafc   : > { %v4016_v34 = vsel %vm4014_vm6, %v4007_v18, %v4807_v58  ;;  %v4015_v28 = vsel %vm4014_vm6, %v4006_v2, %v4806_v7 }
 0xafd   : > { %v4024_v57 = vpack.c.bf16 %v4016_v34, %v4016_v34  ;;  %v4023_v9 = vpack.c.bf16 %v4015_v28, %v4015_v28 }
 0xaff   : > { %4033 = vst.msk [vmem:[%s6141_s20 + $0x4] sm:$0x7] %vm4031_vm7, %v4024_v57  ;;  %4032 = vst.msk [vmem:[%s6141_s20] sm:$0x7] %vm4031_vm7, %v4023_v9 }
 0xb2e   : > { %v4810_v35 = vpop.permute.xlu1 %4809 }
 0xb2f   : > { %v4812_v29 = vunpack.i.h.bf16 %v4810_v35  ;;  %v4811_v30 = vunpack.i.l.bf16 %v4810_v35 }
 0xb31   : > { %v4018_v55 = vsel %vm4014_vm6, %v4009_v4, %v4812_v29  ;;  %v4017_v13 = vsel %vm4014_vm6, %v4008_v17, %v4811_v30 }
 0xb32   : > { %v4026_v5 = vpack.c.bf16 %v4018_v55, %v4018_v55  ;;  %v4025_v63 = vpack.c.bf16 %v4017_v13, %v4017_v13 }
 0xb34   : > { %4035 = vst.msk [vmem:[%s6141_s20 + $0xc] sm:$0x7] %vm4031_vm7, %v4026_v5  ;;  %4034 = vst.msk [vmem:[%s6141_s20 + $0x8] sm:$0x7] %vm4031_vm7, %v4025_v63 }
 0xb36   : > { %v4815_v48 = vpop.permute.xlu0 %4814 }
 0xb37   : > { %v4817_v1 = vunpack.i.h.bf16 %v4815_v48  ;;  %v4816_v52 = vunpack.i.l.bf16 %v4815_v48 }
 0xb39   : > { %v4020_v47 = vsel %vm4014_vm6, %v6098_v38, %v4817_v1  ;;  %v4019_v33 = vsel %vm4014_vm6, %v6095_v49, %v4816_v52 }
 0xb3a   : > { %v4028_v50 = vpack.c.bf16 %v4020_v47, %v4020_v47  ;;  %v4027_v42 = vpack.c.bf16 %v4019_v33, %v4019_v33 }
 0xb3c   : > { %4037 = vst.msk [vmem:[%s6141_s20 + $0x14] sm:$0x7] %vm4031_vm7, %v4028_v50  ;;  %4036 = vst.msk [vmem:[%s6141_s20 + $0x10] sm:$0x7] %vm4031_vm7, %v4027_v42 }
 0xb42   : > { %v4820_v51 = vpop.permute.xlu1 %4819 }
 0xb43   : > { %v4822_v23 = vunpack.i.h.bf16 %v4820_v51  ;;  %v4821_v6 = vunpack.i.l.bf16 %v4820_v51 }
 0xb45   : > { %v4022_v14 = vsel %vm4014_vm6, %v6125_v41, %v4822_v23  ;;  %v4021_v12 = vsel %vm4014_vm6, %v6122_v43, %v4821_v6 }
 0xb46   : > { %v4030_v8 = vpack.c.bf16 %v4022_v14, %v4022_v14  ;;  %v4029_v38 = vpack.c.bf16 %v4021_v12, %v4021_v12 }
 0xb48   : > { %4039 = vst.msk [vmem:[%s6141_s20 + $0x1c] sm:$0x7] %vm4031_vm7, %v4030_v8  ;;  %4038 = vst.msk [vmem:[%s6141_s20 + $0x18] sm:$0x7] %vm4031_vm7, %v4029_v38 }
 0xb49 PF: > { %s14_s15 = sadd.s32 1, %s4981_s15  }
 0xb4a   : > { %p11_p4 = scmp.ge.s32.totalorder %s14_s15, 4  }
 0xb4c   :  { %13 = sbr.rel (!%p11_p4) target bundleno = 1 (0x1), region = 75 }

// kernel: tem_self_attention_forward.3
= control target key start
LH: loop header
LB: loop body
LE: loop exit
PB: predicated region body
PF: predicated region fallthrough
CT: control target
= control target key end

     0   :  { %s4219_s18 = smov 0   ;;  %s4221_s19 = smov 0   ;;  %s4995_s0 = inlined_call_operand.vmem [shape: bf16[8,16,16], index: 0, kind: input, shape index: {}]   ;;  %s4996_s1 = inlined_call_operand.vmem [shape: bf16[3,3,16,16], index: 1, kind: input, shape index: {}]   ;;  %s4997_s2 = inlined_call_operand.vmem [shape: f32[3,3,1,16], index: 2, kind: input, shape index: {}]   ;;  %s4998_s3 = inlined_call_operand.vmem [shape: bf16[3,16,48], index: 3, kind: input, shape index: {}]   ;;  %s4999_s4 = inlined_call_operand.vmem [shape: f32[3,1,48], index: 4, kind: input, shape index: {}]   ;;  %s5000_s5 = inlined_call_operand.vmem [shape: bf16[8,3,16,16], index: 5, kind: output, shape index: {}]  }
   0x1   :  { %s4223_s20 = smov 0  }
   0x2 LB: > { %s3349_s21 = sadd.s32 4294967295, %s4183_s20   ;;  %s4236_s22 = sadd.s32 1, %s4183_s20   ;;  %s4183_s20 = sphi %s4223_s20, %s5004_s20   ;;  %s4179_s19 = sphi %s4221_s19, %s5003_s19   ;;  %s4175_s18 = sphi %s4219_s18, %s5002_s18  }
   0x3   : > { %s19_s23 = ssub.s32 %s4183_s20, %s4236_s22  ;;  %s22_s24 = sadd.s32 1, %s4179_s19 }
   0x4   : > { %p20_p0 = scmp.eq.s32.totalorder %s19_s23, 0  ;;  %p29_p1 = scmp.ne.s32.totalorder %s4179_s19, %s4175_s18 }
   0x5   : > { %p30_p2 = scmp.eq.s32.totalorder %s4183_s20, 0  ;;  %p143_p3 = scmp.eq.s32.totalorder %s3349_s21, 1 }
   0x6   : > { %s4247_s25 = scalar_select %p20_p0, %s4179_s19, %s22_s24  }
   0x7   : > { %p31_p4 = por %p30_p2, %p29_p1  ;;  %p4249_p5 = por %p143_p3, %p29_p1 }
   0x8   : > { %p3352_p6 = scmp.ge.s32.totalorder %s4183_s20, 2 }
   0xa   : > { %177 = sbr.rel (%p3352_p6) target bundleno = 26 (0x1a), region = 32 }
  0x11   : > { %180 = sbr.rel (!%p31_p4) target bundleno = 26 (0x1a), region = 36  ;;  %s182_s27 = sand.u32 (%p31_p4), 1, %s4179_s19  }
  0x12   : > { %s3354_s28 = sshll.u32 (%p31_p4), %s4183_s20, 2  ;;  %s3353_s29 = sshll.u32 (%p31_p4), %s182_s27, 5 }
  0x13   : > { %s186_s7 = scalar_lea.vmem (%p31_p4), %s4995_s0, %s3354_s28  ;;  %s184_s8 = scalar_lea.vmem (%p31_p4), [#allocation14], %s3353_s29 }
  0x14   : > { %v202_v0 = vld [vmem:[%s186_s7] sm:$0xf] (%p31_p4)  ;;  %v204_v1 = vld [vmem:[%s186_s7 + $0x8] sm:$0xf] (%p31_p4)  ;;  %v206_v2 = vld [vmem:[%s186_s7 + $0x10] sm:$0xf] (%p31_p4) }
  0x15   : > { %203 = vst [vmem:[%s184_s8] sm:$0xf] (%p31_p4), %v202_v0  ;;  %205 = vst [vmem:[%s184_s8 + $0x4] sm:$0xf] (%p31_p4), %v204_v1  ;;  %v208_v3 = vld [vmem:[%s186_s7 + $0x18] sm:$0xf] (%p31_p4) }
  0x16   : > { %v210_v4 = vld [vmem:[%s186_s7 + $0x20] sm:$0xf] (%p31_p4)  ;;  %207 = vst [vmem:[%s184_s8 + $0x8] sm:$0xf] (%p31_p4), %v206_v2  ;;  %209 = vst [vmem:[%s184_s8 + $0xc] sm:$0xf] (%p31_p4), %v208_v3 }
  0x17   : > { %211 = vst [vmem:[%s184_s8 + $0x10] sm:$0xf] (%p31_p4), %v210_v4  ;;  %v212_v5 = vld [vmem:[%s186_s7 + $0x28] sm:$0xf] (%p31_p4)  ;;  %v214_v6 = vld [vmem:[%s186_s7 + $0x30] sm:$0xf] (%p31_p4) }
  0x18   : > { %v216_v7 = vld [vmem:[%s186_s7 + $0x38] sm:$0xf]  ;;  %213 = vst [vmem:[%s184_s8 + $0x14] sm:$0xf] %v212_v5  ;;  %215 = vst [vmem:[%s184_s8 + $0x18] sm:$0xf] %v214_v6 }
  0x19   : > { %217 = vst [vmem:[%s184_s8 + $0x1c] sm:$0xf] %v216_v7 }
  0x1a PF: > { %p3355_p7 = scmp.ge.s32.totalorder %s4183_s20, 1  ;;  %p255_p8 = scmp.lt.s32.totalorder %s4183_s20, 3 }
  0x1c   : > { %p256_p9 = pnand %p3355_p7, %p255_p8 }
  0x1d   : > { %v3897_v8 = vld [vmem:[%s4996_s1] sm:$0xff] (!%p256_p9)   ;;  %s262_s11 = sand.u32 (!%p256_p9), 1, %s4175_s18   ;;  %v3898_v9 = vld [vmem:[%s4996_s1 + $0x8] sm:$0xff] (!%p256_p9)   ;;  %vm332_vm0 = vcmask (!%p256_p9), 130048   ;;  %v3901_v10 = vld [vmem:[%s4996_s1 + $0x10] sm:$0xff] (!%p256_p9)   ;;  %v4185_v13 = vmov (!%p256_p9), 0.0  }
  0x1e   : > { %259 = sbr.rel (%p256_p9) target bundleno = 3099 (0xc1b), region = 77  ;;  %s3356_s14 = sshll.u32 (!%p256_p9), %s262_s11, 5  ;;  %3634 = vmatprep.subr.bf16.mxu0 (!%p256_p9), %v3897_v8  ;;  %3644 = vmatprep.subr.bf16.mxu1 (!%p256_p9), %v3898_v9  ;;  %598 = vst.msk [vmem:[#allocation11] sm:$0xff] (!%p256_p9), %vm332_vm0, %v4185_v13  ;;  %869 = vst.msk [vmem:[#allocation12] sm:$0xff] (!%p256_p9), %vm332_vm0, %v4185_v13  ;;  %v3904_v16 = vld [vmem:[%s4996_s1 + $0x18] sm:$0xff] (!%p256_p9)   ;;  %v3905_v17 = vld [vmem:[%s4996_s1 + $0x20] sm:$0xff] (!%p256_p9)  }
  0x1f   : > { %3635 = vmatpush3.bf16.msra.mxu0 (!%p256_p9), %v3897_v8  ;;  %s264_s17 = scalar_lea.vmem (!%p256_p9), [#allocation14], %s3356_s14  ;;  %3645 = vmatpush3.bf16.msra.mxu1 (!%p256_p9), %v3898_v9  ;;  %1140 = vst.msk [vmem:[#allocation13] sm:$0xff] (!%p256_p9), %vm332_vm0, %v4185_v13  ;;  %v3906_v18 = vld [vmem:[%s4996_s1 + $0x28] sm:$0xff] (!%p256_p9)   ;;  %v3907_v19 = vld [vmem:[%s4996_s1 + $0x30] sm:$0xff] (!%p256_p9)   ;;  %v3908_v20 = vld [vmem:[%s4996_s1 + $0x38] sm:$0xff] (!%p256_p9)   ;;  %vm4186_vm1 = vmmov (!%p256_p9), 0  }
  0x20   : > { %v4273_v11 = vld [vmem:[%s264_s17] sm:$0xff] (!%p256_p9)   ;;  %v4275_v12 = vld [vmem:[%s264_s17 + $0x8] sm:$0xff] (!%p256_p9)   ;;  %3654 = vmatprep.subr.bf16.mxu0 (!%p256_p9), %v3901_v10  ;;  %v4289_v14 = vld [vmem:[%s264_s17 + $0x10] sm:$0xff] (!%p256_p9)   ;;  %3664 = vmatprep.subr.bf16.mxu1 (!%p256_p9), %v3904_v16  ;;  %s4187_s29 = smov (!%p256_p9), 112   ;;  %s4188_s9 = smov (!%p256_p9), 96   ;;  %vm1420_vm2 = vcmask (!%p256_p9), 125952  }
  0x21   : > { %3636 = vmatprep.mubr.msk.bf16.mxu0 (!%p256_p9), %vm332_vm0, %v4273_v11  ;;  %3646 = vmatprep.mubr.msk.bf16.mxu1 (!%p256_p9), %vm332_vm0, %v4273_v11  ;;  %v4297_v15 = vld [vmem:[%s264_s17 + $0x18] sm:$0xff] (!%p256_p9)   ;;  %v3909_v21 = vld [vmem:[%s4996_s1 + $0x40] sm:$0xff] (!%p256_p9)   ;;  %v4394_v26 = vld [vmem:[%s4998_s3 + $0x8] sm:$0xff] (!%p256_p9)   ;;  %s3868_s10 = smul.u32 (!%p256_p9), 96, %s262_s11 }
  0x22   : > { %3637 = vmatmul.mubr.msk.bf16.vlgmr.msra.gmra.mrb[0].mxu0 (!%p256_p9), %vm332_vm0, %v4275_v12  ;;  %3647 = vmatmul.mubr.msk.bf16.vlgmr.msra.gmra.mrb[0].mxu1 (!%p256_p9), %vm332_vm0, %v4275_v12  ;;  %v4361_v22 = vld [vmem:[%s4998_s3] sm:$0xff] (!%p256_p9)   ;;  %v4389_v25 = vld [vmem:[%s4998_s3 + $0x10] sm:$0xff] (!%p256_p9)  }
  0x23   : > { %3655 = vmatpush3.bf16.msra.mxu0 (!%p256_p9), %v3901_v10  ;;  %3640 = vmatprep.mubr.msk.bf16.mxu0 (!%p256_p9), %vm332_vm0, %v4289_v14  ;;  %v3357_v31 = vld [vmem:[%s4997_s2] ss:$0 sm:$0xff] (!%p256_p9)  ;;  %v3370_v32 = vld [vmem:[%s4997_s2 + $0x1] ss:$0 sm:$0xff] (!%p256_p9)  ;;  %v3379_v1 = vld [vmem:[%s4997_s2 + $0x2] ss:$0 sm:$0xff] (!%p256_p9) }
  0x24   : > { %3650 = vmatprep.mubr.msk.bf16.mxu1 (!%p256_p9), %vm332_vm0, %v4289_v14  ;;  %3665 = vmatpush3.bf16.msra.mxu1 (!%p256_p9), %v3904_v16  ;;  %v3388_v2 = vld [vmem:[%s4997_s2 + $0x3] ss:$0 sm:$0xff] (!%p256_p9)  ;;  %s4557_s12 = scalar_lea.vmem (!%p256_p9), [#allocation15], %s3868_s10 }
  0x25   : > { %3674 = vmatprep.subr.bf16.mxu0 %v3905_v17  ;;  %3684 = vmatprep.subr.bf16.mxu1 %v3906_v18  ;;  %v4382_v23 = vld [vmem:[#allocation11] sm:$0xff]  ;;  %v4403_v27 = vld [vmem:[#allocation12] sm:$0xff] }
  0x26   : > { %v1151_v24 = vpack.c.bf16 %v4382_v23, %v4382_v23  ;;  %v1240_v28 = vpack.c.bf16 %v4403_v27, %v4403_v27  ;;  %v4416_v29 = vld [vmem:[#allocation13] sm:$0xff] }
  0x27   : > { %v1329_v30 = vpack.c.bf16 %v4416_v29, %v4416_v29 }
  0x2a   : > { %3641 = vmatmul.mubr.msk.bf16.gmra.mrb[4].mxu0 %vm332_vm0, %v4297_v15  ;;  %3651 = vmatmul.mubr.msk.bf16.gmra.mrb[4].mxu1 %vm332_vm0, %v4297_v15 }
  0x2b   : > { %3656 = vmatprep.mubr.msk.bf16.mxu0 %vm332_vm0, %v4273_v11  ;;  %3666 = vmatprep.mubr.msk.bf16.mxu1 %vm332_vm0, %v4273_v11 }
  0x32   : > { %3657 = vmatmul.mubr.msk.bf16.vlgmr.msra.gmra.mrb[8].mxu0 %vm332_vm0, %v4275_v12  ;;  %3667 = vmatmul.mubr.msk.bf16.vlgmr.msra.gmra.mrb[8].mxu1 %vm332_vm0, %v4275_v12 }
  0x33   : > { %3675 = vmatpush3.bf16.msra.mxu0 %v3905_v17  ;;  %3660 = vmatprep.mubr.msk.bf16.mxu0 %vm332_vm0, %v4289_v14 }
  0x34   : > { %3670 = vmatprep.mubr.msk.bf16.mxu1 %vm332_vm0, %v4289_v14  ;;  %3685 = vmatpush3.bf16.msra.mxu1 %v3906_v18 }
  0x35   : > { %3694 = vmatprep.subr.bf16.mxu0 %v3907_v19  ;;  %3704 = vmatprep.subr.bf16.mxu1 %v3908_v20 }
  0x3a   : > { %3661 = vmatmul.mubr.msk.bf16.gmra.mrb[12].mxu0 %vm332_vm0, %v4297_v15  ;;  %3671 = vmatmul.mubr.msk.bf16.gmra.mrb[12].mxu1 %vm332_vm0, %v4297_v15 }
  0x3b   : > { %3676 = vmatprep.mubr.msk.bf16.mxu0 %vm332_vm0, %v4273_v11  ;;  %3686 = vmatprep.mubr.msk.bf16.mxu1 %vm332_vm0, %v4273_v11 }
  0x42   : > { %3677 = vmatmul.mubr.msk.bf16.vlgmr.msra.gmra.mrb[16].mxu0 %vm332_vm0, %v4275_v12  ;;  %3687 = vmatmul.mubr.msk.bf16.vlgmr.msra.gmra.mrb[16].mxu1 %vm332_vm0, %v4275_v12 }
  0x43   : > { %3695 = vmatpush3.bf16.msra.mxu0 %v3907_v19  ;;  %3680 = vmatprep.mubr.msk.bf16.mxu0 %vm332_vm0, %v4289_v14 }
  0x44   : > { %3690 = vmatprep.mubr.msk.bf16.mxu1 %vm332_vm0, %v4289_v14  ;;  %3705 = vmatpush3.bf16.msra.mxu1 %v3908_v20 }
  0x45   : > { %3714 = vmatprep.subr.bf16.mxu0 %v3909_v21  ;;  %3724 = vmatprep.subr.bf16.mxu1 %v4185_v13 }
  0x4a   : > { %3681 = vmatmul.mubr.msk.bf16.gmra.mrb[20].mxu0 %vm332_vm0, %v4297_v15  ;;  %3691 = vmatmul.mubr.msk.bf16.gmra.mrb[20].mxu1 %vm332_vm0, %v4297_v15 }
  0x4b   : > { %3696 = vmatprep.mubr.msk.bf16.mxu0 %vm332_vm0, %v4273_v11  ;;  %3706 = vmatprep.mubr.msk.bf16.mxu1 %vm332_vm0, %v4273_v11 }
  0x52   : > { %3697 = vmatmul.mubr.msk.bf16.vlgmr.msra.gmra.mrb[24].mxu0 %vm332_vm0, %v4275_v12  ;;  %3707 = vmatmul.mubr.msk.bf16.vlgmr.msra.gmra.mrb[24].mxu1 %vm332_vm0, %v4275_v12 }
  0x53   : > { %3715 = vmatpush3.bf16.msra.mxu0 %v3909_v21  ;;  %3700 = vmatprep.mubr.msk.bf16.mxu0 %vm332_vm0, %v4289_v14 }
  0x54   : > { %3710 = vmatprep.mubr.msk.bf16.mxu1 %vm332_vm0, %v4289_v14  ;;  %3725 = vmatpush3.bf16.msra.mxu1 %v4361_v22 }
  0x55   : > { %3736 = vmatprep.subr.bf16.mxu0 %v4185_v13  ;;  %3730 = vmatprep.subr.bf16.mxu1 %v4185_v13 }
  0x5a   : > { %3701 = vmatmul.mubr.msk.bf16.gmra.mrb[28].mxu0 %vm332_vm0, %v4297_v15  ;;  %3711 = vmatmul.mubr.msk.bf16.gmra.mrb[28].mxu1 %vm332_vm0, %v4297_v15 }
  0x5b   : > { %3716 = vmatprep.mubr.msk.bf16.mxu0 %vm332_vm0, %v4273_v11  ;;  %3726 = vmatprep.mubr.msk.bf16.mxu1 %vm4186_vm1, %v4185_v13 }
  0x62   : > { %3717 = vmatmul.mubr.msk.bf16.vlgmr.msra.gmra.mrb[32].mxu0 %vm332_vm0, %v4275_v12  ;;  %3727 = vmatmul.mubr.msk.bf16.vlgmr.msra.gmra.mrb[32].mxu1 %vm332_vm0, %v1151_v24 }
  0x63   : > { %3737 = vmatpush3.bf16.msra.mxu0 %v4389_v25  ;;  %3731 = vmatpush3.bf16.msra.mxu1 %v4394_v26 }
  0x64   : > { %3720 = vmatprep.mubr.msk.bf16.mxu0 %vm332_vm0, %v4289_v14  ;;  %3732 = vmatprep.mubr.msk.bf16.mxu1 %vm4186_vm1, %v4185_v13 }
  0x65   : > { %3742 = vmatprep.subr.bf16.mxu1 %v4185_v13  ;;  %3748 = vmatprep.subr.bf16.mxu0 %v4185_v13 }
  0x6a   : > { %3721 = vmatmul.mubr.msk.bf16.gmra.mrb[36].mxu0 %vm332_vm0, %v4297_v15  ;;  %3733 = vmatmul.mubr.msk.bf16.vlgmr.msra.gmra.mrb[36].mxu1 %vm332_vm0, %v1240_v28 }
  0x6b   : > { %3738 = vmatprep.mubr.msk.bf16.mxu0 %vm4186_vm1, %v4185_v13  ;;  %3743 = vmatpush3.bf16.msra.mxu1 %v4361_v22 }
  0x6c   : > { %3744 = vmatprep.mubr.msk.bf16.mxu1 %vm4186_vm1, %v4185_v13  ;;  %3754 = vmatprep.subr.bf16.mxu1 %v4185_v13 }
  0x72   : > { %3739 = vmatmul.mubr.msk.bf16.vlgmr.msra.gmra.mrb[40].mxu0 %vm332_vm0, %v1329_v30 }
  0x73   : > { %3749 = vmatpush3.bf16.msra.mxu0 %v4394_v26  ;;  %3750 = vmatprep.mubr.msk.bf16.mxu0 %vm4186_vm1, %v4185_v13 }
  0x74   : > { %3760 = vmatprep.subr.bf16.mxu0 %v4185_v13 }
  0xf5   : > { %v3638_v33 = vpop.f32.mrb[0].mxu0  ;;  %v3648_v36 = vpop.f32.mrb[0].mxu1 }
  0xf6   : > { %v388_v34 = vadd.f32 %v3638_v33, %v3357_v31  ;;  %v379_v35 = vpop.f32.mrb[1].mxu0  ;;  %v478_v39 = vadd.f32 %v3648_v36, %v3370_v32  ;;  %v469_v40 = vpop.f32.mrb[1].mxu1 }
  0xf7   : > { %v380_v37 = vadd.f32 %v3357_v31, %v379_v35  ;;  %v3639_v38 = vpop.f32.mrb[2].mxu0  ;;  %v470_v43 = vadd.f32 %v3370_v32, %v469_v40  ;;  %v3649_v44 = vpop.f32.mrb[2].mxu1 }
  0xf8   : > { %412 = vst.msk [vmem:[#allocation2 + $0x10] sm:$0xff] %vm332_vm0, %v388_v34  ;;  %v391_v41 = vadd.f32 %v3639_v38, %v3357_v31  ;;  %v382_v42 = vpop.f32.mrb[3].mxu0  ;;  %502 = vst.msk [vmem:[#allocation3 + $0x10] sm:$0xff] %vm332_vm0, %v478_v39  ;;  %v481_v46 = vadd.f32 %v3649_v44, %v3370_v32  ;;  %v472_v47 = vpop.f32.mrb[3].mxu1 }
  0xf9   : > { %410 = vst.msk [vmem:[#allocation2] sm:$0xff] %vm332_vm0, %v380_v37  ;;  %v383_v45 = vadd.f32 %v3357_v31, %v382_v42  ;;  %500 = vst.msk [vmem:[#allocation3] sm:$0xff] %vm332_vm0, %v470_v43  ;;  %v473_v48 = vadd.f32 %v3370_v32, %v472_v47  ;;  %v3397_v42 = vld [vmem:[%s4997_s2 + $0x4] ss:$0 sm:$0xff]  ;;  %v3406_v43 = vld [vmem:[%s4997_s2 + $0x5] ss:$0 sm:$0xff] }
  0xfa   : > { %413 = vst.msk [vmem:[#allocation2 + $0x18] sm:$0xff] %vm332_vm0, %v391_v41  ;;  %503 = vst.msk [vmem:[#allocation3 + $0x18] sm:$0xff] %vm332_vm0, %v481_v46 }
  0xfb   : > { %411 = vst.msk [vmem:[#allocation2 + $0x8] sm:$0xff] %vm332_vm0, %v383_v45  ;;  %501 = vst.msk [vmem:[#allocation3 + $0x8] sm:$0xff] %vm332_vm0, %v473_v48 }
  0xfd   : > { %v3642_v49 = vpop.f32.mrb[4].mxu0  ;;  %v3652_v52 = vpop.f32.mrb[4].mxu1 }
  0xfe   : > { %v404_v50 = vadd.f32 %v3642_v49, %v3357_v31  ;;  %v395_v51 = vpop.f32.mrb[5].mxu0  ;;  %v494_v55 = vadd.f32 %v3652_v52, %v3370_v32  ;;  %v485_v56 = vpop.f32.mrb[5].mxu1 }
  0xff   : > { %v396_v53 = vadd.f32 %v3357_v31, %v395_v51  ;;  %v3643_v54 = vpop.f32.mrb[6].mxu0  ;;  %v486_v59 = vadd.f32 %v3370_v32, %v485_v56  ;;  %v3653_v60 = vpop.f32.mrb[6].mxu1 }
 0x100   : > { %416 = vst.msk [vmem:[#allocation2 + $0x30] sm:$0xff] %vm332_vm0, %v404_v50  ;;  %v407_v57 = vadd.f32 %v3643_v54, %v3357_v31  ;;  %v398_v58 = vpop.f32.mrb[7].mxu0  ;;  %506 = vst.msk [vmem:[#allocation3 + $0x30] sm:$0xff] %vm332_vm0, %v494_v55  ;;  %v497_v62 = vadd.f32 %v3653_v60, %v3370_v32  ;;  %v488_v63 = vpop.f32.mrb[7].mxu1 }
 0x101   : > { %414 = vst.msk [vmem:[#allocation2 + $0x20] sm:$0xff] %vm332_vm0, %v396_v53  ;;  %v399_v61 = vadd.f32 %v3357_v31, %v398_v58  ;;  %504 = vst.msk [vmem:[#allocation3 + $0x20] sm:$0xff] %vm332_vm0, %v486_v59  ;;  %v489_v0 = vadd.f32 %v3370_v32, %v488_v63 }
 0x102   : > { %417 = vst.msk [vmem:[#allocation2 + $0x38] sm:$0xff] %vm332_vm0, %v407_v57  ;;  %507 = vst.msk [vmem:[#allocation3 + $0x38] sm:$0xff] %vm332_vm0, %v497_v62 }
 0x103   : > { %415 = vst.msk [vmem:[#allocation2 + $0x28] sm:$0xff] %vm332_vm0, %v399_v61  ;;  %505 = vst.msk [vmem:[#allocation3 + $0x28] sm:$0xff] %vm332_vm0, %v489_v0 }
 0x105   : > { %v3658_v3 = vpop.f32.mrb[8].mxu0  ;;  %v3668_v6 = vpop.f32.mrb[8].mxu1 }
 0x106   : > { %v568_v4 = vadd.f32 %v3658_v3, %v3379_v1  ;;  %v559_v5 = vpop.f32.mrb[9].mxu0  ;;  %v659_v9 = vadd.f32 %v3668_v6, %v3388_v2  ;;  %v650_v10 = vpop.f32.mrb[9].mxu1 }
 0x107   : > { %v560_v7 = vadd.f32 %v3379_v1, %v559_v5  ;;  %v3659_v8 = vpop.f32.mrb[10].mxu0  ;;  %v651_v14 = vadd.f32 %v3388_v2, %v650_v10  ;;  %v3669_v15 = vpop.f32.mrb[10].mxu1 }
 0x108   : > { %592 = vst.msk [vmem:[#allocation4 + $0x10] sm:$0xff] %vm332_vm0, %v568_v4  ;;  %v571_v11 = vadd.f32 %v3659_v8, %v3379_v1  ;;  %v562_v12 = vpop.f32.mrb[11].mxu0  ;;  %683 = vst.msk [vmem:[#allocation5 + $0x10] sm:$0xff] %vm332_vm0, %v659_v9  ;;  %v662_v17 = vadd.f32 %v3669_v15, %v3388_v2  ;;  %v653_v18 = vpop.f32.mrb[11].mxu1 }
 0x109   : > { %590 = vst.msk [vmem:[#allocation4] sm:$0xff] %vm332_vm0, %v560_v7  ;;  %v563_v16 = vadd.f32 %v3379_v1, %v562_v12  ;;  %681 = vst.msk [vmem:[#allocation5] sm:$0xff] %vm332_vm0, %v651_v14  ;;  %v654_v19 = vadd.f32 %v3388_v2, %v653_v18  ;;  %v3415_v12 = vld [vmem:[%s4997_s2 + $0x6] ss:$0 sm:$0xff]  ;;  %v3424_v14 = vld [vmem:[%s4997_s2 + $0x7] ss:$0 sm:$0xff] }
 0x10a   : > { %593 = vst.msk [vmem:[#allocation4 + $0x18] sm:$0xff] %vm332_vm0, %v571_v11  ;;  %684 = vst.msk [vmem:[#allocation5 + $0x18] sm:$0xff] %vm332_vm0, %v662_v17 }
 0x10b   : > { %591 = vst.msk [vmem:[#allocation4 + $0x8] sm:$0xff] %vm332_vm0, %v563_v16  ;;  %682 = vst.msk [vmem:[#allocation5 + $0x8] sm:$0xff] %vm332_vm0, %v654_v19 }
 0x10d   : > { %v3662_v20 = vpop.f32.mrb[12].mxu0  ;;  %v3672_v28 = vpop.f32.mrb[12].mxu1 }
 0x10e   : > { %v584_v21 = vadd.f32 %v3662_v20, %v3379_v1  ;;  %v575_v24 = vpop.f32.mrb[13].mxu0  ;;  %v675_v32 = vadd.f32 %v3672_v28, %v3388_v2  ;;  %v666_v33 = vpop.f32.mrb[13].mxu1 }
 0x10f   : > { %v576_v30 = vadd.f32 %v3379_v1, %v575_v24  ;;  %v3663_v31 = vpop.f32.mrb[14].mxu0  ;;  %v667_v36 = vadd.f32 %v3388_v2, %v666_v33  ;;  %v3673_v37 = vpop.f32.mrb[14].mxu1 }
 0x110   : > { %596 = vst.msk [vmem:[#allocation4 + $0x30] sm:$0xff] %vm332_vm0, %v584_v21  ;;  %v587_v34 = vadd.f32 %v3663_v31, %v3379_v1  ;;  %v578_v35 = vpop.f32.mrb[15].mxu0  ;;  %687 = vst.msk [vmem:[#allocation5 + $0x30] sm:$0xff] %vm332_vm0, %v675_v32  ;;  %v678_v39 = vadd.f32 %v3673_v37, %v3388_v2  ;;  %v669_v40 = vpop.f32.mrb[15].mxu1 }
 0x111   : > { %594 = vst.msk [vmem:[#allocation4 + $0x20] sm:$0xff] %vm332_vm0, %v576_v30  ;;  %v579_v38 = vadd.f32 %v3379_v1, %v578_v35  ;;  %685 = vst.msk [vmem:[#allocation5 + $0x20] sm:$0xff] %vm332_vm0, %v667_v36  ;;  %v670_v41 = vadd.f32 %v3388_v2, %v669_v40 }
 0x112   : > { %597 = vst.msk [vmem:[#allocation4 + $0x38] sm:$0xff] %vm332_vm0, %v587_v34  ;;  %688 = vst.msk [vmem:[#allocation5 + $0x38] sm:$0xff] %vm332_vm0, %v678_v39 }
 0x113   : > { %595 = vst.msk [vmem:[#allocation4 + $0x28] sm:$0xff] %vm332_vm0, %v579_v38  ;;  %686 = vst.msk [vmem:[#allocation5 + $0x28] sm:$0xff] %vm332_vm0, %v670_v41 }
 0x115   : > { %v3678_v44 = vpop.f32.mrb[16].mxu0  ;;  %v3688_v47 = vpop.f32.mrb[16].mxu1 }
 0x116   : > { %v749_v45 = vadd.f32 %v3678_v44, %v3397_v42  ;;  %v740_v46 = vpop.f32.mrb[17].mxu0  ;;  %v839_v50 = vadd.f32 %v3688_v47, %v3406_v43  ;;  %v830_v51 = vpop.f32.mrb[17].mxu1 }
 0x117   : > { %v741_v48 = vadd.f32 %v3397_v42, %v740_v46  ;;  %v3679_v49 = vpop.f32.mrb[18].mxu0  ;;  %v831_v54 = vadd.f32 %v3406_v43, %v830_v51  ;;  %v3689_v55 = vpop.f32.mrb[18].mxu1 }
 0x118   : > { %773 = vst.msk [vmem:[#allocation6 + $0x10] sm:$0xff] %vm332_vm0, %v749_v45  ;;  %v752_v52 = vadd.f32 %v3679_v49, %v3397_v42  ;;  %v743_v53 = vpop.f32.mrb[19].mxu0  ;;  %863 = vst.msk [vmem:[#allocation7 + $0x10] sm:$0xff] %vm332_vm0, %v839_v50  ;;  %v842_v57 = vadd.f32 %v3689_v55, %v3406_v43  ;;  %v833_v58 = vpop.f32.mrb[19].mxu1 }
 0x119   : > { %771 = vst.msk [vmem:[#allocation6] sm:$0xff] %vm332_vm0, %v741_v48  ;;  %v744_v56 = vadd.f32 %v3397_v42, %v743_v53  ;;  %861 = vst.msk [vmem:[#allocation7] sm:$0xff] %vm332_vm0, %v831_v54  ;;  %v834_v59 = vadd.f32 %v3406_v43, %v833_v58  ;;  %v3433_v53 = vld [vmem:[%s4997_s2 + $0x8] ss:$0 sm:$0xff]  ;;  %v4523_v54 = vld [vmem:[%s4999_s4] ss:$0 sm:$0xff] }
 0x11a   : > { %774 = vst.msk [vmem:[#allocation6 + $0x18] sm:$0xff] %vm332_vm0, %v752_v52  ;;  %864 = vst.msk [vmem:[#allocation7 + $0x18] sm:$0xff] %vm332_vm0, %v842_v57 }
 0x11b   : > { %772 = vst.msk [vmem:[#allocation6 + $0x8] sm:$0xff] %vm332_vm0, %v744_v56  ;;  %862 = vst.msk [vmem:[#allocation7 + $0x8] sm:$0xff] %vm332_vm0, %v834_v59 }
 0x11d   : > { %v3682_v60 = vpop.f32.mrb[20].mxu0  ;;  %v3692_v63 = vpop.f32.mrb[20].mxu1 }
 0x11e   : > { %v765_v61 = vadd.f32 %v3682_v60, %v3397_v42  ;;  %v756_v62 = vpop.f32.mrb[21].mxu0  ;;  %v855_v2 = vadd.f32 %v3692_v63, %v3406_v43  ;;  %v846_v3 = vpop.f32.mrb[21].mxu1 }
 0x11f   : > { %v757_v0 = vadd.f32 %v3397_v42, %v756_v62  ;;  %v3683_v1 = vpop.f32.mrb[22].mxu0  ;;  %v847_v6 = vadd.f32 %v3406_v43, %v846_v3  ;;  %v3693_v7 = vpop.f32.mrb[22].mxu1 }
 0x120   : > { %777 = vst.msk [vmem:[#allocation6 + $0x30] sm:$0xff] %vm332_vm0, %v765_v61  ;;  %v768_v4 = vadd.f32 %v3683_v1, %v3397_v42  ;;  %v759_v5 = vpop.f32.mrb[23].mxu0  ;;  %867 = vst.msk [vmem:[#allocation7 + $0x30] sm:$0xff] %vm332_vm0, %v855_v2  ;;  %v858_v9 = vadd.f32 %v3693_v7, %v3406_v43  ;;  %v849_v10 = vpop.f32.mrb[23].mxu1 }
 0x121   : > { %775 = vst.msk [vmem:[#allocation6 + $0x20] sm:$0xff] %vm332_vm0, %v757_v0  ;;  %v760_v8 = vadd.f32 %v3397_v42, %v759_v5  ;;  %865 = vst.msk [vmem:[#allocation7 + $0x20] sm:$0xff] %vm332_vm0, %v847_v6  ;;  %v850_v11 = vadd.f32 %v3406_v43, %v849_v10 }
 0x122   : > { %778 = vst.msk [vmem:[#allocation6 + $0x38] sm:$0xff] %vm332_vm0, %v768_v4  ;;  %868 = vst.msk [vmem:[#allocation7 + $0x38] sm:$0xff] %vm332_vm0, %v858_v9  ;;  %v4534_v4 = vld [vmem:[%s4999_s4 + $0x1] ss:$0 sm:$0xff] }
 0x123   : > { %776 = vst.msk [vmem:[#allocation6 + $0x28] sm:$0xff] %vm332_vm0, %v760_v8  ;;  %866 = vst.msk [vmem:[#allocation7 + $0x28] sm:$0xff] %vm332_vm0, %v850_v11 }
 0x125   : > { %v3698_v15 = vpop.f32.mrb[24].mxu0  ;;  %v3708_v18 = vpop.f32.mrb[24].mxu1 }
 0x126   : > { %v930_v16 = vadd.f32 %v3698_v15, %v3415_v12  ;;  %v921_v17 = vpop.f32.mrb[25].mxu0  ;;  %v1020_v21 = vadd.f32 %v3708_v18, %v3424_v14  ;;  %v1011_v24 = vpop.f32.mrb[25].mxu1 }
 0x127   : > { %v922_v19 = vadd.f32 %v3415_v12, %v921_v17  ;;  %v3699_v20 = vpop.f32.mrb[26].mxu0  ;;  %v1012_v31 = vadd.f32 %v3424_v14, %v1011_v24  ;;  %v3709_v32 = vpop.f32.mrb[26].mxu1 }
 0x128   : > { %954 = vst.msk [vmem:[#allocation8 + $0x10] sm:$0xff] %vm332_vm0, %v930_v16  ;;  %v933_v28 = vadd.f32 %v3699_v20, %v3415_v12  ;;  %v924_v30 = vpop.f32.mrb[27].mxu0  ;;  %1044 = vst.msk [vmem:[#allocation9 + $0x10] sm:$0xff] %vm332_vm0, %v1020_v21  ;;  %v1023_v34 = vadd.f32 %v3709_v32, %v3424_v14  ;;  %v1014_v35 = vpop.f32.mrb[27].mxu1 }
 0x129   : > { %952 = vst.msk [vmem:[#allocation8] sm:$0xff] %vm332_vm0, %v922_v19  ;;  %v925_v33 = vadd.f32 %v3415_v12, %v924_v30  ;;  %1042 = vst.msk [vmem:[#allocation9] sm:$0xff] %vm332_vm0, %v1012_v31  ;;  %v1015_v36 = vadd.f32 %v3424_v14, %v1014_v35  ;;  %v4545_v19 = vld [vmem:[%s4999_s4 + $0x2] ss:$0 sm:$0xff] }
 0x12a   : > { %955 = vst.msk [vmem:[#allocation8 + $0x18] sm:$0xff] %vm332_vm0, %v933_v28  ;;  %1045 = vst.msk [vmem:[#allocation9 + $0x18] sm:$0xff] %vm332_vm0, %v1023_v34  ;;  %v1207_v31 = vld [vmem:[#allocation2] sm:$0xff] }
 0x12b   : > { %953 = vst.msk [vmem:[#allocation8 + $0x8] sm:$0xff] %vm332_vm0, %v925_v33  ;;  %1043 = vst.msk [vmem:[#allocation9 + $0x8] sm:$0xff] %vm332_vm0, %v1015_v36  ;;  %v1296_v33 = vld [vmem:[#allocation5] sm:$0xff] }
 0x12d   : > { %v3702_v37 = vpop.f32.mrb[28].mxu0  ;;  %v3712_v40 = vpop.f32.mrb[28].mxu1 }
 0x12e   : > { %v946_v38 = vadd.f32 %v3702_v37, %v3415_v12  ;;  %v937_v39 = vpop.f32.mrb[29].mxu0  ;;  %v1036_v43 = vadd.f32 %v3712_v40, %v3424_v14  ;;  %v1027_v44 = vpop.f32.mrb[29].mxu1 }
 0x12f   : > { %v938_v41 = vadd.f32 %v3415_v12, %v937_v39  ;;  %v3703_v42 = vpop.f32.mrb[30].mxu0  ;;  %v1028_v47 = vadd.f32 %v3424_v14, %v1027_v44  ;;  %v3713_v48 = vpop.f32.mrb[30].mxu1 }
 0x130   : > { %958 = vst.msk [vmem:[#allocation8 + $0x30] sm:$0xff] %vm332_vm0, %v946_v38  ;;  %v949_v45 = vadd.f32 %v3703_v42, %v3415_v12  ;;  %v940_v46 = vpop.f32.mrb[31].mxu0  ;;  %1048 = vst.msk [vmem:[#allocation9 + $0x30] sm:$0xff] %vm332_vm0, %v1036_v43  ;;  %v1039_v50 = vadd.f32 %v3713_v48, %v3424_v14  ;;  %v1030_v51 = vpop.f32.mrb[31].mxu1  ;;  %v1385_v37 = vld [vmem:[#allocation8] sm:$0xff] }
 0x131   : > { %956 = vst.msk [vmem:[#allocation8 + $0x20] sm:$0xff] %vm332_vm0, %v938_v41  ;;  %v941_v49 = vadd.f32 %v3415_v12, %v940_v46  ;;  %1046 = vst.msk [vmem:[#allocation9 + $0x20] sm:$0xff] %vm332_vm0, %v1028_v47  ;;  %v1031_v52 = vadd.f32 %v3424_v14, %v1030_v51  ;;  %v1215_v41 = vld [vmem:[#allocation3] sm:$0xff] }
 0x132   : > { %959 = vst.msk [vmem:[#allocation8 + $0x38] sm:$0xff] %vm332_vm0, %v949_v45  ;;  %1049 = vst.msk [vmem:[#allocation9 + $0x38] sm:$0xff] %vm332_vm0, %v1039_v50 }
 0x133   : > { %957 = vst.msk [vmem:[#allocation8 + $0x28] sm:$0xff] %vm332_vm0, %v941_v49  ;;  %1047 = vst.msk [vmem:[#allocation9 + $0x28] sm:$0xff] %vm332_vm0, %v1031_v52  ;;  %v1304_v49 = vld [vmem:[#allocation6] sm:$0xff] }
 0x135   : > { %v3718_v55 = vpop.f32.mrb[32].mxu0  ;;  %v1201_v57 = vpop.f32.mrb[32].mxu1 }
 0x136   : > { %v1110_v56 = vadd.f32 %v3718_v55, %v3433_v53  ;;  %v1101_v58 = vpop.f32.mrb[33].mxu0  ;;  %v1202_v59 = vadd.f32 %v4523_v54, %v1201_v57  ;;  %v3728_v62 = vpop.f32.mrb[33].mxu1 }
 0x137   : > { %v1102_v60 = vadd.f32 %v3433_v53, %v1101_v58  ;;  %v3719_v61 = vpop.f32.mrb[34].mxu0  ;;  %v1204_v1 = vpop.f32.mrb[34].mxu1 }
 0x138   : > { %1134 = vst.msk [vmem:[#allocation10 + $0x10] sm:$0xff] %vm332_vm0, %v1110_v56  ;;  %v1113_v63 = vadd.f32 %v3719_v61, %v3433_v53  ;;  %v1104_v0 = vpop.f32.mrb[35].mxu0  ;;  %1217 = vrot.lane.b32.xlu0 %v1202_v59, %s4187_s29  ;;  %v3729_v3 = vpop.f32.mrb[35].mxu1  ;;  %v1208_v32 = vadd.f32 %v1207_v31, %v1202_v59  ;;  %v1393_v56 = vld [vmem:[#allocation9] sm:$0xff] }
 0x139   : > { %1132 = vst.msk [vmem:[#allocation10] sm:$0xff] %vm332_vm0, %v1102_v60  ;;  %v1105_v2 = vadd.f32 %v3433_v53, %v1104_v0  ;;  %v1227_v3 = vld [vmem:[#allocation4] sm:$0xff] }
 0x13a   : > { %1135 = vst.msk [vmem:[#allocation10 + $0x18] sm:$0xff] %vm332_vm0, %v1113_v63  ;;  %v3442_v35 = vmul.f32 -1.442695, %v1208_v32 }
 0x13b   : > { %1133 = vst.msk [vmem:[#allocation10 + $0x8] sm:$0xff] %vm332_vm0, %v1105_v2 }
 0x13c   : > { %3913 = vpow2.f32 %v3442_v35 }
 0x13d   : > { %v3722_v5 = vpop.f32.mrb[36].mxu0  ;;  %v1290_v7 = vpop.f32.mrb[36].mxu1 }
 0x13e   : > { %v1126_v6 = vadd.f32 %v3722_v5, %v3433_v53  ;;  %v1117_v8 = vpop.f32.mrb[37].mxu0  ;;  %v1291_v9 = vadd.f32 %v4534_v4, %v1290_v7  ;;  %v3734_v12 = vpop.f32.mrb[37].mxu1  ;;  %v1316_v7 = vld [vmem:[#allocation7] sm:$0xff] }
 0x13f   : > { %v1118_v10 = vadd.f32 %v3433_v53, %v1117_v8  ;;  %v3723_v11 = vpop.f32.mrb[38].mxu0  ;;  %v1293_v16 = vpop.f32.mrb[38].mxu1 }
 0x140   : > { %1138 = vst.msk [vmem:[#allocation10 + $0x30] sm:$0xff] %vm332_vm0, %v1126_v6  ;;  %v1129_v14 = vadd.f32 %v3723_v11, %v3433_v53  ;;  %v1120_v15 = vpop.f32.mrb[39].mxu0  ;;  %1306 = vrot.lane.b32.xlu0 %v1291_v9, %s4187_s29  ;;  %v3735_v18 = vpop.f32.mrb[39].mxu1  ;;  %v1297_v34 = vadd.f32 %v1296_v33, %v1291_v9  ;;  %v1405_v16 = vld [vmem:[#allocation10] sm:$0xff] }
 0x141   : > { %1136 = vst.msk [vmem:[#allocation10 + $0x20] sm:$0xff] %vm332_vm0, %v1118_v10  ;;  %v1121_v17 = vadd.f32 %v3433_v53, %v1120_v15 }
 0x142   : > { %1139 = vst.msk [vmem:[#allocation10 + $0x38] sm:$0xff] %vm332_vm0, %v1129_v14  ;;  %v3447_v36 = vmul.f32 -1.442695, %v1297_v34 }
 0x143   : > { %1137 = vst.msk [vmem:[#allocation10 + $0x28] sm:$0xff] %vm332_vm0, %v1121_v17 }
 0x144   : > { %1317 = vrot.lane.b32.xlu0 %v1291_v9, %s4188_s9  ;;  %3915 = vpow2.f32 %v3447_v36 }
 0x145   : > { %v1379_v20 = vpop.f32.mrb[40].mxu0 }
 0x146   : > { %v1380_v21 = vadd.f32 %v4545_v19, %v1379_v20  ;;  %v3740_v24 = vpop.f32.mrb[41].mxu0  ;;  %v3914_v42 = vpop.eup %3913 }
 0x147   : > { %v1382_v28 = vpop.f32.mrb[42].mxu0  ;;  %v1212_v46 = vadd.f32 1.0, %v3914_v42 }
 0x148   : > { %1395 = vrot.lane.b32.xlu1 %v1380_v21, %s4187_s29  ;;  %v3741_v30 = vpop.f32.mrb[43].mxu0  ;;  %v1386_v38 = vadd.f32 %v1385_v37, %v1380_v21 }
 0x14a   : > { %v3452_v39 = vmul.f32 -1.442695, %v1386_v38 }
 0x14c   : > { %1228 = vrot.lane.b32.xlu1 %v1202_v59, %s4188_s9  ;;  %3917 = vpow2.f32 %v3452_v39 }
 0x14e   : > { %v3916_v44 = vpop.eup %3915 }
 0x14f   : > { %v1301_v47 = vadd.f32 1.0, %v3916_v44 }
 0x150   : > { %1406 = vrot.lane.b32.xlu1 %v1380_v21, %s4188_s9 }
 0x156   : > { %v3918_v50 = vpop.eup %3917 }
 0x157   : > { %v1390_v53 = vadd.f32 1.0, %v3918_v50 }
 0x1aa   : > { %v1218_v40 = vpop.permute.xlu0 %1217 }
 0x1ab   : > { %v1220_v43 = vadd.f32 %v1218_v40, %v1215_v41 }
 0x1ad   : > { %v3443_v45 = vmul.f32 -1.442695, %v1220_v43 }
 0x1af   : > { %3919 = vpow2.f32 %v3443_v45 }
 0x1b0   : > { %3921 = vrcp.f32 %v1212_v46 }
 0x1b1   : > { %3923 = vrcp.f32 %v1301_v47 }
 0x1b2   : > { %v1307_v48 = vpop.permute.xlu0 %1306 }
 0x1b3   : > { %v1309_v51 = vadd.f32 %v1307_v48, %v1304_v49 }
 0x1b5   : > { %v3448_v52 = vmul.f32 -1.442695, %v1309_v51 }
 0x1b6   : > { %v1318_v60 = vpop.permute.xlu0 %1317 }
 0x1b7   : > { %3925 = vpow2.f32 %v3448_v52 }
 0x1b8   : > { %3927 = vrcp.f32 %v1390_v53 }
 0x1b9   : > { %v3920_v55 = vpop.eup %3919 }
 0x1ba   : > { %v1396_v57 = vpop.permute.xlu1 %1395  ;;  %v1224_v58 = vadd.f32 1.0, %v3920_v55  ;;  %v3922_v61 = vpop.eup %3921 }
 0x1bb   : > { %v1398_v59 = vadd.f32 %v1396_v57, %v1393_v56  ;;  %v3924_v63 = vpop.eup %3923 }
 0x1bc   : > { %3929 = vrcp.f32 %v1224_v58  ;;  %v1320_v1 = vmul.f32 %v3924_v63, %v1318_v60 }
 0x1bd   : > { %v3453_v62 = vmul.f32 -1.442695, %v1398_v59 }
 0x1be   : > { %v1229_v0 = vpop.permute.xlu1 %1228  ;;  %v1321_v9 = vadd.f32 %v1320_v1, %v1316_v7  ;;  %v1630_v7 = vld [vmem:[#allocation8 + $0x8] sm:$0xff] }
 0x1bf   : > { %3931 = vpow2.f32 %v3453_v62  ;;  %v1231_v2 = vmul.f32 %v3922_v61, %v1229_v0  ;;  %v1470_v0 = vld [vmem:[#allocation2 + $0x8] sm:$0xff] }
 0x1c1   : > { %v1232_v5 = vadd.f32 %v1231_v2, %v1227_v3  ;;  %v3926_v6 = vpop.eup %3925  ;;  %v1550_v2 = vld [vmem:[#allocation5 + $0x8] sm:$0xff] }
 0x1c2   : > { %v1313_v8 = vadd.f32 1.0, %v3926_v6  ;;  %v1407_v10 = vpop.permute.xlu1 %1406  ;;  %v3928_v11 = vpop.eup %3927 }
 0x1c3   : > { %3933 = vtanh.f32 %v1232_v5  ;;  %v1409_v12 = vmul.f32 %v3928_v11, %v1407_v10 }
 0x1c4   : > { %3935 = vrcp.f32 %v1313_v8 }
 0x1c5   : > { %3937 = vtanh.f32 %v1321_v9  ;;  %v1410_v18 = vadd.f32 %v1409_v12, %v1405_v16 }
 0x1c6   : > { %v3930_v14 = vpop.eup %3929 }
 0x1c7   : > { %v1234_v20 = vsub.f32 1.0, %v3930_v14  ;;  %v1236_v24 = vmul.f32 %v3930_v14, %v4382_v23 }
 0x1c9   : > { %v3932_v15 = vpop.eup %3931 }
 0x1ca   : > { %v1402_v17 = vadd.f32 1.0, %v3932_v15  ;;  %v1479_v15 = vld [vmem:[#allocation3 + $0x8] sm:$0xff] }
 0x1cc   : > { %3939 = vrcp.f32 %v1402_v17 }
 0x1cd   : > { %v3934_v21 = vpop.eup %3933  ;;  %3941 = vtanh.f32 %v1410_v18 }
 0x1ce   : > { %v1235_v28 = vmul.f32 %v3934_v21, %v1234_v20  ;;  %v3936_v30 = vpop.eup %3935  ;;  %v1559_v20 = vld [vmem:[#allocation6 + $0x8] sm:$0xff] }
 0x1cf   : > { %v1323_v31 = vsub.f32 1.0, %v3936_v30  ;;  %v3938_v33 = vpop.eup %3937  ;;  %v1325_v34 = vmul.f32 %v3936_v30, %v4403_v27 }
 0x1d0   : > { %v1237_v32 = vadd.f32 %v1236_v24, %v1235_v28 }
 0x1d1   : > { %v1324_v35 = vmul.f32 %v3938_v33, %v1323_v31 }
 0x1d2   : > { %1238 = vst.msk [vmem:[#allocation11] sm:$0xff] %vm332_vm0, %v1237_v32  ;;  %v1417_v36 = vpack.c.bf16 %v1237_v32, %v1237_v32 }
 0x1d3   : > { %v1326_v37 = vadd.f32 %v1325_v34, %v1324_v35  ;;  %v1639_v34 = vld [vmem:[#allocation9 + $0x8] sm:$0xff] }
 0x1d4   : > { %1421 = vst.msk [vmem:[%s4557_s12] sm:$0xf] %vm1420_vm2, %v1417_v36 }
 0x1d5   : > { %1327 = vst.msk [vmem:[#allocation12] sm:$0xff] %vm332_vm0, %v1326_v37  ;;  %v1418_v38 = vpack.c.bf16 %v1326_v37, %v1326_v37 }
 0x1d6   : > { %v3940_v23 = vpop.eup %3939 }
 0x1d7   : > { %v1412_v39 = vsub.f32 1.0, %v3940_v23  ;;  %v3942_v40 = vpop.eup %3941  ;;  %1422 = vst.msk [vmem:[%s4557_s12 + $0x4] sm:$0xf] %vm1420_vm2, %v1418_v38  ;;  %v1414_v27 = vmul.f32 %v3940_v23, %v4416_v29 }
 0x1d9   : > { %v1413_v41 = vmul.f32 %v3942_v40, %v1412_v39  ;;  %v4565_v42 = vld [vmem:[#allocation11] sm:$0xff]  ;;  %v1492_v40 = vld [vmem:[#allocation4 + $0x8] sm:$0xff] }
 0x1da   : > { %v1425_v43 = vpack.c.bf16 %v4565_v42, %v4565_v42 }
 0x1db   : > { %v1415_v44 = vadd.f32 %v1414_v27, %v1413_v41 }
 0x1dc   : > { %3745 = vmatmul.mubr.msk.bf16.vlgmr.msra.gmra.mrb[40].mxu1 %vm332_vm0, %v1425_v43  ;;  %v4571_v46 = vld [vmem:[#allocation12] sm:$0xff] }
 0x1dd   : > { %1416 = vst.msk [vmem:[#allocation13] sm:$0xff] %vm332_vm0, %v1415_v44  ;;  %v1419_v45 = vpack.c.bf16 %v1415_v44, %v1415_v44  ;;  %3755 = vmatpush3.bf16.msra.mxu1 %v4389_v25  ;;  %3756 = vmatprep.mubr.msk.bf16.mxu1 %vm4186_vm1, %v4185_v13  ;;  %v1505_v29 = vpack.c.bf16 %v4571_v46, %v4571_v46 }
 0x1de   : > { %3766 = vmatprep.subr.bf16.mxu1 %v4185_v13 }
 0x1df   : > { %1423 = vst.msk [vmem:[%s4557_s12 + $0x8] sm:$0xf] %vm1420_vm2, %v1419_v45  ;;  %3751 = vmatmul.mubr.msk.bf16.vlgmr.msra.gmra.mrb[44].mxu0 %vm332_vm0, %v1505_v29  ;;  %v1572_v29 = vld [vmem:[#allocation7 + $0x8] sm:$0xff] }
 0x1e0   : > { %3761 = vmatpush3.bf16.msra.mxu0 %v4361_v22  ;;  %3762 = vmatprep.mubr.msk.bf16.mxu0 %vm4186_vm1, %v4185_v13 }
 0x1e1   : > { %3772 = vmatprep.subr.bf16.mxu0 %v4185_v13 }
 0x1e4   : > { %v4586_v47 = vld [vmem:[#allocation13] sm:$0xff] }
 0x1e5   : > { %v1585_v48 = vpack.c.bf16 %v4586_v47, %v4586_v47 }
 0x1e7   : > { %3757 = vmatmul.mubr.msk.bf16.vlgmr.msra.gmra.mrb[44].mxu1 %vm332_vm0, %v1585_v48 }
 0x1e8   : > { %3767 = vmatpush3.bf16.msra.mxu1 %v4394_v26  ;;  %3768 = vmatprep.mubr.msk.bf16.mxu1 %vm4186_vm1, %v4185_v13 }
 0x1e9   : > { %3778 = vmatprep.subr.bf16.mxu1 %v4185_v13 }
 0x2af   : > { %v1463_v22 = vpop.f32.mrb[40].mxu1 }
 0x2b0   : > { %v1464_v49 = vadd.f32 %v4523_v54, %v1463_v22  ;;  %v3746_v50 = vpop.f32.mrb[41].mxu1 }
 0x2b1   : > { %v1466_v51 = vpop.f32.mrb[42].mxu1 }
 0x2b2   : > { %1481 = vrot.lane.b32.xlu0 %v1464_v49, %s4187_s29  ;;  %v3747_v52 = vpop.f32.mrb[43].mxu1  ;;  %v1543_v53 = vpop.f32.mrb[44].mxu0  ;;  %v1471_v1 = vadd.f32 %v1470_v0, %v1464_v49 }
 0x2b3   : > { %v1544_v55 = vadd.f32 %v4534_v4, %v1543_v53  ;;  %v3752_v56 = vpop.f32.mrb[45].mxu0  ;;  %v1652_v53 = vld [vmem:[#allocation10 + $0x8] sm:$0xff] }
 0x2b4   : > { %v1546_v57 = vpop.f32.mrb[46].mxu0  ;;  %v3455_v5 = vmul.f32 -1.442695, %v1471_v1 }
 0x2b5   : > { %1561 = vrot.lane.b32.xlu1 %v1544_v55, %s4187_s29  ;;  %v3753_v58 = vpop.f32.mrb[47].mxu0  ;;  %v1551_v3 = vadd.f32 %v1550_v2, %v1544_v55 }
 0x2b6   : > { %3943 = vpow2.f32 %v3455_v5 }
 0x2b7   : > { %v3458_v6 = vmul.f32 -1.442695, %v1551_v3 }
 0x2b9   : > { %1493 = vrot.lane.b32.xlu1 %v1464_v49, %s4188_s9  ;;  %3945 = vpow2.f32 %v3458_v6 }
 0x2ba   : > { %v1623_v59 = vpop.f32.mrb[44].mxu1 }
 0x2bb   : > { %v1624_v60 = vadd.f32 %v4545_v19, %v1623_v59  ;;  %v3758_v61 = vpop.f32.mrb[45].mxu1 }
 0x2bc   : > { %v1626_v62 = vpop.f32.mrb[46].mxu1 }
 0x2bd   : > { %1641 = vrot.lane.b32.xlu0 %v1624_v60, %s4187_s29  ;;  %v3759_v63 = vpop.f32.mrb[47].mxu1  ;;  %1653 = vrot.lane.b32.xlu1 %v1624_v60, %s4188_s9  ;;  %v1631_v8 = vadd.f32 %v1630_v7, %v1624_v60 }
 0x2bf   : > { %v3461_v9 = vmul.f32 -1.442695, %v1631_v8 }
 0x2c0   : > { %v3944_v10 = vpop.eup %3943 }
 0x2c1   : > { %1573 = vrot.lane.b32.xlu0 %v1544_v55, %s4188_s9  ;;  %3947 = vpow2.f32 %v3461_v9  ;;  %v1475_v12 = vadd.f32 1.0, %v3944_v10 }
 0x2c3   : > { %v3946_v11 = vpop.eup %3945  ;;  %3949 = vrcp.f32 %v1475_v12 }
 0x2c4   : > { %v1555_v14 = vadd.f32 1.0, %v3946_v11 }
 0x2c6   : > { %3951 = vrcp.f32 %v1555_v14 }
 0x2cb   : > { %v3948_v24 = vpop.eup %3947 }
 0x2cc   : > { %v1635_v31 = vadd.f32 1.0, %v3948_v24 }
 0x2cd   : > { %v3950_v33 = vpop.eup %3949 }
 0x2d0   : > { %v3952_v23 = vpop.eup %3951 }
 0x324   : > { %v1482_v16 = vpop.permute.xlu0 %1481 }
 0x325   : > { %v1484_v17 = vadd.f32 %v1482_v16, %v1479_v15 }
 0x327   : > { %v3456_v18 = vmul.f32 -1.442695, %v1484_v17  ;;  %v1562_v21 = vpop.permute.xlu1 %1561  ;;  %v4633_v17 = vld [vmem:[%s4998_s3] sm:$0xff]  }
 0x328   : > { %v1564_v28 = vadd.f32 %v1562_v21, %v1559_v20 }
 0x329   : > { %3953 = vpow2.f32 %v3456_v18 }
 0x32a   : > { %v3459_v30 = vmul.f32 -1.442695, %v1564_v28 }
 0x32b   : > { %v1494_v32 = vpop.permute.xlu1 %1493 }
 0x32c   : > { %3955 = vpow2.f32 %v3459_v30  ;;  %v1496_v36 = vmul.f32 %v3950_v33, %v1494_v32 }
 0x32d   : > { %3957 = vrcp.f32 %v1635_v31 }
 0x32e   : > { %v1497_v43 = vadd.f32 %v1496_v36, %v1492_v40 }
 0x32f   : > { %v1642_v35 = vpop.permute.xlu0 %1641  ;;  %v1654_v22 = vpop.permute.xlu1 %1653 }
 0x330   : > { %v1644_v37 = vadd.f32 %v1642_v35, %v1639_v34 }
 0x332   : > { %v3462_v38 = vmul.f32 -1.442695, %v1644_v37 }
 0x333   : > { %v3954_v39 = vpop.eup %3953  ;;  %v1574_v27 = vpop.permute.xlu0 %1573 }
 0x334   : > { %v1488_v41 = vadd.f32 1.0, %v3954_v39  ;;  %3959 = vpow2.f32 %v3462_v38  ;;  %v1576_v44 = vmul.f32 %v3952_v23, %v1574_v27  ;;  %v1717_v39 = vld [vmem:[#allocation2 + $0x10] sm:$0xff] }
 0x335   : > { %v1797_v27 = vld [vmem:[#allocation5 + $0x10] sm:$0xff] }
 0x336   : > { %3961 = vrcp.f32 %v1488_v41  ;;  %v3956_v45 = vpop.eup %3955  ;;  %v1577_v49 = vadd.f32 %v1576_v44, %v1572_v29 }
 0x337   : > { %v1568_v48 = vadd.f32 1.0, %v3956_v45  ;;  %3963 = vtanh.f32 %v1497_v43  ;;  %v3958_v50 = vpop.eup %3957  ;;  %v1877_v45 = vld [vmem:[#allocation8 + $0x10] sm:$0xff] }
 0x338   : > { %v1656_v51 = vmul.f32 %v3958_v50, %v1654_v22 }
 0x339   : > { %3965 = vrcp.f32 %v1568_v48 }
 0x33a   : > { %3967 = vtanh.f32 %v1577_v49  ;;  %v1657_v55 = vadd.f32 %v1656_v51, %v1652_v53 }
 0x33e   : > { %v3960_v52 = vpop.eup %3959 }
 0x33f   : > { %v1648_v56 = vadd.f32 1.0, %v3960_v52  ;;  %v1726_v52 = vld [vmem:[#allocation3 + $0x10] sm:$0xff] }
 0x340   : > { %v3962_v57 = vpop.eup %3961 }
 0x341   : > { %v1499_v58 = vsub.f32 1.0, %v3962_v57  ;;  %3969 = vrcp.f32 %v1648_v56  ;;  %v3964_v59 = vpop.eup %3963  ;;  %v1501_v60 = vmul.f32 %v3962_v57, %v4565_v42  ;;  %v1806_v57 = vld [vmem:[#allocation6 + $0x10] sm:$0xff] }
 0x342   : > { %3971 = vtanh.f32 %v1657_v55 }
 0x343   : > { %v1500_v61 = vmul.f32 %v3964_v59, %v1499_v58  ;;  %v3966_v62 = vpop.eup %3965 }
 0x344   : > { %v1579_v63 = vsub.f32 1.0, %v3966_v62  ;;  %v3968_v1 = vpop.eup %3967  ;;  %v1581_v2 = vmul.f32 %v3966_v62, %v4571_v46 }
 0x345   : > { %v1502_v0 = vadd.f32 %v1501_v60, %v1500_v61 }
 0x346   : > { %v1580_v5 = vmul.f32 %v3968_v1, %v1579_v63  ;;  %v1886_v1 = vld [vmem:[#allocation9 + $0x10] sm:$0xff] }
 0x347   : > { %1503 = vst.msk [vmem:[#allocation11] sm:$0xff] %vm332_vm0, %v1502_v0  ;;  %v1664_v3 = vpack.c.bf16 %v1502_v0, %v1502_v0 }
 0x348   : > { %v1582_v6 = vadd.f32 %v1581_v2, %v1580_v5 }
 0x349   : > { %3463 = vst.msk [vmem:[%s4557_s12 + $0xc] sm:$0xf] %vm1420_vm2, %v1664_v3 }
 0x34a   : > { %1583 = vst.msk [vmem:[#allocation12] sm:$0xff] %vm332_vm0, %v1582_v6  ;;  %v1665_v42 = vpack.c.bf16 %v1582_v6, %v1582_v6 }
 0x34b   : > { %v3970_v7 = vpop.eup %3969 }
 0x34c   : > { %v1659_v8 = vsub.f32 1.0, %v3970_v7  ;;  %v3972_v9 = vpop.eup %3971  ;;  %3464 = vst.msk [vmem:[%s4557_s12 + $0x10] sm:$0xf] %vm1420_vm2, %v1665_v42  ;;  %v1661_v11 = vmul.f32 %v3970_v7, %v4586_v47 }
 0x34e   : > { %v1660_v10 = vmul.f32 %v3972_v9, %v1659_v8  ;;  %v4613_v46 = vld [vmem:[#allocation11] sm:$0xff]  ;;  %v1739_v8 = vld [vmem:[#allocation4 + $0x10] sm:$0xff] }
 0x34f   : > { %v1672_v12 = vpack.c.bf16 %v4613_v46, %v4613_v46 }
 0x350   : > { %v1662_v14 = vadd.f32 %v1661_v11, %v1660_v10 }
 0x351   : > { %3763 = vmatmul.mubr.msk.bf16.vlgmr.msra.gmra.mrb[48].mxu0 %vm332_vm0, %v1672_v12  ;;  %v4619_v16 = vld [vmem:[#allocation12] sm:$0xff] }
 0x352   : > { %1663 = vst.msk [vmem:[#allocation13] sm:$0xff] %vm332_vm0, %v1662_v14  ;;  %v1666_v15 = vpack.c.bf16 %v1662_v14, %v1662_v14  ;;  %3773 = vmatpush3.bf16.msra.mxu0 %v4389_v25  ;;  %3774 = vmatprep.mubr.msk.bf16.mxu0 %vm4186_vm1, %v4185_v13  ;;  %v1752_v47 = vpack.c.bf16 %v4619_v16, %v4619_v16 }
 0x353   : > { %3784 = vmatprep.subr.bf16.mxu0 %v4185_v13 }
 0x354   : > { %3465 = vst.msk [vmem:[%s4557_s12 + $0x14] sm:$0xf] %vm1420_vm2, %v1666_v15  ;;  %3769 = vmatmul.mubr.msk.bf16.vlgmr.msra.gmra.mrb[48].mxu1 %vm332_vm0, %v1752_v47  ;;  %v1819_v15 = vld [vmem:[#allocation7 + $0x10] sm:$0xff] }
 0x355   : > { %3779 = vmatpush3.bf16.msra.mxu1 %v4633_v17  ;;  %3780 = vmatprep.mubr.msk.bf16.mxu1 %vm4186_vm1, %v4185_v13 }
 0x356   : > { %3790 = vmatprep.subr.bf16.mxu1 %v4185_v13 }
 0x359   : > { %v4639_v25 = vld [vmem:[#allocation13] sm:$0xff] }
 0x35a   : > { %v1832_v18 = vpack.c.bf16 %v4639_v25, %v4639_v25 }
 0x35c   : > { %3775 = vmatmul.mubr.msk.bf16.vlgmr.msra.gmra.mrb[52].mxu0 %vm332_vm0, %v1832_v18 }
 0x35d   : > { %3785 = vmatpush3.bf16.msra.mxu0 %v4394_v26  ;;  %3786 = vmatprep.mubr.msk.bf16.mxu0 %vm4186_vm1, %v4185_v13 }
 0x35e   : > { %3796 = vmatprep.subr.bf16.mxu0 %v4185_v13 }
 0x424   : > { %v1710_v20 = vpop.f32.mrb[48].mxu0 }
 0x425   : > { %v1711_v21 = vadd.f32 %v4523_v54, %v1710_v20  ;;  %v3764_v24 = vpop.f32.mrb[49].mxu0 }
 0x426   : > { %v1713_v28 = vpop.f32.mrb[50].mxu0 }
 0x427   : > { %v3765_v30 = vpop.f32.mrb[51].mxu0  ;;  %1728 = vrot.lane.b32.xlu0 %v1711_v21, %s4187_s29  ;;  %v1790_v31 = vpop.f32.mrb[48].mxu1  ;;  %v1718_v40 = vadd.f32 %v1717_v39, %v1711_v21 }
 0x428   : > { %v1791_v32 = vadd.f32 %v4534_v4, %v1790_v31  ;;  %v3770_v33 = vpop.f32.mrb[49].mxu1  ;;  %v1899_v30 = vld [vmem:[#allocation10 + $0x10] sm:$0xff] }
 0x429   : > { %v1793_v34 = vpop.f32.mrb[50].mxu1  ;;  %v3467_v43 = vmul.f32 -1.442695, %v1718_v40 }
 0x42a   : > { %1808 = vrot.lane.b32.xlu1 %v1791_v32, %s4187_s29  ;;  %v3771_v26 = vpop.f32.mrb[51].mxu1  ;;  %v1798_v41 = vadd.f32 %v1797_v27, %v1791_v32 }
 0x42b   : > { %3973 = vpow2.f32 %v3467_v43 }
 0x42c   : > { %v3470_v44 = vmul.f32 -1.442695, %v1798_v41 }
 0x42e   : > { %1740 = vrot.lane.b32.xlu1 %v1711_v21, %s4188_s9  ;;  %3975 = vpow2.f32 %v3470_v44 }
 0x42f   : > { %v1870_v35 = vpop.f32.mrb[52].mxu0 }
 0x430   : > { %v1871_v36 = vadd.f32 %v4545_v19, %v1870_v35  ;;  %v3776_v37 = vpop.f32.mrb[53].mxu0 }
 0x431   : > { %v1873_v23 = vpop.f32.mrb[54].mxu0 }
 0x432   : > { %1888 = vrot.lane.b32.xlu0 %v1871_v36, %s4187_s29  ;;  %v3777_v38 = vpop.f32.mrb[55].mxu0  ;;  %1900 = vrot.lane.b32.xlu1 %v1871_v36, %s4188_s9  ;;  %v1878_v29 = vadd.f32 %v1877_v45, %v1871_v36 }
 0x434   : > { %v3473_v48 = vmul.f32 -1.442695, %v1878_v29 }
 0x435   : > { %v3974_v22 = vpop.eup %3973 }
 0x436   : > { %1820 = vrot.lane.b32.xlu0 %v1791_v32, %s4188_s9  ;;  %3977 = vpow2.f32 %v3473_v48  ;;  %v1722_v50 = vadd.f32 1.0, %v3974_v22 }
 0x438   : > { %v3976_v49 = vpop.eup %3975  ;;  %3979 = vrcp.f32 %v1722_v50 }
 0x439   : > { %v1802_v51 = vadd.f32 1.0, %v3976_v49 }
 0x43b   : > { %3981 = vrcp.f32 %v1802_v51 }
 0x440   : > { %v3978_v59 = vpop.eup %3977 }
 0x441   : > { %v1882_v62 = vadd.f32 1.0, %v3978_v59 }
 0x442   : > { %v3980_v0 = vpop.eup %3979 }
 0x445   : > { %v3982_v6 = vpop.eup %3981 }
 0x499   : > { %v1729_v53 = vpop.permute.xlu0 %1728 }
 0x49a   : > { %v1731_v55 = vadd.f32 %v1729_v53, %v1726_v52  ;;  %v4677_v53 = vld [vmem:[%s4998_s3 + $0x10] sm:$0xff]  }
 0x49c   : > { %v3468_v56 = vmul.f32 -1.442695, %v1731_v55  ;;  %v1809_v58 = vpop.permute.xlu1 %1808 }
 0x49d   : > { %v1811_v60 = vadd.f32 %v1809_v58, %v1806_v57  ;;  %v4700_v57 = vld [vmem:[%s4998_s3 + $0x8] sm:$0xff]  }
 0x49e   : > { %3983 = vpow2.f32 %v3468_v56 }
 0x49f   : > { %v3471_v61 = vmul.f32 -1.442695, %v1811_v60 }
 0x4a0   : > { %v1741_v63 = vpop.permute.xlu1 %1740 }
 0x4a1   : > { %3985 = vpow2.f32 %v3471_v61  ;;  %v1743_v3 = vmul.f32 %v3980_v0, %v1741_v63 }
 0x4a2   : > { %3987 = vrcp.f32 %v1882_v62 }
 0x4a3   : > { %v1744_v11 = vadd.f32 %v1743_v3, %v1739_v8 }
 0x4a4   : > { %v1889_v2 = vpop.permute.xlu0 %1888  ;;  %v1901_v18 = vpop.permute.xlu1 %1900 }
 0x4a5   : > { %v1891_v5 = vadd.f32 %v1889_v2, %v1886_v1 }
 0x4a7   : > { %v3474_v7 = vmul.f32 -1.442695, %v1891_v5 }
 0x4a8   : > { %v3984_v42 = vpop.eup %3983  ;;  %v1821_v9 = vpop.permute.xlu0 %1820 }
 0x4a9   : > { %v1735_v10 = vadd.f32 1.0, %v3984_v42  ;;  %3989 = vpow2.f32 %v3474_v7  ;;  %v1823_v12 = vmul.f32 %v3982_v6, %v1821_v9  ;;  %v2044_v9 = vld [vmem:[#allocation5 + $0x18] sm:$0xff] }
 0x4ab   : > { %3991 = vrcp.f32 %v1735_v10  ;;  %v3986_v14 = vpop.eup %3985  ;;  %v1824_v20 = vadd.f32 %v1823_v12, %v1819_v15 }
 0x4ac   : > { %v1815_v47 = vadd.f32 1.0, %v3986_v14  ;;  %3993 = vtanh.f32 %v1744_v11  ;;  %v3988_v21 = vpop.eup %3987  ;;  %v2124_v14 = vld [vmem:[#allocation8 + $0x18] sm:$0xff] }
 0x4ad   : > { %v1903_v24 = vmul.f32 %v3988_v21, %v1901_v18 }
 0x4ae   : > { %3995 = vrcp.f32 %v1815_v47 }
 0x4af   : > { %3997 = vtanh.f32 %v1824_v20  ;;  %v1904_v32 = vadd.f32 %v1903_v24, %v1899_v30  ;;  %v1973_v24 = vld [vmem:[#allocation3 + $0x18] sm:$0xff] }
 0x4b3   : > { %v3990_v28 = vpop.eup %3989 }
 0x4b4   : > { %v1895_v31 = vadd.f32 1.0, %v3990_v28 }
 0x4b5   : > { %v3992_v33 = vpop.eup %3991 }
 0x4b6   : > { %v1746_v34 = vsub.f32 1.0, %v3992_v33  ;;  %3999 = vrcp.f32 %v1895_v31  ;;  %v3994_v26 = vpop.eup %3993  ;;  %v1748_v35 = vmul.f32 %v3992_v33, %v4613_v46 }
 0x4b7   : > { %4001 = vtanh.f32 %v1904_v32  ;;  %v2053_v32 = vld [vmem:[#allocation6 + $0x18] sm:$0xff] }
 0x4b8   : > { %v1747_v36 = vmul.f32 %v3994_v26, %v1746_v34  ;;  %v3996_v37 = vpop.eup %3995 }
 0x4b9   : > { %v1826_v23 = vsub.f32 1.0, %v3996_v37  ;;  %v3998_v39 = vpop.eup %3997  ;;  %v1828_v40 = vmul.f32 %v3996_v37, %v4619_v16 }
 0x4ba   : > { %v1749_v38 = vadd.f32 %v1748_v35, %v1747_v36 }
 0x4bb   : > { %v1827_v41 = vmul.f32 %v3998_v39, %v1826_v23 }
 0x4bc   : > { %1750 = vst.msk [vmem:[#allocation11] sm:$0xff] %vm332_vm0, %v1749_v38  ;;  %v1911_v27 = vpack.c.bf16 %v1749_v38, %v1749_v38  ;;  %v2133_v38 = vld [vmem:[#allocation9 + $0x18] sm:$0xff] }
 0x4bd   : > { %v1829_v43 = vadd.f32 %v1828_v40, %v1827_v41 }
 0x4be   : > { %3475 = vst.msk [vmem:[%s4557_s12 + $0x18] sm:$0xf] %vm1420_vm2, %v1911_v27 }
 0x4bf   : > { %1830 = vst.msk [vmem:[#allocation12] sm:$0xff] %vm332_vm0, %v1829_v43  ;;  %v1912_v46 = vpack.c.bf16 %v1829_v43, %v1829_v43 }
 0x4c0   : > { %v4000_v44 = vpop.eup %3999 }
 0x4c1   : > { %v1906_v45 = vsub.f32 1.0, %v4000_v44  ;;  %v4002_v29 = vpop.eup %4001  ;;  %3476 = vst.msk [vmem:[%s4557_s12 + $0x1c] sm:$0xf] %vm1420_vm2, %v1912_v46  ;;  %v1908_v48 = vmul.f32 %v4000_v44, %v4639_v25  ;;  %v1986_v46 = vld [vmem:[#allocation4 + $0x18] sm:$0xff] }
 0x4c3   : > { %v1907_v22 = vmul.f32 %v4002_v29, %v1906_v45  ;;  %v4666_v16 = vld [vmem:[#allocation11] sm:$0xff] }
 0x4c4   : > { %v1919_v49 = vpack.c.bf16 %v4666_v16, %v4666_v16 }
 0x4c5   : > { %v1909_v50 = vadd.f32 %v1908_v48, %v1907_v22 }
 0x4c6   : > { %3781 = vmatmul.mubr.msk.bf16.vlgmr.msra.gmra.mrb[52].mxu1 %vm332_vm0, %v1919_v49  ;;  %v4672_v52 = vld [vmem:[#allocation12] sm:$0xff] }
 0x4c7   : > { %1910 = vst.msk [vmem:[#allocation13] sm:$0xff] %vm332_vm0, %v1909_v50  ;;  %v1913_v51 = vpack.c.bf16 %v1909_v50, %v1909_v50  ;;  %3791 = vmatpush3.bf16.msra.mxu1 %v4677_v53  ;;  %3792 = vmatprep.mubr.msk.bf16.mxu1 %vm4186_vm1, %v4185_v13  ;;  %v1999_v25 = vpack.c.bf16 %v4672_v52, %v4672_v52  ;;  %v2066_v50 = vld [vmem:[#allocation7 + $0x18] sm:$0xff] }
 0x4c8   : > { %3802 = vmatprep.subr.bf16.mxu1 %v4185_v13 }
 0x4c9   : > { %3477 = vst.msk [vmem:[%s4557_s12 + $0x20] sm:$0xf] %vm1420_vm2, %v1913_v51  ;;  %3787 = vmatmul.mubr.msk.bf16.vlgmr.msra.gmra.mrb[56].mxu0 %vm332_vm0, %v1999_v25 }
 0x4ca   : > { %3797 = vmatpush3.bf16.msra.mxu0 %v4633_v17  ;;  %3798 = vmatprep.mubr.msk.bf16.mxu0 %vm4186_vm1, %v4185_v13 }
 0x4cb   : > { %3808 = vmatprep.subr.bf16.mxu0 %v4185_v13 }
 0x4ce   : > { %v4692_v55 = vld [vmem:[#allocation13] sm:$0xff] }
 0x4cf   : > { %v2079_v56 = vpack.c.bf16 %v4692_v55, %v4692_v55 }
 0x4d1   : > { %3793 = vmatmul.mubr.msk.bf16.vlgmr.msra.gmra.mrb[56].mxu1 %vm332_vm0, %v2079_v56 }
 0x4d2   : > { %3803 = vmatpush3.bf16.msra.mxu1 %v4700_v57  ;;  %3804 = vmatprep.mubr.msk.bf16.mxu1 %vm4186_vm1, %v4185_v13 }
 0x4d3   : > { %3814 = vmatprep.subr.bf16.mxu1 %v4185_v13 }
 0x599   : > { %v1957_v58 = vpop.f32.mrb[52].mxu1 }
 0x59a   : > { %v1958_v59 = vadd.f32 %v4523_v54, %v1957_v58  ;;  %v3782_v60 = vpop.f32.mrb[53].mxu1 }
 0x59b   : > { %v1960_v61 = vpop.f32.mrb[54].mxu1 }
 0x59c   : > { %1975 = vrot.lane.b32.xlu0 %v1958_v59, %s4187_s29  ;;  %v3783_v62 = vpop.f32.mrb[55].mxu1  ;;  %v2037_v63 = vpop.f32.mrb[56].mxu0  ;;  %v2146_v61 = vld [vmem:[#allocation10 + $0x18] sm:$0xff] }
 0x59d   : > { %v2038_v0 = vadd.f32 %v4534_v4, %v2037_v63  ;;  %v3788_v1 = vpop.f32.mrb[57].mxu0  ;;  %v1964_v4 = vld [vmem:[#allocation2 + $0x18] sm:$0xff] }
 0x59e   : > { %v2040_v2 = vpop.f32.mrb[58].mxu0  ;;  %v1965_v8 = vadd.f32 %v1964_v4, %v1958_v59 }
 0x59f   : > { %2055 = vrot.lane.b32.xlu1 %v2038_v0, %s4187_s29  ;;  %v3789_v3 = vpop.f32.mrb[59].mxu0  ;;  %v2045_v10 = vadd.f32 %v2044_v9, %v2038_v0 }
 0x5a0   : > { %v3479_v11 = vmul.f32 -1.442695, %v1965_v8 }
 0x5a1   : > { %v3482_v12 = vmul.f32 -1.442695, %v2045_v10 }
 0x5a2   : > { %4003 = vpow2.f32 %v3479_v11 }
 0x5a3   : > { %1987 = vrot.lane.b32.xlu1 %v1958_v59, %s4188_s9  ;;  %4005 = vpow2.f32 %v3482_v12 }
 0x5a4   : > { %v2117_v5 = vpop.f32.mrb[56].mxu1 }
 0x5a5   : > { %v2118_v6 = vadd.f32 %v4545_v19, %v2117_v5  ;;  %v3794_v7 = vpop.f32.mrb[57].mxu1 }
 0x5a6   : > { %v2120_v54 = vpop.f32.mrb[58].mxu1 }
 0x5a7   : > { %2135 = vrot.lane.b32.xlu0 %v2118_v6, %s4187_s29  ;;  %v3795_v42 = vpop.f32.mrb[59].mxu1  ;;  %2147 = vrot.lane.b32.xlu1 %v2118_v6, %s4188_s9  ;;  %v2125_v15 = vadd.f32 %v2124_v14, %v2118_v6 }
 0x5a9   : > { %v3485_v19 = vmul.f32 -1.442695, %v2125_v15 }
 0x5ab   : > { %2067 = vrot.lane.b32.xlu0 %v2038_v0, %s4188_s9  ;;  %4007 = vpow2.f32 %v3485_v19 }
 0x5ac   : > { %v4004_v47 = vpop.eup %4003 }
 0x5ad   : > { %v4006_v18 = vpop.eup %4005  ;;  %v1969_v20 = vadd.f32 1.0, %v4004_v47 }
 0x5ae   : > { %v2049_v21 = vadd.f32 1.0, %v4006_v18 }
 0x5af   : > { %4009 = vrcp.f32 %v1969_v20 }
 0x5b0   : > { %4011 = vrcp.f32 %v2049_v21 }
 0x5b5   : > { %v4008_v34 = vpop.eup %4007 }
 0x5b6   : > { %v2129_v36 = vadd.f32 1.0, %v4008_v34 }
 0x5b9   : > { %v4010_v23 = vpop.eup %4009 }
 0x5ba   : > { %v4012_v41 = vpop.eup %4011 }
 0x60e   : > { %v1976_v28 = vpop.permute.xlu0 %1975 }
 0x60f   : > { %v1978_v30 = vadd.f32 %v1976_v28, %v1973_v24 }
 0x611   : > { %v3480_v31 = vmul.f32 -1.442695, %v1978_v30  ;;  %v2056_v33 = vpop.permute.xlu1 %2055 }
 0x612   : > { %v2058_v26 = vadd.f32 %v2056_v33, %v2053_v32 }
 0x613   : > { %4013 = vpow2.f32 %v3480_v31  ;;  %v4757_v31 = vld [vmem:[%s4999_s4] ss:$0 sm:$0xff] }
 0x614   : > { %v3483_v35 = vmul.f32 -1.442695, %v2058_v26 }
 0x615   : > { %v1988_v37 = vpop.permute.xlu1 %1987 }
 0x616   : > { %4015 = vpow2.f32 %v3483_v35  ;;  %v1990_v40 = vmul.f32 %v4010_v23, %v1988_v37 }
 0x617   : > { %4017 = vrcp.f32 %v2129_v36  ;;  %v4764_v36 = vld [vmem:[%s4999_s4 + $0x1] ss:$0 sm:$0xff] }
 0x618   : > { %v1991_v48 = vadd.f32 %v1990_v40, %v1986_v46 }
 0x619   : > { %v2136_v39 = vpop.permute.xlu0 %2135  ;;  %v2148_v25 = vpop.permute.xlu1 %2147 }
 0x61a   : > { %v2138_v27 = vadd.f32 %v2136_v39, %v2133_v38 }
 0x61c   : > { %v3486_v43 = vmul.f32 -1.442695, %v2138_v27  ;;  %v4772_v27 = vld [vmem:[%s4999_s4 + $0x2] ss:$0 sm:$0xff] }
 0x61d   : > { %v4014_v44 = vpop.eup %4013  ;;  %v2068_v45 = vpop.permute.xlu0 %2067 }
 0x61e   : > { %v1982_v29 = vadd.f32 1.0, %v4014_v44  ;;  %4019 = vpow2.f32 %v3486_v43  ;;  %v2070_v22 = vmul.f32 %v4012_v41, %v2068_v45  ;;  %v2211_v45 = vld [vmem:[#allocation2 + $0x20] sm:$0xff] }
 0x620   : > { %4021 = vrcp.f32 %v1982_v29  ;;  %v4016_v49 = vpop.eup %4015  ;;  %v2071_v56 = vadd.f32 %v2070_v22, %v2066_v50 }
 0x621   : > { %v2062_v51 = vadd.f32 1.0, %v4016_v49  ;;  %4023 = vtanh.f32 %v1991_v48  ;;  %v4018_v58 = vpop.eup %4017  ;;  %v2291_v48 = vld [vmem:[#allocation5 + $0x20] sm:$0xff] }
 0x622   : > { %v2150_v59 = vmul.f32 %v4018_v58, %v2148_v25 }
 0x623   : > { %4025 = vrcp.f32 %v2062_v51  ;;  %v2371_v51 = vld [vmem:[#allocation8 + $0x20] sm:$0xff] }
 0x624   : > { %4027 = vtanh.f32 %v2071_v56  ;;  %v2151_v62 = vadd.f32 %v2150_v59, %v2146_v61 }
 0x628   : > { %v4020_v60 = vpop.eup %4019 }
 0x629   : > { %v2142_v63 = vadd.f32 1.0, %v4020_v60 }
 0x62a   : > { %v4022_v0 = vpop.eup %4021 }
 0x62b   : > { %v1993_v1 = vsub.f32 1.0, %v4022_v0  ;;  %4029 = vrcp.f32 %v2142_v63  ;;  %v4024_v2 = vpop.eup %4023  ;;  %v1995_v3 = vmul.f32 %v4022_v0, %v4666_v16 }
 0x62c   : > { %4031 = vtanh.f32 %v2151_v62  ;;  %v2220_v62 = vld [vmem:[#allocation3 + $0x20] sm:$0xff] }
 0x62d   : > { %v1994_v5 = vmul.f32 %v4024_v2, %v1993_v1  ;;  %v4026_v6 = vpop.eup %4025  ;;  %v2300_v2 = vld [vmem:[#allocation6 + $0x20] sm:$0xff] }
 0x62e   : > { %v2073_v7 = vsub.f32 1.0, %v4026_v6  ;;  %v4028_v42 = vpop.eup %4027  ;;  %v2075_v4 = vmul.f32 %v4026_v6, %v4672_v52 }
 0x62f   : > { %v1996_v54 = vadd.f32 %v1995_v3, %v1994_v5 }
 0x630   : > { %v2074_v9 = vmul.f32 %v4028_v42, %v2073_v7 }
 0x631   : > { %1997 = vst.msk [vmem:[#allocation11] sm:$0xff] %vm332_vm0, %v1996_v54  ;;  %v2158_v8 = vpack.c.bf16 %v1996_v54, %v1996_v54 }
 0x632   : > { %v2076_v10 = vadd.f32 %v2075_v4, %v2074_v9 }
 0x633   : > { %3487 = vst.msk [vmem:[%s4557_s12 + $0x24] sm:$0xf] %vm1420_vm2, %v2158_v8  ;;  %v2380_v8 = vld [vmem:[#allocation9 + $0x20] sm:$0xff] }
 0x634   : > { %2077 = vst.msk [vmem:[#allocation12] sm:$0xff] %vm332_vm0, %v2076_v10  ;;  %v2159_v16 = vpack.c.bf16 %v2076_v10, %v2076_v10 }
 0x635   : > { %v4030_v11 = vpop.eup %4029 }
 0x636   : > { %v2153_v12 = vsub.f32 1.0, %v4030_v11  ;;  %v4032_v14 = vpop.eup %4031  ;;  %3488 = vst.msk [vmem:[%s4557_s12 + $0x28] sm:$0xf] %vm1420_vm2, %v2159_v16  ;;  %v2155_v19 = vmul.f32 %v4030_v11, %v4692_v55 }
 0x638   : > { %v2154_v15 = vmul.f32 %v4032_v14, %v2153_v12  ;;  %v4724_v52 = vld [vmem:[#allocation11] sm:$0xff] }
 0x639   : > { %v2166_v47 = vpack.c.bf16 %v4724_v52, %v4724_v52 }
 0x63a   : > { %v2156_v18 = vadd.f32 %v2155_v19, %v2154_v15  ;;  %v2233_v15 = vld [vmem:[#allocation4 + $0x20] sm:$0xff] }
 0x63b   : > { %3799 = vmatmul.mubr.msk.bf16.vlgmr.msra.gmra.mrb[60].mxu0 %vm332_vm0, %v2166_v47  ;;  %v4730_v21 = vld [vmem:[#allocation12] sm:$0xff] }
 0x63c   : > { %2157 = vst.msk [vmem:[#allocation13] sm:$0xff] %vm332_vm0, %v2156_v18  ;;  %v2160_v20 = vpack.c.bf16 %v2156_v18, %v2156_v18  ;;  %3809 = vmatpush3.bf16.msra.mxu0 %v4677_v53  ;;  %3810 = vmatprep.mubr.msk.bf16.mxu0 %vm4186_vm1, %v4185_v13  ;;  %v2246_v55 = vpack.c.bf16 %v4730_v21, %v4730_v21 }
 0x63d   : > { %3820 = vmatprep.subr.bf16.mxu0 %v4185_v13 }
 0x63e   : > { %3489 = vst.msk [vmem:[%s4557_s12 + $0x2c] sm:$0xf] %vm1420_vm2, %v2160_v20  ;;  %3805 = vmatmul.mubr.msk.bf16.vlgmr.msra.gmra.mrb[60].mxu1 %vm332_vm0, %v2246_v55 }
 0x63f   : > { %3815 = vmatpush3.bf16.msra.mxu1 %v4633_v17  ;;  %3816 = vmatprep.mubr.msk.bf16.mxu1 %vm4186_vm1, %v4185_v13 }
 0x640   : > { %3826 = vmatprep.subr.bf16.mxu1 %v4185_v13 }
 0x643   : > { %v4745_v24 = vld [vmem:[#allocation13] sm:$0xff] }
 0x644   : > { %v2326_v28 = vpack.c.bf16 %v4745_v24, %v4745_v24 }
 0x646   : > { %3811 = vmatmul.mubr.msk.bf16.vlgmr.msra.gmra.mrb[64].mxu0 %vm332_vm0, %v2326_v28  ;;  %v2313_v28 = vld [vmem:[#allocation7 + $0x20] sm:$0xff] }
 0x647   : > { %3821 = vmatpush3.bf16.msra.mxu0 %v4700_v57  ;;  %3822 = vmatprep.mubr.msk.bf16.mxu0 %vm4186_vm1, %v4185_v13 }
 0x648   : > { %3832 = vmatprep.subr.bf16.mxu0 %v4185_v13 }
 0x70e   : > { %v2204_v30 = vpop.f32.mrb[60].mxu0 }
 0x70f   : > { %v2205_v32 = vadd.f32 %v4757_v31, %v2204_v30  ;;  %v3800_v33 = vpop.f32.mrb[61].mxu0 }
 0x710   : > { %v2207_v34 = vpop.f32.mrb[62].mxu0 }
 0x711   : > { %v3801_v26 = vpop.f32.mrb[63].mxu0  ;;  %2222 = vrot.lane.b32.xlu0 %v2205_v32, %s4187_s29  ;;  %v2284_v35 = vpop.f32.mrb[60].mxu1  ;;  %v2212_v29 = vadd.f32 %v2211_v45, %v2205_v32 }
 0x712   : > { %v2285_v37 = vadd.f32 %v4764_v36, %v2284_v35  ;;  %v3806_v23 = vpop.f32.mrb[61].mxu1 }
 0x713   : > { %v2287_v38 = vpop.f32.mrb[62].mxu1  ;;  %v3491_v49 = vmul.f32 -1.442695, %v2212_v29 }
 0x714   : > { %2302 = vrot.lane.b32.xlu1 %v2285_v37, %s4187_s29  ;;  %v3807_v39 = vpop.f32.mrb[63].mxu1  ;;  %v2292_v22 = vadd.f32 %v2291_v48, %v2285_v37 }
 0x715   : > { %4033 = vpow2.f32 %v3491_v49 }
 0x716   : > { %v3494_v50 = vmul.f32 -1.442695, %v2292_v22 }
 0x718   : > { %2234 = vrot.lane.b32.xlu1 %v2205_v32, %s4188_s9  ;;  %4035 = vpow2.f32 %v3494_v50 }
 0x719   : > { %v2364_v40 = vpop.f32.mrb[64].mxu0 }
 0x71a   : > { %v2365_v41 = vadd.f32 %v4772_v27, %v2364_v40  ;;  %v3812_v43 = vpop.f32.mrb[65].mxu0 }
 0x71b   : > { %v2367_v44 = vpop.f32.mrb[66].mxu0 }
 0x71c   : > { %2382 = vrot.lane.b32.xlu0 %v2365_v41, %s4187_s29  ;;  %v3813_v46 = vpop.f32.mrb[67].mxu0  ;;  %2394 = vrot.lane.b32.xlu1 %v2365_v41, %s4188_s9  ;;  %v2372_v25 = vadd.f32 %v2371_v51, %v2365_v41 }
 0x71e   : > { %v3497_v56 = vmul.f32 -1.442695, %v2372_v25 }
 0x71f   : > { %v4034_v58 = vpop.eup %4033 }
 0x720   : > { %2314 = vrot.lane.b32.xlu0 %v2285_v37, %s4188_s9  ;;  %4037 = vpow2.f32 %v3497_v56  ;;  %v2216_v60 = vadd.f32 1.0, %v4034_v58  ;;  %v2393_v37 = vld [vmem:[#allocation10 + $0x20] sm:$0xff] }
 0x722   : > { %v4036_v59 = vpop.eup %4035  ;;  %4039 = vrcp.f32 %v2216_v60 }
 0x723   : > { %v2296_v61 = vadd.f32 1.0, %v4036_v59 }
 0x725   : > { %4041 = vrcp.f32 %v2296_v61 }
 0x72a   : > { %v4038_v5 = vpop.eup %4037 }
 0x72b   : > { %v2376_v54 = vadd.f32 1.0, %v4038_v5 }
 0x72c   : > { %v4040_v4 = vpop.eup %4039 }
 0x72f   : > { %v4042_v16 = vpop.eup %4041 }
 0x783   : > { %v2223_v63 = vpop.permute.xlu0 %2222 }
 0x784   : > { %v2225_v0 = vadd.f32 %v2223_v63, %v2220_v62 }
 0x786   : > { %v3492_v1 = vmul.f32 -1.442695, %v2225_v0  ;;  %v2303_v3 = vpop.permute.xlu1 %2302 }
 0x787   : > { %v2305_v6 = vadd.f32 %v2303_v3, %v2300_v2 }
 0x788   : > { %4043 = vpow2.f32 %v3492_v1 }
 0x789   : > { %v3495_v7 = vmul.f32 -1.442695, %v2305_v6 }
 0x78a   : > { %v2235_v42 = vpop.permute.xlu1 %2234 }
 0x78b   : > { %4045 = vpow2.f32 %v3495_v7  ;;  %v2237_v10 = vmul.f32 %v4040_v4, %v2235_v42 }
 0x78c   : > { %4047 = vrcp.f32 %v2376_v54 }
 0x78d   : > { %v2238_v18 = vadd.f32 %v2237_v10, %v2233_v15  ;;  %v2458_v15 = vld [vmem:[#allocation2 + $0x28] sm:$0xff] }
 0x78e   : > { %v2383_v9 = vpop.permute.xlu0 %2382  ;;  %v2395_v32 = vpop.permute.xlu1 %2394 }
 0x78f   : > { %v2385_v11 = vadd.f32 %v2383_v9, %v2380_v8 }
 0x791   : > { %v3498_v12 = vmul.f32 -1.442695, %v2385_v11 }
 0x792   : > { %v4044_v14 = vpop.eup %4043  ;;  %v2315_v19 = vpop.permute.xlu0 %2314 }
 0x793   : > { %v2229_v47 = vadd.f32 1.0, %v4044_v14  ;;  %4049 = vpow2.f32 %v3498_v12  ;;  %v2317_v20 = vmul.f32 %v4042_v16, %v2315_v19 }
 0x795   : > { %4051 = vrcp.f32 %v2229_v47  ;;  %v4046_v55 = vpop.eup %4045  ;;  %v2318_v33 = vadd.f32 %v2317_v20, %v2313_v28  ;;  %v2538_v47 = vld [vmem:[#allocation5 + $0x28] sm:$0xff] }
 0x796   : > { %v2309_v30 = vadd.f32 1.0, %v4046_v55  ;;  %4053 = vtanh.f32 %v2238_v18  ;;  %v4048_v34 = vpop.eup %4047  ;;  %v2618_v28 = vld [vmem:[#allocation8 + $0x28] sm:$0xff] }
 0x797   : > { %v2397_v26 = vmul.f32 %v4048_v34, %v2395_v32 }
 0x798   : > { %4055 = vrcp.f32 %v2309_v30 }
 0x799   : > { %4057 = vtanh.f32 %v2318_v33  ;;  %v2398_v38 = vadd.f32 %v2397_v26, %v2393_v37  ;;  %v2467_v37 = vld [vmem:[#allocation3 + $0x28] sm:$0xff] }
 0x79d   : > { %v4050_v35 = vpop.eup %4049 }
 0x79e   : > { %v2389_v23 = vadd.f32 1.0, %v4050_v35 }
 0x79f   : > { %v4052_v39 = vpop.eup %4051 }
 0x7a0   : > { %v2240_v40 = vsub.f32 1.0, %v4052_v39  ;;  %4059 = vrcp.f32 %v2389_v23  ;;  %v4054_v41 = vpop.eup %4053  ;;  %v2242_v43 = vmul.f32 %v4052_v39, %v4724_v52 }
 0x7a1   : > { %4061 = vtanh.f32 %v2398_v38 }
 0x7a2   : > { %v2241_v44 = vmul.f32 %v4054_v41, %v2240_v40  ;;  %v4056_v46 = vpop.eup %4055  ;;  %v2547_v40 = vld [vmem:[#allocation6 + $0x28] sm:$0xff] }
 0x7a3   : > { %v2320_v45 = vsub.f32 1.0, %v4056_v46  ;;  %v4058_v48 = vpop.eup %4057  ;;  %v2322_v22 = vmul.f32 %v4056_v46, %v4730_v21 }
 0x7a4   : > { %v2243_v29 = vadd.f32 %v2242_v43, %v2241_v44 }
 0x7a5   : > { %v2321_v50 = vmul.f32 %v4058_v48, %v2320_v45 }
 0x7a6   : > { %2244 = vst.msk [vmem:[#allocation11] sm:$0xff] %vm332_vm0, %v2243_v29  ;;  %v2405_v49 = vpack.c.bf16 %v2243_v29, %v2243_v29 }
 0x7a7   : > { %v2323_v51 = vadd.f32 %v2322_v22, %v2321_v50  ;;  %v2627_v22 = vld [vmem:[#allocation9 + $0x28] sm:$0xff] }
 0x7a8   : > { %3499 = vst.msk [vmem:[%s4557_s12 + $0x30] sm:$0xf] %vm1420_vm2, %v2405_v49 }
 0x7a9   : > { %2324 = vst.msk [vmem:[#allocation12] sm:$0xff] %vm332_vm0, %v2323_v51  ;;  %v2406_v52 = vpack.c.bf16 %v2323_v51, %v2323_v51 }
 0x7aa   : > { %v4060_v25 = vpop.eup %4059 }
 0x7ab   : > { %v2400_v56 = vsub.f32 1.0, %v4060_v25  ;;  %v4062_v58 = vpop.eup %4061  ;;  %3500 = vst.msk [vmem:[%s4557_s12 + $0x34] sm:$0xf] %vm1420_vm2, %v2406_v52  ;;  %v2402_v59 = vmul.f32 %v4060_v25, %v4745_v24 }
 0x7ad   : > { %v2401_v60 = vmul.f32 %v4062_v58, %v2400_v56  ;;  %v4787_v21 = vld [vmem:[#allocation11] sm:$0xff]  ;;  %v2480_v58 = vld [vmem:[#allocation4 + $0x28] sm:$0xff] }
 0x7ae   : > { %v2413_v61 = vpack.c.bf16 %v4787_v21, %v4787_v21 }
 0x7af   : > { %v2403_v62 = vadd.f32 %v2402_v59, %v2401_v60 }
 0x7b0   : > { %3817 = vmatmul.mubr.msk.bf16.vlgmr.msra.gmra.mrb[64].mxu1 %vm332_vm0, %v2413_v61  ;;  %v4793_v0 = vld [vmem:[#allocation12] sm:$0xff] }
 0x7b1   : > { %2404 = vst.msk [vmem:[#allocation13] sm:$0xff] %vm332_vm0, %v2403_v62  ;;  %v2407_v63 = vpack.c.bf16 %v2403_v62, %v2403_v62  ;;  %3827 = vmatpush3.bf16.msra.mxu1 %v4677_v53  ;;  %3828 = vmatprep.mubr.msk.bf16.mxu1 %vm4186_vm1, %v4185_v13  ;;  %v2493_v24 = vpack.c.bf16 %v4793_v0, %v4793_v0 }
 0x7b2   : > { %3838 = vmatprep.subr.bf16.mxu1 %v4185_v13 }
 0x7b3   : > { %3501 = vst.msk [vmem:[%s4557_s12 + $0x38] sm:$0xf] %vm1420_vm2, %v2407_v63  ;;  %3823 = vmatmul.mubr.msk.bf16.vlgmr.msra.gmra.mrb[68].mxu0 %vm332_vm0, %v2493_v24  ;;  %v2560_v24 = vld [vmem:[#allocation7 + $0x28] sm:$0xff] }
 0x7b4   : > { %3833 = vmatpush3.bf16.msra.mxu0 %v4633_v17  ;;  %3834 = vmatprep.mubr.msk.bf16.mxu0 %vm4186_vm1, %v4185_v13 }
 0x7b5   : > { %3844 = vmatprep.subr.bf16.mxu0 %v4185_v13 }
 0x7b8   : > { %v4808_v1 = vld [vmem:[#allocation13] sm:$0xff] }
 0x7b9   : > { %v2573_v2 = vpack.c.bf16 %v4808_v1, %v4808_v1 }
 0x7bb   : > { %3829 = vmatmul.mubr.msk.bf16.vlgmr.msra.gmra.mrb[68].mxu1 %vm332_vm0, %v2573_v2 }
 0x7bc   : > { %3839 = vmatpush3.bf16.msra.mxu1 %v4700_v57  ;;  %3840 = vmatprep.mubr.msk.bf16.mxu1 %vm4186_vm1, %v4185_v13 }
 0x7bd   : > { %3850 = vmatprep.subr.bf16.mxu1 %v4185_v13 }
 0x883   : > { %v2451_v17 = vpop.f32.mrb[64].mxu1 }
 0x884   : > { %v2452_v3 = vadd.f32 %v4757_v31, %v2451_v17  ;;  %v3818_v5 = vpop.f32.mrb[65].mxu1 }
 0x885   : > { %v2454_v6 = vpop.f32.mrb[66].mxu1 }
 0x886   : > { %2469 = vrot.lane.b32.xlu0 %v2452_v3, %s4187_s29  ;;  %v3819_v7 = vpop.f32.mrb[67].mxu1  ;;  %v2531_v54 = vpop.f32.mrb[68].mxu0  ;;  %v2459_v19 = vadd.f32 %v2458_v15, %v2452_v3 }
 0x887   : > { %v2532_v42 = vadd.f32 %v4764_v36, %v2531_v54  ;;  %v3824_v4 = vpop.f32.mrb[69].mxu0  ;;  %v2640_v54 = vld [vmem:[#allocation10 + $0x28] sm:$0xff] }
 0x888   : > { %v2534_v8 = vpop.f32.mrb[70].mxu0  ;;  %v3503_v20 = vmul.f32 -1.442695, %v2459_v19 }
 0x889   : > { %2549 = vrot.lane.b32.xlu1 %v2532_v42, %s4187_s29  ;;  %v3825_v9 = vpop.f32.mrb[71].mxu0  ;;  %v2539_v18 = vadd.f32 %v2538_v47, %v2532_v42 }
 0x88a   : > { %4063 = vpow2.f32 %v3503_v20 }
 0x88b   : > { %v3506_v55 = vmul.f32 -1.442695, %v2539_v18 }
 0x88d   : > { %2481 = vrot.lane.b32.xlu1 %v2452_v3, %s4188_s9  ;;  %4065 = vpow2.f32 %v3506_v55 }
 0x88e   : > { %v2611_v10 = vpop.f32.mrb[68].mxu1 }
 0x88f   : > { %v2612_v11 = vadd.f32 %v4772_v27, %v2611_v10  ;;  %v3830_v16 = vpop.f32.mrb[69].mxu1 }
 0x890   : > { %v2614_v12 = vpop.f32.mrb[70].mxu1 }
 0x891   : > { %2629 = vrot.lane.b32.xlu0 %v2612_v11, %s4187_s29  ;;  %v3831_v14 = vpop.f32.mrb[71].mxu1  ;;  %2641 = vrot.lane.b32.xlu1 %v2612_v11, %s4188_s9  ;;  %v2619_v30 = vadd.f32 %v2618_v28, %v2612_v11 }
 0x893   : > { %v3509_v32 = vmul.f32 -1.442695, %v2619_v30 }
 0x894   : > { %v4064_v33 = vpop.eup %4063 }
 0x895   : > { %2561 = vrot.lane.b32.xlu0 %v2532_v42, %s4188_s9  ;;  %4067 = vpow2.f32 %v3509_v32  ;;  %v2463_v26 = vadd.f32 1.0, %v4064_v33 }
 0x897   : > { %v4066_v34 = vpop.eup %4065  ;;  %4069 = vrcp.f32 %v2463_v26 }
 0x898   : > { %v2543_v35 = vadd.f32 1.0, %v4066_v34 }
 0x89a   : > { %4071 = vrcp.f32 %v2543_v35 }
 0x89f   : > { %v4068_v43 = vpop.eup %4067 }
 0x8a0   : > { %v2623_v45 = vadd.f32 1.0, %v4068_v43 }
 0x8a1   : > { %v4070_v48 = vpop.eup %4069 }
 0x8a4   : > { %v4072_v25 = vpop.eup %4071 }
 0x8f8   : > { %v2470_v23 = vpop.permute.xlu0 %2469 }
 0x8f9   : > { %v2472_v38 = vadd.f32 %v2470_v23, %v2467_v37 }
 0x8fb   : > { %v3504_v39 = vmul.f32 -1.442695, %v2472_v38  ;;  %v2550_v41 = vpop.permute.xlu1 %2549  ;;  %v4159_v38 = vld [vmem:[%s4998_s3] sm:$0xff]  }
 0x8fc   : > { %v2552_v44 = vadd.f32 %v2550_v41, %v2547_v40 }
 0x8fd   : > { %4073 = vpow2.f32 %v3504_v39 }
 0x8fe   : > { %v3507_v46 = vmul.f32 -1.442695, %v2552_v44 }
 0x8ff   : > { %v2482_v29 = vpop.permute.xlu1 %2481 }
 0x900   : > { %4075 = vpow2.f32 %v3507_v46  ;;  %v2484_v50 = vmul.f32 %v4070_v48, %v2482_v29 }
 0x901   : > { %4077 = vrcp.f32 %v2623_v45 }
 0x902   : > { %v2485_v61 = vadd.f32 %v2484_v50, %v2480_v58 }
 0x903   : > { %v2630_v49 = vpop.permute.xlu0 %2629  ;;  %v2642_v17 = vpop.permute.xlu1 %2641 }
 0x904   : > { %v2632_v51 = vadd.f32 %v2630_v49, %v2627_v22 }
 0x906   : > { %v3510_v52 = vmul.f32 -1.442695, %v2632_v51 }
 0x907   : > { %v4074_v56 = vpop.eup %4073  ;;  %v2562_v59 = vpop.permute.xlu0 %2561 }
 0x908   : > { %v2476_v60 = vadd.f32 1.0, %v4074_v56  ;;  %4079 = vpow2.f32 %v3510_v52  ;;  %v2564_v62 = vmul.f32 %v4072_v25, %v2562_v59  ;;  %v2705_v56 = vld [vmem:[#allocation2 + $0x30] sm:$0xff] }
 0x909   : > { %v2785_v59 = vld [vmem:[#allocation5 + $0x30] sm:$0xff] }
 0x90a   : > { %4081 = vrcp.f32 %v2476_v60  ;;  %v4076_v63 = vpop.eup %4075  ;;  %v2565_v3 = vadd.f32 %v2564_v62, %v2560_v24 }
 0x90b   : > { %v2556_v2 = vadd.f32 1.0, %v4076_v63  ;;  %4083 = vtanh.f32 %v2485_v61  ;;  %v4078_v5 = vpop.eup %4077  ;;  %v2865_v63 = vld [vmem:[#allocation8 + $0x30] sm:$0xff] }
 0x90c   : > { %v2644_v6 = vmul.f32 %v4078_v5, %v2642_v17 }
 0x90d   : > { %4085 = vrcp.f32 %v2556_v2 }
 0x90e   : > { %4087 = vtanh.f32 %v2565_v3  ;;  %v2645_v42 = vadd.f32 %v2644_v6, %v2640_v54 }
 0x912   : > { %v4080_v7 = vpop.eup %4079 }
 0x913   : > { %v2636_v4 = vadd.f32 1.0, %v4080_v7  ;;  %v2714_v7 = vld [vmem:[#allocation3 + $0x30] sm:$0xff] }
 0x914   : > { %v4082_v8 = vpop.eup %4081 }
 0x915   : > { %v2487_v9 = vsub.f32 1.0, %v4082_v8  ;;  %4089 = vrcp.f32 %v2636_v4  ;;  %v4084_v10 = vpop.eup %4083  ;;  %v2489_v11 = vmul.f32 %v4082_v8, %v4787_v21  ;;  %v2794_v8 = vld [vmem:[#allocation6 + $0x30] sm:$0xff] }
 0x916   : > { %4091 = vtanh.f32 %v2645_v42 }
 0x917   : > { %v2488_v16 = vmul.f32 %v4084_v10, %v2487_v9  ;;  %v4086_v12 = vpop.eup %4085 }
 0x918   : > { %v2567_v14 = vsub.f32 1.0, %v4086_v12  ;;  %v4088_v19 = vpop.eup %4087  ;;  %v2569_v47 = vmul.f32 %v4086_v12, %v4793_v0 }
 0x919   : > { %v2490_v15 = vadd.f32 %v2489_v11, %v2488_v16 }
 0x91a   : > { %v2568_v20 = vmul.f32 %v4088_v19, %v2567_v14  ;;  %v2874_v19 = vld [vmem:[#allocation9 + $0x30] sm:$0xff] }
 0x91b   : > { %2491 = vst.msk [vmem:[#allocation11] sm:$0xff] %vm332_vm0, %v2490_v15  ;;  %v2652_v18 = vpack.c.bf16 %v2490_v15, %v2490_v15 }
 0x91c   : > { %v2570_v55 = vadd.f32 %v2569_v47, %v2568_v20 }
 0x91d   : > { %3511 = vst.msk [vmem:[%s4557_s12 + $0x3c] sm:$0xf] %vm1420_vm2, %v2652_v18 }
 0x91e   : > { %2571 = vst.msk [vmem:[#allocation12] sm:$0xff] %vm332_vm0, %v2570_v55  ;;  %v2653_v21 = vpack.c.bf16 %v2570_v55, %v2570_v55 }
 0x91f   : > { %v4090_v28 = vpop.eup %4089 }
 0x920   : > { %v2647_v30 = vsub.f32 1.0, %v4090_v28  ;;  %v4092_v32 = vpop.eup %4091  ;;  %3512 = vst.msk [vmem:[%s4557_s12 + $0x40] sm:$0xf] %vm1420_vm2, %v2653_v21  ;;  %v2649_v34 = vmul.f32 %v4090_v28, %v4808_v1 }
 0x922   : > { %v2648_v33 = vmul.f32 %v4092_v32, %v2647_v30  ;;  %v4835_v0 = vld [vmem:[#allocation11] sm:$0xff]  ;;  %v2727_v30 = vld [vmem:[#allocation4 + $0x30] sm:$0xff] }
 0x923   : > { %v2660_v26 = vpack.c.bf16 %v4835_v0, %v4835_v0 }
 0x924   : > { %v2650_v35 = vadd.f32 %v2649_v34, %v2648_v33 }
 0x925   : > { %3835 = vmatmul.mubr.msk.bf16.vlgmr.msra.gmra.mrb[72].mxu0 %vm332_vm0, %v2660_v26  ;;  %v4841_v23 = vld [vmem:[#allocation12] sm:$0xff] }
 0x926   : > { %2651 = vst.msk [vmem:[#allocation13] sm:$0xff] %vm332_vm0, %v2650_v35  ;;  %v2654_v37 = vpack.c.bf16 %v2650_v35, %v2650_v35  ;;  %3845 = vmatpush3.bf16.msra.mxu0 %v4677_v53  ;;  %3846 = vmatprep.mubr.msk.bf16.mxu0 %vm4186_vm1, %v4185_v13  ;;  %v2740_v1 = vpack.c.bf16 %v4841_v23, %v4841_v23 }
 0x927   : > { %3856 = vmatprep.subr.bf16.mxu0 %v4185_v13 }
 0x928   : > { %3513 = vst.msk [vmem:[%s4557_s12 + $0x44] sm:$0xf] %vm1420_vm2, %v2654_v37  ;;  %3841 = vmatmul.mubr.msk.bf16.vlgmr.msra.gmra.mrb[72].mxu1 %vm332_vm0, %v2740_v1  ;;  %v2807_v37 = vld [vmem:[#allocation7 + $0x30] sm:$0xff] }
 0x929   : > { %3851 = vmatpush3.bf16.msra.mxu1 %v4159_v38  ;;  %3852 = vmatprep.mubr.msk.bf16.mxu1 %vm4186_vm1, %v4185_v13 }
 0x92a   : > { %3862 = vmatprep.subr.bf16.mxu1 %v4185_v13 }
 0x92d   : > { %v4858_v53 = vld [vmem:[#allocation13] sm:$0xff] }
 0x92e   : > { %v2820_v39 = vpack.c.bf16 %v4858_v53, %v4858_v53 }
 0x930   : > { %3847 = vmatmul.mubr.msk.bf16.vlgmr.msra.gmra.mrb[76].mxu0 %vm332_vm0, %v2820_v39 }
 0x931   : > { %3857 = vmatpush3.bf16.msra.mxu0 %v4700_v57  ;;  %3858 = vmatprep.mubr.msk.bf16.mxu0 %vm4186_vm1, %v4185_v13 }
 0x9f8   : > { %v2698_v40 = vpop.f32.mrb[72].mxu0 }
 0x9f9   : > { %v2699_v41 = vadd.f32 %v4757_v31, %v2698_v40  ;;  %v3836_v43 = vpop.f32.mrb[73].mxu0 }
 0x9fa   : > { %v2701_v44 = vpop.f32.mrb[74].mxu0 }
 0x9fb   : > { %v3837_v46 = vpop.f32.mrb[75].mxu0  ;;  %2716 = vrot.lane.b32.xlu0 %v2699_v41, %s4187_s29  ;;  %v2778_v45 = vpop.f32.mrb[72].mxu1  ;;  %v2706_v58 = vadd.f32 %v2705_v56, %v2699_v41  ;;  %v2887_v44 = vld [vmem:[#allocation10 + $0x30] sm:$0xff] }
 0x9fc   : > { %v2779_v29 = vadd.f32 %v4764_v36, %v2778_v45  ;;  %v3842_v48 = vpop.f32.mrb[73].mxu1 }
 0x9fd   : > { %v2781_v22 = vpop.f32.mrb[74].mxu1  ;;  %v3515_v61 = vmul.f32 -1.442695, %v2706_v58 }
 0x9fe   : > { %2796 = vrot.lane.b32.xlu1 %v2779_v29, %s4187_s29  ;;  %v3843_v49 = vpop.f32.mrb[75].mxu1  ;;  %v2786_v60 = vadd.f32 %v2785_v59, %v2779_v29 }
 0x9ff   : > { %4093 = vpow2.f32 %v3515_v61 }
 0xa00   : > { %v3518_v62 = vmul.f32 -1.442695, %v2786_v60 }
 0xa02   : > { %2728 = vrot.lane.b32.xlu1 %v2699_v41, %s4188_s9  ;;  %4095 = vpow2.f32 %v3518_v62 }
 0xa03   : > { %v2858_v57 = vpop.f32.mrb[76].mxu0 }
 0xa04   : > { %v2859_v50 = vadd.f32 %v4772_v27, %v2858_v57  ;;  %v3848_v51 = vpop.f32.mrb[77].mxu0 }
 0xa05   : > { %v2861_v25 = vpop.f32.mrb[78].mxu0 }
 0xa06   : > { %2876 = vrot.lane.b32.xlu0 %v2859_v50, %s4187_s29  ;;  %v3849_v52 = vpop.f32.mrb[79].mxu0  ;;  %2888 = vrot.lane.b32.xlu1 %v2859_v50, %s4188_s9  ;;  %v2866_v24 = vadd.f32 %v2865_v63, %v2859_v50 }
 0xa08   : > { %v3521_v2 = vmul.f32 -1.442695, %v2866_v24 }
 0xa09   : > { %v4094_v17 = vpop.eup %4093 }
 0xa0a   : > { %2808 = vrot.lane.b32.xlu0 %v2779_v29, %s4188_s9  ;;  %4097 = vpow2.f32 %v3521_v2  ;;  %v2710_v5 = vadd.f32 1.0, %v4094_v17 }
 0xa0c   : > { %v4096_v3 = vpop.eup %4095  ;;  %4099 = vrcp.f32 %v2710_v5 }
 0xa0d   : > { %v2790_v6 = vadd.f32 1.0, %v4096_v3 }
 0xa0f   : > { %4101 = vrcp.f32 %v2790_v6 }
 0xa14   : > { %v4098_v10 = vpop.eup %4097 }
 0xa15   : > { %v2870_v12 = vadd.f32 1.0, %v4098_v10 }
 0xa16   : > { %v4100_v15 = vpop.eup %4099 }
 0xa19   : > { %v4102_v55 = vpop.eup %4101 }
 0xa6d   : > { %v2717_v54 = vpop.permute.xlu0 %2716 }
 0xa6e   : > { %v2719_v42 = vadd.f32 %v2717_v54, %v2714_v7  ;;  %v4160_v7 = vld [vmem:[%s4998_s3 + $0x10] sm:$0xff]  }
 0xa70   : > { %v3516_v4 = vmul.f32 -1.442695, %v2719_v42  ;;  %v2797_v9 = vpop.permute.xlu1 %2796 }
 0xa71   : > { %v2799_v11 = vadd.f32 %v2797_v9, %v2794_v8 }
 0xa72   : > { %4103 = vpow2.f32 %v3516_v4 }
 0xa73   : > { %v3519_v16 = vmul.f32 -1.442695, %v2799_v11 }
 0xa74   : > { %v2729_v14 = vpop.permute.xlu1 %2728 }
 0xa75   : > { %4105 = vpow2.f32 %v3519_v16  ;;  %v2731_v18 = vmul.f32 %v4100_v15, %v2729_v14 }
 0xa76   : > { %4107 = vrcp.f32 %v2870_v12 }
 0xa77   : > { %v2732_v34 = vadd.f32 %v2731_v18, %v2727_v30 }
 0xa78   : > { %v2877_v47 = vpop.permute.xlu0 %2876  ;;  %v2889_v38 = vpop.permute.xlu1 %2888 }
 0xa79   : > { %v2879_v20 = vadd.f32 %v2877_v47, %v2874_v19 }
 0xa7b   : > { %v3522_v28 = vmul.f32 -1.442695, %v2879_v20 }
 0xa7c   : > { %v4104_v21 = vpop.eup %4103  ;;  %v2809_v32 = vpop.permute.xlu0 %2808 }
 0xa7d   : > { %v2723_v33 = vadd.f32 1.0, %v4104_v21  ;;  %4109 = vpow2.f32 %v3522_v28  ;;  %v2811_v26 = vmul.f32 %v4102_v55, %v2809_v32  ;;  %v3032_v28 = vld [vmem:[#allocation5 + $0x38] sm:$0xff] }
 0xa7f   : > { %4111 = vrcp.f32 %v2723_v33  ;;  %v4106_v35 = vpop.eup %4105  ;;  %v2812_v39 = vadd.f32 %v2811_v26, %v2807_v37  ;;  %v3112_v33 = vld [vmem:[#allocation8 + $0x38] sm:$0xff] }
 0xa80   : > { %v2803_v1 = vadd.f32 1.0, %v4106_v35  ;;  %4113 = vtanh.f32 %v2732_v34  ;;  %v4108_v40 = vpop.eup %4107 }
 0xa81   : > { %v2891_v41 = vmul.f32 %v4108_v40, %v2889_v38  ;;  %v2961_v38 = vld [vmem:[#allocation3 + $0x38] sm:$0xff] }
 0xa82   : > { %4115 = vrcp.f32 %v2803_v1 }
 0xa83   : > { %4117 = vtanh.f32 %v2812_v39  ;;  %v2892_v45 = vadd.f32 %v2891_v41, %v2887_v44 }
 0xa87   : > { %v4110_v43 = vpop.eup %4109 }
 0xa88   : > { %v2883_v46 = vadd.f32 1.0, %v4110_v43  ;;  %v3041_v43 = vld [vmem:[#allocation6 + $0x38] sm:$0xff] }
 0xa89   : > { %v4112_v29 = vpop.eup %4111 }
 0xa8a   : > { %v2734_v48 = vsub.f32 1.0, %v4112_v29  ;;  %4119 = vrcp.f32 %v2883_v46  ;;  %v4114_v22 = vpop.eup %4113  ;;  %v2736_v49 = vmul.f32 %v4112_v29, %v4835_v0 }
 0xa8b   : > { %4121 = vtanh.f32 %v2892_v45 }
 0xa8c   : > { %v2735_v57 = vmul.f32 %v4114_v22, %v2734_v48  ;;  %v4116_v50 = vpop.eup %4115 }
 0xa8d   : > { %v2814_v51 = vsub.f32 1.0, %v4116_v50  ;;  %v4118_v52 = vpop.eup %4117  ;;  %v2816_v56 = vmul.f32 %v4116_v50, %v4841_v23 }
 0xa8e   : > { %v2737_v25 = vadd.f32 %v2736_v49, %v2735_v57  ;;  %v3121_v57 = vld [vmem:[#allocation9 + $0x38] sm:$0xff] }
 0xa8f   : > { %v2815_v59 = vmul.f32 %v4118_v52, %v2814_v51 }
 0xa90   : > { %2738 = vst.msk [vmem:[#allocation11] sm:$0xff] %vm332_vm0, %v2737_v25  ;;  %v2899_v58 = vpack.c.bf16 %v2737_v25, %v2737_v25 }
 0xa91   : > { %v2817_v60 = vadd.f32 %v2816_v56, %v2815_v59  ;;  %v2974_v59 = vld [vmem:[#allocation4 + $0x38] sm:$0xff] }
 0xa92   : > { %3523 = vst.msk [vmem:[%s4557_s12 + $0x48] sm:$0xf] %vm1420_vm2, %v2899_v58 }
 0xa93   : > { %2818 = vst.msk [vmem:[#allocation12] sm:$0xff] %vm332_vm0, %v2817_v60  ;;  %v2900_v0 = vpack.c.bf16 %v2817_v60, %v2817_v60 }
 0xa94   : > { %v4120_v61 = vpop.eup %4119 }
 0xa95   : > { %v2894_v62 = vsub.f32 1.0, %v4120_v61  ;;  %v4122_v63 = vpop.eup %4121  ;;  %3524 = vst.msk [vmem:[%s4557_s12 + $0x4c] sm:$0xf] %vm1420_vm2, %v2900_v0  ;;  %v2896_v24 = vmul.f32 %v4120_v61, %v4858_v53 }
 0xa97   : > { %v2895_v2 = vmul.f32 %v4122_v63, %v2894_v62  ;;  %v4884_v23 = vld [vmem:[#allocation11] sm:$0xff] }
 0xa98   : > { %v2907_v17 = vpack.c.bf16 %v4884_v23, %v4884_v23 }
 0xa99   : > { %v2897_v3 = vadd.f32 %v2896_v24, %v2895_v2  ;;  %v3054_v24 = vld [vmem:[#allocation7 + $0x38] sm:$0xff] }
 0xa9a   : > { %3853 = vmatmul.mubr.msk.bf16.vlgmr.msra.gmra.mrb[76].mxu1 %vm332_vm0, %v2907_v17  ;;  %v4890_v6 = vld [vmem:[#allocation12] sm:$0xff] }
 0xa9b   : > { %2898 = vst.msk [vmem:[#allocation13] sm:$0xff] %vm332_vm0, %v2897_v3  ;;  %v2901_v5 = vpack.c.bf16 %v2897_v3, %v2897_v3  ;;  %3863 = vmatpush3.bf16.msra.mxu1 %v4160_v7  ;;  %3864 = vmatprep.mubr.msk.bf16.mxu1 %vm4186_vm1, %v4185_v13  ;;  %v2987_v53 = vpack.c.bf16 %v4890_v6, %v4890_v6 }
 0xa9d   : > { %3525 = vst.msk [vmem:[%s4557_s12 + $0x50] sm:$0xf] %vm1420_vm2, %v2901_v5  ;;  %3859 = vmatmul.mubr.msk.bf16.vlgmr.msra.gmra.mrb[80].mxu0 %vm332_vm0, %v2987_v53 }
 0xaa2   : > { %v4902_v54 = vld [vmem:[#allocation13] sm:$0xff] }
 0xaa3   : > { %v3067_v42 = vpack.c.bf16 %v4902_v54, %v4902_v54 }
 0xaa5   : > { %3865 = vmatmul.mubr.msk.bf16.vlgmr.msra.gmra.mrb[80].mxu1 %vm332_vm0, %v3067_v42  ;;  %v3134_v42 = vld [vmem:[#allocation10 + $0x38] sm:$0xff] }
 0xb6d   : > { %v2945_v4 = vpop.f32.mrb[76].mxu1 }
 0xb6e   : > { %v2946_v8 = vadd.f32 %v4757_v31, %v2945_v4  ;;  %v3854_v9 = vpop.f32.mrb[77].mxu1 }
 0xb6f   : > { %v2948_v10 = vpop.f32.mrb[78].mxu1 }
 0xb70   : > { %2963 = vrot.lane.b32.xlu0 %v2946_v8, %s4187_s29  ;;  %v3855_v13 = vpop.f32.mrb[79].mxu1  ;;  %v3025_v11 = vpop.f32.mrb[80].mxu0 }
 0xb71   : > { %v3026_v16 = vadd.f32 %v4764_v36, %v3025_v11  ;;  %v3860_v12 = vpop.f32.mrb[81].mxu0  ;;  %v2952_v36 = vld [vmem:[#allocation2 + $0x38] sm:$0xff] }
 0xb72   : > { %v3028_v14 = vpop.f32.mrb[82].mxu0  ;;  %v2953_v55 = vadd.f32 %v2952_v36, %v2946_v8 }
 0xb73   : > { %3043 = vrot.lane.b32.xlu1 %v3026_v16, %s4187_s29  ;;  %v3861_v15 = vpop.f32.mrb[83].mxu0  ;;  %v3033_v21 = vadd.f32 %v3032_v28, %v3026_v16 }
 0xb74   : > { %v3527_v30 = vmul.f32 -1.442695, %v2953_v55 }
 0xb75   : > { %v3530_v32 = vmul.f32 -1.442695, %v3033_v21 }
 0xb76   : > { %4123 = vpow2.f32 %v3527_v30 }
 0xb77   : > { %2975 = vrot.lane.b32.xlu1 %v2946_v8, %s4188_s9  ;;  %4125 = vpow2.f32 %v3530_v32 }
 0xb78   : > { %v3105_v19 = vpop.f32.mrb[80].mxu1 }
 0xb79   : > { %v3106_v47 = vadd.f32 %v4772_v27, %v3105_v19  ;;  %v3866_v18 = vpop.f32.mrb[81].mxu1 }
 0xb7a   : > { %v3108_v31 = vpop.f32.mrb[82].mxu1 }
 0xb7b   : > { %3123 = vrot.lane.b32.xlu0 %v3106_v47, %s4187_s29  ;;  %v3867_v20 = vpop.f32.mrb[83].mxu1  ;;  %3135 = vrot.lane.b32.xlu1 %v3106_v47, %s4188_s9  ;;  %v3113_v34 = vadd.f32 %v3112_v33, %v3106_v47  ;;  %s3538_s29 = sshll.u32 (%p4249_p5), %s3349_s21, 2  ;;  %v3179_v33 = vld [vmem:[%s4557_s12 + $0x4] sm:$0xf] (%p4249_p5) }
 0xb7c   : > { %s4937_s11 = scalar_lea.vmem (%p4249_p5), %s5000_s5, %s3538_s29 }
 0xb7d   : > { %v3533_v27 = vmul.f32 -1.442695, %v3113_v34  ;;  %v3181_v34 = vld [vmem:[%s4557_s12 + $0x8] sm:$0xf] (%p4249_p5)  ;;  %3180 = vst [vmem:[%s4937_s11 + $0x8] sm:$0xf] (%p4249_p5), %v3179_v33 }
 0xb7e   : > { %3182 = vst [vmem:[%s4937_s11 + $0x10] sm:$0xf] (%p4249_p5), %v3181_v34 }
 0xb7f   : > { %3055 = vrot.lane.b32.xlu0 %v3026_v16, %s4188_s9  ;;  %4127 = vpow2.f32 %v3533_v27  ;;  %v3183_v27 = vld [vmem:[%s4557_s12 + $0xc] sm:$0xf] (%p4249_p5) }
 0xb80   : > { %v4124_v26 = vpop.eup %4123  ;;  %3184 = vst [vmem:[%s4937_s11 + $0x18] sm:$0xf] (%p4249_p5), %v3183_v27 }
 0xb81   : > { %v4126_v35 = vpop.eup %4125  ;;  %v2957_v37 = vadd.f32 1.0, %v4124_v26  ;;  %v3185_v26 = vld [vmem:[%s4557_s12 + $0x10] sm:$0xf] (%p4249_p5) }
 0xb82   : > { %v3037_v1 = vadd.f32 1.0, %v4126_v35  ;;  %3186 = vst [vmem:[%s4937_s11 + $0x20] sm:$0xf] (%p4249_p5), %v3185_v26  ;;  %v3187_v35 = vld [vmem:[%s4557_s12 + $0x14] sm:$0xf] (%p4249_p5) }
 0xb83   : > { %4129 = vrcp.f32 %v2957_v37  ;;  %v3189_v37 = vld [vmem:[%s4557_s12 + $0x18] sm:$0xf] (%p4249_p5)  ;;  %3188 = vst [vmem:[%s4937_s11 + $0x28] sm:$0xf] (%p4249_p5), %v3187_v35 }
 0xb84   : > { %4131 = vrcp.f32 %v3037_v1  ;;  %v3191_v1 = vld [vmem:[%s4557_s12 + $0x1c] sm:$0xf] (%p4249_p5)  ;;  %3190 = vst [vmem:[%s4937_s11 + $0x30] sm:$0xf] (%p4249_p5), %v3189_v37 }
 0xb85   : > { %3192 = vst [vmem:[%s4937_s11 + $0x38] sm:$0xf] (%p4249_p5), %v3191_v1 }
 0xb89   : > { %v4128_v46 = vpop.eup %4127 }
 0xb8a   : > { %v3117_v48 = vadd.f32 1.0, %v4128_v46  ;;  %v3205_v46 = vld [vmem:[%s4557_s12 + $0x38] sm:$0xf] (%p4249_p5) }
 0xb8b   : > { %3206 = vst [vmem:[%s4937_s11 + $0x70] sm:$0xf] (%p4249_p5), %v3205_v46 }
 0xb8d   : > { %v4130_v49 = vpop.eup %4129 }
 0xb8e   : > { %v4132_v52 = vpop.eup %4131 }
 0xbe2   : > { %v2964_v39 = vpop.permute.xlu0 %2963 }
 0xbe3   : > { %v2966_v40 = vadd.f32 %v2964_v39, %v2961_v38  ;;  %v3193_v38 = vld [vmem:[%s4557_s12 + $0x20] sm:$0xf] (%p4249_p5)  ;;  %v3195_v39 = vld [vmem:[%s4557_s12 + $0x24] sm:$0xf] (%p4249_p5) }
 0xbe4   : > { %3194 = vst [vmem:[%s4937_s11 + $0x40] sm:$0xf] (%p4249_p5), %v3193_v38  ;;  %3196 = vst [vmem:[%s4937_s11 + $0x48] sm:$0xf] (%p4249_p5), %v3195_v39 }
 0xbe5   : > { %v3528_v41 = vmul.f32 -1.442695, %v2966_v40  ;;  %v3044_v44 = vpop.permute.xlu1 %3043  ;;  %v3197_v40 = vld [vmem:[%s4557_s12 + $0x28] sm:$0xf] (%p4249_p5) }
 0xbe6   : > { %v3046_v45 = vadd.f32 %v3044_v44, %v3041_v43  ;;  %3198 = vst [vmem:[%s4937_s11 + $0x50] sm:$0xf] (%p4249_p5), %v3197_v40  ;;  %v3201_v43 = vld [vmem:[%s4557_s12 + $0x30] sm:$0xf] (%p4249_p5)  ;;  %v3203_v44 = vld [vmem:[%s4557_s12 + $0x34] sm:$0xf] (%p4249_p5) }
 0xbe7   : > { %4133 = vpow2.f32 %v3528_v41  ;;  %v3199_v41 = vld [vmem:[%s4557_s12 + $0x2c] sm:$0xf] (%p4249_p5)  ;;  %3202 = vst [vmem:[%s4937_s11 + $0x60] sm:$0xf] (%p4249_p5), %v3201_v43  ;;  %3204 = vst [vmem:[%s4937_s11 + $0x68] sm:$0xf] (%p4249_p5), %v3203_v44 }
 0xbe8   : > { %v3531_v29 = vmul.f32 -1.442695, %v3046_v45  ;;  %3200 = vst [vmem:[%s4937_s11 + $0x58] sm:$0xf] (%p4249_p5), %v3199_v41  ;;  %v3207_v45 = vld [vmem:[%s4557_s12 + $0x3c] sm:$0xf] (%p4249_p5) }
 0xbe9   : > { %v2976_v22 = vpop.permute.xlu1 %2975  ;;  %3208 = vst [vmem:[%s4937_s11 + $0x78] sm:$0xf] (%p4249_p5), %v3207_v45 }
 0xbea   : > { %4135 = vpow2.f32 %v3531_v29  ;;  %v2978_v51 = vmul.f32 %v4130_v49, %v2976_v22  ;;  %v3209_v29 = vld [vmem:[%s4557_s12 + $0x40] sm:$0xf] (%p4249_p5)  ;;  %v3213_v22 = vld [vmem:[%s4557_s12 + $0x48] sm:$0xf] (%p4249_p5)  ;;  %v3215_v49 = vld [vmem:[%s4557_s12 + $0x4c] sm:$0xf] (%p4249_p5) }
 0xbeb   : > { %4137 = vrcp.f32 %v3117_v48  ;;  %3210 = vst [vmem:[%s4937_s11 + $0x80] sm:$0xf] (%p4249_p5), %v3209_v29  ;;  %v3211_v48 = vld [vmem:[%s4557_s12 + $0x44] sm:$0xf] (%p4249_p5)  ;;  %3214 = vst [vmem:[%s4937_s11 + $0x90] sm:$0xf] (%p4249_p5), %v3213_v22 }
 0xbec   : > { %v2979_v0 = vadd.f32 %v2978_v51, %v2974_v59  ;;  %3212 = vst [vmem:[%s4937_s11 + $0x88] sm:$0xf] (%p4249_p5), %v3211_v48  ;;  %3216 = vst [vmem:[%s4937_s11 + $0x98] sm:$0xf] (%p4249_p5), %v3215_v49 }
 0xbed   : > { %v3124_v50 = vpop.permute.xlu0 %3123  ;;  %v3136_v17 = vpop.permute.xlu1 %3135 }
 0xbee   : > { %v3126_v25 = vadd.f32 %v3124_v50, %v3121_v57  ;;  %v3217_v57 = vld [vmem:[%s4557_s12 + $0x50] sm:$0xf] (%p4249_p5) }
 0xbef   : > { %3218 = vst [vmem:[%s4937_s11 + $0xa0] sm:$0xf] (%p4249_p5), %v3217_v57 }
 0xbf0   : > { %v3534_v56 = vmul.f32 -1.442695, %v3126_v25 }
 0xbf1   : > { %v4134_v58 = vpop.eup %4133  ;;  %v3056_v60 = vpop.permute.xlu0 %3055 }
 0xbf2   : > { %v2970_v61 = vadd.f32 1.0, %v4134_v58  ;;  %4139 = vpow2.f32 %v3534_v56  ;;  %v3058_v62 = vmul.f32 %v4132_v52, %v3056_v60 }
 0xbf4   : > { %4141 = vrcp.f32 %v2970_v61  ;;  %v4136_v63 = vpop.eup %4135  ;;  %v3059_v3 = vadd.f32 %v3058_v62, %v3054_v24 }
 0xbf5   : > { %v3050_v2 = vadd.f32 1.0, %v4136_v63  ;;  %4143 = vtanh.f32 %v2979_v0  ;;  %v4138_v5 = vpop.eup %4137 }
 0xbf6   : > { %v3138_v7 = vmul.f32 %v4138_v5, %v3136_v17 }
 0xbf7   : > { %4145 = vrcp.f32 %v3050_v2 }
 0xbf8   : > { %4147 = vtanh.f32 %v3059_v3  ;;  %v3139_v4 = vadd.f32 %v3138_v7, %v3134_v42 }
 0xbfc   : > { %v4140_v53 = vpop.eup %4139 }
 0xbfd   : > { %v3130_v8 = vadd.f32 1.0, %v4140_v53 }
 0xbfe   : > { %v4142_v9 = vpop.eup %4141 }
 0xbff   : > { %v2981_v10 = vsub.f32 1.0, %v4142_v9  ;;  %4149 = vrcp.f32 %v3130_v8  ;;  %v4144_v13 = vpop.eup %4143  ;;  %v2983_v11 = vmul.f32 %v4142_v9, %v4884_v23 }
 0xc00   : > { %4151 = vtanh.f32 %v3139_v4 }
 0xc01   : > { %v2982_v16 = vmul.f32 %v4144_v13, %v2981_v10  ;;  %v4146_v12 = vpop.eup %4145 }
 0xc02   : > { %v3061_v14 = vsub.f32 1.0, %v4146_v12  ;;  %v4148_v19 = vpop.eup %4147  ;;  %v3063_v47 = vmul.f32 %v4146_v12, %v4890_v6 }
 0xc03   : > { %v2984_v15 = vadd.f32 %v2983_v11, %v2982_v16 }
 0xc04   : > { %v3062_v31 = vmul.f32 %v4148_v19, %v3061_v14 }
 0xc05   : > { %2985 = vst.msk [vmem:[#allocation11] sm:$0xff] %vm332_vm0, %v2984_v15  ;;  %v3146_v18 = vpack.c.bf16 %v2984_v15, %v2984_v15 }
 0xc06   : > { %v3064_v20 = vadd.f32 %v3063_v47, %v3062_v31 }
 0xc07   : > { %3535 = vst.msk [vmem:[%s4557_s12 + $0x54] sm:$0xf] %vm1420_vm2, %v3146_v18 }
 0xc08   : > { %3065 = vst.msk [vmem:[#allocation12] sm:$0xff] %vm332_vm0, %v3064_v20  ;;  %v3147_v23 = vpack.c.bf16 %v3064_v20, %v3064_v20 }
 0xc09   : > { %v4150_v36 = vpop.eup %4149 }
 0xc0a   : > { %v3141_v55 = vsub.f32 1.0, %v4150_v36  ;;  %v4152_v28 = vpop.eup %4151  ;;  %3536 = vst.msk [vmem:[%s4557_s12 + $0x58] sm:$0xf] %vm1420_vm2, %v3147_v23  ;;  %v3143_v30 = vmul.f32 %v4150_v36, %v4902_v54  ;;  %v3177_v54 = vld [vmem:[%s4557_s12] sm:$0xf] (%p4249_p5) }
 0xc0b   : > { %3178 = vst [vmem:[%s4937_s11] sm:$0xf] (%p4249_p5), %v3177_v54 }
 0xc0c   : > { %v3142_v21 = vmul.f32 %v4152_v28, %v3141_v55  ;;  %3159 = sbr.rel (!%p4249_p5) target bundleno = 3099 (0xc1b), region = 85 }
 0xc0e   : > { %v3144_v6 = vadd.f32 %v3143_v30, %v3142_v21  ;;  %v3219_v50 = vld [vmem:[%s4557_s12 + $0x54] sm:$0xf] (%p4249_p5) }
 0xc0f   : > { %3220 = vst [vmem:[%s4937_s11 + $0xa8] sm:$0xf] (%p4249_p5), %v3219_v50 }
 0xc10   : > { %3145 = vst.msk [vmem:[#allocation13] sm:$0xff] %vm332_vm0, %v3144_v6  ;;  %v3148_v32 = vpack.c.bf16 %v3144_v6, %v3144_v6 }
 0xc11   : > { %v3221_v51 = vld [vmem:[%s4557_s12 + $0x58] sm:$0xf] (%p4249_p5) }
 0xc12   : > { %3537 = vst.msk [vmem:[%s4557_s12 + $0x5c] sm:$0xf] %vm1420_vm2, %v3148_v32  ;;  %3222 = vst [vmem:[%s4937_s11 + $0xb0] sm:$0xf] (%p4249_p5), %v3221_v51 }
 0xc19   : > { %v3223_v25 = vld [vmem:[%s4557_s12 + $0x5c] sm:$0xf] }
 0xc1a   : > { %3224 = vst [vmem:[%s4937_s11 + $0xb8] sm:$0xf] %v3223_v25 }
 0xc1b PF: > { %p12_p10 = scmp.ge.s32.totalorder %s4236_s22, 4   ;;  %s5002_s18 = smov %s4179_s19 }
 0xc1c   : > { %s5003_s19 = smov %s4247_s25  ;;  %s5004_s20 = smov %s4236_s22 }
 0xc1d   :  { %14 = sbr.rel (!%p12_p10) target bundleno = 2 (0x2), region = 243 }

</bundles_post_ra>
